<compile_context>
chip_gen: v6e
topology: v6e:2x2x1
jax: 0.10.0
libtpu: 0.0.40
codegen_flags: <defaults>
</compile_context>

<pallas_src>
import functools

import jax
import jax.numpy as jnp
from jax.experimental import pallas as pl
from jax.experimental.pallas import tpu as pltpu

LEAKY_SLOPE = 0.1
BN_EPS = 1e-5

H4_DIM = 1024                    # fc2 output width
K_FC2 = 7 * 7 * 128              # 6272 = fc2 input width
K_FC2_PAD = 50 * 128             # 6400: lane-aligned, splits into 2 equal K tiles
TK_FC2 = K_FC2_PAD // 2          # 3200 (= 25 * 128)


def _lrelu(v):
    return jnp.where(v >= 0, v, LEAKY_SLOPE * v)


def _round_up(x, m):
    return (x + m - 1) // m * m


# --------------------------- Pallas kernels -------------------------------- #
def _gemm_affine_lrelu_kernel(a_ref, w_ref, s_ref, t_ref, o_ref):
    """Single-shot GEMM + per-column affine + LeakyReLU (K fits one tile).

    Weight stays bf16; the (small) activation is cast to bf16 so the MXU runs
    its native bf16 pipe with f32 accumulation.
    """
    acc = jnp.dot(a_ref[...].astype(jnp.bfloat16), w_ref[...],
                  preferred_element_type=jnp.float32)
    y = acc * s_ref[...] + t_ref[...]
    o_ref[...] = jnp.where(y >= 0, y, LEAKY_SLOPE * y)


def _fused_fc_kernel(a_ref, w2_ref, s2_ref, t2_ref, w1_ref, s1_ref, t1_ref,
                     o_ref, acc_ref):
    """K-tiled fc2 GEMM (+BN+LReLU) with fc1 (+BN+LReLU) fused in the epilogue.

    acc_ref (M,1024) holds the fc2 intermediate (cannot live in o_ref, which is
    only (M,128)); the fc1 weight is VMEM-resident across the K loop.  Weights
    stay bf16; activations are cast to bf16 right before each MXU dot.
    """
    k = pl.program_id(0)

    @pl.when(k == 0)
    def _():
        acc_ref[...] = jnp.zeros_like(acc_ref)

    acc_ref[...] += jnp.dot(a_ref[...].astype(jnp.bfloat16), w2_ref[...],
                            preferred_element_type=jnp.float32)

    @pl.when(k == pl.num_programs(0) - 1)
    def _():
        h = acc_ref[...] * s2_ref[...] + t2_ref[...]
        h = jnp.where(h >= 0, h, LEAKY_SLOPE * h)
        z = jnp.dot(h.astype(jnp.bfloat16), w1_ref[...],
                    preferred_element_type=jnp.float32)
        y = z * s1_ref[...] + t1_ref[...]
        o_ref[...] = jnp.where(y >= 0, y, LEAKY_SLOPE * y)


# --------------------------- kernel wrappers -------------------------------- #
def gemm_affine_lrelu(a, w_bf16, scale, shift):
    """out = LReLU((a @ w) * scale + shift); a:(M,K) f32, w:(K,N) bf16."""
    M, K = a.shape
    K2, N = w_bf16.shape
    assert K == K2 and N % 128 == 0 and K % 128 == 0
    M_pad = _round_up(M, 8)
    if M_pad != M:
        a = jnp.pad(a, ((0, M_pad - M), (0, 0)))

    out = pl.pallas_call(
        _gemm_affine_lrelu_kernel,
        out_shape=jax.ShapeDtypeStruct((M_pad, N), jnp.float32),
        grid_spec=pltpu.PrefetchScalarGridSpec(
            num_scalar_prefetch=0,
            grid=(1,),
            in_specs=[
                pl.BlockSpec((M_pad, K), lambda i: (0, 0)),
                pl.BlockSpec((K, N), lambda i: (0, 0)),
                pl.BlockSpec((1, N), lambda i: (0, 0)),
                pl.BlockSpec((1, N), lambda i: (0, 0)),
            ],
            out_specs=pl.BlockSpec((M_pad, N), lambda i: (0, 0)),
        ),
        compiler_params=pltpu.CompilerParams(
            dimension_semantics=("arbitrary",)),
    )(a.astype(jnp.float32), w_bf16,
      scale.reshape(1, N).astype(jnp.float32),
      shift.reshape(1, N).astype(jnp.float32))
    return out[:M]


def fused_fc(a, w2_bf16, s2, t2, w1p_bf16, s1p, t1p, *, tk=TK_FC2):
    """z = LReLU(BN(LReLU(BN(a @ W2)) @ W1p)) in one pallas_call.

    a: (M, K) f32.  w2_bf16: (Kp, H) bf16 with Kp >= K (zero rows appended at
    prep time so K tiles are 128-lane aligned); a is zero-padded to Kp here.
    """
    M, K = a.shape
    Kp, H = w2_bf16.shape
    H2, Np = w1p_bf16.shape
    assert H == H2 and K <= Kp
    assert Kp % tk == 0 and tk % 128 == 0, "K tile must be lane-aligned"
    assert H % 128 == 0 and Np % 128 == 0
    nk = Kp // tk
    M_pad = _round_up(M, 8)
    a = jnp.pad(a, ((0, M_pad - M), (0, Kp - K)))

    out = pl.pallas_call(
        _fused_fc_kernel,
        out_shape=jax.ShapeDtypeStruct((M_pad, Np), jnp.float32),
        grid_spec=pltpu.PrefetchScalarGridSpec(
            num_scalar_prefetch=0,
            grid=(nk,),
            in_specs=[
                pl.BlockSpec((M_pad, tk), lambda k: (0, k)),
                pl.BlockSpec((tk, H), lambda k: (k, 0)),
                pl.BlockSpec((1, H), lambda k: (0, 0)),
                pl.BlockSpec((1, H), lambda k: (0, 0)),
                pl.BlockSpec((H, Np), lambda k: (0, 0)),
                pl.BlockSpec((1, Np), lambda k: (0, 0)),
                pl.BlockSpec((1, Np), lambda k: (0, 0)),
            ],
            out_specs=pl.BlockSpec((M_pad, Np), lambda k: (0, 0)),
            scratch_shapes=[pltpu.VMEM((M_pad, H), jnp.float32)],
        ),
        compiler_params=pltpu.CompilerParams(
            dimension_semantics=("arbitrary",),
            # ~13 MiB peak (double-buffered 6.25 MiB weight tile + resident fc1
            # weight + activation/acc); raise past v5e's 16 MiB scoped default,
            # still well within v7x's 64 MiB physical VMEM.
            vmem_limit_bytes=32 * 1024 * 1024),
    )(a.astype(jnp.float32), w2_bf16,
      s2.reshape(1, H).astype(jnp.float32), t2.reshape(1, H).astype(jnp.float32),
      w1p_bf16,
      s1p.reshape(1, Np).astype(jnp.float32), t1p.reshape(1, Np).astype(jnp.float32))
    return out[:M]


# ----------------------------- parameters ----------------------------------- #
def _bn_params(key, n):
    k1, k2, k3, k4 = jax.random.split(key, 4)
    return dict(
        gamma=1.0 + 0.1 * jax.random.normal(k1, (n,), jnp.float32),
        beta=0.1 * jax.random.normal(k2, (n,), jnp.float32),
        mean=0.1 * jax.random.normal(k3, (n,), jnp.float32),
        var=0.5 + 0.1 * jnp.abs(jax.random.normal(k4, (n,), jnp.float32)),
    )


def init_params(key, latent_dim):
    ks = jax.random.split(key, 11)
    p = {}
    p["conv12_w"] = 0.10 * jax.random.normal(ks[0], (64, 1, 4, 4), jnp.float32)
    p["conv12_b"] = 0.10 * jax.random.normal(ks[1], (64,), jnp.float32)
    p["conv1_w"] = 0.05 * jax.random.normal(ks[2], (128, 64, 4, 4), jnp.float32)
    p["conv1_b"] = 0.10 * jax.random.normal(ks[3], (128,), jnp.float32)
    p["bn1"] = _bn_params(ks[4], 128)
    p["fc2_w"] = 0.02 * jax.random.normal(ks[5], (H4_DIM, K_FC2), jnp.float32)
    p["fc2_b"] = 0.10 * jax.random.normal(ks[6], (H4_DIM,), jnp.float32)
    p["bn2"] = _bn_params(ks[7], H4_DIM)
    p["fc1_w"] = 0.05 * jax.random.normal(ks[8], (latent_dim, H4_DIM), jnp.float32)
    p["fc1_b"] = 0.10 * jax.random.normal(ks[9], (latent_dim,), jnp.float32)
    p["bn3"] = _bn_params(ks[10], latent_dim)
    return p


def _fold_bn(bias, bn):
    s = bn["gamma"] / jnp.sqrt(bn["var"] + BN_EPS)
    t = bn["beta"] - bn["mean"] * s
    return s, bias * s + t


def prepare_params(params, latent_dim):
    """One-time weight prep hoisted out of the per-call path: transposes,
    BN folding, bf16 casts, the fc2 NCHW->NHWC row permutation (+K padding),
    and fc1 lane padding (latent -> 128)."""
    prep = {}
    # conv12 (XLA path): (cout,cin,kh,kw) -> (kh*kw*cin, cout), keep f32.
    prep["conv12_w"] = params["conv12_w"].transpose(2, 3, 1, 0).reshape(16, 64)
    prep["conv12_b"] = params["conv12_b"]
    # conv1: im2col weight (kh,kw,cin,cout) -> (1024, 128), bf16; BN folded.
    prep["conv1_w"] = (params["conv1_w"].transpose(2, 3, 1, 0)
                       .reshape(16 * 64, 128).astype(jnp.bfloat16))
    prep["conv1_s"], prep["conv1_t"] = _fold_bn(params["conv1_b"], params["bn1"])
    # fc2: pre-transposed (6272, 1024) with rows PERMUTED from PyTorch's NCHW
    # flatten order (c*49 + hw) to our NHWC order (hw*128 + c), so the runtime
    # flatten after conv1 is a free contiguous reshape.  Rows then zero-padded
    # 6272 -> 6400 so the K grid splits into 2 lane-aligned tiles.  bf16.
    w2t = params["fc2_w"].T                                   # rows = c*49 + hw
    w2_nhwc = (w2t.reshape(128, 49, H4_DIM).transpose(1, 0, 2)
               .reshape(K_FC2, H4_DIM))                       # rows = hw*128 + c
    w2_pad = jnp.pad(w2_nhwc, ((0, K_FC2_PAD - K_FC2), (0, 0)))
    prep["fc2_w"] = w2_pad.astype(jnp.bfloat16)
    prep["fc2_s"], prep["fc2_t"] = _fold_bn(params["fc2_b"], params["bn2"])
    # fc1: pre-transposed (1024, latent) padded to lane-dense (1024, 128), bf16.
    n_pad = _round_up(latent_dim, 128)
    wz = jnp.pad(params["fc1_w"].T, ((0, 0), (0, n_pad - latent_dim)))
    prep["fc1_w"] = wz.astype(jnp.bfloat16)
    s3, t3 = _fold_bn(params["fc1_b"], params["bn3"])
    prep["fc1_s"] = jnp.pad(s3, (0, n_pad - latent_dim), constant_values=1.0)
    prep["fc1_t"] = jnp.pad(t3, (0, n_pad - latent_dim))
    return prep


# ----------------------------- forward pass --------------------------------- #
@functools.partial(jax.jit, static_argnames=("latent_dim",))
def encoder1_forward(prep, x_nchw, latent_dim):
    B = x_nchw.shape[0]
    x = jnp.transpose(x_nchw, (0, 2, 3, 1))  # NCHW -> NHWC: (B, 56, 56, 1)

    # conv12: k=4, s=4, p=0 -> non-overlapping 4x4 patch GEMM (B*196, 16)@(16, 64).
    # TODO(synk): intentionally left to plain XLA (inside this jit) — K=16 is
    # lane-misaligned and the work is ~1 MFLOP, below pallas_call launch cost.
    patches = (x.reshape(B, 14, 4, 14, 4, 1)
                .transpose(0, 1, 3, 2, 4, 5).reshape(B * 196, 16))
    h1 = _lrelu(patches @ prep["conv12_w"] + prep["conv12_b"])
    h1 = h1.reshape(B, 14, 14, 64)

    # conv1: k=4, s=2, p=1 -> im2col GEMM + folded BN + LReLU (Pallas).
    hp = jnp.pad(h1, ((0, 0), (1, 1), (1, 1), (0, 0)))  # (B, 16, 16, 64)
    cols = [hp[:, di:di + 13:2, dj:dj + 13:2, :]
            for di in range(4) for dj in range(4)]       # each (B, 7, 7, 64)
    patches1 = jnp.concatenate(cols, axis=-1).reshape(B * 49, 16 * 64)
    h2 = gemm_affine_lrelu(patches1, prep["conv1_w"],
                           prep["conv1_s"], prep["conv1_t"])
    # fc2 weight rows were permuted to NHWC order at prep time, so PyTorch's
    # NCHW .view() flatten reduces to a free contiguous reshape here.
    h2 = h2.reshape(B, 49 * 128)

    # fc2 (+BN+LReLU) fused with fc1 (+BN+LReLU) in a single Pallas call.
    z = fused_fc(h2, prep["fc2_w"], prep["fc2_s"], prep["fc2_t"],
                 prep["fc1_w"], prep["fc1_s"], prep["fc1_t"])
    return z[:, :latent_dim]


# ----------------------------- pure-JAX reference --------------------------- #
def _reference_forward(params, x):
    """Reference Encoder1 forward using the SAME quantization model as the
    kernel path (bf16 weights and bf16 MXU activations with f32 accumulation),
    so the comparison isolates kernel correctness from deliberate quantization."""
    def bn(v, p):  # channel axis = last
        return (v - p["mean"]) / jnp.sqrt(p["var"] + BN_EPS) * p["gamma"] + p["beta"]

    bf = jnp.bfloat16
    dn = ("NCHW", "OIHW", "NCHW")
    y = jax.lax.conv_general_dilated(x, params["conv12_w"], (4, 4), "VALID",
                                     dimension_numbers=dn)
    y = _lrelu(y + params["conv12_b"][None, :, None, None])
    y = jax.lax.conv_general_dilated(
        y.astype(bf), params["conv1_w"].astype(bf), (2, 2), ((1, 1), (1, 1)),
        dimension_numbers=dn, preferred_element_type=jnp.float32)
    y = y + params["conv1_b"][None, :, None, None]
    y = jnp.moveaxis(bn(jnp.moveaxis(y, 1, -1), params["bn1"]), -1, 1)
    y = _lrelu(y)
    y = y.reshape(y.shape[0], -1)
    h = jnp.dot(y.astype(bf), params["fc2_w"].T.astype(bf),
                preferred_element_type=jnp.float32) + params["fc2_b"]
    h = _lrelu(bn(h, params["bn2"]))
    z = jnp.dot(h.astype(bf), params["fc1_w"].T.astype(bf),
                preferred_element_type=jnp.float32) + params["fc1_b"]
    z = _lrelu(bn(z, params["bn3"]))
    return z


if __name__ == "__main__":
    latent_dim = 32
    B = 2
    key = jax.random.PRNGKey(0)
    kx, kp = jax.random.split(key)
    # 56x56 input -> conv12 (k=s=4) -> 14x14 -> conv1 (k=4,s=2,p=1) -> 7x7
    x = jax.random.normal(kx, (B, 1, 56, 56), jnp.float32)
    params = init_params(kp, latent_dim)
    prep = prepare_params(params, latent_dim)   # hoisted, done once

    z = encoder1_forward(prep, x, latent_dim=latent_dim)
    z = jax.block_until_ready(z)
    assert z.shape == (B, latent_dim), z.shape

    z_ref = jax.block_until_ready(_reference_forward(params, x))
    max_err = float(jnp.max(jnp.abs(z - z_ref)))
    assert jnp.allclose(z, z_ref, rtol=5e-3, atol=5e-3), max_err

    print("KERNEL_OK")
</pallas_src>

<mosaic_0001>
module attributes {stable_mosaic.version = 11 : i64} {
  func.func @_gemm_affine_lrelu_kernel(%arg0: i32, %arg1: memref<104x1024xf32, #tpu.memory_space<vmem>>, %arg2: memref<1024x128xbf16, #tpu.memory_space<vmem>>, %arg3: memref<1x128xf32, #tpu.memory_space<vmem>>, %arg4: memref<1x128xf32, #tpu.memory_space<vmem>>, %arg5: memref<104x128xf32, #tpu.memory_space<vmem>>) attributes {dimension_semantics = [#tpu.dimension_semantics<arbitrary>], iteration_bounds = array<i64: 1>, scalar_prefetch = 0 : i64, scratch_operands = 0 : i64, tpu.core_type = #tpu.core_type<tc>, window_params = [{pipeline_mode = #tpu.pipeline_mode<synchronous>, transform_indices = @transform_0, window_bounds = array<i64: 104, 1024>}, {pipeline_mode = #tpu.pipeline_mode<synchronous>, transform_indices = @transform_1, window_bounds = array<i64: 1024, 128>}, {pipeline_mode = #tpu.pipeline_mode<synchronous>, transform_indices = @transform_2, window_bounds = array<i64: 1, 128>}, {pipeline_mode = #tpu.pipeline_mode<synchronous>, transform_indices = @transform_3, window_bounds = array<i64: 1, 128>}, {pipeline_mode = #tpu.pipeline_mode<synchronous>, transform_indices = @transform_4, window_bounds = array<i64: 104, 128>}]} {
    %c0 = arith.constant 0 : index
    %c0_0 = arith.constant 0 : index
    %0 = vector.load %arg1[%c0, %c0_0] : memref<104x1024xf32, #tpu.memory_space<vmem>>, vector<104x1024xf32>
    %1 = arith.truncf %0 : vector<104x1024xf32> to vector<104x1024xbf16>
    %c0_1 = arith.constant 0 : index
    %c0_2 = arith.constant 0 : index
    %2 = vector.load %arg2[%c0_1, %c0_2] : memref<1024x128xbf16, #tpu.memory_space<vmem>>, vector<1024x128xbf16>
    %cst = arith.constant dense<0.000000e+00> : vector<104x128xf32>
    %3 = tpu.matmul %1, %2, %cst {dimension_numbers = #tpu.dot_dimension_numbers<[1], [0], [0], [1], [0, 0, 1, 1], [], []>} : vector<104x1024xbf16>, vector<1024x128xbf16>, vector<104x128xf32> -> vector<104x128xf32>
    %c0_3 = arith.constant 0 : index
    %c0_4 = arith.constant 0 : index
    %4 = vector.load %arg3[%c0_3, %c0_4] : memref<1x128xf32, #tpu.memory_space<vmem>>, vector<1x128xf32>
    %5 = vector.broadcast %4 : vector<1x128xf32> to vector<104x128xf32>
    %6 = arith.mulf %3, %5 : vector<104x128xf32>
    %c0_5 = arith.constant 0 : index
    %c0_6 = arith.constant 0 : index
    %7 = vector.load %arg4[%c0_5, %c0_6] : memref<1x128xf32, #tpu.memory_space<vmem>>, vector<1x128xf32>
    %8 = vector.broadcast %7 : vector<1x128xf32> to vector<104x128xf32>
    %9 = arith.addf %6, %8 : vector<104x128xf32>
    %cst_7 = arith.constant 0.000000e+00 : f32
    %10 = vector.broadcast %cst_7 : f32 to vector<104x128xf32>
    %11 = arith.cmpf oge, %9, %10 : vector<104x128xf32>
    %cst_8 = arith.constant 1.000000e-01 : f32
    %12 = vector.broadcast %cst_8 : f32 to vector<104x128xf32>
    %13 = arith.mulf %12, %9 : vector<104x128xf32>
    %14 = arith.select %11, %9, %13 : vector<104x128xi1>, vector<104x128xf32>
    %c0_9 = arith.constant 0 : index
    %c0_10 = arith.constant 0 : index
    %15 = vector.load %arg5[%c0_9, %c0_10] : memref<104x128xf32, #tpu.memory_space<vmem>>, vector<104x128xf32>
    tpu.vector_store %arg5[%c0_9, %c0_10], %14 {strides = array<i32>} : memref<104x128xf32, #tpu.memory_space<vmem>>, vector<104x128xf32>,
    return
  }
  func.func @transform_0(%arg0: i32) -> (i32, i32) {
    %c0_i32 = arith.constant 0 : i32
    %c0_i32_0 = arith.constant 0 : i32
    %c0_i32_1 = arith.constant 0 : i32
    return %c0_i32, %c0_i32_0 : i32, i32
  }
  func.func @transform_1(%arg0: i32) -> (i32, i32) {
    %c0_i32 = arith.constant 0 : i32
    %c0_i32_0 = arith.constant 0 : i32
    %c0_i32_1 = arith.constant 0 : i32
    return %c0_i32, %c0_i32_0 : i32, i32
  }
  func.func @transform_2(%arg0: i32) -> (i32, i32) {
    %c0_i32 = arith.constant 0 : i32
    %c0_i32_0 = arith.constant 0 : i32
    %c0_i32_1 = arith.constant 0 : i32
    return %c0_i32, %c0_i32_0 : i32, i32
  }
  func.func @transform_3(%arg0: i32) -> (i32, i32) {
    %c0_i32 = arith.constant 0 : i32
    %c0_i32_0 = arith.constant 0 : i32
    %c0_i32_1 = arith.constant 0 : i32
    return %c0_i32, %c0_i32_0 : i32, i32
  }
  func.func @transform_4(%arg0: i32) -> (i32, i32) {
    %c0_i32 = arith.constant 0 : i32
    %c0_i32_0 = arith.constant 0 : i32
    %c0_i32_1 = arith.constant 0 : i32
    return %c0_i32, %c0_i32_0 : i32, i32
  }
}

module attributes {stable_mosaic.version = 11 : i64} {
  func.func @_fused_fc_kernel(%arg0: i32, %arg1: memref<8x3200xf32, #tpu.memory_space<vmem>>, %arg2: memref<3200x1024xbf16, #tpu.memory_space<vmem>>, %arg3: memref<1x1024xf32, #tpu.memory_space<vmem>>, %arg4: memref<1x1024xf32, #tpu.memory_space<vmem>>, %arg5: memref<1024x128xbf16, #tpu.memory_space<vmem>>, %arg6: memref<1x128xf32, #tpu.memory_space<vmem>>, %arg7: memref<1x128xf32, #tpu.memory_space<vmem>>, %arg8: memref<8x128xf32, #tpu.memory_space<vmem>>, %arg9: memref<8x1024xf32, #tpu.memory_space<vmem>>) attributes {dimension_semantics = [#tpu.dimension_semantics<arbitrary>], iteration_bounds = array<i64: 2>, scalar_prefetch = 0 : i64, scratch_operands = 1 : i64, tpu.core_type = #tpu.core_type<tc>, window_params = [{transform_indices = @transform_0, window_bounds = array<i64: 8, 3200>}, {transform_indices = @transform_1, window_bounds = array<i64: 3200, 1024>}, {pipeline_mode = #tpu.pipeline_mode<synchronous>, transform_indices = @transform_2, window_bounds = array<i64: 1, 1024>}, {pipeline_mode = #tpu.pipeline_mode<synchronous>, transform_indices = @transform_3, window_bounds = array<i64: 1, 1024>}, {pipeline_mode = #tpu.pipeline_mode<synchronous>, transform_indices = @transform_4, window_bounds = array<i64: 1024, 128>}, {pipeline_mode = #tpu.pipeline_mode<synchronous>, transform_indices = @transform_5, window_bounds = array<i64: 1, 128>}, {pipeline_mode = #tpu.pipeline_mode<synchronous>, transform_indices = @transform_6, window_bounds = array<i64: 1, 128>}, {pipeline_mode = #tpu.pipeline_mode<synchronous>, transform_indices = @transform_7, window_bounds = array<i64: 8, 128>}]} {
    %c0_i32 = arith.constant 0 : i32
    %0 = arith.cmpi eq, %arg0, %c0_i32 : i32
    %1 = arith.extui %0 : i1 to i32
    %c0_i32_0 = arith.constant 0 : i32
    %2 = arith.cmpi ne, %1, %c0_i32_0 : i32
    scf.if %2 {
      %cst_9 = arith.constant 0.000000e+00 : f32
      %13 = vector.broadcast %cst_9 : f32 to vector<8x1024xf32>
      %c0_10 = arith.constant 0 : index
      %c0_11 = arith.constant 0 : index
      %14 = vector.load %arg9[%c0_10, %c0_11] : memref<8x1024xf32, #tpu.memory_space<vmem>>, vector<8x1024xf32>
      tpu.vector_store %arg9[%c0_10, %c0_11], %13 {strides = array<i32>} : memref<8x1024xf32, #tpu.memory_space<vmem>>, vector<8x1024xf32>,
    } else {
    }
    %c0 = arith.constant 0 : index
    %c0_1 = arith.constant 0 : index
    %3 = vector.load %arg9[%c0, %c0_1] : memref<8x1024xf32, #tpu.memory_space<vmem>>, vector<8x1024xf32>
    %c0_2 = arith.constant 0 : index
    %c0_3 = arith.constant 0 : index
    %4 = vector.load %arg1[%c0_2, %c0_3] : memref<8x3200xf32, #tpu.memory_space<vmem>>, vector<8x3200xf32>
    %5 = arith.truncf %4 : vector<8x3200xf32> to vector<8x3200xbf16>
    %c0_4 = arith.constant 0 : index
    %c0_5 = arith.constant 0 : index
    %6 = vector.load %arg2[%c0_4, %c0_5] : memref<3200x1024xbf16, #tpu.memory_space<vmem>>, vector<3200x1024xbf16>
    %cst = arith.constant dense<0.000000e+00> : vector<8x1024xf32>
    %7 = tpu.matmul %5, %6, %cst {dimension_numbers = #tpu.dot_dimension_numbers<[1], [0], [0], [1], [0, 0, 1, 1], [], []>} : vector<8x3200xbf16>, vector<3200x1024xbf16>, vector<8x1024xf32> -> vector<8x1024xf32>
    %8 = arith.addf %3, %7 : vector<8x1024xf32>
    %c0_6 = arith.constant 0 : index
    %c0_7 = arith.constant 0 : index
    %9 = vector.load %arg9[%c0_6, %c0_7] : memref<8x1024xf32, #tpu.memory_space<vmem>>, vector<8x1024xf32>
    tpu.vector_store %arg9[%c0_6, %c0_7], %8 {strides = array<i32>} : memref<8x1024xf32, #tpu.memory_space<vmem>>, vector<8x1024xf32>,
    %c1_i32 = arith.constant 1 : i32
    %10 = arith.cmpi eq, %arg0, %c1_i32 : i32
    %11 = arith.extui %10 : i1 to i32
    %c0_i32_8 = arith.constant 0 : i32
    %12 = arith.cmpi ne, %11, %c0_i32_8 : i32
    scf.if %12 {
      %c0_9 = arith.constant 0 : index
      %c0_10 = arith.constant 0 : index
      %13 = vector.load %arg9[%c0_9, %c0_10] : memref<8x1024xf32, #tpu.memory_space<vmem>>, vector<8x1024xf32>
      %c0_11 = arith.constant 0 : index
      %c0_12 = arith.constant 0 : index
      %14 = vector.load %arg3[%c0_11, %c0_12] : memref<1x1024xf32, #tpu.memory_space<vmem>>, vector<1x1024xf32>
      %15 = vector.broadcast %14 : vector<1x1024xf32> to vector<8x1024xf32>
      %16 = arith.mulf %13, %15 : vector<8x1024xf32>
      %c0_13 = arith.constant 0 : index
      %c0_14 = arith.constant 0 : index
      %17 = vector.load %arg4[%c0_13, %c0_14] : memref<1x1024xf32, #tpu.memory_space<vmem>>, vector<1x1024xf32>
      %18 = vector.broadcast %17 : vector<1x1024xf32> to vector<8x1024xf32>
      %19 = arith.addf %16, %18 : vector<8x1024xf32>
      %cst_15 = arith.constant 0.000000e+00 : f32
      %20 = vector.broadcast %cst_15 : f32 to vector<8x1024xf32>
      %21 = arith.cmpf oge, %19, %20 : vector<8x1024xf32>
      %cst_16 = arith.constant 1.000000e-01 : f32
      %22 = vector.broadcast %cst_16 : f32 to vector<8x1024xf32>
      %23 = arith.mulf %22, %19 : vector<8x1024xf32>
      %24 = arith.select %21, %19, %23 : vector<8x1024xi1>, vector<8x1024xf32>
      %25 = arith.truncf %24 : vector<8x1024xf32> to vector<8x1024xbf16>
      %c0_17 = arith.constant 0 : index
      %c0_18 = arith.constant 0 : index
      %26 = vector.load %arg5[%c0_17, %c0_18] : memref<1024x128xbf16, #tpu.memory_space<vmem>>, vector<1024x128xbf16>
      %cst_19 = arith.constant dense<0.000000e+00> : vector<8x128xf32>
      %27 = tpu.matmul %25, %26, %cst_19 {dimension_numbers = #tpu.dot_dimension_numbers<[1], [0], [0], [1], [0, 0, 1, 1], [], []>} : vector<8x1024xbf16>, vector<1024x128xbf16>, vector<8x128xf32> -> vector<8x128xf32>
      %c0_20 = arith.constant 0 : index
      %c0_21 = arith.constant 0 : index
      %28 = vector.load %arg6[%c0_20, %c0_21] : memref<1x128xf32, #tpu.memory_space<vmem>>, vector<1x128xf32>
      %29 = vector.broadcast %28 : vector<1x128xf32> to vector<8x128xf32>
      %30 = arith.mulf %27, %29 : vector<8x128xf32>
      %c0_22 = arith.constant 0 : index
      %c0_23 = arith.constant 0 : index
      %31 = vector.load %arg7[%c0_22, %c0_23] : memref<1x128xf32, #tpu.memory_space<vmem>>, vector<1x128xf32>
      %32 = vector.broadcast %31 : vector<1x128xf32> to vector<8x128xf32>
      %33 = arith.addf %30, %32 : vector<8x128xf32>
      %cst_24 = arith.constant 0.000000e+00 : f32
      %34 = vector.broadcast %cst_24 : f32 to vector<8x128xf32>
      %35 = arith.cmpf oge, %33, %34 : vector<8x128xf32>
      %cst_25 = arith.constant 1.000000e-01 : f32
      %36 = vector.broadcast %cst_25 : f32 to vector<8x128xf32>
      %37 = arith.mulf %36, %33 : vector<8x128xf32>
      %38 = arith.select %35, %33, %37 : vector<8x128xi1>, vector<8x128xf32>
      %c0_26 = arith.constant 0 : index
      %c0_27 = arith.constant 0 : index
      %39 = vector.load %arg8[%c0_26, %c0_27] : memref<8x128xf32, #tpu.memory_space<vmem>>, vector<8x128xf32>
      tpu.vector_store %arg8[%c0_26, %c0_27], %38 {strides = array<i32>} : memref<8x128xf32, #tpu.memory_space<vmem>>, vector<8x128xf32>,
    } else {
    }
    return
  }
  func.func @transform_0(%arg0: i32) -> (i32, i32) {
    %c0_i32 = arith.constant 0 : i32
    %c0_i32_0 = arith.constant 0 : i32
    return %c0_i32, %arg0 : i32, i32
  }
  func.func @transform_1(%arg0: i32) -> (i32, i32) {
    %c0_i32 = arith.constant 0 : i32
    %c0_i32_0 = arith.constant 0 : i32
    return %arg0, %c0_i32 : i32, i32
  }
  func.func @transform_2(%arg0: i32) -> (i32, i32) {
    %c0_i32 = arith.constant 0 : i32
    %c0_i32_0 = arith.constant 0 : i32
    %c0_i32_1 = arith.constant 0 : i32
    return %c0_i32, %c0_i32_0 : i32, i32
  }
  func.func @transform_3(%arg0: i32) -> (i32, i32) {
    %c0_i32 = arith.constant 0 : i32
    %c0_i32_0 = arith.constant 0 : i32
    %c0_i32_1 = arith.constant 0 : i32
    return %c0_i32, %c0_i32_0 : i32, i32
  }
  func.func @transform_4(%arg0: i32) -> (i32, i32) {
    %c0_i32 = arith.constant 0 : i32
    %c0_i32_0 = arith.constant 0 : i32
    %c0_i32_1 = arith.constant 0 : i32
    return %c0_i32, %c0_i32_0 : i32, i32
  }
  func.func @transform_5(%arg0: i32) -> (i32, i32) {
    %c0_i32 = arith.constant 0 : i32
    %c0_i32_0 = arith.constant 0 : i32
    %c0_i32_1 = arith.constant 0 : i32
    return %c0_i32, %c0_i32_0 : i32, i32
  }
  func.func @transform_6(%arg0: i32) -> (i32, i32) {
    %c0_i32 = arith.constant 0 : i32
    %c0_i32_0 = arith.constant 0 : i32
    %c0_i32_1 = arith.constant 0 : i32
    return %c0_i32, %c0_i32_0 : i32, i32
  }
  func.func @transform_7(%arg0: i32) -> (i32, i32) {
    %c0_i32 = arith.constant 0 : i32
    %c0_i32_0 = arith.constant 0 : i32
    %c0_i32_1 = arith.constant 0 : i32
    return %c0_i32, %c0_i32_0 : i32, i32
  }
}

</mosaic_0001>

<bundles_post_ra>
// kernel: encoder1_forward.2
= control target key start
LH: loop header
LB: loop body
LE: loop exit
PB: predicated region body
PF: predicated region fallthrough
CT: control target
= control target key end

     0   :  { %9 = vsyncpa [#allocation3], 0  ;;  %s2160_s0 = inlined_call_operand.vmem [shape: f32[104,1024], index: 0, kind: input, shape index: {}]   ;;  %s2161_s1 = inlined_call_operand.hbm [shape: bf16[1024,128], index: 1, kind: input, shape index: {}]   ;;  %s2162_s2 = inlined_call_operand.hbm [shape: f32[1,128], index: 2, kind: input, shape index: {}]   ;;  %s2163_s3 = inlined_call_operand.hbm [shape: f32[1,128], index: 3, kind: input, shape index: {}]   ;;  %s2164_s4 = inlined_call_operand.vmem [shape: f32[104,128], index: 4, kind: output, shape index: {}]  }
   0x1   :  { %10 = vsyncpa [#allocation5], 0  ;;  %s1608_s15 = smov [#allocation4]   ;;  %s1609_s17 = smov [#allocation2]  }
   0x2   :  { %s31_s16 = sshll.u32 %s1608_s15, 4  ;;  %s18_s18 = sshll.u32 %s1609_s17, 4  ;;  %s32_s16 = int_to_ptr.vmem [resolvable:$true] %s31_s16  ;;  %s19_s18 = int_to_ptr.vmem [resolvable:$true] %s18_s18 }
   0x3   :  { %s1552_s19 = scalar_lea.vmem %s32_s16, 16  ;;  %s1556_s20 = scalar_lea.vmem %s32_s16, 32 }
   0x4   :  { %p1553_p0 = scmp.ne.s32.totalorder %s32_s16, %s1552_s19  ;;  %p1557_p1 = scmp.lt.s32.totalorder %s32_s16, %s32_s16 }
   0x5   :  { %p1558_p2 = scmp.lt.s32.totalorder %s1556_s20, %s1552_s19 }
   0x7   :  { %p1559_p3 = por %p1558_p2, %p1557_p1 }
   0x9   :  { %p1560_p4 = pnand %p1559_p3, %p1553_p0 }
   0xb   :  { %1563 = shalt.err (!%p1560_p4)
}
   0xc   :  { %34 = dma.hbm_to_vmem [thread:$0]  %s2162_s2, 16, %s32_s16, [#allocation5]  }
   0xd   :  { %s1572_s23 = scalar_lea.vmem %s19_s18, 8192  ;;  %p1577_p6 = scmp.lt.s32.totalorder %s19_s18, %s19_s18 }
   0xe   :  { %p1573_p5 = scmp.ne.s32.totalorder %s19_s18, %s1572_s23  ;;  %p1578_p7 = scmp.lt.s32.totalorder %s1572_s23, %s1572_s23 }
  0x10   :  { %p1579_p8 = por %p1578_p7, %p1577_p6 }
  0x12   :  { %p1580_p9 = pnand %p1579_p8, %p1573_p5 }
  0x14   :  { %1583 = shalt.err (!%p1580_p9)
}
  0x15   :  { %s1610_s24 = smov 64   ;;  %s1611_s25 = smov 4  }
  0x16   :  { %24 = dma.hbm_to_vmem [thread:$0]  %s2161_s1, 8192, %s19_s18, [#allocation3], %s1610_s24, %s1610_s24, %s1611_s25  }
  0x17   :  { %s1612_s28 = smov [#allocation6]  }
  0x18   :  { %s41_s29 = sshll.u32 %s1612_s28, 4  ;;  %s42_s29 = int_to_ptr.vmem [resolvable:$true] %s41_s29 }
  0x19   :  { %s1592_s30 = scalar_lea.vmem %s42_s29, 16  ;;  %s1596_s5 = scalar_lea.vmem %s42_s29, 32 }
  0x1a   :  { %p1593_p10 = scmp.ne.s32.totalorder %s42_s29, %s1592_s30  ;;  %p1597_p11 = scmp.lt.s32.totalorder %s42_s29, %s42_s29 }
  0x1b   :  { %p1598_p12 = scmp.lt.s32.totalorder %s1596_s5, %s1592_s30 }
  0x1d   :  { %p1599_p13 = por %p1598_p12, %p1597_p11 }
  0x1f   :  { %p1600_p0 = pnand %p1599_p13, %p1593_p10 }
  0x21   :  { %1603 = shalt.err (!%p1600_p0)
}
  0x22   :  { %44 = dma.hbm_to_vmem [thread:$0]  %s2163_s3, 16, %s42_s29, [#allocation5]  }
  0x23   :  { %1604 = dma.done.wait [#allocation3], 8192  }
  0x24   :  { %1605 = vsyncadd [#allocation3], 4294959104 }
  0x25   :  { %1606 = dma.done.wait [#allocation5], 32  }
  0x26   :  { %1607 = vsyncadd [#allocation5], 4294967264  ;;  %v1480_v0 = vld [vmem:[#allocation2 + $0x78] sm:$0xff]   ;;  %v1484_v4 = vld [vmem:[#allocation2 + $0x70] sm:$0xff]  }
  0x27   :  { %v1481_v1 = vld [vmem:[#allocation2 + $0xf8] sm:$0xff]   ;;  %1243 = vmatprep.subr.bf16.mxu0 %v1480_v0  ;;  %v1485_v5 = vld [vmem:[#allocation2 + $0xf0] sm:$0xff]   ;;  %v1488_v8 = vld [vmem:[#allocation2 + $0x68] sm:$0xff]  }
  0x28   :  { %v1482_v2 = vld [vmem:[#allocation2 + $0x38] sm:$0xff]   ;;  %1301 = vmatprep.subr.bf16.mxu1 %v1481_v1  ;;  %v1486_v6 = vld [vmem:[#allocation2 + $0x30] sm:$0xff]   ;;  %v1489_v9 = vld [vmem:[#allocation2 + $0xe8] sm:$0xff]  }
  0x29   :  { %v1483_v3 = vld [vmem:[#allocation2 + $0xb8] sm:$0xff]   ;;  %1244 = vmatpush3.bf16.msra.mxu0 %v1482_v2  ;;  %v1487_v7 = vld [vmem:[#allocation2 + $0xb0] sm:$0xff]   ;;  %v1490_v10 = vld [vmem:[#allocation2 + $0x28] sm:$0xff]  }
  0x2a   :  { %1302 = vmatpush3.bf16.msra.mxu1 %v1483_v3  ;;  %1245 = vmatprep.subr.bf16.mxu0 %v1484_v4  ;;  %v1491_v11 = vld [vmem:[#allocation2 + $0xa8] sm:$0xff]   ;;  %v1492_v12 = vld [vmem:[#allocation2 + $0x60] sm:$0xff]   ;;  %v1496_v16 = vld [vmem:[#allocation2 + $0x58] sm:$0xff]  }
  0x2b   :  { %1303 = vmatprep.subr.bf16.mxu1 %v1485_v5  ;;  %v1493_v13 = vld [vmem:[#allocation2 + $0xe0] sm:$0xff]   ;;  %v1497_v17 = vld [vmem:[#allocation2 + $0xd8] sm:$0xff]   ;;  %v1500_v20 = vld [vmem:[#allocation2 + $0x50] sm:$0xff]  }
  0x2c   :  { %v1494_v14 = vld [vmem:[#allocation2 + $0x20] sm:$0xff]   ;;  %v1498_v18 = vld [vmem:[#allocation2 + $0x18] sm:$0xff]   ;;  %v1501_v21 = vld [vmem:[#allocation2 + $0xd0] sm:$0xff]  }
  0x2d   :  { %1246 = vmatpush3.bf16.msra.mxu0 %v1486_v6  ;;  %v1495_v15 = vld [vmem:[#allocation2 + $0xa0] sm:$0xff]   ;;  %v1499_v19 = vld [vmem:[#allocation2 + $0x98] sm:$0xff]   ;;  %v1502_v22 = vld [vmem:[#allocation2 + $0x10] sm:$0xff]  }
  0x2e   :  { %1304 = vmatpush3.bf16.msra.mxu1 %v1487_v7  ;;  %1247 = vmatprep.subr.bf16.mxu0 %v1488_v8  ;;  %v1503_v23 = vld [vmem:[#allocation2 + $0x90] sm:$0xff]   ;;  %v1504_v24 = vld [vmem:[#allocation2 + $0x48] sm:$0xff]   ;;  %v1508_v28 = vld [vmem:[#allocation2 + $0x40] sm:$0xff]  }
  0x2f   :  { %1305 = vmatprep.subr.bf16.mxu1 %v1489_v9  ;;  %v1505_v25 = vld [vmem:[#allocation2 + $0xc8] sm:$0xff]   ;;  %v1509_v29 = vld [vmem:[#allocation2 + $0xc0] sm:$0xff]   ;;  %v58_v34 = vld [vmem:[%s2160_s0 + $0x18] sm:$0xff] }
  0x30   :  { %v1506_v26 = vld [vmem:[#allocation2 + $0x8] sm:$0xff]   ;;  %v1510_v30 = vld [vmem:[#allocation2] sm:$0xff]   ;;  %v66_v36 = vld [vmem:[%s2160_s0 + $0x58] sm:$0xff] }
  0x31   :  { %1248 = vmatpush3.bf16.msra.mxu0 %v1490_v10  ;;  %v1507_v27 = vld [vmem:[#allocation2 + $0x88] sm:$0xff]   ;;  %v1511_v31 = vld [vmem:[#allocation2 + $0x80] sm:$0xff]   ;;  %v162_v39 = vpack.c.bf16 %v66_v36, %v58_v34  ;;  %v57_v41 = vld [vmem:[%s2160_s0 + $0x10] sm:$0xff] }
  0x32   :  { %1306 = vmatpush3.bf16.msra.mxu1 %v1491_v11  ;;  %1249 = vmatprep.subr.bf16.mxu0 %v1492_v12  ;;  %v56_v32 = vld [vmem:[%s2160_s0 + $0x8] sm:$0xff]  ;;  %v55_v37 = vld [vmem:[%s2160_s0] sm:$0xff]  ;;  %v65_v42 = vld [vmem:[%s2160_s0 + $0x50] sm:$0xff] }
  0x33   :  { %1307 = vmatprep.subr.bf16.mxu1 %v1493_v13  ;;  %v64_v33 = vld [vmem:[%s2160_s0 + $0x48] sm:$0xff]  ;;  %v63_v38 = vld [vmem:[%s2160_s0 + $0x40] sm:$0xff]  ;;  %v161_v43 = vpack.c.bf16 %v65_v42, %v57_v41  ;;  %v1512_v44 = vld [vmem:[#allocation2 + $0x178] sm:$0xff]   ;;  %847 = vmatprep.mubr.bf16.mxu1 %v162_v39 }
  0x34   :  { %v160_v35 = vpack.c.bf16 %v64_v33, %v56_v32  ;;  %v159_v40 = vpack.c.bf16 %v63_v38, %v55_v37  ;;  %v1513_v45 = vld [vmem:[#allocation2 + $0x138] sm:$0xff]   ;;  %v72_v48 = vld [vmem:[%s2160_s0 + $0x88] sm:$0xff]  ;;  %v1516_v54 = vld [vmem:[#allocation2 + $0x170] sm:$0xff]  }
  0x35   :  { %1250 = vmatpush3.bf16.msra.mxu0 %v1494_v14  ;;  %v1514_v46 = vld [vmem:[#allocation2 + $0x1f8] sm:$0xff]   ;;  %v80_v49 = vld [vmem:[%s2160_s0 + $0xc8] sm:$0xff]  ;;  %v71_v55 = vld [vmem:[%s2160_s0 + $0x80] sm:$0xff] }
  0x36   :  { %1308 = vmatpush3.bf16.msra.mxu1 %v1495_v15  ;;  %1251 = vmatprep.subr.bf16.mxu0 %v1496_v16  ;;  %v1515_v47 = vld [vmem:[#allocation2 + $0x1b8] sm:$0xff]   ;;  %v168_v52 = vpack.c.bf16 %v80_v49, %v72_v48  ;;  %v79_v56 = vld [vmem:[%s2160_s0 + $0xc0] sm:$0xff]  ;;  %v73_v57 = vld [vmem:[%s2160_s0 + $0x90] sm:$0xff] }
  0x37   :  { %1309 = vmatprep.subr.bf16.mxu1 %v1497_v17  ;;  %759 = vmatprep.mubr.bf16.mxu0 %v160_v35  ;;  %v74_v50 = vld [vmem:[%s2160_s0 + $0x98] sm:$0xff]  ;;  %v167_v58 = vpack.c.bf16 %v79_v56, %v71_v55  ;;  %v81_v59 = vld [vmem:[%s2160_s0 + $0xd0] sm:$0xff]  ;;  %v1520_v0 = vld [vmem:[#allocation2 + $0x168] sm:$0xff]  }
  0x38   :  { %v82_v51 = vld [vmem:[%s2160_s0 + $0xd8] sm:$0xff]  ;;  %v169_v60 = vpack.c.bf16 %v81_v59, %v73_v57  ;;  %v1517_v61 = vld [vmem:[#allocation2 + $0x130] sm:$0xff]   ;;  %v88_v1 = vld [vmem:[%s2160_s0 + $0x108] sm:$0xff] }
  0x39   :  { %1252 = vmatpush3.bf16.msra.mxu0 %v1498_v18  ;;  %v170_v53 = vpack.c.bf16 %v82_v51, %v74_v50  ;;  %v1518_v62 = vld [vmem:[#allocation2 + $0x1f0] sm:$0xff]   ;;  %v96_v2 = vld [vmem:[%s2160_s0 + $0x148] sm:$0xff]  ;;  %v90_v4 = vld [vmem:[%s2160_s0 + $0x118] sm:$0xff] }
  0x3a   :  { %1310 = vmatpush3.bf16.msra.mxu1 %v1499_v19  ;;  %1253 = vmatprep.subr.bf16.mxu0 %v1500_v20  ;;  %v1519_v63 = vld [vmem:[#allocation2 + $0x1b0] sm:$0xff]   ;;  %v176_v3 = vpack.c.bf16 %v96_v2, %v88_v1  ;;  %v98_v5 = vld [vmem:[%s2160_s0 + $0x158] sm:$0xff]  ;;  %v1521_v7 = vld [vmem:[#allocation2 + $0x128] sm:$0xff]  }
  0x3b   :  { %1311 = vmatprep.subr.bf16.mxu1 %v1501_v21  ;;  %v178_v6 = vpack.c.bf16 %v98_v5, %v90_v4  ;;  %v87_v8 = vld [vmem:[%s2160_s0 + $0x100] sm:$0xff]  ;;  %v89_v10 = vld [vmem:[%s2160_s0 + $0x110] sm:$0xff]  ;;  %v1522_v14 = vld [vmem:[#allocation2 + $0x1e8] sm:$0xff]  }
  0x3c   :  { %v95_v9 = vld [vmem:[%s2160_s0 + $0x140] sm:$0xff]  ;;  %v97_v11 = vld [vmem:[%s2160_s0 + $0x150] sm:$0xff]  ;;  %v1523_v15 = vld [vmem:[#allocation2 + $0x1a8] sm:$0xff]  }
  0x3d   :  { %1254 = vmatpush3.bf16.msra.mxu0 %v1502_v22  ;;  %v175_v12 = vpack.c.bf16 %v95_v9, %v87_v8  ;;  %v177_v13 = vpack.c.bf16 %v97_v11, %v89_v10  ;;  %v1524_v16 = vld [vmem:[#allocation2 + $0x160] sm:$0xff]   ;;  %v104_v18 = vld [vmem:[%s2160_s0 + $0x188] sm:$0xff]  ;;  %v106_v20 = vld [vmem:[%s2160_s0 + $0x198] sm:$0xff] }
  0x3e   :  { %1312 = vmatpush3.bf16.msra.mxu1 %v1503_v23  ;;  %1255 = vmatprep.subr.bf16.mxu0 %v1504_v24  ;;  %v1525_v17 = vld [vmem:[#allocation2 + $0x120] sm:$0xff]   ;;  %v112_v19 = vld [vmem:[%s2160_s0 + $0x1c8] sm:$0xff]  ;;  %v114_v22 = vld [vmem:[%s2160_s0 + $0x1d8] sm:$0xff] }
  0x3f   :  { %1313 = vmatprep.subr.bf16.mxu1 %v1505_v25  ;;  %v184_v21 = vpack.c.bf16 %v112_v19, %v104_v18  ;;  %v186_v23 = vpack.c.bf16 %v114_v22, %v106_v20  ;;  %v1526_v24 = vld [vmem:[#allocation2 + $0x1e0] sm:$0xff]   ;;  %v1528_v32 = vld [vmem:[#allocation2 + $0x158] sm:$0xff]   ;;  %v120_v35 = vld [vmem:[%s2160_s0 + $0x208] sm:$0xff] }
  0x40   :  { %v103_v25 = vld [vmem:[%s2160_s0 + $0x180] sm:$0xff]  ;;  %v1529_v33 = vld [vmem:[#allocation2 + $0x118] sm:$0xff]   ;;  %v128_v36 = vld [vmem:[%s2160_s0 + $0x248] sm:$0xff] }
  0x41   :  { %1256 = vmatpush3.bf16.msra.mxu0 %v1506_v26  ;;  %v111_v26 = vld [vmem:[%s2160_s0 + $0x1c0] sm:$0xff]  ;;  %v1530_v34 = vld [vmem:[#allocation2 + $0x1d8] sm:$0xff]   ;;  %v192_v39 = vpack.c.bf16 %v128_v36, %v120_v35  ;;  %v1532_v48 = vld [vmem:[#allocation2 + $0x150] sm:$0xff]  }
  0x42   :  { %1314 = vmatpush3.bf16.msra.mxu1 %v1507_v27  ;;  %1257 = vmatprep.subr.bf16.mxu0 %v1508_v28  ;;  %v183_v27 = vpack.c.bf16 %v111_v26, %v103_v25  ;;  %v105_v28 = vld [vmem:[%s2160_s0 + $0x190] sm:$0xff]  ;;  %v122_v37 = vld [vmem:[%s2160_s0 + $0x218] sm:$0xff]  ;;  %v119_v42 = vld [vmem:[%s2160_s0 + $0x200] sm:$0xff] }
  0x43   :  { %1315 = vmatprep.subr.bf16.mxu1 %v1509_v29  ;;  %v113_v29 = vld [vmem:[%s2160_s0 + $0x1d0] sm:$0xff]  ;;  %v130_v38 = vld [vmem:[%s2160_s0 + $0x258] sm:$0xff]  ;;  %v135_v57 = vld [vmem:[%s2160_s0 + $0x280] sm:$0xff] }
  0x44   :  { %v1531_v41 = vld [vmem:[#allocation2 + $0x198] sm:$0xff]   ;;  %v1533_v49 = vld [vmem:[#allocation2 + $0x110] sm:$0xff]   ;;  %v143_v59 = vld [vmem:[%s2160_s0 + $0x2c0] sm:$0xff] }
  0x45   :  { %1258 = vmatpush3.bf16.msra.mxu0 %v1510_v30  ;;  %v185_v30 = vpack.c.bf16 %v113_v29, %v105_v28  ;;  %v1534_v50 = vld [vmem:[#allocation2 + $0x1d0] sm:$0xff]   ;;  %v138_v55 = vld [vmem:[%s2160_s0 + $0x298] sm:$0xff]  ;;  %v1537_v1 = vld [vmem:[#allocation2 + $0x108] sm:$0xff]  }
  0x46   :  { %1316 = vmatpush3.bf16.msra.mxu1 %v1511_v31  ;;  %1359 = vmatprep.subr.bf16.mxu0 %v1512_v44  ;;  %v1527_v31 = vld [vmem:[#allocation2 + $0x1a0] sm:$0xff]   ;;  %v121_v44 = vld [vmem:[%s2160_s0 + $0x210] sm:$0xff]  ;;  %v146_v56 = vld [vmem:[%s2160_s0 + $0x2d8] sm:$0xff] }
  0x47   :  { %1417 = vmatprep.subr.bf16.mxu1 %v1514_v46  ;;  %v129_v46 = vld [vmem:[%s2160_s0 + $0x250] sm:$0xff]  ;;  %v1538_v2 = vld [vmem:[#allocation2 + $0x1c8] sm:$0xff]   ;;  %v154_v5 = vld [vmem:[%s2160_s0 + $0x318] sm:$0xff] }
  0x48   :  { %760 = vmatmul.mubr.bf16.vlgmr.msra.gmra.mxu0 %v159_v40  ;;  %v194_v40 = vpack.c.bf16 %v130_v38, %v122_v37  ;;  %v1535_v51 = vld [vmem:[#allocation2 + $0x190] sm:$0xff]   ;;  %v152_v4 = vld [vmem:[%s2160_s0 + $0x308] sm:$0xff]  ;;  %v210_v8 = vpack.c.bf16 %v154_v5, %v154_v5  ;;  %v1540_v10 = vld [vmem:[#allocation2 + $0x140] sm:$0xff]  }
  0x49   :  { %848 = vmatmul.mubr.bf16.vlgmr.msra.gmra.mxu1 %v161_v43  ;;  %1360 = vmatpush3.bf16.msra.mxu0 %v1513_v45  ;;  %v127_v43 = vld [vmem:[%s2160_s0 + $0x240] sm:$0xff]  ;;  %v153_v9 = vld [vmem:[%s2160_s0 + $0x310] sm:$0xff]  ;;  %v62_v19 = vld [vmem:[%s2160_s0 + $0x38] sm:$0xff] }
  0x4a   :  { %1418 = vmatpush3.bf16.msra.mxu1 %v1515_v47  ;;  %767 = vmatprep.mubr.bf16.mxu0 %v168_v52  ;;  %v191_v45 = vpack.c.bf16 %v127_v43, %v119_v42  ;;  %v193_v47 = vpack.c.bf16 %v129_v46, %v121_v44  ;;  %v136_v52 = vld [vmem:[%s2160_s0 + $0x288] sm:$0xff]  ;;  %v1541_v11 = vld [vmem:[#allocation2 + $0x100] sm:$0xff]   ;;  %v70_v20 = vld [vmem:[%s2160_s0 + $0x78] sm:$0xff] }
  0x4b   :  { %855 = vmatprep.mubr.bf16.mxu1 %v170_v53  ;;  %1361 = vmatprep.subr.bf16.mxu0 %v1516_v54  ;;  %v144_v53 = vld [vmem:[%s2160_s0 + $0x2c8] sm:$0xff]  ;;  %v59_v22 = vld [vmem:[%s2160_s0 + $0x20] sm:$0xff]  ;;  %v69_v25 = vld [vmem:[%s2160_s0 + $0x70] sm:$0xff] }
  0x4c   :  { %1419 = vmatprep.subr.bf16.mxu1 %v1518_v62  ;;  %v200_v54 = vpack.c.bf16 %v144_v53, %v136_v52  ;;  %v199_v62 = vpack.c.bf16 %v143_v59, %v135_v57  ;;  %v76_v26 = vld [vmem:[%s2160_s0 + $0xa8] sm:$0xff]  ;;  %v78_v28 = vld [vmem:[%s2160_s0 + $0xb8] sm:$0xff]  ;;  %v83_v35 = vld [vmem:[%s2160_s0 + $0xe0] sm:$0xff] }
  0x4d   :  { %1362 = vmatpush3.bf16.msra.mxu0 %v1517_v61  ;;  %v145_v61 = vld [vmem:[%s2160_s0 + $0x2d0] sm:$0xff]  ;;  %v86_v29 = vld [vmem:[%s2160_s0 + $0xf8] sm:$0xff]  ;;  %v92_v38 = vld [vmem:[%s2160_s0 + $0x128] sm:$0xff] }
  0x4e   :  { %1420 = vmatpush3.bf16.msra.mxu1 %v1519_v63  ;;  %1363 = vmatprep.subr.bf16.mxu0 %v1520_v0  ;;  %v1536_v63 = vld [vmem:[#allocation2 + $0x148] sm:$0xff]   ;;  %v77_v36 = vld [vmem:[%s2160_s0 + $0xb0] sm:$0xff]  ;;  %v91_v46 = vld [vmem:[%s2160_s0 + $0x120] sm:$0xff] }
  0x4f   :  { %1421 = vmatprep.subr.bf16.mxu1 %v1522_v14  ;;  %v209_v14 = vpack.c.bf16 %v153_v9, %v153_v9  ;;  %v85_v37 = vld [vmem:[%s2160_s0 + $0xf0] sm:$0xff]  ;;  %v110_v52 = vld [vmem:[%s2160_s0 + $0x1b8] sm:$0xff]  ;;  %v115_v59 = vld [vmem:[%s2160_s0 + $0x1e0] sm:$0xff] }
  0x50   :  { %768 = vmatmul.mubr.bf16.gmra.mxu0 %v167_v58  ;;  %v202_v58 = vpack.c.bf16 %v146_v56, %v138_v55  ;;  %v173_v43 = vpack.c.bf16 %v85_v37, %v77_v36  ;;  %v118_v53 = vld [vmem:[%s2160_s0 + $0x1f8] sm:$0xff]  ;;  %v133_v9 = vld [vmem:[%s2160_s0 + $0x270] sm:$0xff] }
  0x51   :  { %856 = vmatmul.mubr.bf16.gmra.mxu1 %v169_v60  ;;  %775 = vmatprep.mubr.bf16.mxu0 %v176_v3  ;;  %v137_v60 = vld [vmem:[%s2160_s0 + $0x290] sm:$0xff]  ;;  %v1539_v3 = vld [vmem:[#allocation2 + $0x188] sm:$0xff]   ;;  %v190_v57 = vpack.c.bf16 %v118_v53, %v110_v52 }
  0x52   :  { %863 = vmatprep.mubr.bf16.mxu1 %v178_v6  ;;  %1364 = vmatpush3.bf16.msra.mxu0 %v1521_v7  ;;  %v201_v0 = vpack.c.bf16 %v145_v61, %v137_v60  ;;  %v151_v6 = vld [vmem:[%s2160_s0 + $0x300] sm:$0xff]  ;;  %v208_v7 = vpack.c.bf16 %v152_v4, %v152_v4  ;;  %v109_v60 = vld [vmem:[%s2160_s0 + $0x1b0] sm:$0xff] }
  0x53   :  { %1422 = vmatpush3.bf16.msra.mxu1 %v1523_v15  ;;  %1365 = vmatprep.subr.bf16.mxu0 %v1524_v16  ;;  %v1543_v15 = vld [vmem:[#allocation2 + $0x180] sm:$0xff]   ;;  %v60_v16 = vld [vmem:[%s2160_s0 + $0x28] sm:$0xff]  ;;  %v117_v61 = vld [vmem:[%s2160_s0 + $0x1f0] sm:$0xff] }
  0x54   :  { %1423 = vmatprep.subr.bf16.mxu1 %v1526_v24  ;;  %v61_v24 = vld [vmem:[%s2160_s0 + $0x30] sm:$0xff] }
  0x56   :  { %1366 = vmatpush3.bf16.msra.mxu0 %v1525_v17  ;;  %v68_v17 = vld [vmem:[%s2160_s0 + $0x68] sm:$0xff] }
  0x57   :  { %1424 = vmatpush3.bf16.msra.mxu1 %v1527_v31  ;;  %1367 = vmatprep.subr.bf16.mxu0 %v1528_v32  ;;  %v164_v18 = vpack.c.bf16 %v68_v17, %v60_v16  ;;  %v165_v31 = vpack.c.bf16 %v69_v25, %v61_v24 }
  0x58   :  { %776 = vmatmul.mubr.bf16.gmra.mxu0 %v175_v12  ;;  %1425 = vmatprep.subr.bf16.mxu1 %v1530_v34  ;;  %v207_v12 = vpack.c.bf16 %v151_v6, %v151_v6  ;;  %v75_v34 = vld [vmem:[%s2160_s0 + $0xa0] sm:$0xff] }
  0x59   :  { %864 = vmatmul.mubr.bf16.gmra.mxu1 %v177_v13  ;;  %783 = vmatprep.mubr.bf16.mxu0 %v184_v21  ;;  %v1542_v13 = vld [vmem:[#allocation2 + $0x1c0] sm:$0xff]   ;;  %v166_v21 = vpack.c.bf16 %v70_v20, %v62_v19  ;;  %v171_v42 = vpack.c.bf16 %v83_v35, %v75_v34  ;;  %v141_v20 = vld [vmem:[%s2160_s0 + $0x2b0] sm:$0xff] }
  0x5a   :  { %871 = vmatprep.mubr.bf16.mxu1 %v186_v23  ;;  %1368 = vmatpush3.bf16.msra.mxu0 %v1529_v33  ;;  %v67_v23 = vld [vmem:[%s2160_s0 + $0x60] sm:$0xff]  ;;  %v174_v33 = vpack.c.bf16 %v86_v29, %v78_v28  ;;  %v157_v29 = vld [vmem:[%s2160_s0 + $0x330] sm:$0xff] }
  0x5b   :  { %1426 = vmatpush3.bf16.msra.mxu1 %v1531_v41  ;;  %1369 = vmatprep.subr.bf16.mxu0 %v1532_v48  ;;  %v102_v41 = vld [vmem:[%s2160_s0 + $0x178] sm:$0xff]  ;;  %v93_v48 = vld [vmem:[%s2160_s0 + $0x130] sm:$0xff]  ;;  %v123_v6 = vld [vmem:[%s2160_s0 + $0x220] sm:$0xff] }
  0x5c   :  { %1427 = vmatprep.subr.bf16.mxu1 %v1534_v50  ;;  %v108_v50 = vld [vmem:[%s2160_s0 + $0x1a8] sm:$0xff]  ;;  %v147_v19 = vld [vmem:[%s2160_s0 + $0x2e0] sm:$0xff] }
  0x5d   :  { %v155_v28 = vld [vmem:[%s2160_s0 + $0x320] sm:$0xff] }
  0x5e   :  { %1370 = vmatpush3.bf16.msra.mxu0 %v1533_v49  ;;  %v101_v49 = vld [vmem:[%s2160_s0 + $0x170] sm:$0xff] }
  0x5f   :  { %1428 = vmatpush3.bf16.msra.mxu1 %v1535_v51  ;;  %1371 = vmatprep.subr.bf16.mxu0 %v1536_v63  ;;  %v116_v51 = vld [vmem:[%s2160_s0 + $0x1e8] sm:$0xff]  ;;  %v181_v55 = vpack.c.bf16 %v101_v49, %v93_v48 }
  0x60   :  { %784 = vmatmul.mubr.bf16.gmra.mxu0 %v183_v27  ;;  %1429 = vmatprep.subr.bf16.mxu1 %v1538_v2  ;;  %v84_v27 = vld [vmem:[%s2160_s0 + $0xe8] sm:$0xff]  ;;  %v188_v56 = vpack.c.bf16 %v116_v51, %v108_v50 }
  0x61   :  { %872 = vmatmul.mubr.bf16.gmra.mxu1 %v185_v30  ;;  %791 = vmatprep.mubr.bf16.mxu0 %v192_v39  ;;  %v163_v30 = vpack.c.bf16 %v67_v23, %v59_v22  ;;  %v172_v32 = vpack.c.bf16 %v84_v27, %v76_v26  ;;  %v100_v39 = vld [vmem:[%s2160_s0 + $0x168] sm:$0xff]  ;;  %v158_v23 = vld [vmem:[%s2160_s0 + $0x338] sm:$0xff] }
  0x62   :  { %879 = vmatprep.mubr.bf16.mxu1 %v194_v40  ;;  %1372 = vmatpush3.bf16.msra.mxu0 %v1537_v1  ;;  %v94_v40 = vld [vmem:[%s2160_s0 + $0x138] sm:$0xff]  ;;  %v180_v44 = vpack.c.bf16 %v100_v39, %v92_v38  ;;  %v132_v63 = vld [vmem:[%s2160_s0 + $0x268] sm:$0xff]  ;;  %v214_v27 = vpack.c.bf16 %v158_v23, %v158_v23 }
  0x63   :  { %1430 = vmatpush3.bf16.msra.mxu1 %v1539_v3  ;;  %1373 = vmatprep.subr.bf16.mxu0 %v1540_v10  ;;  %v134_v1 = vld [vmem:[%s2160_s0 + $0x278] sm:$0xff]  ;;  %v189_v3 = vpack.c.bf16 %v117_v61, %v109_v60  ;;  %v140_v10 = vld [vmem:[%s2160_s0 + $0x2a8] sm:$0xff] }
  0x64   :  { %1431 = vmatprep.subr.bf16.mxu1 %v1542_v13  ;;  %v150_v13 = vld [vmem:[%s2160_s0 + $0x2f8] sm:$0xff]  ;;  %v156_v22 = vld [vmem:[%s2160_s0 + $0x328] sm:$0xff] }
  0x65   :  { %v212_v26 = vpack.c.bf16 %v156_v22, %v156_v22 }
  0x66   :  { %1374 = vmatpush3.bf16.msra.mxu0 %v1541_v11  ;;  %v148_v11 = vld [vmem:[%s2160_s0 + $0x2e8] sm:$0xff] }
  0x67   :  { %1432 = vmatpush3.bf16.msra.mxu1 %v1543_v15  ;;  %v204_v16 = vpack.c.bf16 %v148_v11, %v140_v10 }
  0x68   :  { %792 = vmatmul.mubr.bf16.gmra.mxu0 %v191_v45  ;;  %v182_v45 = vpack.c.bf16 %v102_v41, %v94_v40 }
  0x69   :  { %880 = vmatmul.mubr.bf16.gmra.mxu1 %v193_v47  ;;  %799 = vmatprep.mubr.bf16.mxu0 %v200_v54  ;;  %v99_v47 = vld [vmem:[%s2160_s0 + $0x160] sm:$0xff] }
  0x6a   :  { %887 = vmatprep.mubr.bf16.mxu1 %v202_v58  ;;  %v179_v54 = vpack.c.bf16 %v99_v47, %v91_v46  ;;  %v107_v58 = vld [vmem:[%s2160_s0 + $0x1a0] sm:$0xff] }
  0x6b   :  { %v187_v2 = vpack.c.bf16 %v115_v59, %v107_v58 }
  0x70   :  { %800 = vmatmul.mubr.bf16.gmra.mxu0 %v199_v62  ;;  %v124_v62 = vld [vmem:[%s2160_s0 + $0x228] sm:$0xff] }
  0x71   :  { %888 = vmatmul.mubr.bf16.gmra.mxu1 %v201_v0  ;;  %807 = vmatprep.mubr.bf16.mxu0 %v208_v7  ;;  %v126_v0 = vld [vmem:[%s2160_s0 + $0x238] sm:$0xff]  ;;  %v196_v4 = vpack.c.bf16 %v132_v63, %v124_v62  ;;  %v131_v7 = vld [vmem:[%s2160_s0 + $0x260] sm:$0xff] }
  0x72   :  { %895 = vmatprep.mubr.bf16.mxu1 %v210_v8  ;;  %v198_v5 = vpack.c.bf16 %v134_v1, %v126_v0  ;;  %v125_v8 = vld [vmem:[%s2160_s0 + $0x230] sm:$0xff] }
  0x73   :  { %v197_v15 = vpack.c.bf16 %v133_v9, %v125_v8 }
  0x78   :  { %808 = vmatmul.mubr.bf16.gmra.mxu0 %v207_v12  ;;  %v142_v12 = vld [vmem:[%s2160_s0 + $0x2b8] sm:$0xff] }
  0x79   :  { %896 = vmatmul.mubr.bf16.gmra.mxu1 %v209_v14  ;;  %935 = vmatprep.mubr.bf16.mxu0 %v164_v18  ;;  %v195_v14 = vpack.c.bf16 %v131_v7, %v123_v6  ;;  %v206_v17 = vpack.c.bf16 %v150_v13, %v142_v12  ;;  %v139_v18 = vld [vmem:[%s2160_s0 + $0x2a0] sm:$0xff] }
  0x7a   :  { %1023 = vmatprep.mubr.bf16.mxu1 %v166_v21  ;;  %v149_v21 = vld [vmem:[%s2160_s0 + $0x2f0] sm:$0xff]  ;;  %v203_v24 = vpack.c.bf16 %v147_v19, %v139_v18 }
  0x7b   :  { %v205_v25 = vpack.c.bf16 %v149_v21, %v141_v20 }
  0x80   :  { %936 = vmatmul.mubr.bf16.vlgmr.msra.gmra.mxu0 %v163_v30  ;;  %v211_v30 = vpack.c.bf16 %v155_v28, %v155_v28 }
  0x81   :  { %1024 = vmatmul.mubr.bf16.vlgmr.msra.gmra.mxu1 %v165_v31  ;;  %943 = vmatprep.mubr.bf16.mxu0 %v172_v32  ;;  %v213_v31 = vpack.c.bf16 %v157_v29, %v157_v29 }
  0x82   :  { %1031 = vmatprep.mubr.bf16.mxu1 %v174_v33 }
  0x88   :  { %944 = vmatmul.mubr.bf16.gmra.mxu0 %v171_v42 }
  0x89   :  { %1032 = vmatmul.mubr.bf16.gmra.mxu1 %v173_v43  ;;  %951 = vmatprep.mubr.bf16.mxu0 %v180_v44 }
  0x8a   :  { %1039 = vmatprep.mubr.bf16.mxu1 %v182_v45 }
  0x90   :  { %952 = vmatmul.mubr.bf16.gmra.mxu0 %v179_v54 }
  0x91   :  { %1040 = vmatmul.mubr.bf16.gmra.mxu1 %v181_v55  ;;  %959 = vmatprep.mubr.bf16.mxu0 %v188_v56 }
  0x92   :  { %1047 = vmatprep.mubr.bf16.mxu1 %v190_v57 }
  0x98   :  { %960 = vmatmul.mubr.bf16.gmra.mxu0 %v187_v2 }
  0x99   :  { %1048 = vmatmul.mubr.bf16.gmra.mxu1 %v189_v3  ;;  %967 = vmatprep.mubr.bf16.mxu0 %v196_v4 }
  0x9a   :  { %1055 = vmatprep.mubr.bf16.mxu1 %v198_v5 }
  0xa0   :  { %968 = vmatmul.mubr.bf16.gmra.mxu0 %v195_v14 }
  0xa1   :  { %1056 = vmatmul.mubr.bf16.gmra.mxu1 %v197_v15  ;;  %975 = vmatprep.mubr.bf16.mxu0 %v204_v16 }
  0xa2   :  { %1063 = vmatprep.mubr.bf16.mxu1 %v206_v17 }
  0xa8   :  { %976 = vmatmul.mubr.bf16.gmra.mxu0 %v203_v24 }
  0xa9   :  { %1064 = vmatmul.mubr.bf16.gmra.mxu1 %v205_v25  ;;  %983 = vmatprep.mubr.bf16.mxu0 %v212_v26 }
  0xaa   :  { %1071 = vmatprep.mubr.bf16.mxu1 %v214_v27 }
  0xb0   :  { %984 = vmatmul.mubr.bf16.gmra.mxu0 %v211_v30 }
  0xb1   :  { %1072 = vmatmul.mubr.bf16.gmra.mxu1 %v213_v31 }
 0x108   :  { %v1259_v32 = vpop.f32.mrf.mxu0 }
 0x109   :  { %v1317_v33 = vpop.f32.mrf.mxu1 }
 0x10a   :  { %v1260_v34 = vpop.f32.mrf.mxu0 }
 0x10b   :  { %v1318_v35 = vpop.f32.mrf.mxu1  ;;  %v1261_v23 = vadd.f32 %v1260_v34, %v1259_v32 }
 0x10c   :  { %v1262_v36 = vpop.f32.mrf.mxu0  ;;  %v1319_v24 = vadd.f32 %v1318_v35, %v1317_v33 }
 0x10d   :  { %v1320_v37 = vpop.f32.mrf.mxu1 }
 0x10e   :  { %v1263_v38 = vpop.f32.mrf.mxu0  ;;  %v850_v31 = vadd.f32 %v1319_v24, %v1261_v23 }
 0x10f   :  { %v1321_v39 = vpop.f32.mrf.mxu1  ;;  %v1264_v28 = vadd.f32 %v1263_v38, %v1262_v36 }
 0x110   :  { %v1959_v40 = vpop.f32.mrf.mxu0  ;;  %v1322_v29 = vadd.f32 %v1321_v39, %v1320_v37  ;;  %v2053_v37 = vld [vmem:[#allocation6] ss:$0 sm:$0xff] }
 0x111   :  { %v1961_v41 = vpop.f32.mrf.mxu1 }
 0x112   :  { %v1963_v42 = vpop.f32.mrf.mxu0 }
 0x113   :  { %v1965_v43 = vpop.f32.mrf.mxu1  ;;  %v1267_v32 = vadd.f32 %v1963_v42, %v1959_v40 }
 0x114   :  { %v1967_v44 = vpop.f32.mrf.mxu0  ;;  %v1325_v33 = vadd.f32 %v1965_v43, %v1961_v41 }
 0x115   :  { %v1969_v45 = vpop.f32.mrf.mxu1 }
 0x116   :  { %v1971_v46 = vpop.f32.mrf.mxu0  ;;  %v858_v23 = vadd.f32 %v1325_v33, %v1267_v32 }
 0x117   :  { %v1973_v47 = vpop.f32.mrf.mxu1 }
 0x118   :  { %v1975_v48 = vpop.f32.mrf.mxu0  ;;  %v1328_v40 = vadd.f32 %v1973_v47, %v1969_v45 }
 0x119   :  { %v1977_v49 = vpop.f32.mrf.mxu1 }
 0x11a   :  { %v1979_v50 = vpop.f32.mrf.mxu0 }
 0x11b   :  { %v1981_v51 = vpop.f32.mrf.mxu1 }
 0x11c   :  { %v1983_v52 = vpop.f32.mrf.mxu0  ;;  %v1331_v45 = vadd.f32 %v1981_v51, %v1977_v49 }
 0x11d   :  { %v1985_v53 = vpop.f32.mrf.mxu1 }
 0x11e   :  { %v1987_v54 = vpop.f32.mrf.mxu0 }
 0x11f   :  { %v1989_v55 = vpop.f32.mrf.mxu1  ;;  %v1276_v51 = vadd.f32 %v1987_v54, %v1983_v52 }
 0x120   :  { %v1991_v56 = vpop.f32.mrf.mxu0 }
 0x121   :  { %v1993_v57 = vpop.f32.mrf.mxu1 }
 0x122   :  { %v1995_v58 = vpop.f32.mrf.mxu0 }
 0x123   :  { %v1997_v59 = vpop.f32.mrf.mxu1 }
 0x124   :  { %v1999_v60 = vpop.f32.mrf.mxu0 }
 0x125   :  { %v2001_v61 = vpop.f32.mrf.mxu1 }
 0x126   :  { %v2003_v62 = vpop.f32.mrf.mxu0 }
 0x127   :  { %v2005_v63 = vpop.f32.mrf.mxu1 }
 0x128   :  { %v2007_v0 = vpop.f32.mrf.mxu0 }
 0x129   :  { %v2009_v1 = vpop.f32.mrf.mxu1 }
 0x12a   :  { %v2011_v2 = vpop.f32.mrf.mxu0 }
 0x12b   :  { %v2013_v3 = vpop.f32.mrf.mxu1 }
 0x12c   :  { %v2015_v4 = vpop.f32.mrf.mxu0 }
 0x12d   :  { %v2017_v5 = vpop.f32.mrf.mxu1 }
 0x12e   :  { %v2019_v6 = vpop.f32.mrf.mxu0 }
 0x12f   :  { %v2021_v7 = vpop.f32.mrf.mxu1 }
 0x130   :  { %v2023_v8 = vpop.f32.mrf.mxu0 }
 0x131   :  { %v2025_v9 = vpop.f32.mrf.mxu1 }
 0x132   :  { %v2027_v10 = vpop.f32.mrf.mxu0 }
 0x133   :  { %v2029_v11 = vpop.f32.mrf.mxu1 }
 0x134   :  { %v2031_v12 = vpop.f32.mrf.mxu0 }
 0x135   :  { %2165 = vst [vmem:[#allocation9_spill] sm:$0xff] %v2031_v12  ;;  %v2033_v13 = vpop.f32.mrf.mxu1  ;;  %v853_v12 = vadd.f32 %v1322_v29, %v1264_v28 }
 0x136   :  { %2166 = vst [vmem:[#allocation10_spill] sm:$0xff] %v2033_v13  ;;  %v2035_v14 = vpop.f32.mrf.mxu0 }
 0x137   :  { %2167 = vst [vmem:[#allocation11_spill] sm:$0xff] %v2035_v14  ;;  %v2037_v15 = vpop.f32.mrf.mxu1 }
 0x138   :  { %2168 = vst [vmem:[#allocation12_spill] sm:$0xff] %v2037_v15  ;;  %v2039_v16 = vpop.f32.mrf.mxu0 }
 0x139   :  { %2169 = vst [vmem:[#allocation13_spill] sm:$0xff] %v2039_v16  ;;  %v2041_v17 = vpop.f32.mrf.mxu1 }
 0x13a   :  { %2170 = vst [vmem:[#allocation14_spill] sm:$0xff] %v2041_v17  ;;  %v2043_v18 = vpop.f32.mrf.mxu0 }
 0x13b   :  { %2171 = vst [vmem:[#allocation15_spill] sm:$0xff] %v2043_v18  ;;  %v2045_v19 = vpop.f32.mrf.mxu1 }
 0x13c   :  { %2172 = vst [vmem:[#allocation16_spill] sm:$0xff] %v2045_v19  ;;  %v1298_v20 = vpop.f32.mrf.mxu0  ;;  %v2047_v19 = vld [vmem:[#allocation4] ss:$0 sm:$0xff] }
 0x13d   :  { %v1356_v21 = vpop.f32.mrf.mxu1 }
 0x13e   :  { %v1299_v22 = vpop.f32.mrf.mxu0 }
 0x13f   :  { %v1357_v25 = vpop.f32.mrf.mxu1  ;;  %v1270_v22 = vadd.f32 %v1971_v46, %v1967_v44  ;;  %v1273_v44 = vadd.f32 %v1979_v50, %v1975_v48 }
 0x140   :  { %v1375_v26 = vpop.f32.mrf.mxu0 }
 0x141   :  { %v1433_v27 = vpop.f32.mrf.mxu1  ;;  %v866_v49 = vadd.f32 %v1331_v45, %v1273_v44  ;;  %v1340_v44 = vadd.f32 %v2005_v63, %v2001_v61  ;;  %v1285_v63 = vadd.f32 %v2011_v2, %v2007_v0 }
 0x142   :  { %v1376_v30 = vpop.f32.mrf.mxu0 }
 0x143   :  { %v1377_v15 = vadd.f32 %v1376_v30, %v1375_v26  ;;  %v1434_v16 = vpop.f32.mrf.mxu1 }
 0x144   :  { %v1378_v13 = vpop.f32.mrf.mxu0  ;;  %v1435_v14 = vadd.f32 %v1434_v16, %v1433_v27  ;;  %v861_v27 = vadd.f32 %v1328_v40, %v1270_v22 }
 0x145   :  { %v938_v17 = vadd.f32 %v1377_v15, %v850_v31  ;;  %v1436_v18 = vpop.f32.mrf.mxu1 }
 0x146   :  { %v1379_v20 = vpop.f32.mrf.mxu0 }
 0x147   :  { %v1026_v34 = vadd.f32 %v1435_v14, %v938_v17  ;;  %v1380_v35 = vadd.f32 %v1379_v20, %v1378_v13  ;;  %v1437_v36 = vpop.f32.mrf.mxu1 }
 0x148   :  { %v1381_v38 = vpop.f32.mrf.mxu0  ;;  %v1438_v16 = vadd.f32 %v1437_v36, %v1436_v18 }
 0x149   :  { %v1086_v39 = vmul.f32 %v2047_v19, %v1026_v34  ;;  %v941_v15 = vadd.f32 %v1380_v35, %v853_v12  ;;  %v1439_v21 = vpop.f32.mrf.mxu1  ;;  %v1334_v35 = vadd.f32 %v1989_v55, %v1985_v53  ;;  %v1279_v55 = vadd.f32 %v1995_v58, %v1991_v56 }
 0x14a   :  { %v1382_v42 = vpop.f32.mrf.mxu0 }
 0x14b   :  { %v1106_v41 = vadd.f32 %v2053_v37, %v1086_v39  ;;  %v1029_v43 = vadd.f32 %v1438_v16, %v941_v15  ;;  %v1383_v13 = vadd.f32 %v1382_v42, %v1381_v38  ;;  %v1440_v14 = vpop.f32.mrf.mxu1  ;;  %v869_v53 = vadd.f32 %v1334_v35, %v1276_v51 }
 0x14c   :  { %v1441_v17 = vadd.f32 %v1440_v14, %v1439_v21  ;;  %v1384_v24 = vpop.f32.mrf.mxu0 }
 0x14d   :  { %vm1119_vm0 = vcmp.ge.f32.partialorder %v1106_v41, 0.0  ;;  %v1132_v25 = vmul.f32 0.1, %v1106_v41  ;;  %v1087_v12 = vmul.f32 %v2047_v19, %v1029_v43  ;;  %v946_v18 = vadd.f32 %v1383_v13, %v858_v23  ;;  %v1442_v26 = vpop.f32.mrf.mxu1 }
 0x14e   :  { %v1385_v46 = vpop.f32.mrf.mxu0 }
 0x14f   :  { %v1145_v47 = vsel %vm1119_vm0, %v1106_v41, %v1132_v25  ;;  %v1107_v28 = vadd.f32 %v2053_v37, %v1087_v12  ;;  %v1034_v29 = vadd.f32 %v1441_v17, %v946_v18  ;;  %v1386_v30 = vadd.f32 %v1385_v46, %v1384_v24  ;;  %v1443_v31 = vpop.f32.mrf.mxu1 }
 0x150   :  { %1158 = vst [vmem:[%s2164_s4] sm:$0xff] %v1145_v47  ;;  %v1444_v20 = vadd.f32 %v1443_v31, %v1442_v26  ;;  %v1387_v32 = vpop.f32.mrf.mxu0  ;;  %v1337_v41 = vadd.f32 %v1997_v59, %v1993_v57  ;;  %v1282_v59 = vadd.f32 %v2003_v62, %v1999_v60 }
 0x151   :  { %vm1120_vm1 = vcmp.ge.f32.partialorder %v1107_v28, 0.0  ;;  %v1133_v33 = vmul.f32 0.1, %v1107_v28  ;;  %v1088_v48 = vmul.f32 %v2047_v19, %v1034_v29  ;;  %v949_v50 = vadd.f32 %v1386_v30, %v861_v27  ;;  %v1445_v34 = vpop.f32.mrf.mxu1 }
 0x152   :  { %v1388_v36 = vpop.f32.mrf.mxu0  ;;  %v874_v57 = vadd.f32 %v1337_v41, %v1279_v55  ;;  %v877_v61 = vadd.f32 %v1340_v44, %v1282_v59  ;;  %v2175_v44 = vld [vmem:[#allocation10_spill] sm:$0xff] }
 0x153   :  { %v1146_v38 = vsel %vm1120_vm1, %v1107_v28, %v1133_v33  ;;  %v1108_v39 = vadd.f32 %v2053_v37, %v1088_v48  ;;  %v1037_v15 = vadd.f32 %v1444_v20, %v949_v50  ;;  %v1389_v16 = vadd.f32 %v1388_v36, %v1387_v32  ;;  %v1446_v21 = vpop.f32.mrf.mxu1 }
 0x154   :  { %1159 = vst [vmem:[%s2164_s4 + $0x8] sm:$0xff] %v1146_v38  ;;  %v1447_v22 = vadd.f32 %v1446_v21, %v1445_v34  ;;  %v1390_v40 = vpop.f32.mrf.mxu0  ;;  %v1343_v48 = vadd.f32 %v2013_v3, %v2009_v1  ;;  %v1288_v3 = vadd.f32 %v2019_v6, %v2015_v4  ;;  %v1346_v21 = vadd.f32 %v2021_v7, %v2017_v5 }
 0x155   :  { %vm1121_vm2 = vcmp.ge.f32.partialorder %v1108_v39, 0.0  ;;  %v1134_v42 = vmul.f32 0.1, %v1108_v39  ;;  %v1089_v52 = vmul.f32 %v2047_v19, %v1037_v15  ;;  %v954_v54 = vadd.f32 %v1389_v16, %v866_v49  ;;  %v1448_v23 = vpop.f32.mrf.mxu1 }
 0x156   :  { %v1391_v43 = vpop.f32.mrf.mxu0  ;;  %v882_v1 = vadd.f32 %v1343_v48, %v1285_v63  ;;  %v885_v5 = vadd.f32 %v1346_v21, %v1288_v3  ;;  %v1291_v7 = vadd.f32 %v2027_v10, %v2023_v8 }
 0x157   :  { %v1147_v13 = vsel %vm1121_vm2, %v1108_v39, %v1134_v42  ;;  %v1109_v14 = vadd.f32 %v2053_v37, %v1089_v52  ;;  %v1042_v17 = vadd.f32 %v1447_v22, %v954_v54  ;;  %v1392_v24 = vadd.f32 %v1391_v43, %v1390_v40  ;;  %v1449_v25 = vpop.f32.mrf.mxu1 }
 0x158   :  { %1160 = vst [vmem:[%s2164_s4 + $0x10] sm:$0xff] %v1147_v13  ;;  %v1450_v12 = vadd.f32 %v1449_v25, %v1448_v23  ;;  %v1393_v18 = vpop.f32.mrf.mxu0  ;;  %v1349_v13 = vadd.f32 %v2029_v11, %v2025_v9  ;;  %v2173_v11 = vld [vmem:[#allocation9_spill] sm:$0xff] }
 0x159   :  { %vm1122_vm3 = vcmp.ge.f32.partialorder %v1109_v14, 0.0  ;;  %v1135_v26 = vmul.f32 0.1, %v1109_v14  ;;  %v1090_v56 = vmul.f32 %v2047_v19, %v1042_v17  ;;  %v957_v58 = vadd.f32 %v1392_v24, %v869_v53  ;;  %v1451_v27 = vpop.f32.mrf.mxu1 }
 0x15a   :  { %v1394_v45 = vpop.f32.mrf.mxu0  ;;  %v890_v9 = vadd.f32 %v1349_v13, %v1291_v7 }
 0x15b   :  { %v1148_v46 = vsel %vm1122_vm3, %v1109_v14, %v1135_v26  ;;  %v1110_v47 = vadd.f32 %v2053_v37, %v1090_v56  ;;  %v1045_v28 = vadd.f32 %v1450_v12, %v957_v58  ;;  %v1395_v29 = vadd.f32 %v1394_v45, %v1393_v18  ;;  %v1452_v30 = vpop.f32.mrf.mxu1  ;;  %v2176_v45 = vld [vmem:[#allocation12_spill] sm:$0xff] }
 0x15c   :  { %1161 = vst [vmem:[%s2164_s4 + $0x18] sm:$0xff] %v1148_v46  ;;  %v1453_v31 = vadd.f32 %v1452_v30, %v1451_v27  ;;  %v1396_v20 = vpop.f32.mrf.mxu0  ;;  %v1352_v46 = vadd.f32 %v2176_v45, %v2175_v44 }
 0x15d   :  { %vm1123_vm4 = vcmp.ge.f32.partialorder %v1110_v47, 0.0  ;;  %v1136_v32 = vmul.f32 0.1, %v1110_v47  ;;  %v1091_v60 = vmul.f32 %v2047_v19, %v1045_v28  ;;  %v962_v62 = vadd.f32 %v1395_v29, %v874_v57  ;;  %v1454_v33 = vpop.f32.mrf.mxu1  ;;  %v2174_v57 = vld [vmem:[#allocation11_spill] sm:$0xff] }
 0x15e   :  { %v1397_v50 = vpop.f32.mrf.mxu0  ;;  %v1294_v59 = vadd.f32 %v2174_v57, %v2173_v11 }
 0x15f   :  { %v1149_v34 = vsel %vm1123_vm4, %v1110_v47, %v1136_v32  ;;  %v1111_v49 = vadd.f32 %v2053_v37, %v1091_v60  ;;  %v1050_v51 = vadd.f32 %v1453_v31, %v962_v62  ;;  %v1398_v35 = vadd.f32 %v1397_v50, %v1396_v20  ;;  %v1455_v36 = vpop.f32.mrf.mxu1  ;;  %v2177_v50 = vld [vmem:[#allocation13_spill] sm:$0xff] }
 0x160   :  { %1162 = vst [vmem:[%s2164_s4 + $0x20] sm:$0xff] %v1149_v34  ;;  %v1456_v38 = vadd.f32 %v1455_v36, %v1454_v33  ;;  %v1399_v39 = vpop.f32.mrf.mxu0  ;;  %v893_v48 = vadd.f32 %v1352_v46, %v1294_v59  ;;  %v2178_v34 = vld [vmem:[#allocation15_spill] sm:$0xff] }
 0x161   :  { %vm1124_vm5 = vcmp.ge.f32.partialorder %v1111_v49, 0.0  ;;  %v1137_v15 = vmul.f32 0.1, %v1111_v49  ;;  %v1092_v0 = vmul.f32 %v2047_v19, %v1050_v51  ;;  %v965_v2 = vadd.f32 %v1398_v35, %v877_v61  ;;  %v1457_v16 = vpop.f32.mrf.mxu1  ;;  %v2179_v51 = vld [vmem:[#allocation14_spill] sm:$0xff]  ;;  %v2180_v35 = vld [vmem:[#allocation16_spill] sm:$0xff] }
 0x162   :  { %v1400_v22 = vpop.f32.mrf.mxu0  ;;  %v1355_v36 = vadd.f32 %v2180_v35, %v2179_v51 }
 0x163   :  { %v1150_v40 = vsel %vm1124_vm5, %v1111_v49, %v1137_v15  ;;  %v1112_v42 = vadd.f32 %v2053_v37, %v1092_v0  ;;  %v1053_v52 = vadd.f32 %v1456_v38, %v965_v2  ;;  %v1401_v54 = vadd.f32 %v1400_v22, %v1399_v39  ;;  %v1458_v23 = vpop.f32.mrf.mxu1 }
 0x164   :  { %1163 = vst [vmem:[%s2164_s4 + $0x28] sm:$0xff] %v1150_v40  ;;  %v1459_v53 = vadd.f32 %v1458_v23, %v1457_v16  ;;  %v1402_v55 = vpop.f32.mrf.mxu0  ;;  %v1297_v49 = vadd.f32 %v2178_v34, %v2177_v50 }
 0x165   :  { %vm1125_vm6 = vcmp.ge.f32.partialorder %v1112_v42, 0.0  ;;  %v1138_v41 = vmul.f32 0.1, %v1112_v42  ;;  %v1093_v4 = vmul.f32 %v2047_v19, %v1053_v52  ;;  %v970_v6 = vadd.f32 %v1401_v54, %v882_v1  ;;  %v1460_v43 = vpop.f32.mrf.mxu1 }
 0x166   :  { %v1403_v14 = vpop.f32.mrf.mxu0  ;;  %v898_v52 = vadd.f32 %v1355_v36, %v1297_v49 }
 0x167   :  { %v1151_v17 = vsel %vm1125_vm6, %v1112_v42, %v1138_v41  ;;  %v1113_v24 = vadd.f32 %v2053_v37, %v1093_v4  ;;  %v1058_v25 = vadd.f32 %v1459_v53, %v970_v6  ;;  %v1404_v12 = vadd.f32 %v1403_v14, %v1402_v55  ;;  %v1461_v18 = vpop.f32.mrf.mxu1 }
 0x168   :  { %1164 = vst [vmem:[%s2164_s4 + $0x30] sm:$0xff] %v1151_v17  ;;  %v1462_v26 = vadd.f32 %v1461_v18, %v1460_v43  ;;  %v1405_v56 = vpop.f32.mrf.mxu0 }
 0x169   :  { %vm1126_vm7 = vcmp.ge.f32.partialorder %v1113_v24, 0.0  ;;  %v1139_v58 = vmul.f32 0.1, %v1113_v24  ;;  %v1094_v8 = vmul.f32 %v2047_v19, %v1058_v25  ;;  %v973_v10 = vadd.f32 %v1404_v12, %v885_v5  ;;  %v1463_v27 = vpop.f32.mrf.mxu1 }
 0x16a   :  { %v1406_v47 = vpop.f32.mrf.mxu0 }
 0x16b   :  { %v1152_v28 = vsel %vm1126_vm7, %v1113_v24, %v1139_v58  ;;  %v1114_v29 = vadd.f32 %v2053_v37, %v1094_v8  ;;  %v1061_v30 = vadd.f32 %v1462_v26, %v973_v10  ;;  %v1407_v31 = vadd.f32 %v1406_v47, %v1405_v56  ;;  %v1464_v20 = vpop.f32.mrf.mxu1 }
 0x16c   :  { %1165 = vst [vmem:[%s2164_s4 + $0x38] sm:$0xff] %v1152_v28  ;;  %v1465_v32 = vadd.f32 %v1464_v20, %v1463_v27  ;;  %v1408_v60 = vpop.f32.mrf.mxu0 }
 0x16d   :  { %vm1127_vm8 = vcmp.ge.f32.partialorder %v1114_v29, 0.0  ;;  %v1140_v62 = vmul.f32 0.1, %v1114_v29  ;;  %v1095_v33 = vmul.f32 %v2047_v19, %v1061_v30  ;;  %v978_v61 = vadd.f32 %v1407_v31, %v890_v9  ;;  %v1466_v63 = vpop.f32.mrf.mxu1 }
 0x16e   :  { %v1409_v38 = vpop.f32.mrf.mxu0 }
 0x16f   :  { %v1153_v39 = vsel %vm1127_vm8, %v1114_v29, %v1140_v62  ;;  %v1115_v15 = vadd.f32 %v2053_v37, %v1095_v33  ;;  %v1066_v0 = vadd.f32 %v1465_v32, %v978_v61  ;;  %v1410_v2 = vadd.f32 %v1409_v38, %v1408_v60  ;;  %v1467_v16 = vpop.f32.mrf.mxu1 }
 0x170   :  { %1166 = vst [vmem:[%s2164_s4 + $0x40] sm:$0xff] %v1153_v39  ;;  %v1468_v1 = vadd.f32 %v1467_v16, %v1466_v63  ;;  %v1411_v3 = vpop.f32.mrf.mxu0 }
 0x171   :  { %vm1128_vm9 = vcmp.ge.f32.partialorder %v1115_v15, 0.0  ;;  %v1141_v21 = vmul.f32 0.1, %v1115_v15  ;;  %v1096_v22 = vmul.f32 %v2047_v19, %v1066_v0  ;;  %v981_v40 = vadd.f32 %v1410_v2, %v893_v48  ;;  %v1469_v42 = vpop.f32.mrf.mxu1 }
 0x172   :  { %v1412_v54 = vpop.f32.mrf.mxu0 }
 0x173   :  { %v1154_v23 = vsel %vm1128_vm9, %v1115_v15, %v1141_v21  ;;  %v1116_v53 = vadd.f32 %v2053_v37, %v1096_v22  ;;  %v1069_v55 = vadd.f32 %v1468_v1, %v981_v40  ;;  %v1413_v41 = vadd.f32 %v1412_v54, %v1411_v3  ;;  %v1470_v4 = vpop.f32.mrf.mxu1 }
 0x174   :  { %1167 = vst [vmem:[%s2164_s4 + $0x48] sm:$0xff] %v1154_v23  ;;  %v1471_v6 = vadd.f32 %v1470_v4, %v1469_v42  ;;  %v1414_v43 = vpop.f32.mrf.mxu0 }
 0x175   :  { %vm1129_vm10 = vcmp.ge.f32.partialorder %v1116_v53, 0.0  ;;  %v1142_v5 = vmul.f32 0.1, %v1116_v53  ;;  %v1097_v7 = vmul.f32 %v2047_v19, %v1069_v55  ;;  %v986_v13 = vadd.f32 %v1413_v41, %v898_v52  ;;  %v1472_v14 = vpop.f32.mrf.mxu1 }
 0x176   :  { %v1415_v17 = vpop.f32.mrf.mxu0 }
 0x177   :  { %v1155_v24 = vsel %vm1129_vm10, %v1116_v53, %v1142_v5  ;;  %v1117_v25 = vadd.f32 %v2053_v37, %v1097_v7  ;;  %v1074_v12 = vadd.f32 %v1471_v6, %v986_v13  ;;  %v1473_v18 = vpop.f32.mrf.mxu1 }
 0x178   :  { %1168 = vst [vmem:[%s2164_s4 + $0x50] sm:$0xff] %v1155_v24 }
 0x179   :  { %vm1130_vm11 = vcmp.ge.f32.partialorder %v1117_v25, 0.0  ;;  %v1143_v26 = vmul.f32 0.1, %v1117_v25  ;;  %v1098_v56 = vmul.f32 %v2047_v19, %v1074_v12 }
 0x17b   :  { %v1156_v58 = vsel %vm1130_vm11, %v1117_v25, %v1143_v26  ;;  %v1118_v8 = vadd.f32 %v2053_v37, %v1098_v56 }
 0x17c   :  { %1169 = vst [vmem:[%s2164_s4 + $0x58] sm:$0xff] %v1156_v58 }
 0x17d   :  { %vm1131_vm12 = vcmp.ge.f32.partialorder %v1118_v8, 0.0  ;;  %v1144_v10 = vmul.f32 0.1, %v1118_v8 }
 0x17f   :  { %v1157_v27 = vsel %vm1131_vm12, %v1118_v8, %v1144_v10 }
 0x180   :  { %1170 = vst [vmem:[%s2164_s4 + $0x60] sm:$0xff] %v1157_v27 }
 0x181   :  { %1175 = vsyncpa [#allocation3], 1 }
 0x182   :  { %1176 = vsyncpa [#allocation5], 1 }

// kernel: encoder1_forward.3
= control target key start
LH: loop header
LB: loop body
LE: loop exit
PB: predicated region body
PF: predicated region fallthrough
CT: control target
= control target key end

     0   :  { %12 = vsyncpa [#allocation4], 0  ;;  %s17509_s0 = inlined_call_operand.vmem [shape: f32[8,6400], index: 0, kind: input, shape index: {}]   ;;  %s17510_s1 = inlined_call_operand.hbm [shape: bf16[6400,1024], index: 1, kind: input, shape index: {}]   ;;  %s17511_s2 = inlined_call_operand.hbm [shape: f32[1,1024], index: 2, kind: input, shape index: {}]   ;;  %s17512_s3 = inlined_call_operand.hbm [shape: f32[1,1024], index: 3, kind: input, shape index: {}]   ;;  %s17513_s4 = inlined_call_operand.hbm [shape: bf16[1024,128], index: 4, kind: input, shape index: {}]   ;;  %s17514_s5 = inlined_call_operand.hbm [shape: f32[1,128], index: 5, kind: input, shape index: {}]   ;;  %s17515_s6 = inlined_call_operand.hbm [shape: f32[1,128], index: 6, kind: input, shape index: {}]   ;;  %s17516_s7 = inlined_call_operand.vmem [shape: f32[8,128], index: 7, kind: output, shape index: {}]  }
   0x1   :  { %14 = vsyncpa [#allocation4 + $0x1], 0 }
   0x2   :  { %15 = vsyncpa [#allocation6], 0 }
   0x3   :  { %16 = vsyncpa [#allocation9], 0 }
   0x4   :  { %17 = vsyncpa [#allocation12], 0  ;;  %s15325_s24 = smov 0   ;;  %s15327_s25 = smov 0  }
   0x5   :  { %s15329_s26 = smov 0   ;;  %s15331_s27 = smov 0  }
   0x6 LB: > { %s15273_s28 = smov [#allocation5]   ;;  %s15346_s30 = sadd.s32 4294967295, %s15271_s27   ;;  %s15271_s27 = sphi %s15331_s27, %s17538_s27   ;;  %s15267_s26 = sphi %s15329_s26, %s17537_s26   ;;  %s15263_s25 = sphi %s15327_s25, %s17536_s25   ;;  %s15259_s24 = sphi %s15325_s24, %s17535_s24  }
   0x7   : > { %s219_s29 = sshll.u32 %s15273_s28, 4  ;;  %p13128_p0 = scmp.ge.s32.totalorder %s15271_s27, 1  ;;  %s220_s29 = int_to_ptr.vmem [resolvable:$true] %s219_s29 }
   0x8   : > { %p17517_p1 = scmp.eq.s32.totalorder %s15346_s30, 0  ;;  %p206_p2 = scmp.lt.s32.totalorder %s15271_s27, 3 }
   0x9   : > { %s15274_s9 = smov [#allocation8]   ;;  %s15275_s12 = smov [#allocation7]  }
   0xa   : > { %p15352_p4 = pnand %p13128_p0, %p206_p2  ;;  %s240_s10 = sshll.u32 %s15274_s9, 4  ;;  %s15358_s10 = int_to_ptr.vmem [resolvable:$true] %s240_s10 }
   0xb   : > { %s230_s13 = sshll.u32 %s15275_s12, 4  ;;  %s15078_s15 = scalar_lea.vmem %s220_s29, 128  ;;  %s15366_s13 = int_to_ptr.vmem [resolvable:$true] %s230_s13 }
   0xc   : > { %s17520_s8 = scalar_select %p15352_p4, 1, 0 }
   0xd   : > { %p14929_p5 = pneg %p15352_p4  ;;  %p15079_p8 = scmp.ne.s32.totalorder %s220_s29, %s15078_s15 }
   0xe   : > { %p15086_p11 = scmp.lt.s32.totalorder %s220_s29, %s220_s29  ;;  %p15087_p12 = scmp.lt.s32.totalorder %s15078_s15, %s15078_s15 }
   0xf   : > { %p15362_p6 = pnand %p14929_p5, %p17517_p1 }
  0x10   : > { %p15088_p13 = por %p15087_p12, %p15086_p11 }
  0x11   : > { %p15370_p7 = pneg %p15362_p6 }
  0x13   : > { %p15081_p9 = pnand %p15079_p8, %p15370_p7 }
  0x15   : > { %p15082_p10 = pneg %p15081_p9 }
  0x17   : > { %p15089_p0 = pnand %p15088_p13, %p15082_p10 }
  0x19   : > { %15092 = shalt.err (!%p15089_p0)
}
  0x1a   : > { %14932 = dma.hbm_to_vmem [thread:$0]  (!%p15362_p6), %s17511_s2, 128, %s220_s29, [#allocation6]  }
  0x1b   : > { %s15104_s18 = scalar_lea.vmem %s15358_s10, 8192  ;;  %p15112_p9 = scmp.lt.s32.totalorder %s15358_s10, %s15358_s10 }
  0x1c   : > { %p15105_p2 = scmp.ne.s32.totalorder %s15358_s10, %s15104_s18  ;;  %p15113_p11 = scmp.lt.s32.totalorder %s15104_s18, %s15104_s18 }
  0x1e   : > { %p15107_p5 = pnand %p15105_p2, %p15370_p7  ;;  %p15114_p10 = por %p15113_p11, %p15112_p9 }
  0x20   : > { %p15108_p8 = pneg %p15107_p5 }
  0x22   : > { %p15115_p12 = pnand %p15114_p10, %p15108_p8 }
  0x24   : > { %15118 = shalt.err (!%p15115_p12)
}
  0x25   : > { %s15276_s19 = smov 64   ;;  %s15277_s20 = smov 4  }
  0x26   : > { %14938 = dma.hbm_to_vmem [thread:$0]  (!%p15362_p6), %s17513_s4, 8192, %s15358_s10, [#allocation9], %s15276_s19, %s15276_s19, %s15277_s20  }
  0x27   : > { %s15130_s23 = scalar_lea.vmem %s15366_s13, 128  ;;  %p15138_p5 = scmp.lt.s32.totalorder %s15366_s13, %s15366_s13 }
  0x28   : > { %p15131_p13 = scmp.ne.s32.totalorder %s15366_s13, %s15130_s23  ;;  %p15139_p8 = scmp.lt.s32.totalorder %s15130_s23, %s15130_s23 }
  0x2a   : > { %p15133_p0 = pnand %p15131_p13, %p15370_p7  ;;  %p15140_p9 = por %p15139_p8, %p15138_p5 }
  0x2c   : > { %p15134_p2 = pneg %p15133_p0 }
  0x2e   : > { %p15141_p11 = pnand %p15140_p9, %p15134_p2 }
  0x30   : > { %15144 = shalt.err (!%p15141_p11)
}
  0x31   : > { %14935 = dma.hbm_to_vmem [thread:$0]  (!%p15362_p6), %s17512_s3, 128, %s15366_s13, [#allocation6]  }
  0x32   : > { %s15278_s9 = smov [#allocation10]   ;;  %s15279_s12 = smov [#allocation11]  }
  0x33   : > { %s254_s10 = sshll.u32 %s15278_s9, 4  ;;  %s265_s15 = sshll.u32 %s15279_s12, 4  ;;  %s255_s10 = int_to_ptr.vmem [resolvable:$true] %s254_s10  ;;  %s266_s15 = int_to_ptr.vmem [resolvable:$true] %s265_s15 }
  0x34   : > { %s15156_s16 = scalar_lea.vmem %s255_s10, 16  ;;  %s15163_s17 = scalar_lea.vmem %s255_s10, 32 }
  0x35   : > { %p15157_p10 = scmp.ne.s32.totalorder %s255_s10, %s15156_s16  ;;  %p15164_p0 = scmp.lt.s32.totalorder %s255_s10, %s255_s10 }
  0x36   : > { %p15165_p2 = scmp.lt.s32.totalorder %s15163_s17, %s15156_s16 }
  0x37   : > { %p15159_p12 = pnand %p15157_p10, %p15370_p7 }
  0x38   : > { %p15166_p5 = por %p15165_p2, %p15164_p0 }
  0x39   : > { %p15160_p13 = pneg %p15159_p12 }
  0x3b   : > { %p15167_p8 = pnand %p15166_p5, %p15160_p13 }
  0x3d   : > { %15170 = shalt.err (!%p15167_p8)
}
  0x3e   : > { %14941 = dma.hbm_to_vmem [thread:$0]  (!%p15362_p6), %s17514_s5, 16, %s255_s10, [#allocation9]  }
  0x3f   : > { %s15182_s19 = scalar_lea.vmem %s266_s15, 16  ;;  %s15189_s20 = scalar_lea.vmem %s266_s15, 32 }
  0x40   : > { %p15183_p9 = scmp.ne.s32.totalorder %s266_s15, %s15182_s19  ;;  %p15190_p12 = scmp.lt.s32.totalorder %s266_s15, %s266_s15 }
  0x41   : > { %p15191_p3 = scmp.lt.s32.totalorder %s15189_s20, %s15182_s19 }
  0x42   : > { %p15185_p11 = pnand %p15183_p9, %p15370_p7 }
  0x43   : > { %p15192_p1 = por %p15191_p3, %p15190_p12 }
  0x44   : > { %p15186_p10 = pneg %p15185_p11 }
  0x46   : > { %p15193_p0 = pnand %p15192_p1, %p15186_p10 }
  0x48   : > { %15196 = shalt.err (!%p15193_p0)
}
  0x49   : > { %14944 = dma.hbm_to_vmem [thread:$0]  (!%p15362_p6), %s17515_s6, 16, %s266_s15, [#allocation12]  }
  0x4a   : > { %s15420_s14 = sadd.s32 1, %s15271_s27   ;;  %s56_s23 = sadd.s32 1, %s15267_s26 }
  0x4b   : > { %s53_s11 = ssub.s32 %s15271_s27, %s15420_s14  ;;  %p63_p3 = scmp.ne.s32.totalorder %s15267_s26, %s15263_s25 }
  0x4c   : > { %p54_p1 = scmp.eq.s32.totalorder %s53_s11, 0  ;;  %p64_p7 = scmp.eq.s32.totalorder %s15271_s27, 0 }
  0x4d   : > { %p69_p13 = scmp.ne.s32.totalorder %s15263_s25, %s15259_s24  ;;  %p17523_p5 = scmp.eq.s32.totalorder %s15346_s30, 0 }
  0x4e   : > { %s15431_s28 = scalar_select %p54_p1, %s15267_s26, %s56_s23  }
  0x4f   : > { %p65_p2 = por %p64_p7, %p63_p3  ;;  %p15435_p8 = por %p17523_p5, %p69_p13 }
  0x50   : > { %p14954_p9 = scmp.lt.s32.totalorder %s15271_s27, 2  ;;  %s285_s9 = sand.u32 1, %s15267_s26  }
  0x51   : > { %s17524_s29 = scalar_select %p15435_p8, 1, 0 }
  0x52   : > { %s14905_s10 = smul.u32 12800, %s285_s9  ;;  %p15442_p6 = pnand %p14954_p9, %p65_p2 }
  0x53   : > { %s14816_s12 = smul.u32 204800, %s15271_s27  ;;  %s15453_s19 = scalar_lea.sflag [#allocation4], %s285_s9 }
  0x54   : > { %s289_s18 = scalar_lea.vmem [#allocation3], %s14905_s10  ;;  %p15199_p10 = pneg %p15442_p6 }
  0x55   : > { %s15449_s24 = scalar_lea.hbm %s17510_s1, %s14816_s12  ;;  %s297_s13 = sshll.u32 %s289_s18, 4  ;;  %s15451_s13 = int_to_ptr.vmem [resolvable:$true] %s297_s13 }
  0x56   : > { %s15197_s27 = scalar_lea.hbm %s15449_s24, 204800  ;;  %s15202_s22 = scalar_lea.hbm %s17510_s1, 409600 }
  0x57   : > { %p15198_p11 = scmp.ne.s32.totalorder %s15449_s24, %s15197_s27  ;;  %p15203_p1 = scmp.lt.s32.totalorder %s15449_s24, %s17510_s1 }
  0x58   : > { %p15204_p3 = scmp.lt.s32.totalorder %s15202_s22, %s15197_s27 }
  0x59   : > { %p15200_p12 = pnand %p15199_p10, %p15198_p11 }
  0x5a   : > { %p15205_p7 = por %p15204_p3, %p15203_p1 }
  0x5b   : > { %p15201_p0 = pneg %p15200_p12 }
  0x5d   : > { %p15206_p13 = pnand %p15205_p7, %p15201_p0 }
  0x5f   : > { %15209 = shalt.err (!%p15206_p13)
}
  0x60   : > { %s15210_s9 = scalar_lea.vmem %s15451_s13, 204800  ;;  %s15280_s10 = smov [#allocation3]  }
  0x61   : > { %p15211_p2 = scmp.ne.s32.totalorder %s15451_s13, %s15210_s9  ;;  %s15215_s12 = sshll.u32 %s15280_s10, 4  ;;  %s15216_s12 = int_to_ptr.vmem [resolvable:$false] %s15215_s12 }
  0x62   : > { %s15217_s16 = scalar_lea.vmem %s15216_s12, 409600  ;;  %p15218_p11 = scmp.lt.s32.totalorder %s15451_s13, %s15216_s12 }
  0x63   : > { %p15213_p5 = pnand %p15211_p2, %p15199_p10  ;;  %p15219_p12 = scmp.lt.s32.totalorder %s15217_s16, %s15210_s9 }
  0x65   : > { %p15214_p9 = pneg %p15213_p5  ;;  %p15220_p8 = por %p15219_p12, %p15218_p11 }
  0x67   : > { %p15221_p4 = pnand %p15220_p8, %p15214_p9 }
  0x69   : > { %15224 = shalt.err (!%p15221_p4)
}
  0x6a   : > { %s15281_s17 = smov 512   ;;  %s15282_s18 = smov 32  }
  0x6b   : > { %14948 = dma.hbm_to_vmem [thread:$0]  (!%p15442_p6), %s15449_s24, 204800, %s15451_s13, %s15453_s19, %s15281_s17, %s15281_s17, %s15282_s18  }
  0x6c   : > { %p17526_p10 = scmp.ne.s32.totalorder %s17520_s8, 0 }
  0x6d   : > { %s311_s27 = sand.u32 (!%p17526_p10), 1, %s15263_s25   ;;  %p17527_p8 = scmp.ne.s32.totalorder (!%p17526_p10), %s17524_s29, 0 }
  0x6e   : > { %309 = sbr.rel (%p17526_p10) target bundleno = 2225 (0x8b1), region = 48  ;;  %s312_s21 = scalar_lea.sflag (!%p17526_p10), [#allocation4], %s311_s27 }
  0x6f   : > { %s14906_s20 = smul.u32 (!%p17526_p10), 12800, %s311_s27 }
  0x71   : > { %s15477_s22 = scalar_lea.vmem (!%p17526_p10), [#allocation3], %s14906_s20 }
  0x73   : > { %15242 = dma.done.wait (%p17527_p8), %s312_s21, 204800  }
  0x74   : > { %15244 = vsyncadd (%p17527_p8), %s312_s21, 4294762496  ;;  %p17528_p4 = scmp.eq.s32.totalorder %s15346_s30, 0 }
  0x76   : > { %15246 = dma.done.wait (%p17528_p4), [#allocation6], 256   ;;  %p17529_p6 = pmov %p17528_p4 }
  0x77   : > { %p17530_p0 = pmov %p17528_p4 }
  0x78   : > { %15248 = vsyncadd (%p17529_p6), [#allocation6], 4294967040 }
  0x79   : > { %15250 = dma.done.wait (%p17530_p0), [#allocation9], 8208   ;;  %p17531_p1 = pmov %p17530_p0 }
  0x7a   : > { %p17532_p3 = pmov %p17530_p0 }
  0x7b   : > { %15252 = vsyncadd (%p17531_p1), [#allocation9], 4294959088 }
  0x7c   : > { %15254 = dma.done.wait (%p17532_p3), [#allocation12], 16   ;;  %p17533_p7 = pmov %p17530_p0 }
  0x7d   : > { %s366_s8 = smul.u32 25, %s15346_s30  ;;  %p17534_p2 = scmp.ne.s32.totalorder %s15346_s30, 0 }
  0x7e   : > { %15256 = vsyncadd (%p17533_p7), [#allocation12], 4294967280 }
  0x7f   : > { %p367_p13 = scmp.lt.s32.totalorder %s366_s8, 49  ;;  %377 = sbr.rel (%p17534_p2) target bundleno = 137 (0x89), region = 76 }
  0x81   : > { %s17540_s8 = smov (!%p367_p13, %s366_s8), 49 }
  0x82   : > { %s13143_s29 = sshll.u32 %s17540_s8, 3 }
  0x83   : > { %s15499_s13 = scalar_lea.vmem %s17509_s0, %s13143_s29 }
  0x84   : > { %v15283_v0 = vmov 0.0  }
  0x85   : > { %378 = vst [vmem:[#allocation2 + $0x30] sm:$0xff] %v15283_v0  ;;  %379 = vst [vmem:[#allocation2] sm:$0xff] %v15283_v0 }
  0x86   : > { %380 = vst [vmem:[#allocation2 + $0x18] sm:$0xff] %v15283_v0  ;;  %381 = vst [vmem:[#allocation2 + $0x10] sm:$0xff] %v15283_v0 }
  0x87   : > { %382 = vst [vmem:[#allocation2 + $0x8] sm:$0xff] %v15283_v0  ;;  %383 = vst [vmem:[#allocation2 + $0x20] sm:$0xff] %v15283_v0 }
  0x88   : > { %384 = vst [vmem:[#allocation2 + $0x28] sm:$0xff] %v15283_v0  ;;  %385 = vst [vmem:[#allocation2 + $0x38] sm:$0xff] %v15283_v0 }
  0x89 PF: > { %v500_v1 = vld [vmem:[%s15477_s22 + $0x1c0] sm:$0xff]  ;;  %v395_v54 = vld [vmem:[%s15499_s13 + $0x8] sm:$0xff]  ;;  %v397_v55 = vld [vmem:[%s15499_s13 + $0x18] sm:$0xff]  ;;  %p14745_p5 = scmp.ne.s32.totalorder %s15346_s30, 1 }
  0x8a   : > { %v504_v2 = vld [vmem:[%s15477_s22 + $0x1e0] sm:$0xff]  ;;  %v15535_v59 = vpack.c.bf16 %v395_v54, %v395_v54  ;;  %v15537_v60 = vpack.c.bf16 %v397_v55, %v397_v55 }
  0x8b   : > { %v628_v3 = vld [vmem:[%s15477_s22 + $0x5c0] sm:$0xff]  ;;  %v13202_v4 = vcombine.high %v500_v1, %v504_v2  ;;  %v13201_v6 = vcombine.low %v500_v1, %v504_v2 }
  0x8c   : > { %v632_v5 = vld [vmem:[%s15477_s22 + $0x5e0] sm:$0xff]  ;;  %10076 = vmatprep.mubr.bf16.mxu0 %v15535_v59  ;;  %10117 = vmatprep.mubr.bf16.mxu1 %v15537_v60 }
  0x8d   : > { %v492_v7 = vld [vmem:[%s15477_s22 + $0x180] sm:$0xff]  ;;  %v13330_v9 = vcombine.high %v628_v3, %v632_v5  ;;  %v13329_v10 = vcombine.low %v628_v3, %v632_v5  ;;  %10044 = vmatprep.subr.bf16.mxu0 %v13202_v4 }
  0x8e   : > { %v496_v8 = vld [vmem:[%s15477_s22 + $0x1a0] sm:$0xff]  ;;  %10045 = vmatpush1.bf16.msra.mxu0 %v13201_v6 }
  0x8f   : > { %v13194_v11 = vcombine.high %v492_v7, %v496_v8  ;;  %v620_v12 = vld [vmem:[%s15477_s22 + $0x580] sm:$0xff]  ;;  %10085 = vmatprep.subr.bf16.mxu1 %v13330_v9  ;;  %v13193_v19 = vcombine.low %v492_v7, %v496_v8 }
  0x90   : > { %v624_v13 = vld [vmem:[%s15477_s22 + $0x5a0] sm:$0xff]  ;;  %10086 = vmatpush1.bf16.msra.mxu1 %v13329_v10 }
  0x91   : > { %v484_v14 = vld [vmem:[%s15477_s22 + $0x140] sm:$0xff]  ;;  %v13322_v15 = vcombine.high %v620_v12, %v624_v13  ;;  %10046 = vmatprep.subr.bf16.mxu0 %v13194_v11  ;;  %v13321_v20 = vcombine.low %v620_v12, %v624_v13 }
  0x92   : > { %v488_v16 = vld [vmem:[%s15477_s22 + $0x160] sm:$0xff]  ;;  %10047 = vmatpush1.bf16.msra.mxu0 %v13193_v19 }
  0x93   : > { %v612_v17 = vld [vmem:[%s15477_s22 + $0x540] sm:$0xff]  ;;  %v13186_v21 = vcombine.high %v484_v14, %v488_v16  ;;  %10087 = vmatprep.subr.bf16.mxu1 %v13322_v15  ;;  %v13185_v27 = vcombine.low %v484_v14, %v488_v16 }
  0x94   : > { %v616_v18 = vld [vmem:[%s15477_s22 + $0x560] sm:$0xff]  ;;  %10088 = vmatpush1.bf16.msra.mxu1 %v13321_v20 }
  0x95   : > { %v13314_v22 = vcombine.high %v612_v17, %v616_v18  ;;  %v476_v23 = vld [vmem:[%s15477_s22 + $0x100] sm:$0xff]  ;;  %10048 = vmatprep.subr.bf16.mxu0 %v13186_v21  ;;  %v13313_v28 = vcombine.low %v612_v17, %v616_v18 }
  0x96   : > { %v480_v24 = vld [vmem:[%s15477_s22 + $0x120] sm:$0xff]  ;;  %10049 = vmatpush1.bf16.msra.mxu0 %v13185_v27 }
  0x97   : > { %v604_v25 = vld [vmem:[%s15477_s22 + $0x500] sm:$0xff]  ;;  %v13178_v29 = vcombine.high %v476_v23, %v480_v24  ;;  %10089 = vmatprep.subr.bf16.mxu1 %v13314_v22  ;;  %v13177_v35 = vcombine.low %v476_v23, %v480_v24 }
  0x98   : > { %v608_v26 = vld [vmem:[%s15477_s22 + $0x520] sm:$0xff]  ;;  %10090 = vmatpush1.bf16.msra.mxu1 %v13313_v28 }
  0x99   : > { %v13306_v30 = vcombine.high %v604_v25, %v608_v26  ;;  %v468_v31 = vld [vmem:[%s15477_s22 + $0xc0] sm:$0xff]  ;;  %10050 = vmatprep.subr.bf16.mxu0 %v13178_v29  ;;  %v13305_v36 = vcombine.low %v604_v25, %v608_v26 }
  0x9a   : > { %v472_v32 = vld [vmem:[%s15477_s22 + $0xe0] sm:$0xff]  ;;  %10051 = vmatpush1.bf16.msra.mxu0 %v13177_v35 }
  0x9b   : > { %v596_v33 = vld [vmem:[%s15477_s22 + $0x4c0] sm:$0xff]  ;;  %v13170_v37 = vcombine.high %v468_v31, %v472_v32  ;;  %10091 = vmatprep.subr.bf16.mxu1 %v13306_v30  ;;  %v13169_v43 = vcombine.low %v468_v31, %v472_v32 }
  0x9c   : > { %v600_v34 = vld [vmem:[%s15477_s22 + $0x4e0] sm:$0xff]  ;;  %10092 = vmatpush1.bf16.msra.mxu1 %v13305_v36 }
  0x9d   : > { %v13298_v38 = vcombine.high %v596_v33, %v600_v34  ;;  %v460_v39 = vld [vmem:[%s15477_s22 + $0x80] sm:$0xff]  ;;  %10052 = vmatprep.subr.bf16.mxu0 %v13170_v37  ;;  %v13297_v44 = vcombine.low %v596_v33, %v600_v34 }
  0x9e   : > { %v464_v40 = vld [vmem:[%s15477_s22 + $0xa0] sm:$0xff]  ;;  %10053 = vmatpush1.bf16.msra.mxu0 %v13169_v43 }
  0x9f   : > { %v588_v41 = vld [vmem:[%s15477_s22 + $0x480] sm:$0xff]  ;;  %v13162_v45 = vcombine.high %v460_v39, %v464_v40  ;;  %10093 = vmatprep.subr.bf16.mxu1 %v13298_v38  ;;  %v13161_v51 = vcombine.low %v460_v39, %v464_v40 }
  0xa0   : > { %v592_v42 = vld [vmem:[%s15477_s22 + $0x4a0] sm:$0xff]  ;;  %10094 = vmatpush1.bf16.msra.mxu1 %v13297_v44 }
  0xa1   : > { %v13290_v46 = vcombine.high %v588_v41, %v592_v42  ;;  %v452_v47 = vld [vmem:[%s15477_s22 + $0x40] sm:$0xff]  ;;  %10054 = vmatprep.subr.bf16.mxu0 %v13162_v45  ;;  %v13289_v52 = vcombine.low %v588_v41, %v592_v42 }
  0xa2   : > { %v456_v48 = vld [vmem:[%s15477_s22 + $0x60] sm:$0xff]  ;;  %10055 = vmatpush1.bf16.msra.mxu0 %v13161_v51 }
  0xa3   : > { %v580_v49 = vld [vmem:[%s15477_s22 + $0x440] sm:$0xff]  ;;  %v13154_v53 = vcombine.high %v452_v47, %v456_v48  ;;  %10095 = vmatprep.subr.bf16.mxu1 %v13290_v46  ;;  %v13153_v63 = vcombine.low %v452_v47, %v456_v48 }
  0xa4   : > { %v584_v50 = vld [vmem:[%s15477_s22 + $0x460] sm:$0xff]  ;;  %10096 = vmatpush1.bf16.msra.mxu1 %v13289_v52 }
  0xa5   : > { %v13282_v56 = vcombine.high %v580_v49, %v584_v50  ;;  %v444_v57 = vld [vmem:[%s15477_s22] sm:$0xff]  ;;  %10056 = vmatprep.subr.bf16.mxu0 %v13154_v53  ;;  %v13281_v0 = vcombine.low %v580_v49, %v584_v50 }
  0xa6   : > { %v448_v58 = vld [vmem:[%s15477_s22 + $0x20] sm:$0xff]  ;;  %10057 = vmatpush1.bf16.msra.mxu0 %v13153_v63 }
  0xa7   : > { %v572_v61 = vld [vmem:[%s15477_s22 + $0x400] sm:$0xff]  ;;  %v13146_v1 = vcombine.high %v444_v57, %v448_v58  ;;  %10097 = vmatprep.subr.bf16.mxu1 %v13282_v56  ;;  %v13145_v7 = vcombine.low %v444_v57, %v448_v58 }
  0xa8   : > { %v576_v62 = vld [vmem:[%s15477_s22 + $0x420] sm:$0xff]  ;;  %10098 = vmatpush1.bf16.msra.mxu1 %v13281_v0 }
  0xa9   : > { %v13274_v2 = vcombine.high %v572_v61, %v576_v62  ;;  %v564_v3 = vld [vmem:[%s15477_s22 + $0x3c0] sm:$0xff]  ;;  %10058 = vmatprep.subr.bf16.mxu0 %v13146_v1  ;;  %v13273_v8 = vcombine.low %v572_v61, %v576_v62 }
  0xaa   : > { %v568_v4 = vld [vmem:[%s15477_s22 + $0x3e0] sm:$0xff]  ;;  %10059 = vmatpush1.bf16.msra.mxu0 %v13145_v7 }
  0xab   : > { %v692_v5 = vld [vmem:[%s15477_s22 + $0x7c0] sm:$0xff]  ;;  %v13266_v9 = vcombine.high %v564_v3, %v568_v4  ;;  %10099 = vmatprep.subr.bf16.mxu1 %v13274_v2  ;;  %v13265_v15 = vcombine.low %v564_v3, %v568_v4 }
  0xac   : > { %v696_v6 = vld [vmem:[%s15477_s22 + $0x7e0] sm:$0xff]  ;;  %10100 = vmatpush1.bf16.msra.mxu1 %v13273_v8 }
  0xad   : > { %v13394_v10 = vcombine.high %v692_v5, %v696_v6  ;;  %v556_v11 = vld [vmem:[%s15477_s22 + $0x380] sm:$0xff]  ;;  %10060 = vmatprep.subr.bf16.mxu0 %v13266_v9  ;;  %v13393_v16 = vcombine.low %v692_v5, %v696_v6 }
  0xae   : > { %v560_v12 = vld [vmem:[%s15477_s22 + $0x3a0] sm:$0xff]  ;;  %10061 = vmatpush2.bf16.msra.mxu0 %v13265_v15 }
  0xaf   : > { %v684_v13 = vld [vmem:[%s15477_s22 + $0x780] sm:$0xff]  ;;  %v13258_v17 = vcombine.high %v556_v11, %v560_v12  ;;  %10101 = vmatprep.subr.bf16.mxu1 %v13394_v10  ;;  %v13257_v23 = vcombine.low %v556_v11, %v560_v12  ;;  %v396_v12 = vld [vmem:[%s15499_s13 + $0x10] sm:$0xff] }
  0xb0   : > { %v688_v14 = vld [vmem:[%s15477_s22 + $0x7a0] sm:$0xff]  ;;  %10102 = vmatpush2.bf16.msra.mxu1 %v13393_v16 }
  0xb1   : > { %v13386_v18 = vcombine.high %v684_v13, %v688_v14  ;;  %v548_v19 = vld [vmem:[%s15477_s22 + $0x340] sm:$0xff]  ;;  %10062 = vmatprep.subr.bf16.mxu0 %v13258_v17  ;;  %v13385_v24 = vcombine.low %v684_v13, %v688_v14 }
  0xb2   : > { %v552_v20 = vld [vmem:[%s15477_s22 + $0x360] sm:$0xff]  ;;  %10063 = vmatpush2.bf16.msra.mxu0 %v13257_v23  ;;  %v401_v23 = vld [vmem:[%s15499_s13 + $0x38] sm:$0xff] }
  0xb3   : > { %v676_v21 = vld [vmem:[%s15477_s22 + $0x740] sm:$0xff]  ;;  %v13250_v25 = vcombine.high %v548_v19, %v552_v20  ;;  %10103 = vmatprep.subr.bf16.mxu1 %v13386_v18  ;;  %v13249_v31 = vcombine.low %v548_v19, %v552_v20  ;;  %v399_v20 = vld [vmem:[%s15499_s13 + $0x28] sm:$0xff] }
  0xb4   : > { %v680_v22 = vld [vmem:[%s15477_s22 + $0x760] sm:$0xff]  ;;  %10104 = vmatpush2.bf16.msra.mxu1 %v13385_v24 }
  0xb5   : > { %v13378_v26 = vcombine.high %v676_v21, %v680_v22  ;;  %v540_v27 = vld [vmem:[%s15477_s22 + $0x300] sm:$0xff]  ;;  %10064 = vmatprep.subr.bf16.mxu0 %v13250_v25  ;;  %v13377_v32 = vcombine.low %v676_v21, %v680_v22  ;;  %v15588_v21 = vpack.c.bf16 %v396_v12, %v396_v12 }
  0xb6   : > { %v544_v28 = vld [vmem:[%s15477_s22 + $0x320] sm:$0xff]  ;;  %10065 = vmatpush2.bf16.msra.mxu0 %v13249_v31 }
  0xb7   : > { %v668_v29 = vld [vmem:[%s15477_s22 + $0x700] sm:$0xff]  ;;  %v13242_v33 = vcombine.high %v540_v27, %v544_v28  ;;  %10105 = vmatprep.subr.bf16.mxu1 %v13378_v26  ;;  %v13241_v39 = vcombine.low %v540_v27, %v544_v28 }
  0xb8   : > { %v672_v30 = vld [vmem:[%s15477_s22 + $0x720] sm:$0xff]  ;;  %10106 = vmatpush2.bf16.msra.mxu1 %v13377_v32  ;;  %v15598_v32 = vpack.c.bf16 %v401_v23, %v401_v23 }
  0xb9   : > { %v13370_v34 = vcombine.high %v668_v29, %v672_v30  ;;  %v532_v35 = vld [vmem:[%s15477_s22 + $0x2c0] sm:$0xff]  ;;  %10066 = vmatprep.subr.bf16.mxu0 %v13242_v33  ;;  %v13369_v40 = vcombine.low %v668_v29, %v672_v30  ;;  %v15593_v29 = vpack.c.bf16 %v399_v20, %v399_v20 }
  0xba   : > { %v536_v36 = vld [vmem:[%s15477_s22 + $0x2e0] sm:$0xff]  ;;  %10067 = vmatpush2.bf16.msra.mxu0 %v13241_v39 }
  0xbb   : > { %v660_v37 = vld [vmem:[%s15477_s22 + $0x6c0] sm:$0xff]  ;;  %v13234_v41 = vcombine.high %v532_v35, %v536_v36  ;;  %10107 = vmatprep.subr.bf16.mxu1 %v13370_v34  ;;  %v13233_v47 = vcombine.low %v532_v35, %v536_v36 }
  0xbc   : > { %v664_v38 = vld [vmem:[%s15477_s22 + $0x6e0] sm:$0xff]  ;;  %10108 = vmatpush2.bf16.msra.mxu1 %v13369_v40 }
  0xbd   : > { %v13362_v42 = vcombine.high %v660_v37, %v664_v38  ;;  %v524_v43 = vld [vmem:[%s15477_s22 + $0x280] sm:$0xff]  ;;  %10068 = vmatprep.subr.bf16.mxu0 %v13234_v41  ;;  %v13361_v48 = vcombine.low %v660_v37, %v664_v38 }
  0xbe   : > { %v528_v44 = vld [vmem:[%s15477_s22 + $0x2a0] sm:$0xff]  ;;  %10069 = vmatpush2.bf16.msra.mxu0 %v13233_v47 }
  0xbf   : > { %v652_v45 = vld [vmem:[%s15477_s22 + $0x680] sm:$0xff]  ;;  %v13226_v49 = vcombine.high %v524_v43, %v528_v44  ;;  %10109 = vmatprep.subr.bf16.mxu1 %v13362_v42  ;;  %v13225_v55 = vcombine.low %v524_v43, %v528_v44 }
  0xc0   : > { %v656_v46 = vld [vmem:[%s15477_s22 + $0x6a0] sm:$0xff]  ;;  %10110 = vmatpush2.bf16.msra.mxu1 %v13361_v48 }
  0xc1   : > { %v13354_v50 = vcombine.high %v652_v45, %v656_v46  ;;  %v516_v51 = vld [vmem:[%s15477_s22 + $0x240] sm:$0xff]  ;;  %10070 = vmatprep.subr.bf16.mxu0 %v13226_v49  ;;  %v13353_v56 = vcombine.low %v652_v45, %v656_v46 }
  0xc2   : > { %v520_v52 = vld [vmem:[%s15477_s22 + $0x260] sm:$0xff]  ;;  %10071 = vmatpush2.bf16.msra.mxu0 %v13225_v55 }
  0xc3   : > { %v644_v53 = vld [vmem:[%s15477_s22 + $0x640] sm:$0xff]  ;;  %v13218_v57 = vcombine.high %v516_v51, %v520_v52  ;;  %10111 = vmatprep.subr.bf16.mxu1 %v13354_v50  ;;  %v13217_v1 = vcombine.low %v516_v51, %v520_v52 }
  0xc4   : > { %v648_v54 = vld [vmem:[%s15477_s22 + $0x660] sm:$0xff]  ;;  %10112 = vmatpush2.bf16.msra.mxu1 %v13353_v56 }
  0xc5   : > { %v13346_v58 = vcombine.high %v644_v53, %v648_v54  ;;  %v508_v61 = vld [vmem:[%s15477_s22 + $0x200] sm:$0xff]  ;;  %10072 = vmatprep.subr.bf16.mxu0 %v13218_v57  ;;  %v13345_v2 = vcombine.low %v644_v53, %v648_v54 }
  0xc6   : > { %v512_v62 = vld [vmem:[%s15477_s22 + $0x220] sm:$0xff]  ;;  %10073 = vmatpush2.bf16.msra.mxu0 %v13217_v1 }
  0xc7   : > { %v636_v63 = vld [vmem:[%s15477_s22 + $0x600] sm:$0xff]  ;;  %v13210_v3 = vcombine.high %v508_v61, %v512_v62  ;;  %10113 = vmatprep.subr.bf16.mxu1 %v13346_v58  ;;  %v13209_v9 = vcombine.low %v508_v61, %v512_v62 }
  0xc8   : > { %v640_v0 = vld [vmem:[%s15477_s22 + $0x620] sm:$0xff]  ;;  %10114 = vmatpush2.bf16.msra.mxu1 %v13345_v2 }
  0xc9   : > { %v13338_v4 = vcombine.high %v636_v63, %v640_v0  ;;  %v756_v5 = vld [vmem:[%s15477_s22 + $0x9c0] sm:$0xff]  ;;  %10074 = vmatprep.subr.bf16.mxu0 %v13210_v3  ;;  %v13337_v11 = vcombine.low %v636_v63, %v640_v0 }
  0xca   : > { %v760_v6 = vld [vmem:[%s15477_s22 + $0x9e0] sm:$0xff]  ;;  %10075 = vmatpush2.bf16.msra.mxu0 %v13209_v9 }
  0xcb   : > { %v884_v7 = vld [vmem:[%s15477_s22 + $0xdc0] sm:$0xff]  ;;  %v13458_v13 = vcombine.high %v756_v5, %v760_v6  ;;  %10115 = vmatprep.subr.bf16.mxu1 %v13338_v4  ;;  %v13457_v22 = vcombine.low %v756_v5, %v760_v6 }
  0xcc   : > { %v888_v8 = vld [vmem:[%s15477_s22 + $0xde0] sm:$0xff]  ;;  %10116 = vmatpush2.bf16.msra.mxu1 %v13337_v11 }
  0xcd   : > { %v394_v10 = vld [vmem:[%s15499_s13] sm:$0xff]  ;;  %v13586_v14 = vcombine.high %v884_v7, %v888_v8  ;;  %10126 = vmatprep.subr.bf16.mxu0 %v13458_v13  ;;  %v13585_v24 = vcombine.low %v884_v7, %v888_v8 }
  0xce   : > { %v748_v15 = vld [vmem:[%s15477_s22 + $0x980] sm:$0xff]  ;;  %v15583_v17 = vpack.c.bf16 %v394_v10, %v394_v10 }
  0xcf   : > { %v752_v16 = vld [vmem:[%s15477_s22 + $0x9a0] sm:$0xff]  ;;  %10167 = vmatprep.subr.bf16.mxu1 %v13586_v14  ;;  %10118 = vmatmul.mubr.bf16.vlgmr.msra.gmra.mxu1 %v15588_v21 }
  0xd0   : > { %v876_v18 = vld [vmem:[%s15477_s22 + $0xd80] sm:$0xff]  ;;  %v13450_v25 = vcombine.high %v748_v15, %v752_v16  ;;  %10077 = vmatmul.mubr.bf16.vlgmr.msra.gmra.mxu0 %v15583_v17  ;;  %v13449_v33 = vcombine.low %v748_v15, %v752_v16  ;;  %10168 = vmatpush1.bf16.msra.mxu1 %v13585_v24 }
  0xd1   : > { %v880_v19 = vld [vmem:[%s15477_s22 + $0xda0] sm:$0xff]  ;;  %10127 = vmatpush1.bf16.msra.mxu0 %v13457_v22  ;;  %10158 = vmatprep.mubr.bf16.mxu0 %v15593_v29 }
  0xd2   : > { %v13578_v26 = vcombine.high %v876_v18, %v880_v19  ;;  %v740_v27 = vld [vmem:[%s15477_s22 + $0x940] sm:$0xff]  ;;  %10128 = vmatprep.subr.bf16.mxu0 %v13450_v25  ;;  %v13577_v34 = vcombine.low %v876_v18, %v880_v19  ;;  %10199 = vmatprep.mubr.bf16.mxu1 %v15598_v32 }
  0xd3   : > { %v744_v28 = vld [vmem:[%s15477_s22 + $0x960] sm:$0xff] }
  0xd4   : > { %v868_v30 = vld [vmem:[%s15477_s22 + $0xd40] sm:$0xff]  ;;  %v13442_v35 = vcombine.high %v740_v27, %v744_v28  ;;  %10169 = vmatprep.subr.bf16.mxu1 %v13578_v26  ;;  %v13441_v41 = vcombine.low %v740_v27, %v744_v28 }
  0xd5   : > { %v872_v31 = vld [vmem:[%s15477_s22 + $0xd60] sm:$0xff]  ;;  %10129 = vmatpush1.bf16.msra.mxu0 %v13449_v33  ;;  %10170 = vmatpush1.bf16.msra.mxu1 %v13577_v34 }
  0xd6   : > { %v13570_v36 = vcombine.high %v868_v30, %v872_v31  ;;  %v732_v37 = vld [vmem:[%s15477_s22 + $0x900] sm:$0xff]  ;;  %10130 = vmatprep.subr.bf16.mxu0 %v13442_v35  ;;  %v13569_v42 = vcombine.low %v868_v30, %v872_v31 }
  0xd7   : > { %v736_v38 = vld [vmem:[%s15477_s22 + $0x920] sm:$0xff] }
  0xd8   : > { %v860_v39 = vld [vmem:[%s15477_s22 + $0xd00] sm:$0xff]  ;;  %v13434_v43 = vcombine.high %v732_v37, %v736_v38  ;;  %10171 = vmatprep.subr.bf16.mxu1 %v13570_v36  ;;  %v13433_v49 = vcombine.low %v732_v37, %v736_v38 }
  0xd9   : > { %v864_v40 = vld [vmem:[%s15477_s22 + $0xd20] sm:$0xff]  ;;  %10131 = vmatpush1.bf16.msra.mxu0 %v13441_v41  ;;  %10172 = vmatpush1.bf16.msra.mxu1 %v13569_v42 }
  0xda   : > { %v13562_v44 = vcombine.high %v860_v39, %v864_v40  ;;  %v724_v45 = vld [vmem:[%s15477_s22 + $0x8c0] sm:$0xff]  ;;  %10132 = vmatprep.subr.bf16.mxu0 %v13434_v43  ;;  %v13561_v50 = vcombine.low %v860_v39, %v864_v40 }
  0xdb   : > { %v728_v46 = vld [vmem:[%s15477_s22 + $0x8e0] sm:$0xff] }
  0xdc   : > { %v852_v47 = vld [vmem:[%s15477_s22 + $0xcc0] sm:$0xff]  ;;  %v13426_v51 = vcombine.high %v724_v45, %v728_v46  ;;  %10173 = vmatprep.subr.bf16.mxu1 %v13562_v44  ;;  %v13425_v57 = vcombine.low %v724_v45, %v728_v46 }
  0xdd   : > { %v856_v48 = vld [vmem:[%s15477_s22 + $0xce0] sm:$0xff]  ;;  %10133 = vmatpush1.bf16.msra.mxu0 %v13433_v49  ;;  %10174 = vmatpush1.bf16.msra.mxu1 %v13561_v50 }
  0xde   : > { %v13554_v52 = vcombine.high %v852_v47, %v856_v48  ;;  %v716_v53 = vld [vmem:[%s15477_s22 + $0x880] sm:$0xff]  ;;  %10134 = vmatprep.subr.bf16.mxu0 %v13426_v51  ;;  %v13553_v58 = vcombine.low %v852_v47, %v856_v48 }
  0xdf   : > { %v720_v54 = vld [vmem:[%s15477_s22 + $0x8a0] sm:$0xff] }
  0xe0   : > { %v844_v55 = vld [vmem:[%s15477_s22 + $0xc80] sm:$0xff]  ;;  %v13418_v61 = vcombine.high %v716_v53, %v720_v54  ;;  %10175 = vmatprep.subr.bf16.mxu1 %v13554_v52  ;;  %v13417_v3 = vcombine.low %v716_v53, %v720_v54 }
  0xe1   : > { %v848_v56 = vld [vmem:[%s15477_s22 + $0xca0] sm:$0xff]  ;;  %10135 = vmatpush1.bf16.msra.mxu0 %v13425_v57  ;;  %10176 = vmatpush1.bf16.msra.mxu1 %v13553_v58 }
  0xe2   : > { %v13546_v62 = vcombine.high %v844_v55, %v848_v56  ;;  %v708_v63 = vld [vmem:[%s15477_s22 + $0x840] sm:$0xff]  ;;  %10136 = vmatprep.subr.bf16.mxu0 %v13418_v61  ;;  %v13545_v4 = vcombine.low %v844_v55, %v848_v56 }
  0xe3   : > { %v712_v0 = vld [vmem:[%s15477_s22 + $0x860] sm:$0xff] }
  0xe4   : > { %v836_v1 = vld [vmem:[%s15477_s22 + $0xc40] sm:$0xff]  ;;  %v13410_v5 = vcombine.high %v708_v63, %v712_v0  ;;  %10177 = vmatprep.subr.bf16.mxu1 %v13546_v62  ;;  %v13409_v11 = vcombine.low %v708_v63, %v712_v0 }
  0xe5   : > { %v840_v2 = vld [vmem:[%s15477_s22 + $0xc60] sm:$0xff]  ;;  %10137 = vmatpush1.bf16.msra.mxu0 %v13417_v3  ;;  %10178 = vmatpush1.bf16.msra.mxu1 %v13545_v4 }
  0xe6   : > { %v13538_v6 = vcombine.high %v836_v1, %v840_v2  ;;  %v700_v7 = vld [vmem:[%s15477_s22 + $0x800] sm:$0xff]  ;;  %10138 = vmatprep.subr.bf16.mxu0 %v13410_v5  ;;  %v13537_v12 = vcombine.low %v836_v1, %v840_v2 }
  0xe7   : > { %v704_v8 = vld [vmem:[%s15477_s22 + $0x820] sm:$0xff] }
  0xe8   : > { %v828_v9 = vld [vmem:[%s15477_s22 + $0xc00] sm:$0xff]  ;;  %v13402_v13 = vcombine.high %v700_v7, %v704_v8  ;;  %10179 = vmatprep.subr.bf16.mxu1 %v13538_v6  ;;  %v13401_v20 = vcombine.low %v700_v7, %v704_v8 }
  0xe9   : > { %v832_v10 = vld [vmem:[%s15477_s22 + $0xc20] sm:$0xff]  ;;  %10139 = vmatpush1.bf16.msra.mxu0 %v13409_v11  ;;  %10180 = vmatpush1.bf16.msra.mxu1 %v13537_v12 }
  0xea   : > { %v13530_v14 = vcombine.high %v828_v9, %v832_v10  ;;  %v820_v15 = vld [vmem:[%s15477_s22 + $0xbc0] sm:$0xff]  ;;  %10140 = vmatprep.subr.bf16.mxu0 %v13402_v13  ;;  %v13529_v22 = vcombine.low %v828_v9, %v832_v10 }
  0xeb   : > { %v824_v16 = vld [vmem:[%s15477_s22 + $0xbe0] sm:$0xff] }
  0xec   : > { %v948_v18 = vld [vmem:[%s15477_s22 + $0xfc0] sm:$0xff]  ;;  %v13522_v23 = vcombine.high %v820_v15, %v824_v16  ;;  %10181 = vmatprep.subr.bf16.mxu1 %v13530_v14  ;;  %v13521_v30 = vcombine.low %v820_v15, %v824_v16 }
  0xed   : > { %v952_v19 = vld [vmem:[%s15477_s22 + $0xfe0] sm:$0xff]  ;;  %10141 = vmatpush1.bf16.msra.mxu0 %v13401_v20  ;;  %10182 = vmatpush1.bf16.msra.mxu1 %v13529_v22 }
  0xee   : > { %v13650_v24 = vcombine.high %v948_v18, %v952_v19  ;;  %v812_v25 = vld [vmem:[%s15477_s22 + $0xb80] sm:$0xff]  ;;  %10142 = vmatprep.subr.bf16.mxu0 %v13522_v23  ;;  %v13649_v31 = vcombine.low %v948_v18, %v952_v19 }
  0xef   : > { %v816_v26 = vld [vmem:[%s15477_s22 + $0xba0] sm:$0xff] }
  0xf0   : > { %v940_v27 = vld [vmem:[%s15477_s22 + $0xf80] sm:$0xff]  ;;  %v13514_v33 = vcombine.high %v812_v25, %v816_v26  ;;  %10183 = vmatprep.subr.bf16.mxu1 %v13650_v24  ;;  %v13513_v39 = vcombine.low %v812_v25, %v816_v26 }
  0xf1   : > { %v944_v28 = vld [vmem:[%s15477_s22 + $0xfa0] sm:$0xff]  ;;  %10143 = vmatpush2.bf16.msra.mxu0 %v13521_v30  ;;  %10184 = vmatpush2.bf16.msra.mxu1 %v13649_v31  ;;  %v400_v31 = vld [vmem:[%s15499_s13 + $0x30] sm:$0xff] }
  0xf2   : > { %v13642_v34 = vcombine.high %v940_v27, %v944_v28  ;;  %v804_v35 = vld [vmem:[%s15477_s22 + $0xb40] sm:$0xff]  ;;  %10144 = vmatprep.subr.bf16.mxu0 %v13514_v33  ;;  %v13641_v40 = vcombine.low %v940_v27, %v944_v28 }
  0xf3   : > { %v808_v36 = vld [vmem:[%s15477_s22 + $0xb60] sm:$0xff] }
  0xf4   : > { %v932_v37 = vld [vmem:[%s15477_s22 + $0xf40] sm:$0xff]  ;;  %v13506_v41 = vcombine.high %v804_v35, %v808_v36  ;;  %10185 = vmatprep.subr.bf16.mxu1 %v13642_v34  ;;  %v13505_v47 = vcombine.low %v804_v35, %v808_v36 }
  0xf5   : > { %v936_v38 = vld [vmem:[%s15477_s22 + $0xf60] sm:$0xff]  ;;  %10145 = vmatpush2.bf16.msra.mxu0 %v13513_v39  ;;  %10186 = vmatpush2.bf16.msra.mxu1 %v13641_v40  ;;  %v403_v40 = vld [vmem:[%s15499_s13 + $0x48] sm:$0xff] }
  0xf6   : > { %v13634_v42 = vcombine.high %v932_v37, %v936_v38  ;;  %v796_v43 = vld [vmem:[%s15477_s22 + $0xb00] sm:$0xff]  ;;  %10146 = vmatprep.subr.bf16.mxu0 %v13506_v41  ;;  %v13633_v48 = vcombine.low %v932_v37, %v936_v38  ;;  %v15668_v41 = vpack.c.bf16 %v400_v31, %v400_v31 }
  0xf7   : > { %v800_v44 = vld [vmem:[%s15477_s22 + $0xb20] sm:$0xff] }
  0xf8   : > { %v924_v45 = vld [vmem:[%s15477_s22 + $0xf00] sm:$0xff]  ;;  %v13498_v49 = vcombine.high %v796_v43, %v800_v44  ;;  %10187 = vmatprep.subr.bf16.mxu1 %v13634_v42  ;;  %v13497_v55 = vcombine.low %v796_v43, %v800_v44  ;;  %v405_v43 = vld [vmem:[%s15499_s13 + $0x58] sm:$0xff] }
  0xf9   : > { %v928_v46 = vld [vmem:[%s15477_s22 + $0xf20] sm:$0xff]  ;;  %10147 = vmatpush2.bf16.msra.mxu0 %v13505_v47  ;;  %10188 = vmatpush2.bf16.msra.mxu1 %v13633_v48 }
  0xfa   : > { %v13626_v50 = vcombine.high %v924_v45, %v928_v46  ;;  %v788_v51 = vld [vmem:[%s15477_s22 + $0xac0] sm:$0xff]  ;;  %10148 = vmatprep.subr.bf16.mxu0 %v13498_v49  ;;  %v13625_v56 = vcombine.low %v924_v45, %v928_v46  ;;  %v15673_v49 = vpack.c.bf16 %v403_v40, %v403_v40 }
  0xfb   : > { %v792_v52 = vld [vmem:[%s15477_s22 + $0xae0] sm:$0xff] }
  0xfc   : > { %v916_v53 = vld [vmem:[%s15477_s22 + $0xec0] sm:$0xff]  ;;  %v13490_v57 = vcombine.high %v788_v51, %v792_v52  ;;  %10189 = vmatprep.subr.bf16.mxu1 %v13626_v50  ;;  %v13489_v1 = vcombine.low %v788_v51, %v792_v52  ;;  %v15678_v52 = vpack.c.bf16 %v405_v43, %v405_v43 }
  0xfd   : > { %v920_v54 = vld [vmem:[%s15477_s22 + $0xee0] sm:$0xff]  ;;  %10149 = vmatpush2.bf16.msra.mxu0 %v13497_v55  ;;  %10190 = vmatpush2.bf16.msra.mxu1 %v13625_v56 }
  0xfe   : > { %v13618_v58 = vcombine.high %v916_v53, %v920_v54  ;;  %v780_v61 = vld [vmem:[%s15477_s22 + $0xa80] sm:$0xff]  ;;  %10150 = vmatprep.subr.bf16.mxu0 %v13490_v57  ;;  %v13617_v2 = vcombine.low %v916_v53, %v920_v54 }
  0xff   : > { %v784_v62 = vld [vmem:[%s15477_s22 + $0xaa0] sm:$0xff] }
 0x100   : > { %v908_v63 = vld [vmem:[%s15477_s22 + $0xe80] sm:$0xff]  ;;  %v13482_v3 = vcombine.high %v780_v61, %v784_v62  ;;  %10191 = vmatprep.subr.bf16.mxu1 %v13618_v58  ;;  %v13481_v9 = vcombine.low %v780_v61, %v784_v62 }
 0x101   : > { %v912_v0 = vld [vmem:[%s15477_s22 + $0xea0] sm:$0xff]  ;;  %10151 = vmatpush2.bf16.msra.mxu0 %v13489_v1  ;;  %10192 = vmatpush2.bf16.msra.mxu1 %v13617_v2 }
 0x102   : > { %v13610_v4 = vcombine.high %v908_v63, %v912_v0  ;;  %v772_v5 = vld [vmem:[%s15477_s22 + $0xa40] sm:$0xff]  ;;  %10152 = vmatprep.subr.bf16.mxu0 %v13482_v3  ;;  %v13609_v10 = vcombine.low %v908_v63, %v912_v0 }
 0x103   : > { %v776_v6 = vld [vmem:[%s15477_s22 + $0xa60] sm:$0xff] }
 0x104   : > { %v900_v7 = vld [vmem:[%s15477_s22 + $0xe40] sm:$0xff]  ;;  %v13474_v11 = vcombine.high %v772_v5, %v776_v6  ;;  %10193 = vmatprep.subr.bf16.mxu1 %v13610_v4  ;;  %v13473_v18 = vcombine.low %v772_v5, %v776_v6 }
 0x105   : > { %v904_v8 = vld [vmem:[%s15477_s22 + $0xe60] sm:$0xff]  ;;  %10153 = vmatpush2.bf16.msra.mxu0 %v13481_v9  ;;  %10194 = vmatpush2.bf16.msra.mxu1 %v13609_v10 }
 0x106   : > { %v13602_v12 = vcombine.high %v900_v7, %v904_v8  ;;  %v764_v13 = vld [vmem:[%s15477_s22 + $0xa00] sm:$0xff]  ;;  %10154 = vmatprep.subr.bf16.mxu0 %v13474_v11  ;;  %v13601_v19 = vcombine.low %v900_v7, %v904_v8 }
 0x107   : > { %v768_v14 = vld [vmem:[%s15477_s22 + $0xa20] sm:$0xff] }
 0x108   : > { %v892_v15 = vld [vmem:[%s15477_s22 + $0xe00] sm:$0xff]  ;;  %v13466_v20 = vcombine.high %v764_v13, %v768_v14  ;;  %10195 = vmatprep.subr.bf16.mxu1 %v13602_v12  ;;  %v13465_v27 = vcombine.low %v764_v13, %v768_v14 }
 0x109   : > { %v896_v16 = vld [vmem:[%s15477_s22 + $0xe20] sm:$0xff]  ;;  %10155 = vmatpush2.bf16.msra.mxu0 %v13473_v18  ;;  %10196 = vmatpush2.bf16.msra.mxu1 %v13601_v19 }
 0x10a   : > { %v13594_v22 = vcombine.high %v892_v15, %v896_v16  ;;  %v1012_v23 = vld [vmem:[%s15477_s22 + $0x11c0] sm:$0xff]  ;;  %10156 = vmatprep.subr.bf16.mxu0 %v13466_v20  ;;  %v13593_v30 = vcombine.low %v892_v15, %v896_v16 }
 0x10b   : > { %v1016_v24 = vld [vmem:[%s15477_s22 + $0x11e0] sm:$0xff] }
 0x10c   : > { %v1140_v25 = vld [vmem:[%s15477_s22 + $0x15c0] sm:$0xff]  ;;  %v13714_v33 = vcombine.high %v1012_v23, %v1016_v24  ;;  %10197 = vmatprep.subr.bf16.mxu1 %v13594_v22  ;;  %v13713_v42 = vcombine.low %v1012_v23, %v1016_v24 }
 0x10d   : > { %v1144_v26 = vld [vmem:[%s15477_s22 + $0x15e0] sm:$0xff]  ;;  %10157 = vmatpush2.bf16.msra.mxu0 %v13465_v27  ;;  %10198 = vmatpush2.bf16.msra.mxu1 %v13593_v30 }
 0x10e   : > { %v398_v28 = vld [vmem:[%s15499_s13 + $0x20] sm:$0xff]  ;;  %v13842_v34 = vcombine.high %v1140_v25, %v1144_v26  ;;  %10208 = vmatprep.subr.bf16.mxu0 %v13714_v33  ;;  %v13841_v44 = vcombine.low %v1140_v25, %v1144_v26 }
 0x10f   : > { %v1004_v35 = vld [vmem:[%s15477_s22 + $0x1180] sm:$0xff]  ;;  %v15663_v37 = vpack.c.bf16 %v398_v28, %v398_v28 }
 0x110   : > { %v1008_v36 = vld [vmem:[%s15477_s22 + $0x11a0] sm:$0xff]  ;;  %10249 = vmatprep.subr.bf16.mxu1 %v13842_v34  ;;  %10200 = vmatmul.mubr.bf16.vlgmr.msra.gmra.mxu1 %v15668_v41 }
 0x111   : > { %v1132_v38 = vld [vmem:[%s15477_s22 + $0x1580] sm:$0xff]  ;;  %v13706_v45 = vcombine.high %v1004_v35, %v1008_v36  ;;  %10159 = vmatmul.mubr.bf16.vlgmr.msra.gmra.mxu0 %v15663_v37  ;;  %v13705_v53 = vcombine.low %v1004_v35, %v1008_v36  ;;  %10250 = vmatpush1.bf16.msra.mxu1 %v13841_v44 }
 0x112   : > { %v1136_v39 = vld [vmem:[%s15477_s22 + $0x15a0] sm:$0xff]  ;;  %10209 = vmatpush1.bf16.msra.mxu0 %v13713_v42  ;;  %10240 = vmatprep.mubr.bf16.mxu0 %v15673_v49 }
 0x113   : > { %v13834_v46 = vcombine.high %v1132_v38, %v1136_v39  ;;  %v996_v47 = vld [vmem:[%s15477_s22 + $0x1140] sm:$0xff]  ;;  %10210 = vmatprep.subr.bf16.mxu0 %v13706_v45  ;;  %v13833_v54 = vcombine.low %v1132_v38, %v1136_v39  ;;  %10281 = vmatprep.mubr.bf16.mxu1 %v15678_v52 }
 0x114   : > { %v1000_v48 = vld [vmem:[%s15477_s22 + $0x1160] sm:$0xff] }
 0x115   : > { %v1124_v50 = vld [vmem:[%s15477_s22 + $0x1540] sm:$0xff]  ;;  %v13698_v55 = vcombine.high %v996_v47, %v1000_v48  ;;  %10251 = vmatprep.subr.bf16.mxu1 %v13834_v46  ;;  %v13697_v63 = vcombine.low %v996_v47, %v1000_v48 }
 0x116   : > { %v1128_v51 = vld [vmem:[%s15477_s22 + $0x1560] sm:$0xff]  ;;  %10211 = vmatpush1.bf16.msra.mxu0 %v13705_v53  ;;  %10252 = vmatpush1.bf16.msra.mxu1 %v13833_v54 }
 0x117   : > { %v13826_v56 = vcombine.high %v1124_v50, %v1128_v51  ;;  %v988_v57 = vld [vmem:[%s15477_s22 + $0x1100] sm:$0xff]  ;;  %10212 = vmatprep.subr.bf16.mxu0 %v13698_v55  ;;  %v13825_v0 = vcombine.low %v1124_v50, %v1128_v51 }
 0x118   : > { %v992_v58 = vld [vmem:[%s15477_s22 + $0x1120] sm:$0xff] }
 0x119   : > { %v1116_v61 = vld [vmem:[%s15477_s22 + $0x1500] sm:$0xff]  ;;  %v13690_v1 = vcombine.high %v988_v57, %v992_v58  ;;  %10253 = vmatprep.subr.bf16.mxu1 %v13826_v56  ;;  %v13689_v7 = vcombine.low %v988_v57, %v992_v58 }
 0x11a   : > { %v1120_v62 = vld [vmem:[%s15477_s22 + $0x1520] sm:$0xff]  ;;  %10213 = vmatpush1.bf16.msra.mxu0 %v13697_v63  ;;  %10254 = vmatpush1.bf16.msra.mxu1 %v13825_v0 }
 0x11b   : > { %v13818_v2 = vcombine.high %v1116_v61, %v1120_v62  ;;  %v980_v3 = vld [vmem:[%s15477_s22 + $0x10c0] sm:$0xff]  ;;  %10214 = vmatprep.subr.bf16.mxu0 %v13690_v1  ;;  %v13817_v8 = vcombine.low %v1116_v61, %v1120_v62 }
 0x11c   : > { %v984_v4 = vld [vmem:[%s15477_s22 + $0x10e0] sm:$0xff] }
 0x11d   : > { %v1108_v5 = vld [vmem:[%s15477_s22 + $0x14c0] sm:$0xff]  ;;  %v13682_v9 = vcombine.high %v980_v3, %v984_v4  ;;  %10255 = vmatprep.subr.bf16.mxu1 %v13818_v2  ;;  %v13681_v15 = vcombine.low %v980_v3, %v984_v4 }
 0x11e   : > { %v1112_v6 = vld [vmem:[%s15477_s22 + $0x14e0] sm:$0xff]  ;;  %10215 = vmatpush1.bf16.msra.mxu0 %v13689_v7  ;;  %10256 = vmatpush1.bf16.msra.mxu1 %v13817_v8 }
 0x11f   : > { %v13810_v10 = vcombine.high %v1108_v5, %v1112_v6  ;;  %v972_v11 = vld [vmem:[%s15477_s22 + $0x1080] sm:$0xff]  ;;  %10216 = vmatprep.subr.bf16.mxu0 %v13682_v9  ;;  %v13809_v16 = vcombine.low %v1108_v5, %v1112_v6 }
 0x120   : > { %v976_v12 = vld [vmem:[%s15477_s22 + $0x10a0] sm:$0xff] }
 0x121   : > { %v1100_v13 = vld [vmem:[%s15477_s22 + $0x1480] sm:$0xff]  ;;  %v13674_v18 = vcombine.high %v972_v11, %v976_v12  ;;  %10257 = vmatprep.subr.bf16.mxu1 %v13810_v10  ;;  %v13673_v25 = vcombine.low %v972_v11, %v976_v12 }
 0x122   : > { %v1104_v14 = vld [vmem:[%s15477_s22 + $0x14a0] sm:$0xff]  ;;  %10217 = vmatpush1.bf16.msra.mxu0 %v13681_v15  ;;  %10258 = vmatpush1.bf16.msra.mxu1 %v13809_v16 }
 0x123   : > { %v13802_v19 = vcombine.high %v1100_v13, %v1104_v14  ;;  %v964_v20 = vld [vmem:[%s15477_s22 + $0x1040] sm:$0xff]  ;;  %10218 = vmatprep.subr.bf16.mxu0 %v13674_v18  ;;  %v13801_v26 = vcombine.low %v1100_v13, %v1104_v14 }
 0x124   : > { %v968_v22 = vld [vmem:[%s15477_s22 + $0x1060] sm:$0xff] }
 0x125   : > { %v1092_v23 = vld [vmem:[%s15477_s22 + $0x1440] sm:$0xff]  ;;  %v13666_v27 = vcombine.high %v964_v20, %v968_v22  ;;  %10259 = vmatprep.subr.bf16.mxu1 %v13802_v19  ;;  %v13665_v35 = vcombine.low %v964_v20, %v968_v22 }
 0x126   : > { %v1096_v24 = vld [vmem:[%s15477_s22 + $0x1460] sm:$0xff]  ;;  %10219 = vmatpush1.bf16.msra.mxu0 %v13673_v25  ;;  %10260 = vmatpush1.bf16.msra.mxu1 %v13801_v26 }
 0x127   : > { %v13794_v28 = vcombine.high %v1092_v23, %v1096_v24  ;;  %v956_v30 = vld [vmem:[%s15477_s22 + $0x1000] sm:$0xff]  ;;  %10220 = vmatprep.subr.bf16.mxu0 %v13666_v27  ;;  %v13793_v36 = vcombine.low %v1092_v23, %v1096_v24 }
 0x128   : > { %v960_v31 = vld [vmem:[%s15477_s22 + $0x1020] sm:$0xff] }
 0x129   : > { %v1084_v33 = vld [vmem:[%s15477_s22 + $0x1400] sm:$0xff]  ;;  %v13658_v38 = vcombine.high %v956_v30, %v960_v31  ;;  %10261 = vmatprep.subr.bf16.mxu1 %v13794_v28  ;;  %v13657_v45 = vcombine.low %v956_v30, %v960_v31 }
 0x12a   : > { %v1088_v34 = vld [vmem:[%s15477_s22 + $0x1420] sm:$0xff]  ;;  %10221 = vmatpush1.bf16.msra.mxu0 %v13665_v35  ;;  %10262 = vmatpush1.bf16.msra.mxu1 %v13793_v36 }
 0x12b   : > { %v13786_v39 = vcombine.high %v1084_v33, %v1088_v34  ;;  %v1076_v40 = vld [vmem:[%s15477_s22 + $0x13c0] sm:$0xff]  ;;  %10222 = vmatprep.subr.bf16.mxu0 %v13658_v38  ;;  %v13785_v46 = vcombine.low %v1084_v33, %v1088_v34 }
 0x12c   : > { %v1080_v42 = vld [vmem:[%s15477_s22 + $0x13e0] sm:$0xff] }
 0x12d   : > { %v1204_v43 = vld [vmem:[%s15477_s22 + $0x17c0] sm:$0xff]  ;;  %v13778_v47 = vcombine.high %v1076_v40, %v1080_v42  ;;  %10263 = vmatprep.subr.bf16.mxu1 %v13786_v39  ;;  %v13777_v55 = vcombine.low %v1076_v40, %v1080_v42 }
 0x12e   : > { %v1208_v44 = vld [vmem:[%s15477_s22 + $0x17e0] sm:$0xff]  ;;  %10223 = vmatpush1.bf16.msra.mxu0 %v13657_v45  ;;  %10264 = vmatpush1.bf16.msra.mxu1 %v13785_v46 }
 0x12f   : > { %v13906_v48 = vcombine.high %v1204_v43, %v1208_v44  ;;  %v1068_v50 = vld [vmem:[%s15477_s22 + $0x1380] sm:$0xff]  ;;  %10224 = vmatprep.subr.bf16.mxu0 %v13778_v47  ;;  %v13905_v56 = vcombine.low %v1204_v43, %v1208_v44 }
 0x130   : > { %v1072_v51 = vld [vmem:[%s15477_s22 + $0x13a0] sm:$0xff] }
 0x131   : > { %v1196_v53 = vld [vmem:[%s15477_s22 + $0x1780] sm:$0xff]  ;;  %v13770_v57 = vcombine.high %v1068_v50, %v1072_v51  ;;  %10265 = vmatprep.subr.bf16.mxu1 %v13906_v48  ;;  %v13769_v1 = vcombine.low %v1068_v50, %v1072_v51 }
 0x132   : > { %v1200_v54 = vld [vmem:[%s15477_s22 + $0x17a0] sm:$0xff]  ;;  %10225 = vmatpush2.bf16.msra.mxu0 %v13777_v55  ;;  %10266 = vmatpush2.bf16.msra.mxu1 %v13905_v56 }
 0x133   : > { %v13898_v58 = vcombine.high %v1196_v53, %v1200_v54  ;;  %v1060_v61 = vld [vmem:[%s15477_s22 + $0x1340] sm:$0xff]  ;;  %10226 = vmatprep.subr.bf16.mxu0 %v13770_v57  ;;  %v13897_v2 = vcombine.low %v1196_v53, %v1200_v54 }
 0x134   : > { %v1064_v62 = vld [vmem:[%s15477_s22 + $0x1360] sm:$0xff] }
 0x135   : > { %v1188_v63 = vld [vmem:[%s15477_s22 + $0x1740] sm:$0xff]  ;;  %v13762_v3 = vcombine.high %v1060_v61, %v1064_v62  ;;  %10267 = vmatprep.subr.bf16.mxu1 %v13898_v58  ;;  %v13761_v9 = vcombine.low %v1060_v61, %v1064_v62  ;;  %v404_v62 = vld [vmem:[%s15499_s13 + $0x50] sm:$0xff] }
 0x136   : > { %v1192_v0 = vld [vmem:[%s15477_s22 + $0x1760] sm:$0xff]  ;;  %10227 = vmatpush2.bf16.msra.mxu0 %v13769_v1  ;;  %10268 = vmatpush2.bf16.msra.mxu1 %v13897_v2 }
 0x137   : > { %v13890_v4 = vcombine.high %v1188_v63, %v1192_v0  ;;  %v1052_v5 = vld [vmem:[%s15477_s22 + $0x1300] sm:$0xff]  ;;  %10228 = vmatprep.subr.bf16.mxu0 %v13762_v3  ;;  %v13889_v10 = vcombine.low %v1188_v63, %v1192_v0 }
 0x138   : > { %v1056_v6 = vld [vmem:[%s15477_s22 + $0x1320] sm:$0xff] }
 0x139   : > { %v1180_v7 = vld [vmem:[%s15477_s22 + $0x1700] sm:$0xff]  ;;  %v13754_v11 = vcombine.high %v1052_v5, %v1056_v6  ;;  %10269 = vmatprep.subr.bf16.mxu1 %v13890_v4  ;;  %v13753_v18 = vcombine.low %v1052_v5, %v1056_v6  ;;  %v407_v6 = vld [vmem:[%s15499_s13 + $0x68] sm:$0xff] }
 0x13a   : > { %v1184_v8 = vld [vmem:[%s15477_s22 + $0x1720] sm:$0xff]  ;;  %10229 = vmatpush2.bf16.msra.mxu0 %v13761_v9  ;;  %10270 = vmatpush2.bf16.msra.mxu1 %v13889_v10  ;;  %v409_v9 = vld [vmem:[%s15499_s13 + $0x78] sm:$0xff] }
 0x13b   : > { %v13882_v12 = vcombine.high %v1180_v7, %v1184_v8  ;;  %v1044_v13 = vld [vmem:[%s15477_s22 + $0x12c0] sm:$0xff]  ;;  %10230 = vmatprep.subr.bf16.mxu0 %v13754_v11  ;;  %v13881_v19 = vcombine.low %v1180_v7, %v1184_v8  ;;  %v15748_v7 = vpack.c.bf16 %v404_v62, %v404_v62 }
 0x13c   : > { %v1048_v14 = vld [vmem:[%s15477_s22 + $0x12e0] sm:$0xff] }
 0x13d   : > { %v1172_v15 = vld [vmem:[%s15477_s22 + $0x16c0] sm:$0xff]  ;;  %v13746_v20 = vcombine.high %v1044_v13, %v1048_v14  ;;  %10271 = vmatprep.subr.bf16.mxu1 %v13882_v12  ;;  %v13745_v27 = vcombine.low %v1044_v13, %v1048_v14 }
 0x13e   : > { %v1176_v16 = vld [vmem:[%s15477_s22 + $0x16e0] sm:$0xff]  ;;  %10231 = vmatpush2.bf16.msra.mxu0 %v13753_v18  ;;  %10272 = vmatpush2.bf16.msra.mxu1 %v13881_v19  ;;  %v15758_v19 = vpack.c.bf16 %v409_v9, %v409_v9 }
 0x13f   : > { %v13874_v22 = vcombine.high %v1172_v15, %v1176_v16  ;;  %v1036_v23 = vld [vmem:[%s15477_s22 + $0x1280] sm:$0xff]  ;;  %10232 = vmatprep.subr.bf16.mxu0 %v13746_v20  ;;  %v13873_v28 = vcombine.low %v1172_v15, %v1176_v16  ;;  %v15753_v15 = vpack.c.bf16 %v407_v6, %v407_v6 }
 0x140   : > { %v1040_v24 = vld [vmem:[%s15477_s22 + $0x12a0] sm:$0xff] }
 0x141   : > { %v1164_v25 = vld [vmem:[%s15477_s22 + $0x1680] sm:$0xff]  ;;  %v13738_v30 = vcombine.high %v1036_v23, %v1040_v24  ;;  %10273 = vmatprep.subr.bf16.mxu1 %v13874_v22  ;;  %v13737_v38 = vcombine.low %v1036_v23, %v1040_v24 }
 0x142   : > { %v1168_v26 = vld [vmem:[%s15477_s22 + $0x16a0] sm:$0xff]  ;;  %10233 = vmatpush2.bf16.msra.mxu0 %v13745_v27  ;;  %10274 = vmatpush2.bf16.msra.mxu1 %v13873_v28 }
 0x143   : > { %v13866_v31 = vcombine.high %v1164_v25, %v1168_v26  ;;  %v1028_v33 = vld [vmem:[%s15477_s22 + $0x1240] sm:$0xff]  ;;  %10234 = vmatprep.subr.bf16.mxu0 %v13738_v30  ;;  %v13865_v39 = vcombine.low %v1164_v25, %v1168_v26 }
 0x144   : > { %v1032_v34 = vld [vmem:[%s15477_s22 + $0x1260] sm:$0xff] }
 0x145   : > { %v1156_v35 = vld [vmem:[%s15477_s22 + $0x1640] sm:$0xff]  ;;  %v13730_v40 = vcombine.high %v1028_v33, %v1032_v34  ;;  %10275 = vmatprep.subr.bf16.mxu1 %v13866_v31  ;;  %v13729_v47 = vcombine.low %v1028_v33, %v1032_v34 }
 0x146   : > { %v1160_v36 = vld [vmem:[%s15477_s22 + $0x1660] sm:$0xff]  ;;  %10235 = vmatpush2.bf16.msra.mxu0 %v13737_v38  ;;  %10276 = vmatpush2.bf16.msra.mxu1 %v13865_v39 }
 0x147   : > { %v13858_v42 = vcombine.high %v1156_v35, %v1160_v36  ;;  %v1020_v43 = vld [vmem:[%s15477_s22 + $0x1200] sm:$0xff]  ;;  %10236 = vmatprep.subr.bf16.mxu0 %v13730_v40  ;;  %v13857_v48 = vcombine.low %v1156_v35, %v1160_v36 }
 0x148   : > { %v1024_v44 = vld [vmem:[%s15477_s22 + $0x1220] sm:$0xff] }
 0x149   : > { %v1148_v45 = vld [vmem:[%s15477_s22 + $0x1600] sm:$0xff]  ;;  %v13722_v50 = vcombine.high %v1020_v43, %v1024_v44  ;;  %10277 = vmatprep.subr.bf16.mxu1 %v13858_v42  ;;  %v13721_v57 = vcombine.low %v1020_v43, %v1024_v44 }
 0x14a   : > { %v1152_v46 = vld [vmem:[%s15477_s22 + $0x1620] sm:$0xff]  ;;  %10237 = vmatpush2.bf16.msra.mxu0 %v13729_v47  ;;  %10278 = vmatpush2.bf16.msra.mxu1 %v13857_v48 }
 0x14b   : > { %v13850_v51 = vcombine.high %v1148_v45, %v1152_v46  ;;  %v1268_v53 = vld [vmem:[%s15477_s22 + $0x19c0] sm:$0xff]  ;;  %10238 = vmatprep.subr.bf16.mxu0 %v13722_v50  ;;  %v13849_v61 = vcombine.low %v1148_v45, %v1152_v46 }
 0x14c   : > { %v1272_v54 = vld [vmem:[%s15477_s22 + $0x19e0] sm:$0xff] }
 0x14d   : > { %v1396_v55 = vld [vmem:[%s15477_s22 + $0x1dc0] sm:$0xff]  ;;  %v13970_v63 = vcombine.high %v1268_v53, %v1272_v54  ;;  %10279 = vmatprep.subr.bf16.mxu1 %v13850_v51  ;;  %v13969_v8 = vcombine.low %v1268_v53, %v1272_v54 }
 0x14e   : > { %v1400_v56 = vld [vmem:[%s15477_s22 + $0x1de0] sm:$0xff]  ;;  %10239 = vmatpush2.bf16.msra.mxu0 %v13721_v57  ;;  %10280 = vmatpush2.bf16.msra.mxu1 %v13849_v61 }
 0x14f   : > { %v402_v58 = vld [vmem:[%s15499_s13 + $0x40] sm:$0xff]  ;;  %v14098_v0 = vcombine.high %v1396_v55, %v1400_v56  ;;  %10290 = vmatprep.subr.bf16.mxu0 %v13970_v63  ;;  %v14097_v10 = vcombine.low %v1396_v55, %v1400_v56 }
 0x150   : > { %v1260_v1 = vld [vmem:[%s15477_s22 + $0x1980] sm:$0xff]  ;;  %v15743_v3 = vpack.c.bf16 %v402_v58, %v402_v58 }
 0x151   : > { %v1264_v2 = vld [vmem:[%s15477_s22 + $0x19a0] sm:$0xff]  ;;  %10331 = vmatprep.subr.bf16.mxu1 %v14098_v0  ;;  %10282 = vmatmul.mubr.bf16.vlgmr.msra.gmra.mxu1 %v15748_v7 }
 0x152   : > { %v1388_v4 = vld [vmem:[%s15477_s22 + $0x1d80] sm:$0xff]  ;;  %v13962_v11 = vcombine.high %v1260_v1, %v1264_v2  ;;  %10241 = vmatmul.mubr.bf16.vlgmr.msra.gmra.mxu0 %v15743_v3  ;;  %v13961_v20 = vcombine.low %v1260_v1, %v1264_v2  ;;  %10332 = vmatpush1.bf16.msra.mxu1 %v14097_v10 }
 0x153   : > { %v1392_v5 = vld [vmem:[%s15477_s22 + $0x1da0] sm:$0xff]  ;;  %10291 = vmatpush1.bf16.msra.mxu0 %v13969_v8  ;;  %10322 = vmatprep.mubr.bf16.mxu0 %v15753_v15 }
 0x154   : > { %v14090_v12 = vcombine.high %v1388_v4, %v1392_v5  ;;  %v1252_v13 = vld [vmem:[%s15477_s22 + $0x1940] sm:$0xff]  ;;  %10292 = vmatprep.subr.bf16.mxu0 %v13962_v11  ;;  %v14089_v22 = vcombine.low %v1388_v4, %v1392_v5  ;;  %10363 = vmatprep.mubr.bf16.mxu1 %v15758_v19 }
 0x155   : > { %v1256_v14 = vld [vmem:[%s15477_s22 + $0x1960] sm:$0xff] }
 0x156   : > { %v1380_v16 = vld [vmem:[%s15477_s22 + $0x1d40] sm:$0xff]  ;;  %v13954_v23 = vcombine.high %v1252_v13, %v1256_v14  ;;  %10333 = vmatprep.subr.bf16.mxu1 %v14090_v12  ;;  %v13953_v30 = vcombine.low %v1252_v13, %v1256_v14 }
 0x157   : > { %v1384_v18 = vld [vmem:[%s15477_s22 + $0x1d60] sm:$0xff]  ;;  %10293 = vmatpush1.bf16.msra.mxu0 %v13961_v20  ;;  %10334 = vmatpush1.bf16.msra.mxu1 %v14089_v22 }
 0x158   : > { %v14082_v24 = vcombine.high %v1380_v16, %v1384_v18  ;;  %v1244_v25 = vld [vmem:[%s15477_s22 + $0x1900] sm:$0xff]  ;;  %10294 = vmatprep.subr.bf16.mxu0 %v13954_v23  ;;  %v14081_v31 = vcombine.low %v1380_v16, %v1384_v18 }
 0x159   : > { %v1248_v26 = vld [vmem:[%s15477_s22 + $0x1920] sm:$0xff] }
 0x15a   : > { %v1372_v27 = vld [vmem:[%s15477_s22 + $0x1d00] sm:$0xff]  ;;  %v13946_v33 = vcombine.high %v1244_v25, %v1248_v26  ;;  %10335 = vmatprep.subr.bf16.mxu1 %v14082_v24  ;;  %v13945_v40 = vcombine.low %v1244_v25, %v1248_v26 }
 0x15b   : > { %v1376_v28 = vld [vmem:[%s15477_s22 + $0x1d20] sm:$0xff]  ;;  %10295 = vmatpush1.bf16.msra.mxu0 %v13953_v30  ;;  %10336 = vmatpush1.bf16.msra.mxu1 %v14081_v31 }
 0x15c   : > { %v14074_v34 = vcombine.high %v1372_v27, %v1376_v28  ;;  %v1236_v35 = vld [vmem:[%s15477_s22 + $0x18c0] sm:$0xff]  ;;  %10296 = vmatprep.subr.bf16.mxu0 %v13946_v33  ;;  %v14073_v42 = vcombine.low %v1372_v27, %v1376_v28 }
 0x15d   : > { %v1240_v36 = vld [vmem:[%s15477_s22 + $0x18e0] sm:$0xff] }
 0x15e   : > { %v1364_v38 = vld [vmem:[%s15477_s22 + $0x1cc0] sm:$0xff]  ;;  %v13938_v43 = vcombine.high %v1236_v35, %v1240_v36  ;;  %10337 = vmatprep.subr.bf16.mxu1 %v14074_v34  ;;  %v13937_v50 = vcombine.low %v1236_v35, %v1240_v36 }
 0x15f   : > { %v1368_v39 = vld [vmem:[%s15477_s22 + $0x1ce0] sm:$0xff]  ;;  %10297 = vmatpush1.bf16.msra.mxu0 %v13945_v40  ;;  %10338 = vmatpush1.bf16.msra.mxu1 %v14073_v42 }
 0x160   : > { %v14066_v44 = vcombine.high %v1364_v38, %v1368_v39  ;;  %v1228_v45 = vld [vmem:[%s15477_s22 + $0x1880] sm:$0xff]  ;;  %10298 = vmatprep.subr.bf16.mxu0 %v13938_v43  ;;  %v14065_v51 = vcombine.low %v1364_v38, %v1368_v39 }
 0x161   : > { %v1232_v46 = vld [vmem:[%s15477_s22 + $0x18a0] sm:$0xff] }
 0x162   : > { %v1356_v47 = vld [vmem:[%s15477_s22 + $0x1c80] sm:$0xff]  ;;  %v13930_v53 = vcombine.high %v1228_v45, %v1232_v46  ;;  %10339 = vmatprep.subr.bf16.mxu1 %v14066_v44  ;;  %v13929_v61 = vcombine.low %v1228_v45, %v1232_v46 }
 0x163   : > { %v1360_v48 = vld [vmem:[%s15477_s22 + $0x1ca0] sm:$0xff]  ;;  %10299 = vmatpush1.bf16.msra.mxu0 %v13937_v50  ;;  %10340 = vmatpush1.bf16.msra.mxu1 %v14065_v51 }
 0x164   : > { %v14058_v54 = vcombine.high %v1356_v47, %v1360_v48  ;;  %v1220_v55 = vld [vmem:[%s15477_s22 + $0x1840] sm:$0xff]  ;;  %10300 = vmatprep.subr.bf16.mxu0 %v13930_v53  ;;  %v14057_v62 = vcombine.low %v1356_v47, %v1360_v48 }
 0x165   : > { %v1224_v56 = vld [vmem:[%s15477_s22 + $0x1860] sm:$0xff] }
 0x166   : > { %v1348_v57 = vld [vmem:[%s15477_s22 + $0x1c40] sm:$0xff]  ;;  %v13922_v63 = vcombine.high %v1220_v55, %v1224_v56  ;;  %10341 = vmatprep.subr.bf16.mxu1 %v14058_v54  ;;  %v13921_v6 = vcombine.low %v1220_v55, %v1224_v56 }
 0x167   : > { %v1352_v58 = vld [vmem:[%s15477_s22 + $0x1c60] sm:$0xff]  ;;  %10301 = vmatpush1.bf16.msra.mxu0 %v13929_v61  ;;  %10342 = vmatpush1.bf16.msra.mxu1 %v14057_v62 }
 0x168   : > { %v14050_v0 = vcombine.high %v1348_v57, %v1352_v58  ;;  %v1212_v1 = vld [vmem:[%s15477_s22 + $0x1800] sm:$0xff]  ;;  %10302 = vmatprep.subr.bf16.mxu0 %v13922_v63  ;;  %v14049_v8 = vcombine.low %v1348_v57, %v1352_v58 }
 0x169   : > { %v1216_v2 = vld [vmem:[%s15477_s22 + $0x1820] sm:$0xff] }
 0x16a   : > { %v1340_v4 = vld [vmem:[%s15477_s22 + $0x1c00] sm:$0xff]  ;;  %v13914_v9 = vcombine.high %v1212_v1, %v1216_v2  ;;  %10343 = vmatprep.subr.bf16.mxu1 %v14050_v0  ;;  %v13913_v16 = vcombine.low %v1212_v1, %v1216_v2 }
 0x16b   : > { %v1344_v5 = vld [vmem:[%s15477_s22 + $0x1c20] sm:$0xff]  ;;  %10303 = vmatpush1.bf16.msra.mxu0 %v13921_v6  ;;  %10344 = vmatpush1.bf16.msra.mxu1 %v14049_v8 }
 0x16c   : > { %v14042_v10 = vcombine.high %v1340_v4, %v1344_v5  ;;  %v1332_v11 = vld [vmem:[%s15477_s22 + $0x1bc0] sm:$0xff]  ;;  %10304 = vmatprep.subr.bf16.mxu0 %v13914_v9  ;;  %v14041_v18 = vcombine.low %v1340_v4, %v1344_v5 }
 0x16d   : > { %v1336_v12 = vld [vmem:[%s15477_s22 + $0x1be0] sm:$0xff] }
 0x16e   : > { %v1460_v13 = vld [vmem:[%s15477_s22 + $0x1fc0] sm:$0xff]  ;;  %v14034_v20 = vcombine.high %v1332_v11, %v1336_v12  ;;  %10345 = vmatprep.subr.bf16.mxu1 %v14042_v10  ;;  %v14033_v27 = vcombine.low %v1332_v11, %v1336_v12 }
 0x16f   : > { %v1464_v14 = vld [vmem:[%s15477_s22 + $0x1fe0] sm:$0xff]  ;;  %10305 = vmatpush1.bf16.msra.mxu0 %v13913_v16  ;;  %10346 = vmatpush1.bf16.msra.mxu1 %v14041_v18 }
 0x170   : > { %v14162_v22 = vcombine.high %v1460_v13, %v1464_v14  ;;  %v1324_v23 = vld [vmem:[%s15477_s22 + $0x1b80] sm:$0xff]  ;;  %10306 = vmatprep.subr.bf16.mxu0 %v14034_v20  ;;  %v14161_v28 = vcombine.low %v1460_v13, %v1464_v14 }
 0x171   : > { %v1328_v24 = vld [vmem:[%s15477_s22 + $0x1ba0] sm:$0xff] }
 0x172   : > { %v1452_v25 = vld [vmem:[%s15477_s22 + $0x1f80] sm:$0xff]  ;;  %v14026_v30 = vcombine.high %v1324_v23, %v1328_v24  ;;  %10347 = vmatprep.subr.bf16.mxu1 %v14162_v22  ;;  %v14025_v38 = vcombine.low %v1324_v23, %v1328_v24 }
 0x173   : > { %v1456_v26 = vld [vmem:[%s15477_s22 + $0x1fa0] sm:$0xff]  ;;  %10307 = vmatpush2.bf16.msra.mxu0 %v14033_v27  ;;  %10348 = vmatpush2.bf16.msra.mxu1 %v14161_v28 }
 0x174   : > { %v14154_v31 = vcombine.high %v1452_v25, %v1456_v26  ;;  %v1316_v33 = vld [vmem:[%s15477_s22 + $0x1b40] sm:$0xff]  ;;  %10308 = vmatprep.subr.bf16.mxu0 %v14026_v30  ;;  %v14153_v39 = vcombine.low %v1452_v25, %v1456_v26 }
 0x175   : > { %v1320_v34 = vld [vmem:[%s15477_s22 + $0x1b60] sm:$0xff] }
 0x176   : > { %v1444_v35 = vld [vmem:[%s15477_s22 + $0x1f40] sm:$0xff]  ;;  %v14018_v40 = vcombine.high %v1316_v33, %v1320_v34  ;;  %10349 = vmatprep.subr.bf16.mxu1 %v14154_v31  ;;  %v14017_v47 = vcombine.low %v1316_v33, %v1320_v34 }
 0x177   : > { %v1448_v36 = vld [vmem:[%s15477_s22 + $0x1f60] sm:$0xff]  ;;  %10309 = vmatpush2.bf16.msra.mxu0 %v14025_v38  ;;  %10350 = vmatpush2.bf16.msra.mxu1 %v14153_v39  ;;  %v408_v39 = vld [vmem:[%s15499_s13 + $0x70] sm:$0xff] }
 0x178   : > { %v14146_v42 = vcombine.high %v1444_v35, %v1448_v36  ;;  %v1308_v43 = vld [vmem:[%s15477_s22 + $0x1b00] sm:$0xff]  ;;  %10310 = vmatprep.subr.bf16.mxu0 %v14018_v40  ;;  %v14145_v48 = vcombine.low %v1444_v35, %v1448_v36 }
 0x179   : > { %v1312_v44 = vld [vmem:[%s15477_s22 + $0x1b20] sm:$0xff] }
 0x17a   : > { %v1436_v45 = vld [vmem:[%s15477_s22 + $0x1f00] sm:$0xff]  ;;  %v14010_v50 = vcombine.high %v1308_v43, %v1312_v44  ;;  %10351 = vmatprep.subr.bf16.mxu1 %v14146_v42  ;;  %v14009_v57 = vcombine.low %v1308_v43, %v1312_v44 }
 0x17b   : > { %v1440_v46 = vld [vmem:[%s15477_s22 + $0x1f20] sm:$0xff]  ;;  %10311 = vmatpush2.bf16.msra.mxu0 %v14017_v47  ;;  %10352 = vmatpush2.bf16.msra.mxu1 %v14145_v48  ;;  %v411_v48 = vld [vmem:[%s15499_s13 + $0x88] sm:$0xff] }
 0x17c   : > { %v14138_v51 = vcombine.high %v1436_v45, %v1440_v46  ;;  %v1300_v53 = vld [vmem:[%s15477_s22 + $0x1ac0] sm:$0xff]  ;;  %10312 = vmatprep.subr.bf16.mxu0 %v14010_v50  ;;  %v14137_v58 = vcombine.low %v1436_v45, %v1440_v46  ;;  %v15828_v50 = vpack.c.bf16 %v408_v39, %v408_v39 }
 0x17d   : > { %v1304_v54 = vld [vmem:[%s15477_s22 + $0x1ae0] sm:$0xff] }
 0x17e   : > { %v1428_v55 = vld [vmem:[%s15477_s22 + $0x1ec0] sm:$0xff]  ;;  %v14002_v61 = vcombine.high %v1300_v53, %v1304_v54  ;;  %10353 = vmatprep.subr.bf16.mxu1 %v14138_v51  ;;  %v14001_v4 = vcombine.low %v1300_v53, %v1304_v54  ;;  %v413_v53 = vld [vmem:[%s15499_s13 + $0x98] sm:$0xff] }
 0x17f   : > { %v1432_v56 = vld [vmem:[%s15477_s22 + $0x1ee0] sm:$0xff]  ;;  %10313 = vmatpush2.bf16.msra.mxu0 %v14009_v57  ;;  %10354 = vmatpush2.bf16.msra.mxu1 %v14137_v58 }
 0x180   : > { %v14130_v62 = vcombine.high %v1428_v55, %v1432_v56  ;;  %v1292_v63 = vld [vmem:[%s15477_s22 + $0x1a80] sm:$0xff]  ;;  %10314 = vmatprep.subr.bf16.mxu0 %v14002_v61  ;;  %v14129_v5 = vcombine.low %v1428_v55, %v1432_v56  ;;  %v15833_v61 = vpack.c.bf16 %v411_v48, %v411_v48 }
 0x181   : > { %v1296_v0 = vld [vmem:[%s15477_s22 + $0x1aa0] sm:$0xff] }
 0x182   : > { %v1420_v1 = vld [vmem:[%s15477_s22 + $0x1e80] sm:$0xff]  ;;  %v13994_v6 = vcombine.high %v1292_v63, %v1296_v0  ;;  %10355 = vmatprep.subr.bf16.mxu1 %v14130_v62  ;;  %v13993_v13 = vcombine.low %v1292_v63, %v1296_v0 }
 0x183   : > { %v1424_v2 = vld [vmem:[%s15477_s22 + $0x1ea0] sm:$0xff]  ;;  %10315 = vmatpush2.bf16.msra.mxu0 %v14001_v4  ;;  %10356 = vmatpush2.bf16.msra.mxu1 %v14129_v5 }
 0x184   : > { %v14122_v8 = vcombine.high %v1420_v1, %v1424_v2  ;;  %v1284_v9 = vld [vmem:[%s15477_s22 + $0x1a40] sm:$0xff]  ;;  %10316 = vmatprep.subr.bf16.mxu0 %v13994_v6  ;;  %v14121_v14 = vcombine.low %v1420_v1, %v1424_v2  ;;  %v15838_v1 = vpack.c.bf16 %v413_v53, %v413_v53 }
 0x185   : > { %v1288_v10 = vld [vmem:[%s15477_s22 + $0x1a60] sm:$0xff] }
 0x186   : > { %v1412_v11 = vld [vmem:[%s15477_s22 + $0x1e40] sm:$0xff]  ;;  %v13986_v16 = vcombine.high %v1284_v9, %v1288_v10  ;;  %10357 = vmatprep.subr.bf16.mxu1 %v14122_v8  ;;  %v13985_v25 = vcombine.low %v1284_v9, %v1288_v10 }
 0x187   : > { %v1416_v12 = vld [vmem:[%s15477_s22 + $0x1e60] sm:$0xff]  ;;  %10317 = vmatpush2.bf16.msra.mxu0 %v13993_v13  ;;  %10358 = vmatpush2.bf16.msra.mxu1 %v14121_v14 }
 0x188   : > { %v14114_v18 = vcombine.high %v1412_v11, %v1416_v12  ;;  %v1276_v20 = vld [vmem:[%s15477_s22 + $0x1a00] sm:$0xff]  ;;  %10318 = vmatprep.subr.bf16.mxu0 %v13986_v16  ;;  %v14113_v26 = vcombine.low %v1412_v11, %v1416_v12 }
 0x189   : > { %v1280_v22 = vld [vmem:[%s15477_s22 + $0x1a20] sm:$0xff] }
 0x18a   : > { %v1404_v23 = vld [vmem:[%s15477_s22 + $0x1e00] sm:$0xff]  ;;  %v13978_v27 = vcombine.high %v1276_v20, %v1280_v22  ;;  %10359 = vmatprep.subr.bf16.mxu1 %v14114_v18  ;;  %v13977_v35 = vcombine.low %v1276_v20, %v1280_v22 }
 0x18b   : > { %v1408_v24 = vld [vmem:[%s15477_s22 + $0x1e20] sm:$0xff]  ;;  %10319 = vmatpush2.bf16.msra.mxu0 %v13985_v25  ;;  %10360 = vmatpush2.bf16.msra.mxu1 %v14113_v26 }
 0x18c   : > { %v14106_v28 = vcombine.high %v1404_v23, %v1408_v24  ;;  %v1524_v30 = vld [vmem:[%s15477_s22 + $0x21c0] sm:$0xff]  ;;  %10320 = vmatprep.subr.bf16.mxu0 %v13978_v27  ;;  %v14105_v38 = vcombine.low %v1404_v23, %v1408_v24 }
 0x18d   : > { %v1528_v31 = vld [vmem:[%s15477_s22 + $0x21e0] sm:$0xff] }
 0x18e   : > { %v1652_v33 = vld [vmem:[%s15477_s22 + $0x25c0] sm:$0xff]  ;;  %v14226_v40 = vcombine.high %v1524_v30, %v1528_v31  ;;  %10361 = vmatprep.subr.bf16.mxu1 %v14106_v28  ;;  %v14225_v51 = vcombine.low %v1524_v30, %v1528_v31 }
 0x18f   : > { %v1656_v34 = vld [vmem:[%s15477_s22 + $0x25e0] sm:$0xff]  ;;  %10321 = vmatpush2.bf16.msra.mxu0 %v13977_v35  ;;  %10362 = vmatpush2.bf16.msra.mxu1 %v14105_v38  ;;  %v10119_v2 = vpop.f32.mrf.mxu1 }
 0x190   : > { %v406_v36 = vld [vmem:[%s15499_s13 + $0x60] sm:$0xff]  ;;  %v14354_v42 = vcombine.high %v1652_v33, %v1656_v34  ;;  %10372 = vmatprep.subr.bf16.mxu0 %v14226_v40  ;;  %v14353_v54 = vcombine.low %v1652_v33, %v1656_v34  ;;  %v10078_v62 = vpop.f32.mrf.mxu0 }
 0x191   : > { %v1516_v43 = vld [vmem:[%s15477_s22 + $0x2180] sm:$0xff]  ;;  %v15823_v45 = vpack.c.bf16 %v406_v36, %v406_v36  ;;  %v15841_v5 = vadd.f32 %v10119_v2, %v10078_v62  ;;  %v10121_v10 = vpop.f32.mrf.mxu1 }
 0x192   : > { %v1520_v44 = vld [vmem:[%s15477_s22 + $0x21a0] sm:$0xff]  ;;  %10413 = vmatprep.subr.bf16.mxu1 %v14354_v42  ;;  %10364 = vmatmul.mubr.bf16.vlgmr.msra.gmra.mxu1 %v15828_v50  ;;  %v10080_v6 = vpop.f32.mrf.mxu0 }
 0x193   : > { %v1644_v46 = vld [vmem:[%s15477_s22 + $0x2580] sm:$0xff]  ;;  %v14218_v55 = vcombine.high %v1516_v43, %v1520_v44  ;;  %10323 = vmatmul.mubr.bf16.vlgmr.msra.gmra.mxu0 %v15823_v45  ;;  %v14217_v4 = vcombine.low %v1516_v43, %v1520_v44  ;;  %10414 = vmatpush1.bf16.msra.mxu1 %v14353_v54  ;;  %v15846_v14 = vadd.f32 %v10121_v10, %v10080_v6  ;;  %v10123_v22 = vpop.f32.mrf.mxu1 }
 0x194   : > { %v1648_v47 = vld [vmem:[%s15477_s22 + $0x25a0] sm:$0xff]  ;;  %10373 = vmatpush1.bf16.msra.mxu0 %v14225_v51  ;;  %10404 = vmatprep.mubr.bf16.mxu0 %v15833_v61  ;;  %v10082_v16 = vpop.f32.mrf.mxu0 }
 0x195   : > { %v14346_v56 = vcombine.high %v1644_v46, %v1648_v47  ;;  %v1508_v57 = vld [vmem:[%s15477_s22 + $0x2140] sm:$0xff]  ;;  %10374 = vmatprep.subr.bf16.mxu0 %v14218_v55  ;;  %v14345_v8 = vcombine.low %v1644_v46, %v1648_v47  ;;  %10445 = vmatprep.mubr.bf16.mxu1 %v15838_v1  ;;  %v10124_v27 = vpop.f32.mrf.mxu1 }
 0x196   : > { %v1512_v58 = vld [vmem:[%s15477_s22 + $0x2160] sm:$0xff]  ;;  %v10083_v24 = vpop.f32.mrf.mxu0 }
 0x197   : > { %v1636_v63 = vld [vmem:[%s15477_s22 + $0x2540] sm:$0xff]  ;;  %v14210_v9 = vcombine.high %v1508_v57, %v1512_v58  ;;  %10415 = vmatprep.subr.bf16.mxu1 %v14346_v56  ;;  %v14209_v23 = vcombine.low %v1508_v57, %v1512_v58 }
 0x198   : > { %v1640_v0 = vld [vmem:[%s15477_s22 + $0x2560] sm:$0xff]  ;;  %10375 = vmatpush1.bf16.msra.mxu0 %v14217_v4  ;;  %10416 = vmatpush1.bf16.msra.mxu1 %v14345_v8 }
 0x199   : > { %v14338_v11 = vcombine.high %v1636_v63, %v1640_v0  ;;  %v1500_v12 = vld [vmem:[%s15477_s22 + $0x2100] sm:$0xff]  ;;  %10376 = vmatprep.subr.bf16.mxu0 %v14210_v9  ;;  %v14337_v25 = vcombine.low %v1636_v63, %v1640_v0 }
 0x19a   : > { %v1504_v13 = vld [vmem:[%s15477_s22 + $0x2120] sm:$0xff] }
 0x19b   : > { %v1628_v18 = vld [vmem:[%s15477_s22 + $0x2500] sm:$0xff]  ;;  %v14202_v26 = vcombine.high %v1500_v12, %v1504_v13  ;;  %10417 = vmatprep.subr.bf16.mxu1 %v14338_v11  ;;  %v14201_v35 = vcombine.low %v1500_v12, %v1504_v13 }
 0x19c   : > { %v1632_v20 = vld [vmem:[%s15477_s22 + $0x2520] sm:$0xff]  ;;  %10377 = vmatpush1.bf16.msra.mxu0 %v14209_v23  ;;  %10418 = vmatpush1.bf16.msra.mxu1 %v14337_v25 }
 0x19d   : > { %v14330_v28 = vcombine.high %v1628_v18, %v1632_v20  ;;  %v1492_v30 = vld [vmem:[%s15477_s22 + $0x20c0] sm:$0xff]  ;;  %10378 = vmatprep.subr.bf16.mxu0 %v14202_v26  ;;  %v14329_v36 = vcombine.low %v1628_v18, %v1632_v20 }
 0x19e   : > { %v1496_v31 = vld [vmem:[%s15477_s22 + $0x20e0] sm:$0xff] }
 0x19f   : > { %v1620_v33 = vld [vmem:[%s15477_s22 + $0x24c0] sm:$0xff]  ;;  %v14194_v38 = vcombine.high %v1492_v30, %v1496_v31  ;;  %10419 = vmatprep.subr.bf16.mxu1 %v14330_v28  ;;  %v14193_v46 = vcombine.low %v1492_v30, %v1496_v31 }
 0x1a0   : > { %v1624_v34 = vld [vmem:[%s15477_s22 + $0x24e0] sm:$0xff]  ;;  %10379 = vmatpush1.bf16.msra.mxu0 %v14201_v35  ;;  %10420 = vmatpush1.bf16.msra.mxu1 %v14329_v36 }
 0x1a1   : > { %v14322_v39 = vcombine.high %v1620_v33, %v1624_v34  ;;  %v1484_v40 = vld [vmem:[%s15477_s22 + $0x2080] sm:$0xff]  ;;  %10380 = vmatprep.subr.bf16.mxu0 %v14194_v38  ;;  %v14321_v47 = vcombine.low %v1620_v33, %v1624_v34 }
 0x1a2   : > { %v1488_v42 = vld [vmem:[%s15477_s22 + $0x20a0] sm:$0xff] }
 0x1a3   : > { %v1612_v43 = vld [vmem:[%s15477_s22 + $0x2480] sm:$0xff]  ;;  %v14186_v48 = vcombine.high %v1484_v40, %v1488_v42  ;;  %10421 = vmatprep.subr.bf16.mxu1 %v14322_v39  ;;  %v14185_v57 = vcombine.low %v1484_v40, %v1488_v42 }
 0x1a4   : > { %v1616_v44 = vld [vmem:[%s15477_s22 + $0x24a0] sm:$0xff]  ;;  %10381 = vmatpush1.bf16.msra.mxu0 %v14193_v46  ;;  %10422 = vmatpush1.bf16.msra.mxu1 %v14321_v47 }
 0x1a5   : > { %v14314_v51 = vcombine.high %v1612_v43, %v1616_v44  ;;  %v1476_v53 = vld [vmem:[%s15477_s22 + $0x2040] sm:$0xff]  ;;  %10382 = vmatprep.subr.bf16.mxu0 %v14186_v48  ;;  %v14313_v58 = vcombine.low %v1612_v43, %v1616_v44 }
 0x1a6   : > { %v1480_v54 = vld [vmem:[%s15477_s22 + $0x2060] sm:$0xff] }
 0x1a7   : > { %v1604_v55 = vld [vmem:[%s15477_s22 + $0x2440] sm:$0xff]  ;;  %v14178_v62 = vcombine.high %v1476_v53, %v1480_v54  ;;  %10423 = vmatprep.subr.bf16.mxu1 %v14314_v51  ;;  %v14177_v8 = vcombine.low %v1476_v53, %v1480_v54 }
 0x1a8   : > { %v1608_v56 = vld [vmem:[%s15477_s22 + $0x2460] sm:$0xff]  ;;  %10383 = vmatpush1.bf16.msra.mxu0 %v14185_v57  ;;  %10424 = vmatpush1.bf16.msra.mxu1 %v14313_v58 }
 0x1a9   : > { %v14306_v63 = vcombine.high %v1604_v55, %v1608_v56  ;;  %v1468_v0 = vld [vmem:[%s15477_s22 + $0x2000] sm:$0xff]  ;;  %10384 = vmatprep.subr.bf16.mxu0 %v14178_v62  ;;  %v14305_v9 = vcombine.low %v1604_v55, %v1608_v56 }
 0x1aa   : > { %v1472_v2 = vld [vmem:[%s15477_s22 + $0x2020] sm:$0xff] }
 0x1ab   : > { %v1596_v4 = vld [vmem:[%s15477_s22 + $0x2400] sm:$0xff]  ;;  %v14170_v10 = vcombine.high %v1468_v0, %v1472_v2  ;;  %10425 = vmatprep.subr.bf16.mxu1 %v14306_v63  ;;  %v14169_v20 = vcombine.low %v1468_v0, %v1472_v2 }
 0x1ac   : > { %v1600_v6 = vld [vmem:[%s15477_s22 + $0x2420] sm:$0xff]  ;;  %10385 = vmatpush1.bf16.msra.mxu0 %v14177_v8  ;;  %10426 = vmatpush1.bf16.msra.mxu1 %v14305_v9 }
 0x1ad   : > { %v14298_v11 = vcombine.high %v1596_v4, %v1600_v6  ;;  %v1588_v12 = vld [vmem:[%s15477_s22 + $0x23c0] sm:$0xff]  ;;  %10386 = vmatprep.subr.bf16.mxu0 %v14170_v10  ;;  %v14297_v22 = vcombine.low %v1596_v4, %v1600_v6 }
 0x1ae   : > { %v1592_v13 = vld [vmem:[%s15477_s22 + $0x23e0] sm:$0xff] }
 0x1af   : > { %v1716_v16 = vld [vmem:[%s15477_s22 + $0x27c0] sm:$0xff]  ;;  %v14290_v23 = vcombine.high %v1588_v12, %v1592_v13  ;;  %10427 = vmatprep.subr.bf16.mxu1 %v14298_v11  ;;  %v14289_v30 = vcombine.low %v1588_v12, %v1592_v13 }
 0x1b0   : > { %v1720_v18 = vld [vmem:[%s15477_s22 + $0x27e0] sm:$0xff]  ;;  %10387 = vmatpush1.bf16.msra.mxu0 %v14169_v20  ;;  %10428 = vmatpush1.bf16.msra.mxu1 %v14297_v22 }
 0x1b1   : > { %v14418_v24 = vcombine.high %v1716_v16, %v1720_v18  ;;  %v1580_v25 = vld [vmem:[%s15477_s22 + $0x2380] sm:$0xff]  ;;  %10388 = vmatprep.subr.bf16.mxu0 %v14290_v23  ;;  %v14417_v31 = vcombine.low %v1716_v16, %v1720_v18 }
 0x1b2   : > { %v1584_v26 = vld [vmem:[%s15477_s22 + $0x23a0] sm:$0xff] }
 0x1b3   : > { %v1708_v27 = vld [vmem:[%s15477_s22 + $0x2780] sm:$0xff]  ;;  %v14282_v33 = vcombine.high %v1580_v25, %v1584_v26  ;;  %10429 = vmatprep.subr.bf16.mxu1 %v14418_v24  ;;  %v14281_v40 = vcombine.low %v1580_v25, %v1584_v26 }
 0x1b4   : > { %v1712_v28 = vld [vmem:[%s15477_s22 + $0x27a0] sm:$0xff]  ;;  %10389 = vmatpush2.bf16.msra.mxu0 %v14289_v30  ;;  %10430 = vmatpush2.bf16.msra.mxu1 %v14417_v31 }
 0x1b5   : > { %v14410_v34 = vcombine.high %v1708_v27, %v1712_v28  ;;  %v1572_v35 = vld [vmem:[%s15477_s22 + $0x2340] sm:$0xff]  ;;  %10390 = vmatprep.subr.bf16.mxu0 %v14282_v33  ;;  %v14409_v42 = vcombine.low %v1708_v27, %v1712_v28 }
 0x1b6   : > { %v1576_v36 = vld [vmem:[%s15477_s22 + $0x2360] sm:$0xff] }
 0x1b7   : > { %v1700_v38 = vld [vmem:[%s15477_s22 + $0x2740] sm:$0xff]  ;;  %v14274_v43 = vcombine.high %v1572_v35, %v1576_v36  ;;  %10431 = vmatprep.subr.bf16.mxu1 %v14410_v34  ;;  %v14273_v53 = vcombine.low %v1572_v35, %v1576_v36 }
 0x1b8   : > { %v1704_v39 = vld [vmem:[%s15477_s22 + $0x2760] sm:$0xff]  ;;  %10391 = vmatpush2.bf16.msra.mxu0 %v14281_v40  ;;  %10432 = vmatpush2.bf16.msra.mxu1 %v14409_v42 }
 0x1b9   : > { %v14402_v44 = vcombine.high %v1700_v38, %v1704_v39  ;;  %v1564_v46 = vld [vmem:[%s15477_s22 + $0x2300] sm:$0xff]  ;;  %10392 = vmatprep.subr.bf16.mxu0 %v14274_v43  ;;  %v14401_v54 = vcombine.low %v1700_v38, %v1704_v39 }
 0x1ba   : > { %v1568_v47 = vld [vmem:[%s15477_s22 + $0x2320] sm:$0xff] }
 0x1bb   : > { %v1692_v48 = vld [vmem:[%s15477_s22 + $0x2700] sm:$0xff]  ;;  %v14266_v55 = vcombine.high %v1564_v46, %v1568_v47  ;;  %10433 = vmatprep.subr.bf16.mxu1 %v14402_v44  ;;  %v14265_v0 = vcombine.low %v1564_v46, %v1568_v47 }
 0x1bc   : > { %v1696_v51 = vld [vmem:[%s15477_s22 + $0x2720] sm:$0xff]  ;;  %10393 = vmatpush2.bf16.msra.mxu0 %v14273_v53  ;;  %10434 = vmatpush2.bf16.msra.mxu1 %v14401_v54 }
 0x1bd   : > { %v14394_v56 = vcombine.high %v1692_v48, %v1696_v51  ;;  %v1556_v57 = vld [vmem:[%s15477_s22 + $0x22c0] sm:$0xff]  ;;  %10394 = vmatprep.subr.bf16.mxu0 %v14266_v55  ;;  %v14393_v2 = vcombine.low %v1692_v48, %v1696_v51  ;;  %v412_v51 = vld [vmem:[%s15499_s13 + $0x90] sm:$0xff] }
 0x1be   : > { %v1560_v58 = vld [vmem:[%s15477_s22 + $0x22e0] sm:$0xff] }
 0x1bf   : > { %v1684_v62 = vld [vmem:[%s15477_s22 + $0x26c0] sm:$0xff]  ;;  %v14258_v4 = vcombine.high %v1556_v57, %v1560_v58  ;;  %10435 = vmatprep.subr.bf16.mxu1 %v14394_v56  ;;  %v14257_v12 = vcombine.low %v1556_v57, %v1560_v58 }
 0x1c0   : > { %v1688_v63 = vld [vmem:[%s15477_s22 + $0x26e0] sm:$0xff]  ;;  %10395 = vmatpush2.bf16.msra.mxu0 %v14265_v0  ;;  %10436 = vmatpush2.bf16.msra.mxu1 %v14393_v2  ;;  %v15912_v0 = vpack.c.bf16 %v412_v51, %v412_v51 }
 0x1c1   : > { %v14386_v6 = vcombine.high %v1684_v62, %v1688_v63  ;;  %v1548_v8 = vld [vmem:[%s15477_s22 + $0x2280] sm:$0xff]  ;;  %10396 = vmatprep.subr.bf16.mxu0 %v14258_v4  ;;  %v14385_v13 = vcombine.low %v1684_v62, %v1688_v63  ;;  %v415_v63 = vld [vmem:[%s15499_s13 + $0xa8] sm:$0xff]  ;;  %v417_v4 = vld [vmem:[%s15499_s13 + $0xb8] sm:$0xff] }
 0x1c2   : > { %v1552_v9 = vld [vmem:[%s15477_s22 + $0x22a0] sm:$0xff] }
 0x1c3   : > { %v1676_v10 = vld [vmem:[%s15477_s22 + $0x2680] sm:$0xff]  ;;  %v14250_v16 = vcombine.high %v1548_v8, %v1552_v9  ;;  %10437 = vmatprep.subr.bf16.mxu1 %v14386_v6  ;;  %v14249_v25 = vcombine.low %v1548_v8, %v1552_v9 }
 0x1c4   : > { %v1680_v11 = vld [vmem:[%s15477_s22 + $0x26a0] sm:$0xff]  ;;  %10397 = vmatpush2.bf16.msra.mxu0 %v14257_v12  ;;  %10438 = vmatpush2.bf16.msra.mxu1 %v14385_v13  ;;  %v15917_v12 = vpack.c.bf16 %v415_v63, %v415_v63 }
 0x1c5   : > { %v14378_v18 = vcombine.high %v1676_v10, %v1680_v11  ;;  %v1540_v20 = vld [vmem:[%s15477_s22 + $0x2240] sm:$0xff]  ;;  %10398 = vmatprep.subr.bf16.mxu0 %v14250_v16  ;;  %v14377_v26 = vcombine.low %v1676_v10, %v1680_v11 }
 0x1c6   : > { %v1544_v22 = vld [vmem:[%s15477_s22 + $0x2260] sm:$0xff] }
 0x1c7   : > { %v1668_v23 = vld [vmem:[%s15477_s22 + $0x2640] sm:$0xff]  ;;  %v14242_v27 = vcombine.high %v1540_v20, %v1544_v22  ;;  %10439 = vmatprep.subr.bf16.mxu1 %v14378_v18  ;;  %v14241_v35 = vcombine.low %v1540_v20, %v1544_v22  ;;  %v15922_v20 = vpack.c.bf16 %v417_v4, %v417_v4 }
 0x1c8   : > { %v1672_v24 = vld [vmem:[%s15477_s22 + $0x2660] sm:$0xff]  ;;  %10399 = vmatpush2.bf16.msra.mxu0 %v14249_v25  ;;  %10440 = vmatpush2.bf16.msra.mxu1 %v14377_v26 }
 0x1c9   : > { %v14370_v28 = vcombine.high %v1668_v23, %v1672_v24  ;;  %v1532_v30 = vld [vmem:[%s15477_s22 + $0x2200] sm:$0xff]  ;;  %10400 = vmatprep.subr.bf16.mxu0 %v14242_v27  ;;  %v14369_v36 = vcombine.low %v1668_v23, %v1672_v24 }
 0x1ca   : > { %v1536_v31 = vld [vmem:[%s15477_s22 + $0x2220] sm:$0xff] }
 0x1cb   : > { %v1660_v33 = vld [vmem:[%s15477_s22 + $0x2600] sm:$0xff]  ;;  %v14234_v38 = vcombine.high %v1532_v30, %v1536_v31  ;;  %10441 = vmatprep.subr.bf16.mxu1 %v14370_v28  ;;  %v14233_v46 = vcombine.low %v1532_v30, %v1536_v31 }
 0x1cc   : > { %v1664_v34 = vld [vmem:[%s15477_s22 + $0x2620] sm:$0xff]  ;;  %10401 = vmatpush2.bf16.msra.mxu0 %v14241_v35  ;;  %10442 = vmatpush2.bf16.msra.mxu1 %v14369_v36 }
 0x1cd   : > { %v14362_v39 = vcombine.high %v1660_v33, %v1664_v34  ;;  %v1780_v40 = vld [vmem:[%s15477_s22 + $0x29c0] sm:$0xff]  ;;  %10402 = vmatprep.subr.bf16.mxu0 %v14234_v38  ;;  %v14361_v48 = vcombine.low %v1660_v33, %v1664_v34 }
 0x1ce   : > { %v1784_v42 = vld [vmem:[%s15477_s22 + $0x29e0] sm:$0xff] }
 0x1cf   : > { %v1908_v43 = vld [vmem:[%s15477_s22 + $0x2dc0] sm:$0xff]  ;;  %v14482_v53 = vcombine.high %v1780_v40, %v1784_v42  ;;  %10443 = vmatprep.subr.bf16.mxu1 %v14362_v39  ;;  %v14481_v2 = vcombine.low %v1780_v40, %v1784_v42 }
 0x1d0   : > { %v1912_v44 = vld [vmem:[%s15477_s22 + $0x2de0] sm:$0xff]  ;;  %10403 = vmatpush2.bf16.msra.mxu0 %v14233_v46  ;;  %10444 = vmatpush2.bf16.msra.mxu1 %v14361_v48  ;;  %v10201_v23 = vpop.f32.mrf.mxu1 }
 0x1d1   : > { %v410_v47 = vld [vmem:[%s15499_s13 + $0x80] sm:$0xff]  ;;  %v14610_v54 = vcombine.high %v1908_v43, %v1912_v44  ;;  %10454 = vmatprep.subr.bf16.mxu0 %v14482_v53  ;;  %v14609_v6 = vcombine.low %v1908_v43, %v1912_v44  ;;  %v10160_v13 = vpop.f32.mrf.mxu0 }
 0x1d2   : > { %v1772_v55 = vld [vmem:[%s15477_s22 + $0x2980] sm:$0xff]  ;;  %v15907_v57 = vpack.c.bf16 %v410_v47, %v410_v47  ;;  %v10161_v22 = vadd.f32 %v10160_v13, %v15841_v5  ;;  %v10203_v31 = vpop.f32.mrf.mxu1 }
 0x1d3   : > { %v1776_v56 = vld [vmem:[%s15477_s22 + $0x29a0] sm:$0xff]  ;;  %10495 = vmatprep.subr.bf16.mxu1 %v14610_v54  ;;  %10446 = vmatmul.mubr.bf16.vlgmr.msra.gmra.mxu1 %v15912_v0  ;;  %v10162_v25 = vpop.f32.mrf.mxu0 }
 0x1d4   : > { %v1900_v58 = vld [vmem:[%s15477_s22 + $0x2d80] sm:$0xff]  ;;  %v14474_v8 = vcombine.high %v1772_v55, %v1776_v56  ;;  %10405 = vmatmul.mubr.bf16.vlgmr.msra.gmra.mxu0 %v15907_v57  ;;  %v14473_v24 = vcombine.low %v1772_v55, %v1776_v56  ;;  %10496 = vmatpush1.bf16.msra.mxu1 %v14609_v6  ;;  %v15926_v28 = vadd.f32 %v10201_v23, %v10161_v22  ;;  %v10205_v40 = vpop.f32.mrf.mxu1 }
 0x1d5   : > { %v1904_v62 = vld [vmem:[%s15477_s22 + $0x2da0] sm:$0xff]  ;;  %10455 = vmatpush1.bf16.msra.mxu0 %v14481_v2  ;;  %v10163_v30 = vadd.f32 %v10162_v25, %v15846_v14  ;;  %10486 = vmatprep.mubr.bf16.mxu0 %v15917_v12  ;;  %v10164_v35 = vpop.f32.mrf.mxu0 }
 0x1d6   : > { %v14602_v9 = vcombine.high %v1900_v58, %v1904_v62  ;;  %v1764_v10 = vld [vmem:[%s15477_s22 + $0x2940] sm:$0xff]  ;;  %10456 = vmatprep.subr.bf16.mxu0 %v14474_v8  ;;  %v14601_v26 = vcombine.low %v1900_v58, %v1904_v62  ;;  %10527 = vmatprep.mubr.bf16.mxu1 %v15922_v20  ;;  %v10206_v46 = vpop.f32.mrf.mxu1 }
 0x1d7   : > { %v1768_v11 = vld [vmem:[%s15477_s22 + $0x2960] sm:$0xff]  ;;  %v15935_v39 = vadd.f32 %v10203_v31, %v10163_v30  ;;  %v10165_v42 = vpop.f32.mrf.mxu0 }
 0x1d8   : > { %v1892_v16 = vld [vmem:[%s15477_s22 + $0x2d40] sm:$0xff]  ;;  %v14466_v27 = vcombine.high %v1764_v10, %v1768_v11  ;;  %10497 = vmatprep.subr.bf16.mxu1 %v14602_v9  ;;  %v14465_v14 = vcombine.low %v1764_v10, %v1768_v11 }
 0x1d9   : > { %v1896_v18 = vld [vmem:[%s15477_s22 + $0x2d60] sm:$0xff]  ;;  %10457 = vmatpush1.bf16.msra.mxu0 %v14473_v24  ;;  %10498 = vmatpush1.bf16.msra.mxu1 %v14601_v26 }
 0x1da   : > { %v14594_v5 = vcombine.high %v1892_v16, %v1896_v18  ;;  %v1756_v33 = vld [vmem:[%s15477_s22 + $0x2900] sm:$0xff]  ;;  %10458 = vmatprep.subr.bf16.mxu0 %v14466_v27  ;;  %v14593_v43 = vcombine.low %v1892_v16, %v1896_v18 }
 0x1db   : > { %v1760_v34 = vld [vmem:[%s15477_s22 + $0x2920] sm:$0xff] }
 0x1dc   : > { %v1884_v36 = vld [vmem:[%s15477_s22 + $0x2d00] sm:$0xff]  ;;  %v14458_v44 = vcombine.high %v1756_v33, %v1760_v34  ;;  %10499 = vmatprep.subr.bf16.mxu1 %v14594_v5  ;;  %v14457_v55 = vcombine.low %v1756_v33, %v1760_v34 }
 0x1dd   : > { %v1888_v38 = vld [vmem:[%s15477_s22 + $0x2d20] sm:$0xff]  ;;  %10459 = vmatpush1.bf16.msra.mxu0 %v14465_v14  ;;  %10500 = vmatpush1.bf16.msra.mxu1 %v14593_v43 }
 0x1de   : > { %v14586_v47 = vcombine.high %v1884_v36, %v1888_v38  ;;  %v1748_v48 = vld [vmem:[%s15477_s22 + $0x28c0] sm:$0xff]  ;;  %10460 = vmatprep.subr.bf16.mxu0 %v14458_v44  ;;  %v14585_v56 = vcombine.low %v1884_v36, %v1888_v38 }
 0x1df   : > { %v1752_v51 = vld [vmem:[%s15477_s22 + $0x28e0] sm:$0xff] }
 0x1e0   : > { %v1876_v53 = vld [vmem:[%s15477_s22 + $0x2cc0] sm:$0xff]  ;;  %v14450_v58 = vcombine.high %v1748_v48, %v1752_v51  ;;  %10501 = vmatprep.subr.bf16.mxu1 %v14586_v47  ;;  %v14449_v8 = vcombine.low %v1748_v48, %v1752_v51 }
 0x1e1   : > { %v1880_v54 = vld [vmem:[%s15477_s22 + $0x2ce0] sm:$0xff]  ;;  %10461 = vmatpush1.bf16.msra.mxu0 %v14457_v55  ;;  %10502 = vmatpush1.bf16.msra.mxu1 %v14585_v56 }
 0x1e2   : > { %v14578_v62 = vcombine.high %v1876_v53, %v1880_v54  ;;  %v1740_v63 = vld [vmem:[%s15477_s22 + $0x2880] sm:$0xff]  ;;  %10462 = vmatprep.subr.bf16.mxu0 %v14450_v58  ;;  %v14577_v9 = vcombine.low %v1876_v53, %v1880_v54 }
 0x1e3   : > { %v1744_v2 = vld [vmem:[%s15477_s22 + $0x28a0] sm:$0xff] }
 0x1e4   : > { %v1868_v4 = vld [vmem:[%s15477_s22 + $0x2c80] sm:$0xff]  ;;  %v14442_v10 = vcombine.high %v1740_v63, %v1744_v2  ;;  %10503 = vmatprep.subr.bf16.mxu1 %v14578_v62  ;;  %v14441_v23 = vcombine.low %v1740_v63, %v1744_v2 }
 0x1e5   : > { %v1872_v6 = vld [vmem:[%s15477_s22 + $0x2ca0] sm:$0xff]  ;;  %10463 = vmatpush1.bf16.msra.mxu0 %v14449_v8  ;;  %10504 = vmatpush1.bf16.msra.mxu1 %v14577_v9 }
 0x1e6   : > { %v14570_v11 = vcombine.high %v1868_v4, %v1872_v6  ;;  %v1732_v13 = vld [vmem:[%s15477_s22 + $0x2840] sm:$0xff]  ;;  %10464 = vmatprep.subr.bf16.mxu0 %v14442_v10  ;;  %v14569_v24 = vcombine.low %v1868_v4, %v1872_v6 }
 0x1e7   : > { %v1736_v16 = vld [vmem:[%s15477_s22 + $0x2860] sm:$0xff] }
 0x1e8   : > { %v1860_v18 = vld [vmem:[%s15477_s22 + $0x2c40] sm:$0xff]  ;;  %v14434_v25 = vcombine.high %v1732_v13, %v1736_v16  ;;  %10505 = vmatprep.subr.bf16.mxu1 %v14570_v11  ;;  %v14433_v33 = vcombine.low %v1732_v13, %v1736_v16 }
 0x1e9   : > { %v1864_v22 = vld [vmem:[%s15477_s22 + $0x2c60] sm:$0xff]  ;;  %10465 = vmatpush1.bf16.msra.mxu0 %v14441_v23  ;;  %10506 = vmatpush1.bf16.msra.mxu1 %v14569_v24 }
 0x1ea   : > { %v14562_v26 = vcombine.high %v1860_v18, %v1864_v22  ;;  %v1724_v27 = vld [vmem:[%s15477_s22 + $0x2800] sm:$0xff]  ;;  %10466 = vmatprep.subr.bf16.mxu0 %v14434_v25  ;;  %v14561_v34 = vcombine.low %v1860_v18, %v1864_v22 }
 0x1eb   : > { %v1728_v30 = vld [vmem:[%s15477_s22 + $0x2820] sm:$0xff] }
 0x1ec   : > { %v1852_v31 = vld [vmem:[%s15477_s22 + $0x2c00] sm:$0xff]  ;;  %v14426_v35 = vcombine.high %v1724_v27, %v1728_v30  ;;  %10507 = vmatprep.subr.bf16.mxu1 %v14562_v26  ;;  %v14425_v43 = vcombine.low %v1724_v27, %v1728_v30 }
 0x1ed   : > { %v1856_v5 = vld [vmem:[%s15477_s22 + $0x2c20] sm:$0xff]  ;;  %10467 = vmatpush1.bf16.msra.mxu0 %v14433_v33  ;;  %10508 = vmatpush1.bf16.msra.mxu1 %v14561_v34 }
 0x1ee   : > { %v14554_v36 = vcombine.high %v1852_v31, %v1856_v5  ;;  %v1844_v38 = vld [vmem:[%s15477_s22 + $0x2bc0] sm:$0xff]  ;;  %10468 = vmatprep.subr.bf16.mxu0 %v14426_v35  ;;  %v14553_v44 = vcombine.low %v1852_v31, %v1856_v5 }
 0x1ef   : > { %v1848_v40 = vld [vmem:[%s15477_s22 + $0x2be0] sm:$0xff] }
 0x1f0   : > { %v1972_v14 = vld [vmem:[%s15477_s22 + $0x2fc0] sm:$0xff]  ;;  %v14546_v46 = vcombine.high %v1844_v38, %v1848_v40  ;;  %10509 = vmatprep.subr.bf16.mxu1 %v14554_v36  ;;  %v14545_v55 = vcombine.low %v1844_v38, %v1848_v40 }
 0x1f1   : > { %v1976_v42 = vld [vmem:[%s15477_s22 + $0x2fe0] sm:$0xff]  ;;  %10469 = vmatpush1.bf16.msra.mxu0 %v14425_v43  ;;  %10510 = vmatpush1.bf16.msra.mxu1 %v14553_v44 }
 0x1f2   : > { %v14674_v47 = vcombine.high %v1972_v14, %v1976_v42  ;;  %v1836_v48 = vld [vmem:[%s15477_s22 + $0x2b80] sm:$0xff]  ;;  %10470 = vmatprep.subr.bf16.mxu0 %v14546_v46  ;;  %v14673_v56 = vcombine.low %v1972_v14, %v1976_v42 }
 0x1f3   : > { %v1840_v51 = vld [vmem:[%s15477_s22 + $0x2ba0] sm:$0xff] }
 0x1f4   : > { %v1964_v53 = vld [vmem:[%s15477_s22 + $0x2f80] sm:$0xff]  ;;  %v14538_v58 = vcombine.high %v1836_v48, %v1840_v51  ;;  %10511 = vmatprep.subr.bf16.mxu1 %v14674_v47  ;;  %v14537_v8 = vcombine.low %v1836_v48, %v1840_v51 }
 0x1f5   : > { %v1968_v54 = vld [vmem:[%s15477_s22 + $0x2fa0] sm:$0xff]  ;;  %10471 = vmatpush2.bf16.msra.mxu0 %v14545_v55  ;;  %10512 = vmatpush2.bf16.msra.mxu1 %v14673_v56 }
 0x1f6   : > { %v14666_v62 = vcombine.high %v1964_v53, %v1968_v54  ;;  %v1828_v63 = vld [vmem:[%s15477_s22 + $0x2b40] sm:$0xff]  ;;  %10472 = vmatprep.subr.bf16.mxu0 %v14538_v58  ;;  %v14665_v9 = vcombine.low %v1964_v53, %v1968_v54 }
 0x1f7   : > { %v1832_v2 = vld [vmem:[%s15477_s22 + $0x2b60] sm:$0xff] }
 0x1f8   : > { %v1956_v4 = vld [vmem:[%s15477_s22 + $0x2f40] sm:$0xff]  ;;  %v14530_v10 = vcombine.high %v1828_v63, %v1832_v2  ;;  %10513 = vmatprep.subr.bf16.mxu1 %v14666_v62  ;;  %v14529_v23 = vcombine.low %v1828_v63, %v1832_v2 }
 0x1f9   : > { %v1960_v6 = vld [vmem:[%s15477_s22 + $0x2f60] sm:$0xff]  ;;  %10473 = vmatpush2.bf16.msra.mxu0 %v14537_v8  ;;  %10514 = vmatpush2.bf16.msra.mxu1 %v14665_v9 }
 0x1fa   : > { %v14658_v11 = vcombine.high %v1956_v4, %v1960_v6  ;;  %v1820_v13 = vld [vmem:[%s15477_s22 + $0x2b00] sm:$0xff]  ;;  %10474 = vmatprep.subr.bf16.mxu0 %v14530_v10  ;;  %v14657_v24 = vcombine.low %v1956_v4, %v1960_v6 }
 0x1fb   : > { %v1824_v16 = vld [vmem:[%s15477_s22 + $0x2b20] sm:$0xff] }
 0x1fc   : > { %v1948_v18 = vld [vmem:[%s15477_s22 + $0x2f00] sm:$0xff]  ;;  %v14522_v25 = vcombine.high %v1820_v13, %v1824_v16  ;;  %10515 = vmatprep.subr.bf16.mxu1 %v14658_v11  ;;  %v14521_v33 = vcombine.low %v1820_v13, %v1824_v16 }
 0x1fd   : > { %v1952_v22 = vld [vmem:[%s15477_s22 + $0x2f20] sm:$0xff]  ;;  %10475 = vmatpush2.bf16.msra.mxu0 %v14529_v23  ;;  %10516 = vmatpush2.bf16.msra.mxu1 %v14657_v24 }
 0x1fe   : > { %v14650_v26 = vcombine.high %v1948_v18, %v1952_v22  ;;  %v1812_v27 = vld [vmem:[%s15477_s22 + $0x2ac0] sm:$0xff]  ;;  %10476 = vmatprep.subr.bf16.mxu0 %v14522_v25  ;;  %v14649_v34 = vcombine.low %v1948_v18, %v1952_v22  ;;  %v501_v18 = vld [vmem:[%s15477_s22 + $0x1c8] sm:$0xff] }
 0x1ff   : > { %v1816_v30 = vld [vmem:[%s15477_s22 + $0x2ae0] sm:$0xff]  ;;  %v505_v22 = vld [vmem:[%s15477_s22 + $0x1e8] sm:$0xff] }
 0x200   : > { %v1940_v31 = vld [vmem:[%s15477_s22 + $0x2ec0] sm:$0xff]  ;;  %v14514_v35 = vcombine.high %v1812_v27, %v1816_v30  ;;  %10517 = vmatprep.subr.bf16.mxu1 %v14650_v26  ;;  %v14513_v43 = vcombine.low %v1812_v27, %v1816_v30  ;;  %v416_v26 = vld [vmem:[%s15499_s13 + $0xb0] sm:$0xff]  ;;  %v13204_v30 = vcombine.high %v501_v18, %v505_v22 }
 0x201   : > { %v1944_v5 = vld [vmem:[%s15477_s22 + $0x2ee0] sm:$0xff]  ;;  %10477 = vmatpush2.bf16.msra.mxu0 %v14521_v33  ;;  %10518 = vmatpush2.bf16.msra.mxu1 %v14649_v34  ;;  %v493_v34 = vld [vmem:[%s15477_s22 + $0x188] sm:$0xff] }
 0x202   : > { %v14642_v36 = vcombine.high %v1940_v31, %v1944_v5  ;;  %v1804_v38 = vld [vmem:[%s15477_s22 + $0x2a80] sm:$0xff]  ;;  %10478 = vmatprep.subr.bf16.mxu0 %v14514_v35  ;;  %v14641_v44 = vcombine.low %v1940_v31, %v1944_v5  ;;  %v497_v35 = vld [vmem:[%s15477_s22 + $0x1a8] sm:$0xff] }
 0x203   : > { %v1808_v40 = vld [vmem:[%s15477_s22 + $0x2aa0] sm:$0xff] }
 0x204   : > { %v1932_v14 = vld [vmem:[%s15477_s22 + $0x2e80] sm:$0xff]  ;;  %v14506_v46 = vcombine.high %v1804_v38, %v1808_v40  ;;  %10519 = vmatprep.subr.bf16.mxu1 %v14642_v36  ;;  %v14505_v55 = vcombine.low %v1804_v38, %v1808_v40  ;;  %v15997_v36 = vpack.c.bf16 %v416_v26, %v416_v26  ;;  %v13203_v40 = vcombine.low %v501_v18, %v505_v22 }
 0x205   : > { %v1936_v42 = vld [vmem:[%s15477_s22 + $0x2ea0] sm:$0xff]  ;;  %10479 = vmatpush2.bf16.msra.mxu0 %v14513_v43  ;;  %10520 = vmatpush2.bf16.msra.mxu1 %v14641_v44 }
 0x206   : > { %v14634_v47 = vcombine.high %v1932_v14, %v1936_v42  ;;  %v1796_v48 = vld [vmem:[%s15477_s22 + $0x2a40] sm:$0xff]  ;;  %10480 = vmatprep.subr.bf16.mxu0 %v14506_v46  ;;  %v14633_v56 = vcombine.low %v1932_v14, %v1936_v42  ;;  %v13196_v42 = vcombine.high %v493_v34, %v497_v35 }
 0x207   : > { %v1800_v51 = vld [vmem:[%s15477_s22 + $0x2a60] sm:$0xff] }
 0x208   : > { %v1924_v53 = vld [vmem:[%s15477_s22 + $0x2e40] sm:$0xff]  ;;  %v14498_v58 = vcombine.high %v1796_v48, %v1800_v51  ;;  %10521 = vmatprep.subr.bf16.mxu1 %v14634_v47  ;;  %v14497_v8 = vcombine.low %v1796_v48, %v1800_v51  ;;  %v485_v47 = vld [vmem:[%s15477_s22 + $0x148] sm:$0xff] }
 0x209   : > { %v1928_v54 = vld [vmem:[%s15477_s22 + $0x2e60] sm:$0xff]  ;;  %10481 = vmatpush2.bf16.msra.mxu0 %v14505_v55  ;;  %10522 = vmatpush2.bf16.msra.mxu1 %v14633_v56  ;;  %v489_v48 = vld [vmem:[%s15477_s22 + $0x168] sm:$0xff]  ;;  %v13195_v56 = vcombine.low %v493_v34, %v497_v35 }
 0x20a   : > { %v14626_v62 = vcombine.high %v1924_v53, %v1928_v54  ;;  %v1788_v63 = vld [vmem:[%s15477_s22 + $0x2a00] sm:$0xff]  ;;  %10482 = vmatprep.subr.bf16.mxu0 %v14498_v58  ;;  %v14625_v9 = vcombine.low %v1924_v53, %v1928_v54  ;;  %v13187_v22 = vcombine.low %v485_v47, %v489_v48 }
 0x20b   : > { %v1792_v2 = vld [vmem:[%s15477_s22 + $0x2a20] sm:$0xff] }
 0x20c   : > { %v1916_v4 = vld [vmem:[%s15477_s22 + $0x2e00] sm:$0xff]  ;;  %v14490_v10 = vcombine.high %v1788_v63, %v1792_v2  ;;  %10523 = vmatprep.subr.bf16.mxu1 %v14626_v62  ;;  %v14489_v23 = vcombine.low %v1788_v63, %v1792_v2 }
 0x20d   : > { %v1920_v6 = vld [vmem:[%s15477_s22 + $0x2e20] sm:$0xff]  ;;  %10483 = vmatpush2.bf16.msra.mxu0 %v14497_v8  ;;  %10524 = vmatpush2.bf16.msra.mxu1 %v14625_v9  ;;  %v15284_v8 = vmov 0  }
 0x20e   : > { %v14618_v11 = vcombine.high %v1916_v4, %v1920_v6  ;;  %v2036_v13 = vld [vmem:[%s15477_s22 + $0x31c0] sm:$0xff]  ;;  %10484 = vmatprep.subr.bf16.mxu0 %v14490_v10  ;;  %v14617_v25 = vcombine.low %v1916_v4, %v1920_v6  ;;  %v477_v10 = vld [vmem:[%s15477_s22 + $0x108] sm:$0xff] }
 0x20f   : > { %v2040_v16 = vld [vmem:[%s15477_s22 + $0x31e0] sm:$0xff] }
 0x210   : > { %v414_v24 = vld [vmem:[%s15499_s13 + $0xa0] sm:$0xff]  ;;  %v14738_v27 = vcombine.high %v2036_v13, %v2040_v16  ;;  %10525 = vmatprep.subr.bf16.mxu1 %v14618_v11  ;;  %v14737_v38 = vcombine.low %v2036_v13, %v2040_v16  ;;  %v481_v11 = vld [vmem:[%s15477_s22 + $0x128] sm:$0xff] }
 0x211   : > { %v2028_v31 = vld [vmem:[%s15477_s22 + $0x3180] sm:$0xff]  ;;  %v15993_v33 = vpack.c.bf16 %v414_v24, %v414_v24  ;;  %10485 = vmatpush2.bf16.msra.mxu0 %v14489_v23  ;;  %10526 = vmatpush2.bf16.msra.mxu1 %v14617_v25  ;;  %v10283_v53 = vpop.f32.mrf.mxu1  ;;  %v13180_v25 = vcombine.high %v477_v10, %v481_v11  ;;  %v13179_v34 = vcombine.low %v477_v10, %v481_v11 }
 0x212   : > { %v2032_v5 = vld [vmem:[%s15477_s22 + $0x31a0] sm:$0xff]  ;;  %10536 = vmatprep.subr.bf16.mxu0 %v14738_v27  ;;  %10577 = vmatprep.subr.bf16.mxu1 %v13204_v30  ;;  %v10242_v46 = vpop.f32.mrf.mxu0  ;;  %v469_v30 = vld [vmem:[%s15477_s22 + $0xc8] sm:$0xff] }
 0x213   : > { %v14730_v14 = vcombine.high %v2028_v31, %v2032_v5  ;;  %v2020_v43 = vld [vmem:[%s15477_s22 + $0x3140] sm:$0xff]  ;;  %v10243_v51 = vadd.f32 %v10242_v46, %v15926_v28  ;;  %v14729_v54 = vcombine.low %v2028_v31, %v2032_v5  ;;  %v10285_v2 = vpop.f32.mrf.mxu1  ;;  %v13188_v28 = vcombine.high %v485_v47, %v489_v48  ;;  %v473_v31 = vld [vmem:[%s15477_s22 + $0xe8] sm:$0xff] }
 0x214   : > { %v2024_v44 = vld [vmem:[%s15477_s22 + $0x3160] sm:$0xff]  ;;  %10487 = vmatmul.mubr.bf16.vlgmr.msra.gmra.mxu0 %v15993_v33  ;;  %10528 = vmatmul.mubr.bf16.vlgmr.msra.gmra.mxu1 %v15997_v36  ;;  %v10244_v55 = vpop.f32.mrf.mxu0  ;;  %v13171_v46 = vcombine.low %v469_v30, %v473_v31 }
 0x215   : > { %10537 = vmatpush1.bf16.msra.mxu0 %v14737_v38  ;;  %10578 = vmatpush1.bf16.msra.mxu1 %v13203_v40  ;;  %v14722_v58 = vcombine.high %v2020_v43, %v2024_v44  ;;  %v16006_v62 = vadd.f32 %v10283_v53, %v10243_v51  ;;  %v10245_v63 = vadd.f32 %v10244_v55, %v15935_v39  ;;  %v2012_v4 = vld [vmem:[%s15477_s22 + $0x3100] sm:$0xff]  ;;  %v10287_v39 = vpop.f32.mrf.mxu1  ;;  %v457_v55 = vld [vmem:[%s15477_s22 + $0x68] sm:$0xff] }
 0x216   : > { %10538 = vmatprep.subr.bf16.mxu0 %v14730_v14  ;;  %10579 = vmatprep.subr.bf16.mxu1 %v13196_v42  ;;  %v2016_v6 = vld [vmem:[%s15477_s22 + $0x3120] sm:$0xff]  ;;  %v10246_v9 = vpop.f32.mrf.mxu0  ;;  %v14721_v16 = vcombine.low %v2020_v43, %v2024_v44  ;;  %v13172_v38 = vcombine.high %v469_v30, %v473_v31  ;;  %v461_v42 = vld [vmem:[%s15477_s22 + $0x88] sm:$0xff] }
 0x217   : > { %10568 = vmatprep.mubr.bf16.mxu0 %v15284_v8  ;;  %10609 = vmatprep.mubr.bf16.mxu1 %v15535_v59  ;;  %v16015_v13 = vadd.f32 %v10285_v2, %v10245_v63  ;;  %v14714_v23 = vcombine.high %v2012_v4, %v2016_v6  ;;  %v10288_v24 = vpop.f32.mrf.mxu1  ;;  %v2004_v26 = vld [vmem:[%s15477_s22 + $0x30c0] sm:$0xff]  ;;  %v14713_v5 = vcombine.low %v2012_v4, %v2016_v6  ;;  %v465_v43 = vld [vmem:[%s15477_s22 + $0xa8] sm:$0xff] }
 0x218   : > { %v10247_v18 = vpop.f32.mrf.mxu0  ;;  %v2008_v27 = vld [vmem:[%s15477_s22 + $0x30e0] sm:$0xff]  ;;  %v13164_v48 = vcombine.high %v461_v42, %v465_v43  ;;  %v445_v6 = vld [vmem:[%s15477_s22 + $0x8] sm:$0xff] }
 0x219   : > { %10539 = vmatpush1.bf16.msra.mxu0 %v14729_v54  ;;  %10580 = vmatpush1.bf16.msra.mxu1 %v13195_v56  ;;  %v14706_v35 = vcombine.high %v2004_v26, %v2008_v27  ;;  %v1996_v40 = vld [vmem:[%s15477_s22 + $0x3080] sm:$0xff]  ;;  %v14705_v44 = vcombine.low %v2004_v26, %v2008_v27  ;;  %v453_v54 = vld [vmem:[%s15477_s22 + $0x48] sm:$0xff] }
 0x21a   : > { %10540 = vmatprep.subr.bf16.mxu0 %v14722_v58  ;;  %10581 = vmatprep.subr.bf16.mxu1 %v13188_v28  ;;  %v2000_v14 = vld [vmem:[%s15477_s22 + $0x30a0] sm:$0xff]  ;;  %v13163_v58 = vcombine.low %v461_v42, %v465_v43  ;;  %v13156_v2 = vcombine.high %v453_v54, %v457_v55  ;;  %v449_v9 = vld [vmem:[%s15477_s22 + $0x28] sm:$0xff]  ;;  %v13155_v11 = vcombine.low %v453_v54, %v457_v55 }
 0x21b   : > { %v14698_v47 = vcombine.high %v1996_v40, %v2000_v14  ;;  %v1988_v51 = vld [vmem:[%s15477_s22 + $0x3040] sm:$0xff]  ;;  %v14697_v56 = vcombine.low %v1996_v40, %v2000_v14  ;;  %v629_v18 = vld [vmem:[%s15477_s22 + $0x5c8] sm:$0xff]  ;;  %v13147_v27 = vcombine.low %v445_v6, %v449_v9 }
 0x21c   : > { %v1992_v53 = vld [vmem:[%s15477_s22 + $0x3060] sm:$0xff]  ;;  %v569_v24 = vld [vmem:[%s15477_s22 + $0x3e8] sm:$0xff] }
 0x21d   : > { %10541 = vmatpush1.bf16.msra.mxu0 %v14721_v16  ;;  %10582 = vmatpush1.bf16.msra.mxu1 %v13187_v22  ;;  %v14690_v63 = vcombine.high %v1988_v51, %v1992_v53  ;;  %v1980_v28 = vld [vmem:[%s15477_s22 + $0x3000] sm:$0xff]  ;;  %v14689_v10 = vcombine.low %v1988_v51, %v1992_v53  ;;  %v13148_v16 = vcombine.high %v445_v6, %v449_v9  ;;  %v633_v22 = vld [vmem:[%s15477_s22 + $0x5e8] sm:$0xff] }
 0x21e   : > { %10542 = vmatprep.subr.bf16.mxu0 %v14714_v23  ;;  %10583 = vmatprep.subr.bf16.mxu1 %v13180_v25  ;;  %v1984_v4 = vld [vmem:[%s15477_s22 + $0x3020] sm:$0xff]  ;;  %v565_v23 = vld [vmem:[%s15477_s22 + $0x3c8] sm:$0xff]  ;;  %v13332_v30 = vcombine.high %v629_v18, %v633_v22  ;;  %v13331_v14 = vcombine.low %v629_v18, %v633_v22 }
 0x21f   : > { %v14682_v39 = vcombine.high %v1980_v28, %v1984_v4  ;;  %v14681_v25 = vcombine.low %v1980_v28, %v1984_v4  ;;  %v418_v26 = vld [vmem:[%s15499_s13 + $0xc0] sm:$0xff]  ;;  %v13268_v31 = vcombine.high %v565_v23, %v569_v24  ;;  %v561_v40 = vld [vmem:[%s15477_s22 + $0x3a8] sm:$0xff]  ;;  %v13267_v42 = vcombine.low %v565_v23, %v569_v24 }
 0x220   : > { %v553_v51 = vld [vmem:[%s15477_s22 + $0x368] sm:$0xff] }
 0x221   : > { %10543 = vmatpush1.bf16.msra.mxu0 %v14713_v5  ;;  %10584 = vmatpush1.bf16.msra.mxu1 %v13179_v34  ;;  %v621_v5 = vld [vmem:[%s15477_s22 + $0x588] sm:$0xff] }
 0x222   : > { %10544 = vmatprep.subr.bf16.mxu0 %v14706_v35  ;;  %10585 = vmatprep.subr.bf16.mxu1 %v13172_v38  ;;  %v625_v34 = vld [vmem:[%s15477_s22 + $0x5a8] sm:$0xff]  ;;  %v16040_v35 = vpack.c.bf16 %v418_v26, %v418_v26 }
 0x223   : > { %v557_v38 = vld [vmem:[%s15477_s22 + $0x388] sm:$0xff]  ;;  %v13324_v43 = vcombine.high %v621_v5, %v625_v34  ;;  %v13323_v53 = vcombine.low %v621_v5, %v625_v34 }
 0x224   : > { %v13259_v54 = vcombine.low %v557_v38, %v561_v40  ;;  %v545_v28 = vld [vmem:[%s15477_s22 + $0x328] sm:$0xff] }
 0x225   : > { %10545 = vmatpush1.bf16.msra.mxu0 %v14705_v44  ;;  %10586 = vmatpush1.bf16.msra.mxu1 %v13171_v46  ;;  %v13260_v44 = vcombine.high %v557_v38, %v561_v40  ;;  %v613_v46 = vld [vmem:[%s15477_s22 + $0x548] sm:$0xff] }
 0x226   : > { %10546 = vmatprep.subr.bf16.mxu0 %v14698_v47  ;;  %10587 = vmatprep.subr.bf16.mxu1 %v13164_v48  ;;  %v617_v47 = vld [vmem:[%s15477_s22 + $0x568] sm:$0xff] }
 0x227   : > { %v549_v48 = vld [vmem:[%s15477_s22 + $0x348] sm:$0xff]  ;;  %v13316_v55 = vcombine.high %v613_v46, %v617_v47  ;;  %v13315_v4 = vcombine.low %v613_v46, %v617_v47 }
 0x228   : > { %v13251_v6 = vcombine.low %v549_v48, %v553_v51  ;;  %v537_v18 = vld [vmem:[%s15477_s22 + $0x2e8] sm:$0xff] }
 0x229   : > { %10547 = vmatpush1.bf16.msra.mxu0 %v14697_v56  ;;  %10588 = vmatpush1.bf16.msra.mxu1 %v13163_v58  ;;  %v13252_v56 = vcombine.high %v549_v48, %v553_v51  ;;  %v605_v58 = vld [vmem:[%s15477_s22 + $0x508] sm:$0xff] }
 0x22a   : > { %10548 = vmatprep.subr.bf16.mxu0 %v14690_v63  ;;  %10589 = vmatprep.subr.bf16.mxu1 %v13156_v2  ;;  %v609_v63 = vld [vmem:[%s15477_s22 + $0x528] sm:$0xff] }
 0x22b   : > { %v541_v2 = vld [vmem:[%s15477_s22 + $0x308] sm:$0xff]  ;;  %v13308_v9 = vcombine.high %v605_v58, %v609_v63  ;;  %v13307_v22 = vcombine.low %v605_v58, %v609_v63 }
 0x22c   : > { %v13243_v23 = vcombine.low %v541_v2, %v545_v28  ;;  %v589_v26 = vld [vmem:[%s15477_s22 + $0x488] sm:$0xff] }
 0x22d   : > { %10549 = vmatpush1.bf16.msra.mxu0 %v14689_v10  ;;  %10590 = vmatpush1.bf16.msra.mxu1 %v13155_v11  ;;  %v13244_v10 = vcombine.high %v541_v2, %v545_v28  ;;  %v597_v11 = vld [vmem:[%s15477_s22 + $0x4c8] sm:$0xff] }
 0x22e   : > { %10550 = vmatprep.subr.bf16.mxu0 %v14682_v39  ;;  %10591 = vmatprep.subr.bf16.mxu1 %v13148_v16  ;;  %v601_v39 = vld [vmem:[%s15477_s22 + $0x4e8] sm:$0xff] }
 0x22f   : > { %v533_v16 = vld [vmem:[%s15477_s22 + $0x2c8] sm:$0xff]  ;;  %v13300_v24 = vcombine.high %v597_v11, %v601_v39  ;;  %v13299_v5 = vcombine.low %v597_v11, %v601_v39 }
 0x230   : > { %v13235_v34 = vcombine.low %v533_v16, %v537_v18 }
 0x231   : > { %10551 = vmatpush1.bf16.msra.mxu0 %v14681_v25  ;;  %10592 = vmatpush1.bf16.msra.mxu1 %v13147_v27  ;;  %v13236_v25 = vcombine.high %v533_v16, %v537_v18  ;;  %v593_v27 = vld [vmem:[%s15477_s22 + $0x4a8] sm:$0xff] }
 0x232   : > { %10618 = vmatprep.subr.bf16.mxu0 %v13332_v30  ;;  %10593 = vmatprep.subr.bf16.mxu1 %v13268_v31  ;;  %v525_v30 = vld [vmem:[%s15477_s22 + $0x288] sm:$0xff]  ;;  %v13292_v38 = vcombine.high %v589_v26, %v593_v27  ;;  %v13291_v46 = vcombine.low %v589_v26, %v593_v27 }
 0x233   : > { %v529_v31 = vld [vmem:[%s15477_s22 + $0x2a8] sm:$0xff] }
 0x234   : > { %10569 = vmatmul.mubr.bf16.vlgmr.msra.gmra.mxu0 %v16040_v35  ;;  %v13228_v40 = vcombine.high %v525_v30, %v529_v31  ;;  %v13227_v47 = vcombine.low %v525_v30, %v529_v31 }
 0x235   : > { %10619 = vmatpush1.bf16.msra.mxu0 %v13331_v14  ;;  %10650 = vmatprep.mubr.bf16.mxu0 %v15537_v60  ;;  %v581_v14 = vld [vmem:[%s15477_s22 + $0x448] sm:$0xff] }
 0x236   : > { %10594 = vmatpush2.bf16.msra.mxu1 %v13267_v42  ;;  %10620 = vmatprep.subr.bf16.mxu0 %v13324_v43  ;;  %v585_v42 = vld [vmem:[%s15477_s22 + $0x468] sm:$0xff] }
 0x237   : > { %10595 = vmatprep.subr.bf16.mxu1 %v13260_v44  ;;  %v517_v43 = vld [vmem:[%s15477_s22 + $0x248] sm:$0xff]  ;;  %v13284_v48 = vcombine.high %v581_v14, %v585_v42  ;;  %v13283_v58 = vcombine.low %v581_v14, %v585_v42 }
 0x238   : > { %v521_v44 = vld [vmem:[%s15477_s22 + $0x268] sm:$0xff] }
 0x239   : > { %10621 = vmatpush1.bf16.msra.mxu0 %v13323_v53  ;;  %v13220_v51 = vcombine.high %v517_v43, %v521_v44  ;;  %v573_v53 = vld [vmem:[%s15477_s22 + $0x408] sm:$0xff]  ;;  %v13219_v63 = vcombine.low %v517_v43, %v521_v44 }
 0x23a   : > { %10596 = vmatpush2.bf16.msra.mxu1 %v13259_v54  ;;  %10622 = vmatprep.subr.bf16.mxu0 %v13316_v55  ;;  %v577_v54 = vld [vmem:[%s15477_s22 + $0x428] sm:$0xff] }
 0x23b   : > { %10597 = vmatprep.subr.bf16.mxu1 %v13252_v56  ;;  %v509_v55 = vld [vmem:[%s15477_s22 + $0x208] sm:$0xff]  ;;  %v13276_v2 = vcombine.high %v573_v53, %v577_v54  ;;  %v13275_v11 = vcombine.low %v573_v53, %v577_v54 }
 0x23c   : > { %v513_v56 = vld [vmem:[%s15477_s22 + $0x228] sm:$0xff] }
 0x23d   : > { %10623 = vmatpush1.bf16.msra.mxu0 %v13315_v4  ;;  %v13212_v28 = vcombine.high %v509_v55, %v513_v56  ;;  %v693_v4 = vld [vmem:[%s15477_s22 + $0x7c8] sm:$0xff]  ;;  %v13211_v39 = vcombine.low %v509_v55, %v513_v56 }
 0x23e   : > { %10598 = vmatpush2.bf16.msra.mxu1 %v13251_v6  ;;  %10624 = vmatprep.subr.bf16.mxu0 %v13308_v9  ;;  %v697_v6 = vld [vmem:[%s15477_s22 + $0x7e8] sm:$0xff] }
 0x23f   : > { %10599 = vmatprep.subr.bf16.mxu1 %v13244_v10  ;;  %v757_v9 = vld [vmem:[%s15477_s22 + $0x9c8] sm:$0xff]  ;;  %v13396_v16 = vcombine.high %v693_v4, %v697_v6  ;;  %v13395_v26 = vcombine.low %v693_v4, %v697_v6 }
 0x240   : > { %v761_v10 = vld [vmem:[%s15477_s22 + $0x9e8] sm:$0xff] }
 0x241   : > { %10625 = vmatpush1.bf16.msra.mxu0 %v13307_v22  ;;  %v13460_v18 = vcombine.high %v757_v9, %v761_v10  ;;  %v685_v22 = vld [vmem:[%s15477_s22 + $0x788] sm:$0xff]  ;;  %v13459_v27 = vcombine.low %v757_v9, %v761_v10 }
 0x242   : > { %10600 = vmatpush2.bf16.msra.mxu1 %v13243_v23  ;;  %10626 = vmatprep.subr.bf16.mxu0 %v13300_v24  ;;  %v689_v23 = vld [vmem:[%s15477_s22 + $0x7a8] sm:$0xff] }
 0x243   : > { %10601 = vmatprep.subr.bf16.mxu1 %v13236_v25  ;;  %v749_v24 = vld [vmem:[%s15477_s22 + $0x988] sm:$0xff]  ;;  %v13388_v30 = vcombine.high %v685_v22, %v689_v23  ;;  %v13387_v44 = vcombine.low %v685_v22, %v689_v23 }
 0x244   : > { %v753_v25 = vld [vmem:[%s15477_s22 + $0x9a8] sm:$0xff] }
 0x245   : > { %10627 = vmatpush1.bf16.msra.mxu0 %v13299_v5  ;;  %v13452_v31 = vcombine.high %v749_v24, %v753_v25  ;;  %v677_v5 = vld [vmem:[%s15477_s22 + $0x748] sm:$0xff] }
 0x246   : > { %10602 = vmatpush2.bf16.msra.mxu1 %v13235_v34  ;;  %10628 = vmatprep.subr.bf16.mxu0 %v13292_v38  ;;  %v681_v34 = vld [vmem:[%s15477_s22 + $0x768] sm:$0xff] }
 0x247   : > { %10603 = vmatprep.subr.bf16.mxu1 %v13228_v40  ;;  %v741_v40 = vld [vmem:[%s15477_s22 + $0x948] sm:$0xff]  ;;  %v13379_v6 = vcombine.low %v677_v5, %v681_v34 }
 0x248   : > { %v745_v14 = vld [vmem:[%s15477_s22 + $0x968] sm:$0xff] }
 0x249   : > { %10629 = vmatpush1.bf16.msra.mxu0 %v13291_v46  ;;  %v669_v55 = vld [vmem:[%s15477_s22 + $0x708] sm:$0xff]  ;;  %v13443_v9 = vcombine.low %v741_v40, %v745_v14 }
 0x24a   : > { %10604 = vmatpush2.bf16.msra.mxu1 %v13227_v47  ;;  %10630 = vmatprep.subr.bf16.mxu0 %v13284_v48  ;;  %v13451_v47 = vcombine.low %v749_v24, %v753_v25  ;;  %v13380_v48 = vcombine.high %v677_v5, %v681_v34  ;;  %v673_v56 = vld [vmem:[%s15477_s22 + $0x728] sm:$0xff] }
 0x24b   : > { %10605 = vmatprep.subr.bf16.mxu1 %v13220_v51  ;;  %v13372_v10 = vcombine.high %v669_v55, %v673_v56  ;;  %v725_v22 = vld [vmem:[%s15477_s22 + $0x8c8] sm:$0xff]  ;;  %v13371_v24 = vcombine.low %v669_v55, %v673_v56 }
 0x24c   : > { %v729_v23 = vld [vmem:[%s15477_s22 + $0x8e8] sm:$0xff] }
 0x24d   : > { %10631 = vmatpush1.bf16.msra.mxu0 %v13283_v58  ;;  %v717_v5 = vld [vmem:[%s15477_s22 + $0x888] sm:$0xff] }
 0x24e   : > { %10606 = vmatpush2.bf16.msra.mxu1 %v13219_v63  ;;  %10632 = vmatprep.subr.bf16.mxu0 %v13276_v2  ;;  %v733_v63 = vld [vmem:[%s15477_s22 + $0x908] sm:$0xff] }
 0x24f   : > { %10607 = vmatprep.subr.bf16.mxu1 %v13212_v28  ;;  %v737_v2 = vld [vmem:[%s15477_s22 + $0x928] sm:$0xff] }
 0x250   : > { %v13435_v25 = vcombine.low %v733_v63, %v737_v2  ;;  %v721_v34 = vld [vmem:[%s15477_s22 + $0x8a8] sm:$0xff] }
 0x251   : > { %10633 = vmatpush1.bf16.msra.mxu0 %v13275_v11  ;;  %v637_v55 = vld [vmem:[%s15477_s22 + $0x608] sm:$0xff] }
 0x252   : > { %10608 = vmatpush2.bf16.msra.mxu1 %v13211_v39  ;;  %10634 = vmatprep.subr.bf16.mxu0 %v13396_v16  ;;  %v10365_v43 = vpop.f32.mrf.mxu1  ;;  %v13436_v39 = vcombine.high %v733_v63, %v737_v2  ;;  %v661_v16 = vld [vmem:[%s15477_s22 + $0x6c8] sm:$0xff] }
 0x253   : > { %10659 = vmatprep.subr.bf16.mxu1 %v13460_v18  ;;  %v10324_v38 = vpop.f32.mrf.mxu0  ;;  %v665_v18 = vld [vmem:[%s15477_s22 + $0x6e8] sm:$0xff] }
 0x254   : > { %v10325_v42 = vadd.f32 %v10324_v38, %v16006_v62  ;;  %v10367_v54 = vpop.f32.mrf.mxu1  ;;  %v13444_v62 = vcombine.high %v741_v40, %v745_v14  ;;  %v13363_v38 = vcombine.low %v661_v16, %v665_v18  ;;  %v13427_v40 = vcombine.low %v725_v22, %v729_v23  ;;  %v641_v56 = vld [vmem:[%s15477_s22 + $0x628] sm:$0xff] }
 0x255   : > { %10610 = vmatmul.mubr.bf16.vlgmr.msra.gmra.mxu1 %v15583_v17  ;;  %10635 = vmatpush2.bf16.msra.mxu0 %v13395_v26  ;;  %v10326_v46 = vpop.f32.mrf.mxu0  ;;  %v13364_v26 = vcombine.high %v661_v16, %v665_v18  ;;  %v705_v63 = vld [vmem:[%s15477_s22 + $0x828] sm:$0xff]  ;;  %v13339_v16 = vcombine.low %v637_v55, %v641_v56 }
 0x256   : > { %10660 = vmatpush1.bf16.msra.mxu1 %v13459_v27  ;;  %10636 = vmatprep.subr.bf16.mxu0 %v13388_v30  ;;  %v16084_v51 = vadd.f32 %v10365_v43, %v10325_v42  ;;  %v10327_v53 = vadd.f32 %v10326_v46, %v16015_v13  ;;  %v10369_v4 = vpop.f32.mrf.mxu1  ;;  %v13428_v27 = vcombine.high %v725_v22, %v729_v23  ;;  %v653_v30 = vld [vmem:[%s15477_s22 + $0x688] sm:$0xff] }
 0x257   : > { %10661 = vmatprep.subr.bf16.mxu1 %v13452_v31  ;;  %10691 = vmatprep.mubr.bf16.mxu1 %v15593_v29  ;;  %v10328_v58 = vpop.f32.mrf.mxu0  ;;  %v657_v31 = vld [vmem:[%s15477_s22 + $0x6a8] sm:$0xff]  ;;  %v13420_v42 = vcombine.high %v717_v5, %v721_v34 }
 0x258   : > { %v16092_v28 = vadd.f32 %v10367_v54, %v10327_v53  ;;  %v10370_v11 = vpop.f32.mrf.mxu1  ;;  %v13356_v14 = vcombine.high %v653_v30, %v657_v31  ;;  %v645_v43 = vld [vmem:[%s15477_s22 + $0x648] sm:$0xff]  ;;  %v13419_v53 = vcombine.low %v717_v5, %v721_v34 }
 0x259   : > { %10637 = vmatpush2.bf16.msra.mxu0 %v13387_v44  ;;  %v10329_v13 = vpop.f32.mrf.mxu0  ;;  %v649_v44 = vld [vmem:[%s15477_s22 + $0x668] sm:$0xff] }
 0x25a   : > { %10662 = vmatpush1.bf16.msra.mxu1 %v13451_v47  ;;  %10638 = vmatprep.subr.bf16.mxu0 %v13380_v48  ;;  %v709_v46 = vld [vmem:[%s15477_s22 + $0x848] sm:$0xff]  ;;  %v13355_v48 = vcombine.low %v653_v30, %v657_v31  ;;  %v13348_v54 = vcombine.high %v645_v43, %v649_v44  ;;  %v13347_v2 = vcombine.low %v645_v43, %v649_v44 }
 0x25b   : > { %10663 = vmatprep.subr.bf16.mxu1 %v13444_v62  ;;  %v713_v47 = vld [vmem:[%s15477_s22 + $0x868] sm:$0xff] }
 0x25c   : > { %v13412_v62 = vcombine.high %v709_v46, %v713_v47  ;;  %v701_v58 = vld [vmem:[%s15477_s22 + $0x808] sm:$0xff]  ;;  %v13411_v4 = vcombine.low %v709_v46, %v713_v47 }
 0x25d   : > { %10639 = vmatpush2.bf16.msra.mxu0 %v13379_v6  ;;  %v13340_v6 = vcombine.high %v637_v55, %v641_v56  ;;  %v13404_v13 = vcombine.high %v701_v58, %v705_v63  ;;  %v821_v11 = vld [vmem:[%s15477_s22 + $0xbc8] sm:$0xff]  ;;  %v13403_v18 = vcombine.low %v701_v58, %v705_v63 }
 0x25e   : > { %10664 = vmatpush1.bf16.msra.mxu1 %v13443_v9  ;;  %10640 = vmatprep.subr.bf16.mxu0 %v13372_v10  ;;  %v885_v9 = vld [vmem:[%s15477_s22 + $0xdc8] sm:$0xff] }
 0x25f   : > { %10665 = vmatprep.subr.bf16.mxu1 %v13436_v39  ;;  %v889_v10 = vld [vmem:[%s15477_s22 + $0xde8] sm:$0xff] }
 0x260   : > { %v825_v39 = vld [vmem:[%s15477_s22 + $0xbe8] sm:$0xff]  ;;  %v13588_v22 = vcombine.high %v885_v9, %v889_v10  ;;  %v13587_v30 = vcombine.low %v885_v9, %v889_v10 }
 0x261   : > { %10641 = vmatpush2.bf16.msra.mxu0 %v13371_v24  ;;  %v13524_v23 = vcombine.high %v821_v11, %v825_v39  ;;  %v877_v24 = vld [vmem:[%s15477_s22 + $0xd88] sm:$0xff]  ;;  %v13523_v31 = vcombine.low %v821_v11, %v825_v39 }
 0x262   : > { %10666 = vmatpush1.bf16.msra.mxu1 %v13435_v25  ;;  %10642 = vmatprep.subr.bf16.mxu0 %v13364_v26  ;;  %v881_v25 = vld [vmem:[%s15477_s22 + $0xda8] sm:$0xff] }
 0x263   : > { %10667 = vmatprep.subr.bf16.mxu1 %v13428_v27  ;;  %v813_v26 = vld [vmem:[%s15477_s22 + $0xb88] sm:$0xff]  ;;  %v13580_v5 = vcombine.high %v877_v24, %v881_v25  ;;  %v13579_v43 = vcombine.low %v877_v24, %v881_v25 }
 0x264   : > { %v817_v27 = vld [vmem:[%s15477_s22 + $0xba8] sm:$0xff] }
 0x265   : > { %10643 = vmatpush2.bf16.msra.mxu0 %v13363_v38  ;;  %v13516_v34 = vcombine.high %v813_v26, %v817_v27  ;;  %v869_v38 = vld [vmem:[%s15477_s22 + $0xd48] sm:$0xff]  ;;  %v13515_v44 = vcombine.low %v813_v26, %v817_v27 }
 0x266   : > { %10668 = vmatpush1.bf16.msra.mxu1 %v13427_v40  ;;  %10644 = vmatprep.subr.bf16.mxu0 %v13356_v14  ;;  %v873_v40 = vld [vmem:[%s15477_s22 + $0xd68] sm:$0xff] }
 0x267   : > { %10669 = vmatprep.subr.bf16.mxu1 %v13420_v42  ;;  %v805_v14 = vld [vmem:[%s15477_s22 + $0xb48] sm:$0xff]  ;;  %v13572_v46 = vcombine.high %v869_v38, %v873_v40  ;;  %v13571_v55 = vcombine.low %v869_v38, %v873_v40 }
 0x268   : > { %v809_v42 = vld [vmem:[%s15477_s22 + $0xb68] sm:$0xff] }
 0x269   : > { %10645 = vmatpush2.bf16.msra.mxu0 %v13355_v48  ;;  %v13508_v47 = vcombine.high %v805_v14, %v809_v42  ;;  %v861_v48 = vld [vmem:[%s15477_s22 + $0xd08] sm:$0xff]  ;;  %v13507_v56 = vcombine.low %v805_v14, %v809_v42 }
 0x26a   : > { %10670 = vmatpush1.bf16.msra.mxu1 %v13419_v53  ;;  %10646 = vmatprep.subr.bf16.mxu0 %v13348_v54  ;;  %v865_v53 = vld [vmem:[%s15477_s22 + $0xd28] sm:$0xff] }
 0x26b   : > { %10671 = vmatprep.subr.bf16.mxu1 %v13412_v62  ;;  %v797_v54 = vld [vmem:[%s15477_s22 + $0xb08] sm:$0xff]  ;;  %v13564_v58 = vcombine.high %v861_v48, %v865_v53  ;;  %v13563_v9 = vcombine.low %v861_v48, %v865_v53 }
 0x26c   : > { %v801_v62 = vld [vmem:[%s15477_s22 + $0xb28] sm:$0xff] }
 0x26d   : > { %10647 = vmatpush2.bf16.msra.mxu0 %v13347_v2  ;;  %v13500_v63 = vcombine.high %v797_v54, %v801_v62  ;;  %v853_v2 = vld [vmem:[%s15477_s22 + $0xcc8] sm:$0xff]  ;;  %v13499_v10 = vcombine.low %v797_v54, %v801_v62 }
 0x26e   : > { %10672 = vmatpush1.bf16.msra.mxu1 %v13411_v4  ;;  %10648 = vmatprep.subr.bf16.mxu0 %v13340_v6  ;;  %v857_v4 = vld [vmem:[%s15477_s22 + $0xce8] sm:$0xff] }
 0x26f   : > { %10673 = vmatprep.subr.bf16.mxu1 %v13404_v13  ;;  %v789_v6 = vld [vmem:[%s15477_s22 + $0xac8] sm:$0xff]  ;;  %v13556_v11 = vcombine.high %v853_v2, %v857_v4  ;;  %v13555_v24 = vcombine.low %v853_v2, %v857_v4 }
 0x270   : > { %v793_v13 = vld [vmem:[%s15477_s22 + $0xae8] sm:$0xff] }
 0x271   : > { %10649 = vmatpush2.bf16.msra.mxu0 %v13339_v16  ;;  %v13492_v39 = vcombine.high %v789_v6, %v793_v13  ;;  %v845_v16 = vld [vmem:[%s15477_s22 + $0xc88] sm:$0xff]  ;;  %v13491_v25 = vcombine.low %v789_v6, %v793_v13 }
 0x272   : > { %10674 = vmatpush1.bf16.msra.mxu1 %v13403_v18  ;;  %10700 = vmatprep.subr.bf16.mxu0 %v13588_v22  ;;  %v849_v18 = vld [vmem:[%s15477_s22 + $0xca8] sm:$0xff] }
 0x273   : > { %10675 = vmatprep.subr.bf16.mxu1 %v13524_v23  ;;  %v781_v22 = vld [vmem:[%s15477_s22 + $0xa88] sm:$0xff]  ;;  %v13548_v26 = vcombine.high %v845_v16, %v849_v18  ;;  %v13547_v38 = vcombine.low %v845_v16, %v849_v18 }
 0x274   : > { %10651 = vmatmul.mubr.bf16.vlgmr.msra.gmra.mxu0 %v15588_v21  ;;  %v785_v23 = vld [vmem:[%s15477_s22 + $0xaa8] sm:$0xff] }
 0x275   : > { %10701 = vmatpush1.bf16.msra.mxu0 %v13587_v30  ;;  %10732 = vmatprep.mubr.bf16.mxu0 %v15598_v32  ;;  %v13484_v27 = vcombine.high %v781_v22, %v785_v23  ;;  %v837_v30 = vld [vmem:[%s15477_s22 + $0xc48] sm:$0xff]  ;;  %v13483_v40 = vcombine.low %v781_v22, %v785_v23 }
 0x276   : > { %10676 = vmatpush2.bf16.msra.mxu1 %v13523_v31  ;;  %10702 = vmatprep.subr.bf16.mxu0 %v13580_v5  ;;  %v841_v31 = vld [vmem:[%s15477_s22 + $0xc68] sm:$0xff] }
 0x277   : > { %10677 = vmatprep.subr.bf16.mxu1 %v13516_v34  ;;  %v773_v5 = vld [vmem:[%s15477_s22 + $0xa48] sm:$0xff]  ;;  %v13540_v14 = vcombine.high %v837_v30, %v841_v31  ;;  %v13539_v48 = vcombine.low %v837_v30, %v841_v31 }
 0x278   : > { %v777_v34 = vld [vmem:[%s15477_s22 + $0xa68] sm:$0xff] }
 0x279   : > { %10703 = vmatpush1.bf16.msra.mxu0 %v13579_v43  ;;  %v13476_v42 = vcombine.high %v773_v5, %v777_v34  ;;  %v829_v43 = vld [vmem:[%s15477_s22 + $0xc08] sm:$0xff]  ;;  %v13475_v53 = vcombine.low %v773_v5, %v777_v34 }
 0x27a   : > { %10678 = vmatpush2.bf16.msra.mxu1 %v13515_v44  ;;  %10704 = vmatprep.subr.bf16.mxu0 %v13572_v46  ;;  %v833_v44 = vld [vmem:[%s15477_s22 + $0xc28] sm:$0xff] }
 0x27b   : > { %10679 = vmatprep.subr.bf16.mxu1 %v13508_v47  ;;  %v765_v46 = vld [vmem:[%s15477_s22 + $0xa08] sm:$0xff]  ;;  %v13532_v54 = vcombine.high %v829_v43, %v833_v44  ;;  %v13531_v2 = vcombine.low %v829_v43, %v833_v44 }
 0x27c   : > { %v769_v47 = vld [vmem:[%s15477_s22 + $0xa28] sm:$0xff] }
 0x27d   : > { %10705 = vmatpush1.bf16.msra.mxu0 %v13571_v55  ;;  %v13468_v62 = vcombine.high %v765_v46, %v769_v47  ;;  %v949_v55 = vld [vmem:[%s15477_s22 + $0xfc8] sm:$0xff]  ;;  %v13467_v4 = vcombine.low %v765_v46, %v769_v47 }
 0x27e   : > { %10680 = vmatpush2.bf16.msra.mxu1 %v13507_v56  ;;  %10706 = vmatprep.subr.bf16.mxu0 %v13564_v58  ;;  %v953_v56 = vld [vmem:[%s15477_s22 + $0xfe8] sm:$0xff] }
 0x27f   : > { %10681 = vmatprep.subr.bf16.mxu1 %v13500_v63  ;;  %v1013_v58 = vld [vmem:[%s15477_s22 + $0x11c8] sm:$0xff]  ;;  %v13652_v6 = vcombine.high %v949_v55, %v953_v56  ;;  %v13651_v16 = vcombine.low %v949_v55, %v953_v56 }
 0x280   : > { %v1017_v63 = vld [vmem:[%s15477_s22 + $0x11e8] sm:$0xff] }
 0x281   : > { %10707 = vmatpush1.bf16.msra.mxu0 %v13563_v9  ;;  %v13716_v13 = vcombine.high %v1013_v58, %v1017_v63  ;;  %v941_v9 = vld [vmem:[%s15477_s22 + $0xf88] sm:$0xff]  ;;  %v13715_v18 = vcombine.low %v1013_v58, %v1017_v63 }
 0x282   : > { %10682 = vmatpush2.bf16.msra.mxu1 %v13499_v10  ;;  %10708 = vmatprep.subr.bf16.mxu0 %v13556_v11  ;;  %v945_v10 = vld [vmem:[%s15477_s22 + $0xfa8] sm:$0xff] }
 0x283   : > { %10683 = vmatprep.subr.bf16.mxu1 %v13492_v39  ;;  %v1005_v11 = vld [vmem:[%s15477_s22 + $0x1188] sm:$0xff]  ;;  %v13644_v22 = vcombine.high %v941_v9, %v945_v10  ;;  %v13643_v34 = vcombine.low %v941_v9, %v945_v10 }
 0x284   : > { %v1009_v39 = vld [vmem:[%s15477_s22 + $0x11a8] sm:$0xff] }
 0x285   : > { %10709 = vmatpush1.bf16.msra.mxu0 %v13555_v24  ;;  %v13708_v23 = vcombine.high %v1005_v11, %v1009_v39  ;;  %v933_v24 = vld [vmem:[%s15477_s22 + $0xf48] sm:$0xff] }
 0x286   : > { %10684 = vmatpush2.bf16.msra.mxu1 %v13491_v25  ;;  %10710 = vmatprep.subr.bf16.mxu0 %v13548_v26  ;;  %v937_v25 = vld [vmem:[%s15477_s22 + $0xf68] sm:$0xff] }
 0x287   : > { %10685 = vmatprep.subr.bf16.mxu1 %v13484_v27  ;;  %v997_v27 = vld [vmem:[%s15477_s22 + $0x1148] sm:$0xff]  ;;  %v13635_v56 = vcombine.low %v933_v24, %v937_v25 }
 0x288   : > { %v1001_v30 = vld [vmem:[%s15477_s22 + $0x1168] sm:$0xff] }
 0x289   : > { %10711 = vmatpush1.bf16.msra.mxu0 %v13547_v38  ;;  %v925_v46 = vld [vmem:[%s15477_s22 + $0xf08] sm:$0xff]  ;;  %v13699_v58 = vcombine.low %v997_v27, %v1001_v30 }
 0x28a   : > { %10686 = vmatpush2.bf16.msra.mxu1 %v13483_v40  ;;  %10712 = vmatprep.subr.bf16.mxu0 %v13540_v14  ;;  %v13707_v40 = vcombine.low %v1005_v11, %v1009_v39  ;;  %v13636_v14 = vcombine.high %v933_v24, %v937_v25  ;;  %v929_v47 = vld [vmem:[%s15477_s22 + $0xf28] sm:$0xff] }
 0x28b   : > { %10687 = vmatprep.subr.bf16.mxu1 %v13476_v42  ;;  %v13628_v63 = vcombine.high %v925_v46, %v929_v47  ;;  %v981_v9 = vld [vmem:[%s15477_s22 + $0x10c8] sm:$0xff]  ;;  %v13627_v11 = vcombine.low %v925_v46, %v929_v47 }
 0x28c   : > { %v985_v10 = vld [vmem:[%s15477_s22 + $0x10e8] sm:$0xff] }
 0x28d   : > { %10713 = vmatpush1.bf16.msra.mxu0 %v13539_v48  ;;  %v973_v24 = vld [vmem:[%s15477_s22 + $0x1088] sm:$0xff] }
 0x28e   : > { %10688 = vmatpush2.bf16.msra.mxu1 %v13475_v53  ;;  %10714 = vmatprep.subr.bf16.mxu0 %v13532_v54  ;;  %v989_v53 = vld [vmem:[%s15477_s22 + $0x1108] sm:$0xff] }
 0x28f   : > { %10689 = vmatprep.subr.bf16.mxu1 %v13468_v62  ;;  %v993_v54 = vld [vmem:[%s15477_s22 + $0x1128] sm:$0xff] }
 0x290   : > { %v13691_v39 = vcombine.low %v989_v53, %v993_v54  ;;  %v977_v25 = vld [vmem:[%s15477_s22 + $0x10a8] sm:$0xff] }
 0x291   : > { %10715 = vmatpush1.bf16.msra.mxu0 %v13531_v2  ;;  %v893_v46 = vld [vmem:[%s15477_s22 + $0xe08] sm:$0xff] }
 0x292   : > { %10690 = vmatpush2.bf16.msra.mxu1 %v13467_v4  ;;  %10716 = vmatprep.subr.bf16.mxu0 %v13652_v6  ;;  %v13692_v4 = vcombine.high %v989_v53, %v993_v54  ;;  %v917_v6 = vld [vmem:[%s15477_s22 + $0xec8] sm:$0xff] }
 0x293   : > { %10741 = vmatprep.subr.bf16.mxu1 %v13716_v13  ;;  %v10447_v5 = vpop.f32.mrf.mxu1  ;;  %v921_v13 = vld [vmem:[%s15477_s22 + $0xee8] sm:$0xff] }
 0x294   : > { %v10406_v26 = vpop.f32.mrf.mxu0  ;;  %v897_v47 = vld [vmem:[%s15477_s22 + $0xe28] sm:$0xff] }
 0x295   : > { %v10407_v31 = vadd.f32 %v10406_v26, %v16084_v51  ;;  %10692 = vmatmul.mubr.bf16.vlgmr.msra.gmra.mxu1 %v15663_v37  ;;  %10717 = vmatpush2.bf16.msra.mxu0 %v13651_v16  ;;  %v10449_v44 = vpop.f32.mrf.mxu1  ;;  %v13700_v51 = vcombine.high %v997_v27, %v1001_v30  ;;  %v13620_v16 = vcombine.high %v917_v6, %v921_v13  ;;  %v961_v53 = vld [vmem:[%s15477_s22 + $0x1028] sm:$0xff] }
 0x296   : > { %10742 = vmatpush1.bf16.msra.mxu1 %v13715_v18  ;;  %v10408_v38 = vpop.f32.mrf.mxu0  ;;  %10718 = vmatprep.subr.bf16.mxu0 %v13644_v22  ;;  %v13684_v18 = vcombine.high %v981_v9, %v985_v10  ;;  %v909_v22 = vld [vmem:[%s15477_s22 + $0xe88] sm:$0xff]  ;;  %v13619_v26 = vcombine.low %v917_v6, %v921_v13  ;;  %v13683_v27 = vcombine.low %v981_v9, %v985_v10 }
 0x297   : > { %v16158_v42 = vadd.f32 %v10447_v5, %v10407_v31  ;;  %v10409_v43 = vadd.f32 %v10408_v38, %v16092_v28  ;;  %10743 = vmatprep.subr.bf16.mxu1 %v13708_v23  ;;  %10773 = vmatprep.mubr.bf16.mxu1 %v15673_v49  ;;  %v10451_v55 = vpop.f32.mrf.mxu1  ;;  %v913_v23 = vld [vmem:[%s15477_s22 + $0xea8] sm:$0xff]  ;;  %v13676_v31 = vcombine.high %v973_v24, %v977_v25 }
 0x298   : > { %v10410_v48 = vpop.f32.mrf.mxu0  ;;  %v13612_v30 = vcombine.high %v909_v22, %v913_v23  ;;  %v901_v5 = vld [vmem:[%s15477_s22 + $0xe48] sm:$0xff]  ;;  %v13595_v6 = vcombine.low %v893_v46, %v897_v47 }
 0x299   : > { %v16166_v62 = vadd.f32 %v10449_v44, %v10409_v43  ;;  %10719 = vmatpush2.bf16.msra.mxu0 %v13643_v34  ;;  %v10452_v2 = vpop.f32.mrf.mxu1  ;;  %v905_v34 = vld [vmem:[%s15477_s22 + $0xe68] sm:$0xff]  ;;  %v13675_v43 = vcombine.low %v973_v24, %v977_v25 }
 0x29a   : > { %10744 = vmatpush1.bf16.msra.mxu1 %v13707_v40  ;;  %v10411_v28 = vpop.f32.mrf.mxu0  ;;  %10720 = vmatprep.subr.bf16.mxu0 %v13636_v14  ;;  %v965_v38 = vld [vmem:[%s15477_s22 + $0x1048] sm:$0xff]  ;;  %v13611_v14 = vcombine.low %v909_v22, %v913_v23  ;;  %v13604_v44 = vcombine.high %v901_v5, %v905_v34  ;;  %v13603_v54 = vcombine.low %v901_v5, %v905_v34 }
 0x29b   : > { %10745 = vmatprep.subr.bf16.mxu1 %v13700_v51  ;;  %v969_v40 = vld [vmem:[%s15477_s22 + $0x1068] sm:$0xff] }
 0x29c   : > { %v13668_v51 = vcombine.high %v965_v38, %v969_v40  ;;  %v957_v48 = vld [vmem:[%s15477_s22 + $0x1008] sm:$0xff]  ;;  %v13667_v55 = vcombine.low %v965_v38, %v969_v40 }
 0x29d   : > { %10721 = vmatpush2.bf16.msra.mxu0 %v13635_v56  ;;  %v13596_v56 = vcombine.high %v893_v46, %v897_v47  ;;  %v13660_v28 = vcombine.high %v957_v48, %v961_v53  ;;  %v1077_v2 = vld [vmem:[%s15477_s22 + $0x13c8] sm:$0xff]  ;;  %v13659_v13 = vcombine.low %v957_v48, %v961_v53 }
 0x29e   : > { %10746 = vmatpush1.bf16.msra.mxu1 %v13699_v58  ;;  %10722 = vmatprep.subr.bf16.mxu0 %v13628_v63  ;;  %v1141_v58 = vld [vmem:[%s15477_s22 + $0x15c8] sm:$0xff] }
 0x29f   : > { %10747 = vmatprep.subr.bf16.mxu1 %v13692_v4  ;;  %v1145_v63 = vld [vmem:[%s15477_s22 + $0x15e8] sm:$0xff] }
 0x2a0   : > { %v1081_v4 = vld [vmem:[%s15477_s22 + $0x13e8] sm:$0xff]  ;;  %v13844_v9 = vcombine.high %v1141_v58, %v1145_v63  ;;  %v13843_v22 = vcombine.low %v1141_v58, %v1145_v63 }
 0x2a1   : > { %10723 = vmatpush2.bf16.msra.mxu0 %v13627_v11  ;;  %v13780_v10 = vcombine.high %v1077_v2, %v1081_v4  ;;  %v1133_v11 = vld [vmem:[%s15477_s22 + $0x1588] sm:$0xff]  ;;  %v13779_v23 = vcombine.low %v1077_v2, %v1081_v4 }
 0x2a2   : > { %10748 = vmatpush1.bf16.msra.mxu1 %v13691_v39  ;;  %10724 = vmatprep.subr.bf16.mxu0 %v13620_v16  ;;  %v1137_v39 = vld [vmem:[%s15477_s22 + $0x15a8] sm:$0xff] }
 0x2a3   : > { %10749 = vmatprep.subr.bf16.mxu1 %v13684_v18  ;;  %v1069_v16 = vld [vmem:[%s15477_s22 + $0x1388] sm:$0xff]  ;;  %v13836_v24 = vcombine.high %v1133_v11, %v1137_v39  ;;  %v13835_v5 = vcombine.low %v1133_v11, %v1137_v39 }
 0x2a4   : > { %v1073_v18 = vld [vmem:[%s15477_s22 + $0x13a8] sm:$0xff] }
 0x2a5   : > { %10725 = vmatpush2.bf16.msra.mxu0 %v13619_v26  ;;  %v13772_v25 = vcombine.high %v1069_v16, %v1073_v18  ;;  %v1125_v26 = vld [vmem:[%s15477_s22 + $0x1548] sm:$0xff]  ;;  %v13771_v34 = vcombine.low %v1069_v16, %v1073_v18 }
 0x2a6   : > { %10750 = vmatpush1.bf16.msra.mxu1 %v13683_v27  ;;  %10726 = vmatprep.subr.bf16.mxu0 %v13612_v30  ;;  %v1129_v27 = vld [vmem:[%s15477_s22 + $0x1568] sm:$0xff] }
 0x2a7   : > { %10751 = vmatprep.subr.bf16.mxu1 %v13676_v31  ;;  %v1061_v30 = vld [vmem:[%s15477_s22 + $0x1348] sm:$0xff]  ;;  %v13828_v38 = vcombine.high %v1125_v26, %v1129_v27  ;;  %v13827_v46 = vcombine.low %v1125_v26, %v1129_v27 }
 0x2a8   : > { %v1065_v31 = vld [vmem:[%s15477_s22 + $0x1368] sm:$0xff] }
 0x2a9   : > { %10727 = vmatpush2.bf16.msra.mxu0 %v13611_v14  ;;  %v13764_v40 = vcombine.high %v1061_v30, %v1065_v31  ;;  %v1117_v14 = vld [vmem:[%s15477_s22 + $0x1508] sm:$0xff]  ;;  %v13763_v47 = vcombine.low %v1061_v30, %v1065_v31 }
 0x2aa   : > { %10752 = vmatpush1.bf16.msra.mxu1 %v13675_v43  ;;  %10728 = vmatprep.subr.bf16.mxu0 %v13604_v44  ;;  %v1121_v43 = vld [vmem:[%s15477_s22 + $0x1528] sm:$0xff] }
 0x2ab   : > { %10753 = vmatprep.subr.bf16.mxu1 %v13668_v51  ;;  %v1053_v44 = vld [vmem:[%s15477_s22 + $0x1308] sm:$0xff]  ;;  %v13820_v48 = vcombine.high %v1117_v14, %v1121_v43  ;;  %v13819_v58 = vcombine.low %v1117_v14, %v1121_v43 }
 0x2ac   : > { %v1057_v51 = vld [vmem:[%s15477_s22 + $0x1328] sm:$0xff] }
 0x2ad   : > { %10729 = vmatpush2.bf16.msra.mxu0 %v13603_v54  ;;  %v13756_v53 = vcombine.high %v1053_v44, %v1057_v51  ;;  %v1109_v54 = vld [vmem:[%s15477_s22 + $0x14c8] sm:$0xff]  ;;  %v13755_v63 = vcombine.low %v1053_v44, %v1057_v51 }
 0x2ae   : > { %10754 = vmatpush1.bf16.msra.mxu1 %v13667_v55  ;;  %10730 = vmatprep.subr.bf16.mxu0 %v13596_v56  ;;  %v1113_v55 = vld [vmem:[%s15477_s22 + $0x14e8] sm:$0xff] }
 0x2af   : > { %10755 = vmatprep.subr.bf16.mxu1 %v13660_v28  ;;  %v1045_v56 = vld [vmem:[%s15477_s22 + $0x12c8] sm:$0xff]  ;;  %v13812_v2 = vcombine.high %v1109_v54, %v1113_v55  ;;  %v13811_v11 = vcombine.low %v1109_v54, %v1113_v55 }
 0x2b0   : > { %v1049_v28 = vld [vmem:[%s15477_s22 + $0x12e8] sm:$0xff] }
 0x2b1   : > { %10731 = vmatpush2.bf16.msra.mxu0 %v13595_v6  ;;  %v13748_v4 = vcombine.high %v1045_v56, %v1049_v28  ;;  %v1101_v6 = vld [vmem:[%s15477_s22 + $0x1488] sm:$0xff]  ;;  %v13747_v39 = vcombine.low %v1045_v56, %v1049_v28 }
 0x2b2   : > { %10756 = vmatpush1.bf16.msra.mxu1 %v13659_v13  ;;  %10782 = vmatprep.subr.bf16.mxu0 %v13844_v9  ;;  %v1105_v13 = vld [vmem:[%s15477_s22 + $0x14a8] sm:$0xff] }
 0x2b3   : > { %10757 = vmatprep.subr.bf16.mxu1 %v13780_v10  ;;  %v1037_v9 = vld [vmem:[%s15477_s22 + $0x1288] sm:$0xff]  ;;  %v13804_v16 = vcombine.high %v1101_v6, %v1105_v13  ;;  %v13803_v26 = vcombine.low %v1101_v6, %v1105_v13 }
 0x2b4   : > { %10733 = vmatmul.mubr.bf16.vlgmr.msra.gmra.mxu0 %v15668_v41  ;;  %v1041_v10 = vld [vmem:[%s15477_s22 + $0x12a8] sm:$0xff] }
 0x2b5   : > { %10783 = vmatpush1.bf16.msra.mxu0 %v13843_v22  ;;  %10814 = vmatprep.mubr.bf16.mxu0 %v15678_v52  ;;  %v13740_v18 = vcombine.high %v1037_v9, %v1041_v10  ;;  %v1093_v22 = vld [vmem:[%s15477_s22 + $0x1448] sm:$0xff]  ;;  %v13739_v27 = vcombine.low %v1037_v9, %v1041_v10 }
 0x2b6   : > { %10758 = vmatpush2.bf16.msra.mxu1 %v13779_v23  ;;  %10784 = vmatprep.subr.bf16.mxu0 %v13836_v24  ;;  %v1097_v23 = vld [vmem:[%s15477_s22 + $0x1468] sm:$0xff] }
 0x2b7   : > { %10759 = vmatprep.subr.bf16.mxu1 %v13772_v25  ;;  %v1029_v24 = vld [vmem:[%s15477_s22 + $0x1248] sm:$0xff]  ;;  %v13796_v30 = vcombine.high %v1093_v22, %v1097_v23  ;;  %v13795_v14 = vcombine.low %v1093_v22, %v1097_v23 }
 0x2b8   : > { %v1033_v25 = vld [vmem:[%s15477_s22 + $0x1268] sm:$0xff] }
 0x2b9   : > { %10785 = vmatpush1.bf16.msra.mxu0 %v13835_v5  ;;  %v13732_v31 = vcombine.high %v1029_v24, %v1033_v25  ;;  %v1085_v5 = vld [vmem:[%s15477_s22 + $0x1408] sm:$0xff]  ;;  %v13731_v43 = vcombine.low %v1029_v24, %v1033_v25 }
 0x2ba   : > { %10760 = vmatpush2.bf16.msra.mxu1 %v13771_v34  ;;  %10786 = vmatprep.subr.bf16.mxu0 %v13828_v38  ;;  %v1089_v34 = vld [vmem:[%s15477_s22 + $0x1428] sm:$0xff] }
 0x2bb   : > { %10761 = vmatprep.subr.bf16.mxu1 %v13764_v40  ;;  %v1021_v38 = vld [vmem:[%s15477_s22 + $0x1208] sm:$0xff]  ;;  %v13788_v44 = vcombine.high %v1085_v5, %v1089_v34  ;;  %v13787_v54 = vcombine.low %v1085_v5, %v1089_v34 }
 0x2bc   : > { %v1025_v40 = vld [vmem:[%s15477_s22 + $0x1228] sm:$0xff] }
 0x2bd   : > { %10787 = vmatpush1.bf16.msra.mxu0 %v13827_v46  ;;  %v13724_v51 = vcombine.high %v1021_v38, %v1025_v40  ;;  %v1205_v46 = vld [vmem:[%s15477_s22 + $0x17c8] sm:$0xff]  ;;  %v13723_v55 = vcombine.low %v1021_v38, %v1025_v40 }
 0x2be   : > { %10762 = vmatpush2.bf16.msra.mxu1 %v13763_v47  ;;  %10788 = vmatprep.subr.bf16.mxu0 %v13820_v48  ;;  %v1209_v47 = vld [vmem:[%s15477_s22 + $0x17e8] sm:$0xff] }
 0x2bf   : > { %10763 = vmatprep.subr.bf16.mxu1 %v13756_v53  ;;  %v1269_v48 = vld [vmem:[%s15477_s22 + $0x19c8] sm:$0xff]  ;;  %v13908_v56 = vcombine.high %v1205_v46, %v1209_v47  ;;  %v13907_v6 = vcombine.low %v1205_v46, %v1209_v47 }
 0x2c0   : > { %v1273_v53 = vld [vmem:[%s15477_s22 + $0x19e8] sm:$0xff] }
 0x2c1   : > { %10789 = vmatpush1.bf16.msra.mxu0 %v13819_v58  ;;  %v13972_v28 = vcombine.high %v1269_v48, %v1273_v53  ;;  %v1197_v58 = vld [vmem:[%s15477_s22 + $0x1788] sm:$0xff]  ;;  %v13971_v13 = vcombine.low %v1269_v48, %v1273_v53 }
 0x2c2   : > { %10764 = vmatpush2.bf16.msra.mxu1 %v13755_v63  ;;  %10790 = vmatprep.subr.bf16.mxu0 %v13812_v2  ;;  %v1201_v63 = vld [vmem:[%s15477_s22 + $0x17a8] sm:$0xff] }
 0x2c3   : > { %10765 = vmatprep.subr.bf16.mxu1 %v13748_v4  ;;  %v1261_v2 = vld [vmem:[%s15477_s22 + $0x1988] sm:$0xff]  ;;  %v13900_v9 = vcombine.high %v1197_v58, %v1201_v63  ;;  %v13899_v24 = vcombine.low %v1197_v58, %v1201_v63 }
 0x2c4   : > { %v1265_v4 = vld [vmem:[%s15477_s22 + $0x19a8] sm:$0xff] }
 0x2c5   : > { %10791 = vmatpush1.bf16.msra.mxu0 %v13811_v11  ;;  %v13964_v10 = vcombine.high %v1261_v2, %v1265_v4  ;;  %v1189_v11 = vld [vmem:[%s15477_s22 + $0x1748] sm:$0xff] }
 0x2c6   : > { %10766 = vmatpush2.bf16.msra.mxu1 %v13747_v39  ;;  %10792 = vmatprep.subr.bf16.mxu0 %v13804_v16  ;;  %v1193_v39 = vld [vmem:[%s15477_s22 + $0x1768] sm:$0xff] }
 0x2c7   : > { %10767 = vmatprep.subr.bf16.mxu1 %v13740_v18  ;;  %v1253_v18 = vld [vmem:[%s15477_s22 + $0x1948] sm:$0xff] }
 0x2c8   : > { %v1257_v22 = vld [vmem:[%s15477_s22 + $0x1968] sm:$0xff] }
 0x2c9   : > { %10793 = vmatpush1.bf16.msra.mxu0 %v13803_v26  ;;  %v13963_v26 = vcombine.low %v1261_v2, %v1265_v4  ;;  %v1181_v5 = vld [vmem:[%s15477_s22 + $0x1708] sm:$0xff]  ;;  %v13955_v46 = vcombine.low %v1253_v18, %v1257_v22 }
 0x2ca   : > { %10768 = vmatpush2.bf16.msra.mxu1 %v13739_v27  ;;  %10794 = vmatprep.subr.bf16.mxu0 %v13796_v30  ;;  %v13892_v27 = vcombine.high %v1189_v11, %v1193_v39  ;;  %v1185_v34 = vld [vmem:[%s15477_s22 + $0x1728] sm:$0xff] }
 0x2cb   : > { %10769 = vmatprep.subr.bf16.mxu1 %v13732_v31  ;;  %v13956_v31 = vcombine.high %v1253_v18, %v1257_v22  ;;  %v1245_v40 = vld [vmem:[%s15477_s22 + $0x1908] sm:$0xff]  ;;  %v13884_v47 = vcombine.high %v1181_v5, %v1185_v34  ;;  %v13883_v58 = vcombine.low %v1181_v5, %v1185_v34 }
 0x2cd   : > { %10795 = vmatpush1.bf16.msra.mxu0 %v13795_v14  ;;  %v1249_v14 = vld [vmem:[%s15477_s22 + $0x1928] sm:$0xff] }
 0x2ce   : > { %10770 = vmatpush2.bf16.msra.mxu1 %v13731_v43  ;;  %10796 = vmatprep.subr.bf16.mxu0 %v13788_v44  ;;  %v13891_v44 = vcombine.low %v1189_v11, %v1193_v39  ;;  %v13948_v53 = vcombine.high %v1245_v40, %v1249_v14  ;;  %v13947_v63 = vcombine.low %v1245_v40, %v1249_v14  ;;  %v1149_v14 = vld [vmem:[%s15477_s22 + $0x1608] sm:$0xff] }
 0x2cf   : > { %10771 = vmatprep.subr.bf16.mxu1 %v13724_v51 }
 0x2d1   : > { %10797 = vmatpush1.bf16.msra.mxu0 %v13787_v54  ;;  %v1173_v54 = vld [vmem:[%s15477_s22 + $0x16c8] sm:$0xff] }
 0x2d2   : > { %10772 = vmatpush2.bf16.msra.mxu1 %v13723_v55  ;;  %10798 = vmatprep.subr.bf16.mxu0 %v13908_v56  ;;  %v1177_v55 = vld [vmem:[%s15477_s22 + $0x16e8] sm:$0xff] }
 0x2d3   : > { %10823 = vmatprep.subr.bf16.mxu1 %v13972_v28  ;;  %v1237_v56 = vld [vmem:[%s15477_s22 + $0x18c8] sm:$0xff]  ;;  %v13876_v2 = vcombine.high %v1173_v54, %v1177_v55  ;;  %v13875_v11 = vcombine.low %v1173_v54, %v1177_v55 }
 0x2d4   : > { %v16228_v16 = vpop.f32.mrf.mxu0  ;;  %v16232_v23 = vpop.f32.mrf.mxu1  ;;  %v1241_v28 = vld [vmem:[%s15477_s22 + $0x18e8] sm:$0xff] }
 0x2d5   : > { %10774 = vmatmul.mubr.bf16.vlgmr.msra.gmra.mxu1 %v15743_v3  ;;  %10799 = vmatpush2.bf16.msra.mxu0 %v13907_v6  ;;  %v13940_v4 = vcombine.high %v1237_v56, %v1241_v28  ;;  %v1165_v6 = vld [vmem:[%s15477_s22 + $0x1688] sm:$0xff]  ;;  %v13939_v39 = vcombine.low %v1237_v56, %v1241_v28 }
 0x2d6   : > { %10824 = vmatpush1.bf16.msra.mxu1 %v13971_v13  ;;  %v16235_v25 = vpop.f32.mrf.mxu0  ;;  %10800 = vmatprep.subr.bf16.mxu0 %v13900_v9  ;;  %v16237_v30 = vpop.f32.mrf.mxu1  ;;  %v1169_v13 = vld [vmem:[%s15477_s22 + $0x16a8] sm:$0xff] }
 0x2d7   : > { %10825 = vmatprep.subr.bf16.mxu1 %v13964_v10  ;;  %10855 = vmatprep.mubr.bf16.mxu1 %v15753_v15  ;;  %v1229_v9 = vld [vmem:[%s15477_s22 + $0x1888] sm:$0xff]  ;;  %v13868_v18 = vcombine.high %v1165_v6, %v1169_v13  ;;  %v13867_v5 = vcombine.low %v1165_v6, %v1169_v13 }
 0x2d8   : > { %v10492_v38 = vpop.f32.mrf.mxu0  ;;  %v10533_v43 = vpop.f32.mrf.mxu1  ;;  %v1233_v10 = vld [vmem:[%s15477_s22 + $0x18a8] sm:$0xff] }
 0x2d9   : > { %10801 = vmatpush2.bf16.msra.mxu0 %v13899_v24  ;;  %v13932_v22 = vcombine.high %v1229_v9, %v1233_v10  ;;  %v1157_v24 = vld [vmem:[%s15477_s22 + $0x1648] sm:$0xff]  ;;  %v13931_v34 = vcombine.low %v1229_v9, %v1233_v10 }
 0x2da   : > { %10826 = vmatpush1.bf16.msra.mxu1 %v13963_v26  ;;  %v10493_v51 = vpop.f32.mrf.mxu0  ;;  %10802 = vmatprep.subr.bf16.mxu0 %v13892_v27  ;;  %v10534_v48 = vpop.f32.mrf.mxu1  ;;  %v1161_v26 = vld [vmem:[%s15477_s22 + $0x1668] sm:$0xff] }
 0x2db   : > { %10827 = vmatprep.subr.bf16.mxu1 %v13956_v31  ;;  %v1221_v27 = vld [vmem:[%s15477_s22 + $0x1848] sm:$0xff]  ;;  %v13860_v38 = vcombine.high %v1157_v24, %v1161_v26 }
 0x2dc   : > { %v1225_v31 = vld [vmem:[%s15477_s22 + $0x1868] sm:$0xff] }
 0x2dd   : > { %10803 = vmatpush2.bf16.msra.mxu0 %v13891_v44  ;;  %v13924_v40 = vcombine.high %v1221_v27, %v1225_v31  ;;  %v1153_v43 = vld [vmem:[%s15477_s22 + $0x1628] sm:$0xff] }
 0x2de   : > { %10828 = vmatpush1.bf16.msra.mxu1 %v13955_v46  ;;  %10804 = vmatprep.subr.bf16.mxu0 %v13884_v47  ;;  %v1213_v44 = vld [vmem:[%s15477_s22 + $0x1808] sm:$0xff]  ;;  %v13859_v46 = vcombine.low %v1157_v24, %v1161_v26  ;;  %v13923_v47 = vcombine.low %v1221_v27, %v1225_v31  ;;  %v13852_v48 = vcombine.high %v1149_v14, %v1153_v43  ;;  %v386_v31 = vld [vmem:[#allocation2 + $0x30] sm:$0xff] }
 0x2df   : > { %10829 = vmatprep.subr.bf16.mxu1 %v13948_v53  ;;  %v1217_v51 = vld [vmem:[%s15477_s22 + $0x1828] sm:$0xff] }
 0x2e0   : > { %v13916_v53 = vcombine.high %v1213_v44, %v1217_v51  ;;  %v1397_v54 = vld [vmem:[%s15477_s22 + $0x1dc8] sm:$0xff] }
 0x2e1   : > { %10805 = vmatpush2.bf16.msra.mxu0 %v13883_v58  ;;  %v1401_v55 = vld [vmem:[%s15477_s22 + $0x1de8] sm:$0xff]  ;;  %v13851_v58 = vcombine.low %v1149_v14, %v1153_v43 }
 0x2e2   : > { %10830 = vmatpush1.bf16.msra.mxu1 %v13947_v63  ;;  %10806 = vmatprep.subr.bf16.mxu0 %v13876_v2  ;;  %v1333_v56 = vld [vmem:[%s15477_s22 + $0x1bc8] sm:$0xff]  ;;  %v13915_v63 = vcombine.low %v1213_v44, %v1217_v51  ;;  %v14100_v2 = vcombine.high %v1397_v54, %v1401_v55 }
 0x2e3   : > { %10831 = vmatprep.subr.bf16.mxu1 %v13940_v4  ;;  %v1337_v28 = vld [vmem:[%s15477_s22 + $0x1be8] sm:$0xff]  ;;  %v10489_v4 = vadd.f32 %v16228_v16, %v16158_v42 }
 0x2e4   : > { %v14036_v6 = vcombine.high %v1333_v56, %v1337_v28  ;;  %v1389_v13 = vld [vmem:[%s15477_s22 + $0x1d88] sm:$0xff] }
 0x2e5   : > { %10807 = vmatpush2.bf16.msra.mxu0 %v13875_v11  ;;  %v1393_v9 = vld [vmem:[%s15477_s22 + $0x1da8] sm:$0xff]  ;;  %v10530_v42 = vadd.f32 %v16232_v23, %v10489_v4  ;;  %v387_v23 = vld [vmem:[#allocation2] sm:$0xff] }
 0x2e6   : > { %10832 = vmatpush1.bf16.msra.mxu1 %v13939_v39  ;;  %10808 = vmatprep.subr.bf16.mxu0 %v13868_v18  ;;  %v1325_v10 = vld [vmem:[%s15477_s22 + $0x1b88] sm:$0xff]  ;;  %v10491_v39 = vadd.f32 %v16235_v25, %v16166_v62  ;;  %v14099_v18 = vcombine.low %v1397_v54, %v1401_v55  ;;  %v14092_v24 = vcombine.high %v1389_v13, %v1393_v9 }
 0x2e7   : > { %10833 = vmatprep.subr.bf16.mxu1 %v13932_v22  ;;  %v1329_v11 = vld [vmem:[%s15477_s22 + $0x1ba8] sm:$0xff]  ;;  %v14035_v22 = vcombine.low %v1333_v56, %v1337_v28 }
 0x2e8   : > { %v14028_v16 = vcombine.high %v1325_v10, %v1329_v11  ;;  %v1381_v26 = vld [vmem:[%s15477_s22 + $0x1d48] sm:$0xff]  ;;  %v10532_v62 = vadd.f32 %v16237_v30, %v10491_v39  ;;  %v14027_v43 = vcombine.low %v1325_v10, %v1329_v11 }
 0x2e9   : > { %10809 = vmatpush2.bf16.msra.mxu0 %v13867_v5  ;;  %v1385_v27 = vld [vmem:[%s15477_s22 + $0x1d68] sm:$0xff] }
 0x2ea   : > { %10834 = vmatpush1.bf16.msra.mxu1 %v13931_v34  ;;  %10810 = vmatprep.subr.bf16.mxu0 %v13860_v38  ;;  %v1317_v34 = vld [vmem:[%s15477_s22 + $0x1b48] sm:$0xff]  ;;  %v14084_v44 = vcombine.high %v1381_v26, %v1385_v27  ;;  %v14083_v28 = vcombine.low %v1381_v26, %v1385_v27 }
 0x2eb   : > { %10835 = vmatprep.subr.bf16.mxu1 %v13924_v40  ;;  %v1321_v38 = vld [vmem:[%s15477_s22 + $0x1b68] sm:$0xff]  ;;  %v14091_v40 = vcombine.low %v1389_v13, %v1393_v9 }
 0x2ec   : > { %v1377_v30 = vld [vmem:[%s15477_s22 + $0x1d28] sm:$0xff] }
 0x2ed   : > { %10811 = vmatpush2.bf16.msra.mxu0 %v13859_v46  ;;  %v1309_v54 = vld [vmem:[%s15477_s22 + $0x1b08] sm:$0xff] }
 0x2ee   : > { %10836 = vmatpush1.bf16.msra.mxu1 %v13923_v47  ;;  %10812 = vmatprep.subr.bf16.mxu0 %v13852_v48  ;;  %v14020_v47 = vcombine.high %v1317_v34, %v1321_v38  ;;  %v1373_v48 = vld [vmem:[%s15477_s22 + $0x1d08] sm:$0xff] }
 0x2ef   : > { %10837 = vmatprep.subr.bf16.mxu1 %v13916_v53  ;;  %v1313_v55 = vld [vmem:[%s15477_s22 + $0x1b28] sm:$0xff]  ;;  %v14075_v11 = vcombine.low %v1373_v48, %v1377_v30 }
 0x2f0   : > { %v14012_v4 = vcombine.high %v1309_v54, %v1313_v55  ;;  %v1369_v13 = vld [vmem:[%s15477_s22 + $0x1ce8] sm:$0xff]  ;;  %v14011_v39 = vcombine.low %v1309_v54, %v1313_v55 }
 0x2f1   : > { %10813 = vmatpush2.bf16.msra.mxu0 %v13851_v58  ;;  %v1301_v9 = vld [vmem:[%s15477_s22 + $0x1ac8] sm:$0xff] }
 0x2f2   : > { %10838 = vmatpush1.bf16.msra.mxu1 %v13915_v63  ;;  %10864 = vmatprep.subr.bf16.mxu0 %v14100_v2  ;;  %v14019_v63 = vcombine.low %v1317_v34, %v1321_v38  ;;  %v14076_v2 = vcombine.high %v1373_v48, %v1377_v30  ;;  %v1305_v10 = vld [vmem:[%s15477_s22 + $0x1ae8] sm:$0xff] }
 0x2f3   : > { %10839 = vmatprep.subr.bf16.mxu1 %v14036_v6  ;;  %v1365_v6 = vld [vmem:[%s15477_s22 + $0x1cc8] sm:$0xff] }
 0x2f4   : > { %v10570_v5 = vpop.f32.mrf.mxu0  ;;  %10815 = vmatmul.mubr.bf16.vlgmr.msra.gmra.mxu0 %v15748_v7  ;;  %v1297_v26 = vld [vmem:[%s15477_s22 + $0x1aa8] sm:$0xff]  ;;  %v14067_v27 = vcombine.low %v1365_v6, %v1369_v13 }
 0x2f5   : > { %v10571_v25 = vadd.f32 %v10570_v5, %v10530_v42  ;;  %10865 = vmatpush1.bf16.msra.mxu0 %v14099_v18  ;;  %10896 = vmatprep.mubr.bf16.mxu0 %v15758_v19  ;;  %v14068_v18 = vcombine.high %v1365_v6, %v1369_v13  ;;  %v1361_v42 = vld [vmem:[%s15477_s22 + $0x1ca8] sm:$0xff] }
 0x2f6   : > { %10840 = vmatpush2.bf16.msra.mxu1 %v14035_v22  ;;  %v10572_v14 = vpop.f32.mrf.mxu0  ;;  %10866 = vmatprep.subr.bf16.mxu0 %v14092_v24  ;;  %v14004_v22 = vcombine.high %v1301_v9, %v1305_v10  ;;  %v1357_v24 = vld [vmem:[%s15477_s22 + $0x1c88] sm:$0xff] }
 0x2f7   : > { %v12176_v51 = vadd.f32 %v10571_v25, %v386_v31  ;;  %v10573_v46 = vadd.f32 %v10572_v14, %v10532_v62  ;;  %10841 = vmatprep.subr.bf16.mxu1 %v14028_v16  ;;  %v1293_v16 = vld [vmem:[%s15477_s22 + $0x1a88] sm:$0xff]  ;;  %v14003_v31 = vcombine.low %v1301_v9, %v1305_v10  ;;  %v14060_v5 = vcombine.high %v1357_v24, %v1361_v42 }
 0x2f8   : > { %v10574_v53 = vpop.f32.mrf.mxu0  ;;  %v13996_v34 = vcombine.high %v1293_v16, %v1297_v26  ;;  %v1349_v38 = vld [vmem:[%s15477_s22 + $0x1c48] sm:$0xff]  ;;  %v13995_v14 = vcombine.low %v1293_v16, %v1297_v26 }
 0x2f9   : > { %12184 = vst [vmem:[#allocation2 + $0x30] sm:$0xff] %v12176_v51  ;;  %v12177_v56 = vadd.f32 %v10573_v46, %v387_v23  ;;  %10867 = vmatpush1.bf16.msra.mxu0 %v14091_v40  ;;  %v1353_v62 = vld [vmem:[%s15477_s22 + $0x1c68] sm:$0xff]  ;;  %v14059_v23 = vcombine.low %v1357_v24, %v1361_v42 }
 0x2fa   : > { %10842 = vmatpush2.bf16.msra.mxu1 %v14027_v43  ;;  %v10575_v58 = vpop.f32.mrf.mxu0  ;;  %10868 = vmatprep.subr.bf16.mxu0 %v14084_v44  ;;  %v1285_v25 = vld [vmem:[%s15477_s22 + $0x1a48] sm:$0xff]  ;;  %v14052_v43 = vcombine.high %v1349_v38, %v1353_v62  ;;  %v14051_v30 = vcombine.low %v1349_v38, %v1353_v62 }
 0x2fb   : > { %12185 = vst [vmem:[#allocation2] sm:$0xff] %v12177_v56  ;;  %10843 = vmatprep.subr.bf16.mxu1 %v14020_v47  ;;  %v1289_v40 = vld [vmem:[%s15477_s22 + $0x1a68] sm:$0xff] }
 0x2fc   : > { %v13988_v44 = vcombine.high %v1285_v25, %v1289_v40  ;;  %v1341_v51 = vld [vmem:[%s15477_s22 + $0x1c08] sm:$0xff]  ;;  %v13987_v53 = vcombine.low %v1285_v25, %v1289_v40 }
 0x2fd   : > { %10869 = vmatpush1.bf16.msra.mxu0 %v14083_v28  ;;  %v1345_v46 = vld [vmem:[%s15477_s22 + $0x1c28] sm:$0xff] }
 0x2fe   : > { %10844 = vmatpush2.bf16.msra.mxu1 %v14019_v63  ;;  %10870 = vmatprep.subr.bf16.mxu0 %v14076_v2  ;;  %v1277_v47 = vld [vmem:[%s15477_s22 + $0x1a08] sm:$0xff]  ;;  %v14044_v54 = vcombine.high %v1341_v51, %v1345_v46  ;;  %v14043_v2 = vcombine.low %v1341_v51, %v1345_v46 }
 0x2ff   : > { %10845 = vmatprep.subr.bf16.mxu1 %v14012_v4  ;;  %v1281_v48 = vld [vmem:[%s15477_s22 + $0x1a28] sm:$0xff] }
 0x300   : > { %v13980_v55 = vcombine.high %v1277_v47, %v1281_v48  ;;  %v1461_v56 = vld [vmem:[%s15477_s22 + $0x1fc8] sm:$0xff]  ;;  %v13979_v4 = vcombine.low %v1277_v47, %v1281_v48 }
 0x301   : > { %10871 = vmatpush1.bf16.msra.mxu0 %v14075_v11  ;;  %v1465_v28 = vld [vmem:[%s15477_s22 + $0x1fe8] sm:$0xff] }
 0x302   : > { %10846 = vmatpush2.bf16.msra.mxu1 %v14011_v39  ;;  %10872 = vmatprep.subr.bf16.mxu0 %v14068_v18  ;;  %v1525_v58 = vld [vmem:[%s15477_s22 + $0x21c8] sm:$0xff]  ;;  %v14164_v6 = vcombine.high %v1461_v56, %v1465_v28  ;;  %v14163_v18 = vcombine.low %v1461_v56, %v1465_v28 }
 0x303   : > { %10847 = vmatprep.subr.bf16.mxu1 %v14004_v22  ;;  %v1529_v63 = vld [vmem:[%s15477_s22 + $0x21e8] sm:$0xff] }
 0x304   : > { %v14228_v13 = vcombine.high %v1525_v58, %v1529_v63  ;;  %v1453_v9 = vld [vmem:[%s15477_s22 + $0x1f88] sm:$0xff]  ;;  %v14227_v22 = vcombine.low %v1525_v58, %v1529_v63 }
 0x305   : > { %10873 = vmatpush1.bf16.msra.mxu0 %v14067_v27  ;;  %v1457_v10 = vld [vmem:[%s15477_s22 + $0x1fa8] sm:$0xff] }
 0x306   : > { %10848 = vmatpush2.bf16.msra.mxu1 %v14003_v31  ;;  %10874 = vmatprep.subr.bf16.mxu0 %v14060_v5  ;;  %v1517_v11 = vld [vmem:[%s15477_s22 + $0x2188] sm:$0xff]  ;;  %v14156_v24 = vcombine.high %v1453_v9, %v1457_v10 }
 0x307   : > { %10849 = vmatprep.subr.bf16.mxu1 %v13996_v34  ;;  %v1521_v39 = vld [vmem:[%s15477_s22 + $0x21a8] sm:$0xff]  ;;  %v14155_v34 = vcombine.low %v1453_v9, %v1457_v10 }
 0x308   : > { %v14220_v42 = vcombine.high %v1517_v11, %v1521_v39  ;;  %v1445_v16 = vld [vmem:[%s15477_s22 + $0x1f48] sm:$0xff]  ;;  %v14219_v38 = vcombine.low %v1517_v11, %v1521_v39 }
 0x309   : > { %10875 = vmatpush1.bf16.msra.mxu0 %v14059_v23  ;;  %v1449_v26 = vld [vmem:[%s15477_s22 + $0x1f68] sm:$0xff] }
 0x30a   : > { %10850 = vmatpush2.bf16.msra.mxu1 %v13995_v14  ;;  %10876 = vmatprep.subr.bf16.mxu0 %v14052_v43  ;;  %v1509_v27 = vld [vmem:[%s15477_s22 + $0x2148] sm:$0xff]  ;;  %v14148_v62 = vcombine.high %v1445_v16, %v1449_v26  ;;  %v14147_v46 = vcombine.low %v1445_v16, %v1449_v26 }
 0x30b   : > { %10851 = vmatprep.subr.bf16.mxu1 %v13988_v44  ;;  %v1513_v31 = vld [vmem:[%s15477_s22 + $0x2168] sm:$0xff] }
 0x30c   : > { %v14212_v40 = vcombine.high %v1509_v27, %v1513_v31  ;;  %v1437_v23 = vld [vmem:[%s15477_s22 + $0x1f08] sm:$0xff]  ;;  %v14211_v47 = vcombine.low %v1509_v27, %v1513_v31 }
 0x30d   : > { %10877 = vmatpush1.bf16.msra.mxu0 %v14051_v30  ;;  %v1441_v14 = vld [vmem:[%s15477_s22 + $0x1f28] sm:$0xff] }
 0x30e   : > { %10852 = vmatpush2.bf16.msra.mxu1 %v13987_v53  ;;  %10878 = vmatprep.subr.bf16.mxu0 %v14044_v54  ;;  %v1501_v43 = vld [vmem:[%s15477_s22 + $0x2108] sm:$0xff]  ;;  %v14140_v48 = vcombine.high %v1437_v23, %v1441_v14  ;;  %v14139_v58 = vcombine.low %v1437_v23, %v1441_v14 }
 0x30f   : > { %10853 = vmatprep.subr.bf16.mxu1 %v13980_v55  ;;  %v1505_v44 = vld [vmem:[%s15477_s22 + $0x2128] sm:$0xff] }
 0x310   : > { %v14204_v53 = vcombine.high %v1501_v43, %v1505_v44  ;;  %v1429_v54 = vld [vmem:[%s15477_s22 + $0x1ec8] sm:$0xff]  ;;  %v14203_v63 = vcombine.low %v1501_v43, %v1505_v44 }
 0x311   : > { %10879 = vmatpush1.bf16.msra.mxu0 %v14043_v2  ;;  %v1433_v55 = vld [vmem:[%s15477_s22 + $0x1ee8] sm:$0xff] }
 0x312   : > { %10854 = vmatpush2.bf16.msra.mxu1 %v13979_v4  ;;  %10880 = vmatprep.subr.bf16.mxu0 %v14164_v6  ;;  %v1493_v56 = vld [vmem:[%s15477_s22 + $0x20c8] sm:$0xff]  ;;  %v14132_v2 = vcombine.high %v1429_v54, %v1433_v55  ;;  %v14131_v11 = vcombine.low %v1429_v54, %v1433_v55 }
 0x313   : > { %10905 = vmatprep.subr.bf16.mxu1 %v14228_v13  ;;  %v1497_v28 = vld [vmem:[%s15477_s22 + $0x20e8] sm:$0xff] }
 0x314   : > { %v14196_v4 = vcombine.high %v1493_v56, %v1497_v28  ;;  %v1421_v6 = vld [vmem:[%s15477_s22 + $0x1e88] sm:$0xff]  ;;  %v14195_v39 = vcombine.low %v1493_v56, %v1497_v28 }
 0x315   : > { %v16312_v5 = vpop.f32.mrf.mxu1  ;;  %10856 = vmatmul.mubr.bf16.vlgmr.msra.gmra.mxu1 %v15823_v45  ;;  %10881 = vmatpush2.bf16.msra.mxu0 %v14163_v18  ;;  %v1425_v13 = vld [vmem:[%s15477_s22 + $0x1ea8] sm:$0xff] }
 0x316   : > { %10906 = vmatpush1.bf16.msra.mxu1 %v14227_v22  ;;  %10882 = vmatprep.subr.bf16.mxu0 %v14156_v24  ;;  %v1485_v9 = vld [vmem:[%s15477_s22 + $0x2088] sm:$0xff]  ;;  %v14124_v18 = vcombine.high %v1421_v6, %v1425_v13  ;;  %v14123_v27 = vcombine.low %v1421_v6, %v1425_v13 }
 0x317   : > { %v16315_v25 = vpop.f32.mrf.mxu1  ;;  %10907 = vmatprep.subr.bf16.mxu1 %v14220_v42  ;;  %10937 = vmatprep.mubr.bf16.mxu1 %v15833_v61  ;;  %v1489_v10 = vld [vmem:[%s15477_s22 + $0x20a8] sm:$0xff] }
 0x318   : > { %v14188_v22 = vcombine.high %v1485_v9, %v1489_v10  ;;  %v1413_v24 = vld [vmem:[%s15477_s22 + $0x1e48] sm:$0xff]  ;;  %v14187_v31 = vcombine.low %v1485_v9, %v1489_v10 }
 0x319   : > { %v10615_v51 = vpop.f32.mrf.mxu1  ;;  %10883 = vmatpush2.bf16.msra.mxu0 %v14155_v34  ;;  %v1417_v42 = vld [vmem:[%s15477_s22 + $0x1e68] sm:$0xff] }
 0x31a   : > { %10908 = vmatpush1.bf16.msra.mxu1 %v14219_v38  ;;  %10884 = vmatprep.subr.bf16.mxu0 %v14148_v62  ;;  %v1477_v16 = vld [vmem:[%s15477_s22 + $0x2048] sm:$0xff]  ;;  %v14116_v34 = vcombine.high %v1413_v24, %v1417_v42  ;;  %v14115_v43 = vcombine.low %v1413_v24, %v1417_v42 }
 0x31b   : > { %v10616_v30 = vpop.f32.mrf.mxu1  ;;  %10909 = vmatprep.subr.bf16.mxu1 %v14212_v40  ;;  %v1481_v26 = vld [vmem:[%s15477_s22 + $0x2068] sm:$0xff] }
 0x31c   : > { %v14180_v38 = vcombine.high %v1477_v16, %v1481_v26  ;;  %v1405_v62 = vld [vmem:[%s15477_s22 + $0x1e08] sm:$0xff]  ;;  %v14179_v44 = vcombine.low %v1477_v16, %v1481_v26 }
 0x31d   : > { %10885 = vmatpush2.bf16.msra.mxu0 %v14147_v46  ;;  %v1409_v40 = vld [vmem:[%s15477_s22 + $0x1e28] sm:$0xff] }
 0x31e   : > { %10910 = vmatpush1.bf16.msra.mxu1 %v14211_v47  ;;  %10886 = vmatprep.subr.bf16.mxu0 %v14140_v48  ;;  %v1469_v23 = vld [vmem:[%s15477_s22 + $0x2008] sm:$0xff]  ;;  %v14108_v51 = vcombine.high %v1405_v62, %v1409_v40  ;;  %v14107_v54 = vcombine.low %v1405_v62, %v1409_v40 }
 0x31f   : > { %10911 = vmatprep.subr.bf16.mxu1 %v14204_v53  ;;  %v1473_v14 = vld [vmem:[%s15477_s22 + $0x2028] sm:$0xff] }
 0x320   : > { %v14172_v46 = vcombine.high %v1469_v23, %v1473_v14  ;;  %v1653_v47 = vld [vmem:[%s15477_s22 + $0x25c8] sm:$0xff]  ;;  %v14171_v55 = vcombine.low %v1469_v23, %v1473_v14 }
 0x321   : > { %10887 = vmatpush2.bf16.msra.mxu0 %v14139_v58  ;;  %v1657_v48 = vld [vmem:[%s15477_s22 + $0x25e8] sm:$0xff] }
 0x322   : > { %10912 = vmatpush1.bf16.msra.mxu1 %v14203_v63  ;;  %10888 = vmatprep.subr.bf16.mxu0 %v14132_v2  ;;  %v1589_v30 = vld [vmem:[%s15477_s22 + $0x23c8] sm:$0xff]  ;;  %v14356_v56 = vcombine.high %v1653_v47, %v1657_v48  ;;  %v14355_v6 = vcombine.low %v1653_v47, %v1657_v48 }
 0x323   : > { %10913 = vmatprep.subr.bf16.mxu1 %v14196_v4  ;;  %v1593_v53 = vld [vmem:[%s15477_s22 + $0x23e8] sm:$0xff] }
 0x324   : > { %v14292_v28 = vcombine.high %v1589_v30, %v1593_v53  ;;  %v1645_v58 = vld [vmem:[%s15477_s22 + $0x2588] sm:$0xff]  ;;  %v14291_v13 = vcombine.low %v1589_v30, %v1593_v53 }
 0x325   : > { %10889 = vmatpush2.bf16.msra.mxu0 %v14131_v11  ;;  %v1649_v63 = vld [vmem:[%s15477_s22 + $0x25a8] sm:$0xff] }
 0x326   : > { %10914 = vmatpush1.bf16.msra.mxu1 %v14195_v39  ;;  %10890 = vmatprep.subr.bf16.mxu0 %v14124_v18  ;;  %v1581_v2 = vld [vmem:[%s15477_s22 + $0x2388] sm:$0xff]  ;;  %v14348_v9 = vcombine.high %v1645_v58, %v1649_v63  ;;  %v14347_v16 = vcombine.low %v1645_v58, %v1649_v63 }
 0x327   : > { %10915 = vmatprep.subr.bf16.mxu1 %v14188_v22  ;;  %v1585_v4 = vld [vmem:[%s15477_s22 + $0x23a8] sm:$0xff] }
 0x328   : > { %v14284_v10 = vcombine.high %v1581_v2, %v1585_v4  ;;  %v1637_v11 = vld [vmem:[%s15477_s22 + $0x2548] sm:$0xff] }
 0x329   : > { %10891 = vmatpush2.bf16.msra.mxu0 %v14123_v27  ;;  %v1641_v39 = vld [vmem:[%s15477_s22 + $0x2568] sm:$0xff]  ;;  %v14283_v27 = vcombine.low %v1581_v2, %v1585_v4 }
 0x32a   : > { %10916 = vmatpush1.bf16.msra.mxu1 %v14187_v31  ;;  %10892 = vmatprep.subr.bf16.mxu0 %v14116_v34  ;;  %v1573_v22 = vld [vmem:[%s15477_s22 + $0x2348] sm:$0xff]  ;;  %v14340_v31 = vcombine.high %v1637_v11, %v1641_v39 }
 0x32b   : > { %10917 = vmatprep.subr.bf16.mxu1 %v14180_v38  ;;  %v1577_v24 = vld [vmem:[%s15477_s22 + $0x2368] sm:$0xff] }
 0x32c   : > { %v14276_v38 = vcombine.high %v1573_v22, %v1577_v24  ;;  %v1629_v62 = vld [vmem:[%s15477_s22 + $0x2508] sm:$0xff] }
 0x32d   : > { %10893 = vmatpush2.bf16.msra.mxu0 %v14115_v43  ;;  %v1565_v23 = vld [vmem:[%s15477_s22 + $0x2308] sm:$0xff]  ;;  %v14339_v43 = vcombine.low %v1637_v11, %v1641_v39 }
 0x32e   : > { %10918 = vmatpush1.bf16.msra.mxu1 %v14179_v44  ;;  %10894 = vmatprep.subr.bf16.mxu0 %v14108_v51  ;;  %v1569_v14 = vld [vmem:[%s15477_s22 + $0x2328] sm:$0xff]  ;;  %v14275_v51 = vcombine.low %v1573_v22, %v1577_v24 }
 0x32f   : > { %10919 = vmatprep.subr.bf16.mxu1 %v14172_v46  ;;  %v14268_v46 = vcombine.high %v1565_v23, %v1569_v14  ;;  %v1621_v47 = vld [vmem:[%s15477_s22 + $0x24c8] sm:$0xff] }
 0x330   : > { %v1625_v48 = vld [vmem:[%s15477_s22 + $0x24e8] sm:$0xff] }
 0x331   : > { %10895 = vmatpush2.bf16.msra.mxu0 %v14107_v54  ;;  %v1557_v30 = vld [vmem:[%s15477_s22 + $0x22c8] sm:$0xff] }
 0x332   : > { %10920 = vmatpush1.bf16.msra.mxu1 %v14171_v55  ;;  %10946 = vmatprep.subr.bf16.mxu0 %v14356_v56  ;;  %v1561_v53 = vld [vmem:[%s15477_s22 + $0x22e8] sm:$0xff]  ;;  %v14267_v55 = vcombine.low %v1565_v23, %v1569_v14  ;;  %v14324_v56 = vcombine.high %v1621_v47, %v1625_v48 }
 0x333   : > { %10921 = vmatprep.subr.bf16.mxu1 %v14292_v28  ;;  %v14260_v28 = vcombine.high %v1557_v30, %v1561_v53  ;;  %v1613_v58 = vld [vmem:[%s15477_s22 + $0x2488] sm:$0xff] }
 0x334   : > { %v10652_v18 = vpop.f32.mrf.mxu0  ;;  %10897 = vmatmul.mubr.bf16.vlgmr.msra.gmra.mxu0 %v15828_v50  ;;  %v1617_v63 = vld [vmem:[%s15477_s22 + $0x24a8] sm:$0xff] }
 0x335   : > { %v16352_v42 = vadd.f32 %v10652_v18, %v16312_v5  ;;  %10947 = vmatpush1.bf16.msra.mxu0 %v14355_v6  ;;  %10978 = vmatprep.mubr.bf16.mxu0 %v15838_v1  ;;  %v1633_v5 = vld [vmem:[%s15477_s22 + $0x2528] sm:$0xff]  ;;  %v14323_v6 = vcombine.low %v1621_v47, %v1625_v48  ;;  %v14315_v24 = vcombine.low %v1613_v58, %v1617_v63 }
 0x336   : > { %10922 = vmatpush2.bf16.msra.mxu1 %v14291_v13  ;;  %v10654_v26 = vpop.f32.mrf.mxu0  ;;  %10948 = vmatprep.subr.bf16.mxu0 %v14348_v9  ;;  %v14331_v54 = vcombine.low %v1629_v62, %v1633_v5  ;;  %v1549_v2 = vld [vmem:[%s15477_s22 + $0x2288] sm:$0xff]  ;;  %v14259_v13 = vcombine.low %v1557_v30, %v1561_v53  ;;  %v14316_v9 = vcombine.high %v1613_v58, %v1617_v63 }
 0x337   : > { %v16356_v34 = vadd.f32 %v10654_v26, %v16315_v25  ;;  %10923 = vmatprep.subr.bf16.mxu1 %v14284_v10  ;;  %v14332_v25 = vcombine.high %v1629_v62, %v1633_v5  ;;  %v1553_v4 = vld [vmem:[%s15477_s22 + $0x22a8] sm:$0xff] }
 0x338   : > { %v10656_v40 = vpop.f32.mrf.mxu0  ;;  %v14252_v10 = vcombine.high %v1549_v2, %v1553_v4  ;;  %v1605_v11 = vld [vmem:[%s15477_s22 + $0x2448] sm:$0xff] }
 0x339   : > { %10949 = vmatpush1.bf16.msra.mxu0 %v14347_v16  ;;  %v1609_v39 = vld [vmem:[%s15477_s22 + $0x2468] sm:$0xff]  ;;  %v14251_v16 = vcombine.low %v1549_v2, %v1553_v4 }
 0x33a   : > { %10924 = vmatpush2.bf16.msra.mxu1 %v14283_v27  ;;  %v10657_v44 = vpop.f32.mrf.mxu0  ;;  %10950 = vmatprep.subr.bf16.mxu0 %v14340_v31  ;;  %v1541_v18 = vld [vmem:[%s15477_s22 + $0x2248] sm:$0xff]  ;;  %v14308_v26 = vcombine.high %v1605_v11, %v1609_v39  ;;  %v14307_v40 = vcombine.low %v1605_v11, %v1609_v39 }
 0x33b   : > { %10925 = vmatprep.subr.bf16.mxu1 %v14276_v38  ;;  %v1545_v22 = vld [vmem:[%s15477_s22 + $0x2268] sm:$0xff] }
 0x33c   : > { %v14244_v27 = vcombine.high %v1541_v18, %v1545_v22  ;;  %v1597_v31 = vld [vmem:[%s15477_s22 + $0x2408] sm:$0xff]  ;;  %v14243_v23 = vcombine.low %v1541_v18, %v1545_v22 }
 0x33d   : > { %10951 = vmatpush1.bf16.msra.mxu0 %v14339_v43  ;;  %v1601_v38 = vld [vmem:[%s15477_s22 + $0x2428] sm:$0xff] }
 0x33e   : > { %10926 = vmatpush2.bf16.msra.mxu1 %v14275_v51  ;;  %10952 = vmatprep.subr.bf16.mxu0 %v14332_v25  ;;  %v1533_v62 = vld [vmem:[%s15477_s22 + $0x2208] sm:$0xff]  ;;  %v14300_v14 = vcombine.high %v1597_v31, %v1601_v38  ;;  %v14299_v47 = vcombine.low %v1597_v31, %v1601_v38 }
 0x33f   : > { %10927 = vmatprep.subr.bf16.mxu1 %v14268_v46  ;;  %v1537_v5 = vld [vmem:[%s15477_s22 + $0x2228] sm:$0xff] }
 0x340   : > { %v14236_v43 = vcombine.high %v1533_v62, %v1537_v5  ;;  %v1717_v44 = vld [vmem:[%s15477_s22 + $0x27c8] sm:$0xff]  ;;  %v14235_v48 = vcombine.low %v1533_v62, %v1537_v5 }
 0x341   : > { %10953 = vmatpush1.bf16.msra.mxu0 %v14331_v54  ;;  %v1721_v51 = vld [vmem:[%s15477_s22 + $0x27e8] sm:$0xff] }
 0x342   : > { %10928 = vmatpush2.bf16.msra.mxu1 %v14267_v55  ;;  %10954 = vmatprep.subr.bf16.mxu0 %v14324_v56  ;;  %v1781_v25 = vld [vmem:[%s15477_s22 + $0x29c8] sm:$0xff]  ;;  %v14420_v30 = vcombine.high %v1717_v44, %v1721_v51  ;;  %v14419_v58 = vcombine.low %v1717_v44, %v1721_v51 }
 0x343   : > { %10929 = vmatprep.subr.bf16.mxu1 %v14260_v28  ;;  %v1785_v46 = vld [vmem:[%s15477_s22 + $0x29e8] sm:$0xff] }
 0x344   : > { %v14484_v53 = vcombine.high %v1781_v25, %v1785_v46  ;;  %v1709_v54 = vld [vmem:[%s15477_s22 + $0x2788] sm:$0xff]  ;;  %v14483_v63 = vcombine.low %v1781_v25, %v1785_v46 }
 0x345   : > { %10955 = vmatpush1.bf16.msra.mxu0 %v14323_v6  ;;  %v1713_v55 = vld [vmem:[%s15477_s22 + $0x27a8] sm:$0xff] }
 0x346   : > { %10930 = vmatpush2.bf16.msra.mxu1 %v14259_v13  ;;  %10956 = vmatprep.subr.bf16.mxu0 %v14316_v9  ;;  %v1773_v56 = vld [vmem:[%s15477_s22 + $0x2988] sm:$0xff]  ;;  %v14412_v2 = vcombine.high %v1709_v54, %v1713_v55  ;;  %v14411_v39 = vcombine.low %v1709_v54, %v1713_v55 }
 0x347   : > { %10931 = vmatprep.subr.bf16.mxu1 %v14252_v10  ;;  %v1777_v28 = vld [vmem:[%s15477_s22 + $0x29a8] sm:$0xff] }
 0x348   : > { %v14476_v4 = vcombine.high %v1773_v56, %v1777_v28  ;;  %v1701_v6 = vld [vmem:[%s15477_s22 + $0x2748] sm:$0xff]  ;;  %v14475_v22 = vcombine.low %v1773_v56, %v1777_v28 }
 0x349   : > { %10957 = vmatpush1.bf16.msra.mxu0 %v14315_v24  ;;  %v1705_v13 = vld [vmem:[%s15477_s22 + $0x2768] sm:$0xff] }
 0x34a   : > { %10932 = vmatpush2.bf16.msra.mxu1 %v14251_v16  ;;  %10958 = vmatprep.subr.bf16.mxu0 %v14308_v26  ;;  %v1765_v9 = vld [vmem:[%s15477_s22 + $0x2948] sm:$0xff]  ;;  %v14404_v24 = vcombine.high %v1701_v6, %v1705_v13 }
 0x34b   : > { %10933 = vmatprep.subr.bf16.mxu1 %v14244_v27  ;;  %v1769_v10 = vld [vmem:[%s15477_s22 + $0x2968] sm:$0xff] }
 0x34c   : > { %v14468_v26 = vcombine.high %v1765_v9, %v1769_v10  ;;  %v1693_v27 = vld [vmem:[%s15477_s22 + $0x2708] sm:$0xff] }
 0x34d   : > { %10959 = vmatpush1.bf16.msra.mxu0 %v14307_v40  ;;  %v1697_v31 = vld [vmem:[%s15477_s22 + $0x2728] sm:$0xff]  ;;  %v14403_v40 = vcombine.low %v1701_v6, %v1705_v13 }
 0x34e   : > { %10934 = vmatpush2.bf16.msra.mxu1 %v14243_v23  ;;  %10960 = vmatprep.subr.bf16.mxu0 %v14300_v14  ;;  %v1761_v62 = vld [vmem:[%s15477_s22 + $0x2928] sm:$0xff]  ;;  %v14467_v23 = vcombine.low %v1765_v9, %v1769_v10  ;;  %v14396_v14 = vcombine.high %v1693_v27, %v1697_v31 }
 0x34f   : > { %10935 = vmatprep.subr.bf16.mxu1 %v14236_v43  ;;  %v1685_v51 = vld [vmem:[%s15477_s22 + $0x26c8] sm:$0xff] }
 0x350   : > { %v1749_v25 = vld [vmem:[%s15477_s22 + $0x28c8] sm:$0xff] }
 0x351   : > { %10961 = vmatpush1.bf16.msra.mxu0 %v14299_v47  ;;  %v1753_v46 = vld [vmem:[%s15477_s22 + $0x28e8] sm:$0xff]  ;;  %v14395_v47 = vcombine.low %v1693_v27, %v1697_v31 }
 0x352   : > { %10936 = vmatpush2.bf16.msra.mxu1 %v14235_v48  ;;  %10962 = vmatprep.subr.bf16.mxu0 %v14420_v30  ;;  %v1677_v54 = vld [vmem:[%s15477_s22 + $0x2688] sm:$0xff] }
 0x353   : > { %10987 = vmatprep.subr.bf16.mxu1 %v14484_v53  ;;  %v14452_v53 = vcombine.high %v1749_v25, %v1753_v46  ;;  %v1681_v55 = vld [vmem:[%s15477_s22 + $0x26a8] sm:$0xff] }
 0x354   : > { %v1741_v56 = vld [vmem:[%s15477_s22 + $0x2888] sm:$0xff] }
 0x355   : > { %v10693_v11 = vpop.f32.mrf.mxu1  ;;  %10938 = vmatmul.mubr.bf16.vlgmr.msra.gmra.mxu1 %v15907_v57  ;;  %10963 = vmatpush2.bf16.msra.mxu0 %v14419_v58  ;;  %v1745_v28 = vld [vmem:[%s15477_s22 + $0x28a8] sm:$0xff] }
 0x356   : > { %v16392_v18 = vadd.f32 %v10693_v11, %v16352_v42  ;;  %10988 = vmatpush1.bf16.msra.mxu1 %v14483_v63  ;;  %10964 = vmatprep.subr.bf16.mxu0 %v14412_v2  ;;  %v1757_v42 = vld [vmem:[%s15477_s22 + $0x2908] sm:$0xff]  ;;  %v14451_v63 = vcombine.low %v1749_v25, %v1753_v46  ;;  %v14380_v2 = vcombine.high %v1677_v54, %v1681_v55 }
 0x357   : > { %v10695_v16 = vpop.f32.mrf.mxu1  ;;  %10989 = vmatprep.subr.bf16.mxu1 %v14476_v4  ;;  %11019 = vmatprep.mubr.bf16.mxu1 %v15917_v12  ;;  %v14460_v44 = vcombine.high %v1757_v42, %v1761_v62  ;;  %v14459_v48 = vcombine.low %v1757_v42, %v1761_v62  ;;  %v14444_v4 = vcombine.high %v1741_v56, %v1745_v28  ;;  %v1669_v6 = vld [vmem:[%s15477_s22 + $0x2648] sm:$0xff] }
 0x358   : > { %v16398_v38 = vadd.f32 %v10695_v16, %v16356_v34  ;;  %v1689_v34 = vld [vmem:[%s15477_s22 + $0x26e8] sm:$0xff]  ;;  %v14379_v11 = vcombine.low %v1677_v54, %v1681_v55 }
 0x359   : > { %v10697_v5 = vpop.f32.mrf.mxu1  ;;  %10965 = vmatpush2.bf16.msra.mxu0 %v14411_v39  ;;  %v14388_v30 = vcombine.high %v1685_v51, %v1689_v34  ;;  %v14387_v58 = vcombine.low %v1685_v51, %v1689_v34  ;;  %v1673_v13 = vld [vmem:[%s15477_s22 + $0x2668] sm:$0xff]  ;;  %v14443_v39 = vcombine.low %v1741_v56, %v1745_v28 }
 0x35a   : > { %10990 = vmatpush1.bf16.msra.mxu1 %v14475_v22  ;;  %10966 = vmatprep.subr.bf16.mxu0 %v14404_v24  ;;  %v1733_v9 = vld [vmem:[%s15477_s22 + $0x2848] sm:$0xff]  ;;  %v14372_v22 = vcombine.high %v1669_v6, %v1673_v13  ;;  %v14371_v42 = vcombine.low %v1669_v6, %v1673_v13 }
 0x35b   : > { %v10698_v43 = vpop.f32.mrf.mxu1  ;;  %10991 = vmatprep.subr.bf16.mxu1 %v14468_v26  ;;  %v1737_v10 = vld [vmem:[%s15477_s22 + $0x2868] sm:$0xff] }
 0x35c   : > { %v14436_v24 = vcombine.high %v1733_v9, %v1737_v10  ;;  %v1661_v16 = vld [vmem:[%s15477_s22 + $0x2608] sm:$0xff]  ;;  %v14435_v62 = vcombine.low %v1733_v9, %v1737_v10 }
 0x35d   : > { %10967 = vmatpush2.bf16.msra.mxu0 %v14403_v40  ;;  %v1665_v26 = vld [vmem:[%s15477_s22 + $0x2628] sm:$0xff] }
 0x35e   : > { %10992 = vmatpush1.bf16.msra.mxu1 %v14467_v23  ;;  %10968 = vmatprep.subr.bf16.mxu0 %v14396_v14  ;;  %v1725_v27 = vld [vmem:[%s15477_s22 + $0x2808] sm:$0xff]  ;;  %v14364_v5 = vcombine.high %v1661_v16, %v1665_v26  ;;  %v14363_v51 = vcombine.low %v1661_v16, %v1665_v26 }
 0x35f   : > { %10993 = vmatprep.subr.bf16.mxu1 %v14460_v44  ;;  %v1729_v31 = vld [vmem:[%s15477_s22 + $0x2828] sm:$0xff] }
 0x360   : > { %v14428_v40 = vcombine.high %v1725_v27, %v1729_v31  ;;  %v1909_v23 = vld [vmem:[%s15477_s22 + $0x2dc8] sm:$0xff]  ;;  %v14427_v34 = vcombine.low %v1725_v27, %v1729_v31 }
 0x361   : > { %10969 = vmatpush2.bf16.msra.mxu0 %v14395_v47  ;;  %v1913_v14 = vld [vmem:[%s15477_s22 + $0x2de8] sm:$0xff] }
 0x362   : > { %10994 = vmatpush1.bf16.msra.mxu1 %v14459_v48  ;;  %10970 = vmatprep.subr.bf16.mxu0 %v14388_v30  ;;  %v1845_v43 = vld [vmem:[%s15477_s22 + $0x2bc8] sm:$0xff]  ;;  %v14612_v25 = vcombine.high %v1909_v23, %v1913_v14  ;;  %v14611_v54 = vcombine.low %v1909_v23, %v1913_v14 }
 0x363   : > { %10995 = vmatprep.subr.bf16.mxu1 %v14452_v53  ;;  %v1849_v44 = vld [vmem:[%s15477_s22 + $0x2be8] sm:$0xff] }
 0x364   : > { %v14548_v46 = vcombine.high %v1845_v43, %v1849_v44  ;;  %v1901_v47 = vld [vmem:[%s15477_s22 + $0x2d88] sm:$0xff]  ;;  %v14547_v55 = vcombine.low %v1845_v43, %v1849_v44 }
 0x365   : > { %10971 = vmatpush2.bf16.msra.mxu0 %v14387_v58  ;;  %v1905_v48 = vld [vmem:[%s15477_s22 + $0x2da8] sm:$0xff] }
 0x366   : > { %10996 = vmatpush1.bf16.msra.mxu1 %v14451_v63  ;;  %10972 = vmatprep.subr.bf16.mxu0 %v14380_v2  ;;  %v1837_v30 = vld [vmem:[%s15477_s22 + $0x2b88] sm:$0xff]  ;;  %v14604_v56 = vcombine.high %v1901_v47, %v1905_v48  ;;  %v14603_v9 = vcombine.low %v1901_v47, %v1905_v48 }
 0x367   : > { %10997 = vmatprep.subr.bf16.mxu1 %v14444_v4  ;;  %v1841_v53 = vld [vmem:[%s15477_s22 + $0x2ba8] sm:$0xff] }
 0x368   : > { %v14540_v28 = vcombine.high %v1837_v30, %v1841_v53  ;;  %v1893_v58 = vld [vmem:[%s15477_s22 + $0x2d48] sm:$0xff] }
 0x369   : > { %10973 = vmatpush2.bf16.msra.mxu0 %v14379_v11  ;;  %v1897_v63 = vld [vmem:[%s15477_s22 + $0x2d68] sm:$0xff]  ;;  %v14539_v11 = vcombine.low %v1837_v30, %v1841_v53 }
 0x36a   : > { %10998 = vmatpush1.bf16.msra.mxu1 %v14443_v39  ;;  %10974 = vmatprep.subr.bf16.mxu0 %v14372_v22  ;;  %v1829_v4 = vld [vmem:[%s15477_s22 + $0x2b48] sm:$0xff]  ;;  %v14596_v39 = vcombine.high %v1893_v58, %v1897_v63 }
 0x36b   : > { %10999 = vmatprep.subr.bf16.mxu1 %v14436_v24  ;;  %v1833_v6 = vld [vmem:[%s15477_s22 + $0x2b68] sm:$0xff] }
 0x36c   : > { %v14532_v24 = vcombine.high %v1829_v4, %v1833_v6  ;;  %v1885_v16 = vld [vmem:[%s15477_s22 + $0x2d08] sm:$0xff] }
 0x36d   : > { %10975 = vmatpush2.bf16.msra.mxu0 %v14371_v42  ;;  %v1821_v27 = vld [vmem:[%s15477_s22 + $0x2b08] sm:$0xff]  ;;  %v14595_v42 = vcombine.low %v1893_v58, %v1897_v63 }
 0x36e   : > { %11000 = vmatpush1.bf16.msra.mxu1 %v14435_v62  ;;  %10976 = vmatprep.subr.bf16.mxu0 %v14364_v5  ;;  %v1825_v31 = vld [vmem:[%s15477_s22 + $0x2b28] sm:$0xff]  ;;  %v14531_v5 = vcombine.low %v1829_v4, %v1833_v6 }
 0x36f   : > { %11001 = vmatprep.subr.bf16.mxu1 %v14428_v40  ;;  %v14524_v40 = vcombine.high %v1821_v27, %v1825_v31  ;;  %v1877_v23 = vld [vmem:[%s15477_s22 + $0x2cc8] sm:$0xff] }
 0x370   : > { %v1881_v14 = vld [vmem:[%s15477_s22 + $0x2ce8] sm:$0xff] }
 0x371   : > { %10977 = vmatpush2.bf16.msra.mxu0 %v14363_v51  ;;  %v1813_v43 = vld [vmem:[%s15477_s22 + $0x2ac8] sm:$0xff] }
 0x372   : > { %11002 = vmatpush1.bf16.msra.mxu1 %v14427_v34  ;;  %11028 = vmatprep.subr.bf16.mxu0 %v14612_v25  ;;  %v1817_v44 = vld [vmem:[%s15477_s22 + $0x2ae8] sm:$0xff]  ;;  %v14523_v34 = vcombine.low %v1821_v27, %v1825_v31  ;;  %v14580_v25 = vcombine.high %v1877_v23, %v1881_v14 }
 0x373   : > { %11003 = vmatprep.subr.bf16.mxu1 %v14548_v46  ;;  %v14516_v46 = vcombine.high %v1813_v43, %v1817_v44  ;;  %v1869_v47 = vld [vmem:[%s15477_s22 + $0x2c88] sm:$0xff] }
 0x374   : > { %v10734_v2 = vpop.f32.mrf.mxu0  ;;  %10979 = vmatmul.mubr.bf16.vlgmr.msra.gmra.mxu0 %v15912_v0  ;;  %v1873_v48 = vld [vmem:[%s15477_s22 + $0x2ca8] sm:$0xff] }
 0x375   : > { %v16432_v13 = vadd.f32 %v10734_v2, %v16392_v18  ;;  %11029 = vmatpush1.bf16.msra.mxu0 %v14611_v54  ;;  %11060 = vmatprep.mubr.bf16.mxu0 %v15922_v20  ;;  %v1889_v18 = vld [vmem:[%s15477_s22 + $0x2d28] sm:$0xff]  ;;  %v14579_v54 = vcombine.low %v1877_v23, %v1881_v14  ;;  %v14571_v6 = vcombine.low %v1869_v47, %v1873_v48 }
 0x376   : > { %11004 = vmatpush2.bf16.msra.mxu1 %v14547_v55  ;;  %v10736_v10 = vpop.f32.mrf.mxu0  ;;  %11030 = vmatprep.subr.bf16.mxu0 %v14604_v56  ;;  %v14587_v51 = vcombine.low %v1885_v16, %v1889_v18  ;;  %v1805_v30 = vld [vmem:[%s15477_s22 + $0x2a88] sm:$0xff]  ;;  %v14515_v55 = vcombine.low %v1813_v43, %v1817_v44  ;;  %v14572_v56 = vcombine.high %v1869_v47, %v1873_v48 }
 0x377   : > { %v16436_v22 = vadd.f32 %v10736_v10, %v16398_v38  ;;  %11005 = vmatprep.subr.bf16.mxu1 %v14540_v28  ;;  %v14588_v38 = vcombine.high %v1885_v16, %v1889_v18  ;;  %v1809_v53 = vld [vmem:[%s15477_s22 + $0x2aa8] sm:$0xff] }
 0x378   : > { %v10738_v26 = vpop.f32.mrf.mxu0  ;;  %v14508_v28 = vcombine.high %v1805_v30, %v1809_v53  ;;  %v1861_v58 = vld [vmem:[%s15477_s22 + $0x2c48] sm:$0xff] }
 0x379   : > { %11031 = vmatpush1.bf16.msra.mxu0 %v14603_v9  ;;  %v1865_v63 = vld [vmem:[%s15477_s22 + $0x2c68] sm:$0xff]  ;;  %v14507_v9 = vcombine.low %v1805_v30, %v1809_v53 }
 0x37a   : > { %11006 = vmatpush2.bf16.msra.mxu1 %v14539_v11  ;;  %v10739_v62 = vpop.f32.mrf.mxu0  ;;  %11032 = vmatprep.subr.bf16.mxu0 %v14596_v39  ;;  %v1797_v2 = vld [vmem:[%s15477_s22 + $0x2a48] sm:$0xff]  ;;  %v14564_v10 = vcombine.high %v1861_v58, %v1865_v63  ;;  %v14563_v26 = vcombine.low %v1861_v58, %v1865_v63 }
 0x37b   : > { %11007 = vmatprep.subr.bf16.mxu1 %v14532_v24  ;;  %v1801_v4 = vld [vmem:[%s15477_s22 + $0x2a68] sm:$0xff] }
 0x37c   : > { %v14500_v11 = vcombine.high %v1797_v2, %v1801_v4  ;;  %v1853_v39 = vld [vmem:[%s15477_s22 + $0x2c08] sm:$0xff]  ;;  %v14499_v27 = vcombine.low %v1797_v2, %v1801_v4 }
 0x37d   : > { %11033 = vmatpush1.bf16.msra.mxu0 %v14595_v42  ;;  %v1857_v24 = vld [vmem:[%s15477_s22 + $0x2c28] sm:$0xff] }
 0x37e   : > { %11008 = vmatpush2.bf16.msra.mxu1 %v14531_v5  ;;  %11034 = vmatprep.subr.bf16.mxu0 %v14588_v38  ;;  %v1789_v16 = vld [vmem:[%s15477_s22 + $0x2a08] sm:$0xff]  ;;  %v14556_v31 = vcombine.high %v1853_v39, %v1857_v24  ;;  %v14555_v23 = vcombine.low %v1853_v39, %v1857_v24 }
 0x37f   : > { %11009 = vmatprep.subr.bf16.mxu1 %v14524_v40  ;;  %v1793_v18 = vld [vmem:[%s15477_s22 + $0x2a28] sm:$0xff] }
 0x380   : > { %v14492_v42 = vcombine.high %v1789_v16, %v1793_v18  ;;  %v1973_v62 = vld [vmem:[%s15477_s22 + $0x2fc8] sm:$0xff]  ;;  %v14491_v14 = vcombine.low %v1789_v16, %v1793_v18 }
 0x381   : > { %11035 = vmatpush1.bf16.msra.mxu0 %v14587_v51  ;;  %v1977_v5 = vld [vmem:[%s15477_s22 + $0x2fe8] sm:$0xff] }
 0x382   : > { %11010 = vmatpush2.bf16.msra.mxu1 %v14523_v34  ;;  %11036 = vmatprep.subr.bf16.mxu0 %v14580_v25  ;;  %v2037_v38 = vld [vmem:[%s15477_s22 + $0x31c8] sm:$0xff]  ;;  %v14676_v43 = vcombine.high %v1973_v62, %v1977_v5  ;;  %v14675_v47 = vcombine.low %v1973_v62, %v1977_v5 }
 0x383   : > { %11011 = vmatprep.subr.bf16.mxu1 %v14516_v46  ;;  %v2041_v40 = vld [vmem:[%s15477_s22 + $0x31e8] sm:$0xff] }
 0x384   : > { %v14740_v44 = vcombine.high %v2037_v38, %v2041_v40  ;;  %v1965_v51 = vld [vmem:[%s15477_s22 + $0x2f88] sm:$0xff]  ;;  %v14739_v48 = vcombine.low %v2037_v38, %v2041_v40 }
 0x385   : > { %11037 = vmatpush1.bf16.msra.mxu0 %v14579_v54  ;;  %v1969_v34 = vld [vmem:[%s15477_s22 + $0x2fa8] sm:$0xff] }
 0x386   : > { %11012 = vmatpush2.bf16.msra.mxu1 %v14515_v55  ;;  %11038 = vmatprep.subr.bf16.mxu0 %v14572_v56  ;;  %v2029_v25 = vld [vmem:[%s15477_s22 + $0x3188] sm:$0xff]  ;;  %v14668_v30 = vcombine.high %v1965_v51, %v1969_v34  ;;  %v14667_v63 = vcombine.low %v1965_v51, %v1969_v34 }
 0x387   : > { %11013 = vmatprep.subr.bf16.mxu1 %v14508_v28  ;;  %v2033_v46 = vld [vmem:[%s15477_s22 + $0x31a8] sm:$0xff] }
 0x388   : > { %v14732_v53 = vcombine.high %v2029_v25, %v2033_v46  ;;  %v1957_v54 = vld [vmem:[%s15477_s22 + $0x2f48] sm:$0xff]  ;;  %v14731_v4 = vcombine.low %v2029_v25, %v2033_v46 }
 0x389   : > { %11039 = vmatpush1.bf16.msra.mxu0 %v14571_v6  ;;  %v1961_v55 = vld [vmem:[%s15477_s22 + $0x2f68] sm:$0xff] }
 0x38a   : > { %11014 = vmatpush2.bf16.msra.mxu1 %v14507_v9  ;;  %11040 = vmatprep.subr.bf16.mxu0 %v14564_v10  ;;  %v2021_v56 = vld [vmem:[%s15477_s22 + $0x3148] sm:$0xff]  ;;  %v14660_v6 = vcombine.high %v1957_v54, %v1961_v55 }
 0x38b   : > { %11015 = vmatprep.subr.bf16.mxu1 %v14500_v11  ;;  %v2025_v28 = vld [vmem:[%s15477_s22 + $0x3168] sm:$0xff] }
 0x38c   : > { %v14724_v10 = vcombine.high %v2021_v56, %v2025_v28  ;;  %v1949_v11 = vld [vmem:[%s15477_s22 + $0x2f08] sm:$0xff] }
 0x38d   : > { %11041 = vmatpush1.bf16.msra.mxu0 %v14563_v26  ;;  %v1953_v39 = vld [vmem:[%s15477_s22 + $0x2f28] sm:$0xff]  ;;  %v14659_v26 = vcombine.low %v1957_v54, %v1961_v55 }
 0x38e   : > { %11016 = vmatpush2.bf16.msra.mxu1 %v14499_v27  ;;  %11042 = vmatprep.subr.bf16.mxu0 %v14556_v31  ;;  %v2017_v16 = vld [vmem:[%s15477_s22 + $0x3128] sm:$0xff]  ;;  %v14723_v27 = vcombine.low %v2021_v56, %v2025_v28  ;;  %v14652_v31 = vcombine.high %v1949_v11, %v1953_v39 }
 0x38f   : > { %11017 = vmatprep.subr.bf16.mxu1 %v14492_v42  ;;  %v1941_v5 = vld [vmem:[%s15477_s22 + $0x2ec8] sm:$0xff] }
 0x390   : > { %v2005_v38 = vld [vmem:[%s15477_s22 + $0x30c8] sm:$0xff] }
 0x391   : > { %11043 = vmatpush1.bf16.msra.mxu0 %v14555_v23  ;;  %v2009_v40 = vld [vmem:[%s15477_s22 + $0x30e8] sm:$0xff]  ;;  %v14651_v23 = vcombine.low %v1949_v11, %v1953_v39 }
 0x392   : > { %11018 = vmatpush2.bf16.msra.mxu1 %v14491_v14  ;;  %11044 = vmatprep.subr.bf16.mxu0 %v14676_v43  ;;  %v1933_v51 = vld [vmem:[%s15477_s22 + $0x2e88] sm:$0xff] }
 0x393   : > { %11069 = vmatprep.subr.bf16.mxu1 %v14740_v44  ;;  %v14708_v44 = vcombine.high %v2005_v38, %v2009_v40  ;;  %v1937_v34 = vld [vmem:[%s15477_s22 + $0x2ea8] sm:$0xff] }
 0x394   : > { %v1997_v25 = vld [vmem:[%s15477_s22 + $0x3088] sm:$0xff] }
 0x395   : > { %v10775_v58 = vpop.f32.mrf.mxu1  ;;  %11020 = vmatmul.mubr.bf16.vlgmr.msra.gmra.mxu1 %v15993_v33  ;;  %11045 = vmatpush2.bf16.msra.mxu0 %v14675_v47  ;;  %v2001_v46 = vld [vmem:[%s15477_s22 + $0x30a8] sm:$0xff] }
 0x396   : > { %v16472_v2 = vadd.f32 %v10775_v58, %v16432_v13  ;;  %11070 = vmatpush1.bf16.msra.mxu1 %v14739_v48  ;;  %11046 = vmatprep.subr.bf16.mxu0 %v14668_v30  ;;  %v2013_v13 = vld [vmem:[%s15477_s22 + $0x3108] sm:$0xff]  ;;  %v14707_v48 = vcombine.low %v2005_v38, %v2009_v40  ;;  %v14636_v30 = vcombine.high %v1933_v51, %v1937_v34 }
 0x397   : > { %v10777_v9 = vpop.f32.mrf.mxu1  ;;  %11071 = vmatprep.subr.bf16.mxu1 %v14732_v53  ;;  %11101 = vmatprep.mubr.bf16.mxu1 %v15284_v8  ;;  %v14716_v62 = vcombine.high %v2013_v13, %v2017_v16  ;;  %v14715_v14 = vcombine.low %v2013_v13, %v2017_v16  ;;  %v14700_v53 = vcombine.high %v1997_v25, %v2001_v46  ;;  %v1925_v54 = vld [vmem:[%s15477_s22 + $0x2e48] sm:$0xff] }
 0x398   : > { %v16478_v24 = vadd.f32 %v10777_v9, %v16436_v22  ;;  %v1945_v22 = vld [vmem:[%s15477_s22 + $0x2ee8] sm:$0xff]  ;;  %v14635_v58 = vcombine.low %v1933_v51, %v1937_v34 }
 0x399   : > { %v10779_v18 = vpop.f32.mrf.mxu1  ;;  %11047 = vmatpush2.bf16.msra.mxu0 %v14667_v63  ;;  %v14644_v43 = vcombine.high %v1941_v5, %v1945_v22  ;;  %v14643_v47 = vcombine.low %v1941_v5, %v1945_v22  ;;  %v1929_v55 = vld [vmem:[%s15477_s22 + $0x2e68] sm:$0xff]  ;;  %v14699_v63 = vcombine.low %v1997_v25, %v2001_v46 }
 0x39a   : > { %11072 = vmatpush1.bf16.msra.mxu1 %v14731_v4  ;;  %11048 = vmatprep.subr.bf16.mxu0 %v14660_v6  ;;  %v1989_v56 = vld [vmem:[%s15477_s22 + $0x3048] sm:$0xff]  ;;  %v14628_v4 = vcombine.high %v1925_v54, %v1929_v55  ;;  %v14627_v13 = vcombine.low %v1925_v54, %v1929_v55  ;;  %v618_v54 = vld [vmem:[%s15477_s22 + $0x570] sm:$0xff] }
 0x39b   : > { %v10780_v42 = vpop.f32.mrf.mxu1  ;;  %11073 = vmatprep.subr.bf16.mxu1 %v14724_v10  ;;  %v1993_v28 = vld [vmem:[%s15477_s22 + $0x3068] sm:$0xff] }
 0x39c   : > { %v14692_v6 = vcombine.high %v1989_v56, %v1993_v28  ;;  %v1917_v9 = vld [vmem:[%s15477_s22 + $0x2e08] sm:$0xff]  ;;  %v14691_v16 = vcombine.low %v1989_v56, %v1993_v28  ;;  %v630_v42 = vld [vmem:[%s15477_s22 + $0x5d0] sm:$0xff] }
 0x39d   : > { %11049 = vmatpush2.bf16.msra.mxu0 %v14659_v26  ;;  %v1921_v10 = vld [vmem:[%s15477_s22 + $0x2e28] sm:$0xff] }
 0x39e   : > { %11074 = vmatpush1.bf16.msra.mxu1 %v14723_v27  ;;  %11050 = vmatprep.subr.bf16.mxu0 %v14652_v31  ;;  %v1981_v11 = vld [vmem:[%s15477_s22 + $0x3008] sm:$0xff]  ;;  %v14620_v18 = vcombine.high %v1917_v9, %v1921_v10  ;;  %v502_v27 = vld [vmem:[%s15477_s22 + $0x1d0] sm:$0xff]  ;;  %v14619_v5 = vcombine.low %v1917_v9, %v1921_v10 }
 0x39f   : > { %11075 = vmatprep.subr.bf16.mxu1 %v14716_v62  ;;  %v1985_v39 = vld [vmem:[%s15477_s22 + $0x3028] sm:$0xff]  ;;  %v506_v31 = vld [vmem:[%s15477_s22 + $0x1f0] sm:$0xff] }
 0x3a0   : > { %v14684_v26 = vcombine.high %v1981_v11, %v1985_v39  ;;  %v634_v62 = vld [vmem:[%s15477_s22 + $0x5f0] sm:$0xff]  ;;  %v14683_v22 = vcombine.low %v1981_v11, %v1985_v39  ;;  %v13206_v38 = vcombine.high %v502_v27, %v506_v31  ;;  %v13205_v51 = vcombine.low %v502_v27, %v506_v31 }
 0x3a1   : > { %11051 = vmatpush2.bf16.msra.mxu0 %v14651_v23  ;;  %v13334_v40 = vcombine.high %v630_v42, %v634_v62  ;;  %v494_v23 = vld [vmem:[%s15477_s22 + $0x190] sm:$0xff]  ;;  %v13333_v34 = vcombine.low %v630_v42, %v634_v62 }
 0x3a2   : > { %11076 = vmatpush1.bf16.msra.mxu1 %v14715_v14  ;;  %11052 = vmatprep.subr.bf16.mxu0 %v14644_v43  ;;  %v498_v14 = vld [vmem:[%s15477_s22 + $0x1b0] sm:$0xff] }
 0x3a3   : > { %11077 = vmatprep.subr.bf16.mxu1 %v14708_v44  ;;  %v622_v43 = vld [vmem:[%s15477_s22 + $0x590] sm:$0xff]  ;;  %v13198_v25 = vcombine.high %v494_v23, %v498_v14  ;;  %v13197_v56 = vcombine.low %v494_v23, %v498_v14 }
 0x3a4   : > { %v626_v44 = vld [vmem:[%s15477_s22 + $0x5b0] sm:$0xff] }
 0x3a5   : > { %11053 = vmatpush2.bf16.msra.mxu0 %v14643_v47  ;;  %v13326_v46 = vcombine.high %v622_v43, %v626_v44  ;;  %v486_v47 = vld [vmem:[%s15477_s22 + $0x150] sm:$0xff] }
 0x3a6   : > { %11078 = vmatpush1.bf16.msra.mxu1 %v14707_v48  ;;  %11054 = vmatprep.subr.bf16.mxu0 %v14636_v30  ;;  %v490_v48 = vld [vmem:[%s15477_s22 + $0x170] sm:$0xff] }
 0x3a7   : > { %11079 = vmatprep.subr.bf16.mxu1 %v14700_v53  ;;  %v614_v53 = vld [vmem:[%s15477_s22 + $0x550] sm:$0xff] }
 0x3a8   : > { %v478_v9 = vld [vmem:[%s15477_s22 + $0x110] sm:$0xff] }
 0x3a9   : > { %11055 = vmatpush2.bf16.msra.mxu0 %v14635_v58  ;;  %v13325_v58 = vcombine.low %v622_v43, %v626_v44  ;;  %v606_v11 = vld [vmem:[%s15477_s22 + $0x510] sm:$0xff] }
 0x3aa   : > { %11080 = vmatpush1.bf16.msra.mxu1 %v14699_v63  ;;  %11056 = vmatprep.subr.bf16.mxu0 %v14628_v4  ;;  %v13190_v63 = vcombine.high %v486_v47, %v490_v48  ;;  %v610_v39 = vld [vmem:[%s15477_s22 + $0x530] sm:$0xff] }
 0x3ab   : > { %11081 = vmatprep.subr.bf16.mxu1 %v14692_v6  ;;  %v13318_v6 = vcombine.high %v614_v53, %v618_v54  ;;  %v470_v27 = vld [vmem:[%s15477_s22 + $0xd0] sm:$0xff] }
 0x3ac   : > { %v474_v31 = vld [vmem:[%s15477_s22 + $0xf0] sm:$0xff] }
 0x3ad   : > { %11057 = vmatpush2.bf16.msra.mxu0 %v14627_v13  ;;  %v13189_v13 = vcombine.low %v486_v47, %v490_v48  ;;  %v598_v42 = vld [vmem:[%s15477_s22 + $0x4d0] sm:$0xff] }
 0x3ae   : > { %11082 = vmatpush1.bf16.msra.mxu1 %v14691_v16  ;;  %11058 = vmatprep.subr.bf16.mxu0 %v14620_v18  ;;  %v13317_v16 = vcombine.low %v614_v53, %v618_v54  ;;  %v602_v62 = vld [vmem:[%s15477_s22 + $0x4f0] sm:$0xff] }
 0x3af   : > { %11083 = vmatprep.subr.bf16.mxu1 %v14684_v26  ;;  %v13310_v26 = vcombine.high %v606_v11, %v610_v39  ;;  %v462_v23 = vld [vmem:[%s15477_s22 + $0x90] sm:$0xff] }
 0x3b0   : > { %v466_v14 = vld [vmem:[%s15477_s22 + $0xb0] sm:$0xff] }
 0x3b1   : > { %11059 = vmatpush2.bf16.msra.mxu0 %v14619_v5  ;;  %v590_v43 = vld [vmem:[%s15477_s22 + $0x490] sm:$0xff]  ;;  %v13165_v54 = vcombine.low %v462_v23, %v466_v14 }
 0x3b2   : > { %11084 = vmatpush1.bf16.msra.mxu1 %v14683_v22  ;;  %11110 = vmatprep.subr.bf16.mxu0 %v13206_v38  ;;  %v13309_v22 = vcombine.low %v606_v11, %v610_v39  ;;  %v13174_v38 = vcombine.high %v470_v27, %v474_v31  ;;  %v594_v44 = vld [vmem:[%s15477_s22 + $0x4b0] sm:$0xff] }
 0x3b3   : > { %11151 = vmatprep.subr.bf16.mxu1 %v13334_v40  ;;  %v13302_v40 = vcombine.high %v598_v42, %v602_v62  ;;  %v454_v47 = vld [vmem:[%s15477_s22 + $0x50] sm:$0xff] }
 0x3b4   : > { %v10816_v30 = vpop.f32.mrf.mxu0  ;;  %11061 = vmatmul.mubr.bf16.vlgmr.msra.gmra.mxu0 %v15997_v36  ;;  %v458_v48 = vld [vmem:[%s15477_s22 + $0x70] sm:$0xff] }
 0x3b5   : > { %v16512_v55 = vadd.f32 %v10816_v30, %v16472_v2  ;;  %11102 = vmatmul.mubr.bf16.vlgmr.msra.gmra.mxu1 %v16040_v35  ;;  %11111 = vmatpush1.bf16.msra.mxu0 %v13205_v51  ;;  %v482_v2 = vld [vmem:[%s15477_s22 + $0x130] sm:$0xff]  ;;  %v13173_v51 = vcombine.low %v470_v27, %v474_v31 }
 0x3b6   : > { %11152 = vmatpush1.bf16.msra.mxu1 %v13333_v34  ;;  %v10818_v28 = vpop.f32.mrf.mxu0  ;;  %11112 = vmatprep.subr.bf16.mxu0 %v13198_v25  ;;  %v13182_v18 = vcombine.high %v478_v9, %v482_v2  ;;  %v13181_v5 = vcombine.low %v478_v9, %v482_v2  ;;  %v13301_v34 = vcombine.low %v598_v42, %v602_v62  ;;  %v582_v30 = vld [vmem:[%s15477_s22 + $0x450] sm:$0xff] }
 0x3b7   : > { %v16516_v4 = vadd.f32 %v10818_v28, %v16478_v24  ;;  %11153 = vmatprep.subr.bf16.mxu1 %v13326_v46  ;;  %11142 = vmatprep.mubr.bf16.mxu0 %v15535_v59  ;;  %v13166_v25 = vcombine.high %v462_v23, %v466_v14  ;;  %v13294_v46 = vcombine.high %v590_v43, %v594_v44  ;;  %v586_v53 = vld [vmem:[%s15477_s22 + $0x470] sm:$0xff] }
 0x3b8   : > { %v10820_v10 = vpop.f32.mrf.mxu0  ;;  %11183 = vmatprep.mubr.bf16.mxu1 %v15537_v60  ;;  %v13158_v28 = vcombine.high %v454_v47, %v458_v48  ;;  %v574_v9 = vld [vmem:[%s15477_s22 + $0x410] sm:$0xff]  ;;  %v13285_v11 = vcombine.low %v582_v30, %v586_v53 }
 0x3b9   : > { %11113 = vmatpush1.bf16.msra.mxu0 %v13197_v56  ;;  %v13293_v56 = vcombine.low %v590_v43, %v594_v44  ;;  %v578_v2 = vld [vmem:[%s15477_s22 + $0x430] sm:$0xff]  ;;  %v13157_v10 = vcombine.low %v454_v47, %v458_v48 }
 0x3ba   : > { %11154 = vmatpush1.bf16.msra.mxu1 %v13325_v58  ;;  %v10821_v24 = vpop.f32.mrf.mxu0  ;;  %11114 = vmatprep.subr.bf16.mxu0 %v13190_v63  ;;  %v13286_v58 = vcombine.high %v582_v30, %v586_v53  ;;  %v446_v63 = vld [vmem:[%s15477_s22 + $0x10] sm:$0xff]  ;;  %v13277_v31 = vcombine.low %v574_v9, %v578_v2 }
 0x3bb   : > { %11155 = vmatprep.subr.bf16.mxu1 %v13318_v6  ;;  %v450_v6 = vld [vmem:[%s15477_s22 + $0x30] sm:$0xff] }
 0x3bc   : > { %v13150_v39 = vcombine.high %v446_v63, %v450_v6  ;;  %v566_v24 = vld [vmem:[%s15477_s22 + $0x3d0] sm:$0xff]  ;;  %v13149_v27 = vcombine.low %v446_v63, %v450_v6 }
 0x3bd   : > { %11115 = vmatpush1.bf16.msra.mxu0 %v13189_v13  ;;  %v13278_v13 = vcombine.high %v574_v9, %v578_v2  ;;  %v546_v63 = vld [vmem:[%s15477_s22 + $0x330] sm:$0xff] }
 0x3be   : > { %11156 = vmatpush1.bf16.msra.mxu1 %v13317_v16  ;;  %11116 = vmatprep.subr.bf16.mxu0 %v13182_v18  ;;  %v570_v16 = vld [vmem:[%s15477_s22 + $0x3f0] sm:$0xff] }
 0x3bf   : > { %11157 = vmatprep.subr.bf16.mxu1 %v13310_v26  ;;  %v694_v18 = vld [vmem:[%s15477_s22 + $0x7d0] sm:$0xff]  ;;  %v13270_v42 = vcombine.high %v566_v24, %v570_v16  ;;  %v13269_v23 = vcombine.low %v566_v24, %v570_v16 }
 0x3c0   : > { %v698_v26 = vld [vmem:[%s15477_s22 + $0x7f0] sm:$0xff] }
 0x3c1   : > { %11117 = vmatpush1.bf16.msra.mxu0 %v13181_v5  ;;  %v13398_v62 = vcombine.high %v694_v18, %v698_v26  ;;  %v558_v5 = vld [vmem:[%s15477_s22 + $0x390] sm:$0xff]  ;;  %v13397_v14 = vcombine.low %v694_v18, %v698_v26 }
 0x3c2   : > { %11158 = vmatpush1.bf16.msra.mxu1 %v13309_v22  ;;  %11118 = vmatprep.subr.bf16.mxu0 %v13174_v38  ;;  %v562_v22 = vld [vmem:[%s15477_s22 + $0x3b0] sm:$0xff] }
 0x3c3   : > { %11159 = vmatprep.subr.bf16.mxu1 %v13302_v40  ;;  %v686_v38 = vld [vmem:[%s15477_s22 + $0x790] sm:$0xff]  ;;  %v13262_v43 = vcombine.high %v558_v5, %v562_v22  ;;  %v13261_v48 = vcombine.low %v558_v5, %v562_v22 }
 0x3c4   : > { %v690_v40 = vld [vmem:[%s15477_s22 + $0x7b0] sm:$0xff] }
 0x3c5   : > { %11119 = vmatpush1.bf16.msra.mxu0 %v13173_v51  ;;  %v13390_v44 = vcombine.high %v686_v38, %v690_v40  ;;  %v550_v51 = vld [vmem:[%s15477_s22 + $0x350] sm:$0xff]  ;;  %v13389_v53 = vcombine.low %v686_v38, %v690_v40 }
 0x3c6   : > { %11160 = vmatpush1.bf16.msra.mxu1 %v13301_v34  ;;  %11120 = vmatprep.subr.bf16.mxu0 %v13166_v25  ;;  %v554_v34 = vld [vmem:[%s15477_s22 + $0x370] sm:$0xff] }
 0x3c7   : > { %11161 = vmatprep.subr.bf16.mxu1 %v13294_v46  ;;  %v678_v25 = vld [vmem:[%s15477_s22 + $0x750] sm:$0xff] }
 0x3c8   : > { %v682_v46 = vld [vmem:[%s15477_s22 + $0x770] sm:$0xff] }
 0x3c9   : > { %11121 = vmatpush1.bf16.msra.mxu0 %v13165_v54  ;;  %v13254_v54 = vcombine.high %v550_v51, %v554_v34  ;;  %v670_v9 = vld [vmem:[%s15477_s22 + $0x710] sm:$0xff] }
 0x3ca   : > { %11162 = vmatpush1.bf16.msra.mxu1 %v13293_v56  ;;  %11122 = vmatprep.subr.bf16.mxu0 %v13158_v28  ;;  %v13382_v28 = vcombine.high %v678_v25, %v682_v46  ;;  %v674_v2 = vld [vmem:[%s15477_s22 + $0x730] sm:$0xff] }
 0x3cb   : > { %11163 = vmatprep.subr.bf16.mxu1 %v13286_v58  ;;  %v542_v58 = vld [vmem:[%s15477_s22 + $0x310] sm:$0xff]  ;;  %v13374_v24 = vcombine.high %v670_v9, %v674_v2 }
 0x3cc   : > { %v534_v16 = vld [vmem:[%s15477_s22 + $0x2d0] sm:$0xff] }
 0x3cd   : > { %11123 = vmatpush1.bf16.msra.mxu0 %v13157_v10  ;;  %v13253_v10 = vcombine.low %v550_v51, %v554_v34  ;;  %v662_v18 = vld [vmem:[%s15477_s22 + $0x6d0] sm:$0xff] }
 0x3ce   : > { %11164 = vmatpush1.bf16.msra.mxu1 %v13285_v11  ;;  %11124 = vmatprep.subr.bf16.mxu0 %v13150_v39  ;;  %v13381_v11 = vcombine.low %v678_v25, %v682_v46  ;;  %v13246_v39 = vcombine.high %v542_v58, %v546_v63  ;;  %v666_v26 = vld [vmem:[%s15477_s22 + $0x6f0] sm:$0xff] }
 0x3cf   : > { %11165 = vmatprep.subr.bf16.mxu1 %v13278_v13  ;;  %v526_v5 = vld [vmem:[%s15477_s22 + $0x290] sm:$0xff] }
 0x3d0   : > { %v530_v22 = vld [vmem:[%s15477_s22 + $0x2b0] sm:$0xff] }
 0x3d1   : > { %11125 = vmatpush1.bf16.msra.mxu0 %v13149_v27  ;;  %v13245_v27 = vcombine.low %v542_v58, %v546_v63  ;;  %v654_v38 = vld [vmem:[%s15477_s22 + $0x690] sm:$0xff] }
 0x3d2   : > { %11166 = vmatpush1.bf16.msra.mxu1 %v13277_v31  ;;  %11126 = vmatprep.subr.bf16.mxu0 %v13270_v42  ;;  %v13373_v31 = vcombine.low %v670_v9, %v674_v2  ;;  %v658_v40 = vld [vmem:[%s15477_s22 + $0x6b0] sm:$0xff] }
 0x3d3   : > { %11167 = vmatprep.subr.bf16.mxu1 %v13398_v62  ;;  %v13366_v62 = vcombine.high %v662_v18, %v666_v26  ;;  %v518_v51 = vld [vmem:[%s15477_s22 + $0x250] sm:$0xff] }
 0x3d4   : > { %v522_v34 = vld [vmem:[%s15477_s22 + $0x270] sm:$0xff] }
 0x3d5   : > { %v10857_v47 = vpop.f32.mrf.mxu1  ;;  %11127 = vmatpush2.bf16.msra.mxu0 %v13269_v23  ;;  %v646_v25 = vld [vmem:[%s15477_s22 + $0x650] sm:$0xff]  ;;  %v13221_v9 = vcombine.low %v518_v51, %v522_v34 }
 0x3d6   : > { %v16553_v30 = vadd.f32 %v10857_v47, %v16512_v55  ;;  %11168 = vmatpush2.bf16.msra.mxu1 %v13397_v14  ;;  %11128 = vmatprep.subr.bf16.mxu0 %v13262_v43  ;;  %v13365_v14 = vcombine.low %v662_v18, %v666_v26  ;;  %v13230_v43 = vcombine.high %v526_v5, %v530_v22  ;;  %v650_v46 = vld [vmem:[%s15477_s22 + $0x670] sm:$0xff] }
 0x3d7   : > { %v10859_v56 = vpop.f32.mrf.mxu1  ;;  %11169 = vmatprep.subr.bf16.mxu1 %v13390_v44  ;;  %v13358_v44 = vcombine.high %v654_v38, %v658_v40  ;;  %v13229_v47 = vcombine.low %v526_v5, %v530_v22  ;;  %v638_v58 = vld [vmem:[%s15477_s22 + $0x610] sm:$0xff]  ;;  %v13349_v2 = vcombine.low %v646_v25, %v650_v46 }
 0x3d8   : > { %v16558_v6 = vadd.f32 %v10859_v56, %v16516_v4  ;;  %v538_v4 = vld [vmem:[%s15477_s22 + $0x2f0] sm:$0xff] }
 0x3d9   : > { %v10861_v55 = vpop.f32.mrf.mxu1  ;;  %11129 = vmatpush2.bf16.msra.mxu0 %v13261_v48  ;;  %v13238_v42 = vcombine.high %v534_v16, %v538_v4  ;;  %v13237_v23 = vcombine.low %v534_v16, %v538_v4  ;;  %v13357_v48 = vcombine.low %v654_v38, %v658_v40  ;;  %v510_v56 = vld [vmem:[%s15477_s22 + $0x210] sm:$0xff] }
 0x3da   : > { %11170 = vmatpush2.bf16.msra.mxu1 %v13389_v53  ;;  %11130 = vmatprep.subr.bf16.mxu0 %v13254_v54  ;;  %v13222_v53 = vcombine.high %v518_v51, %v522_v34  ;;  %v13350_v54 = vcombine.high %v646_v25, %v650_v46  ;;  %v642_v63 = vld [vmem:[%s15477_s22 + $0x630] sm:$0xff] }
 0x3db   : > { %v10862_v13 = vpop.f32.mrf.mxu1  ;;  %11171 = vmatprep.subr.bf16.mxu1 %v13382_v28  ;;  %v514_v28 = vld [vmem:[%s15477_s22 + $0x230] sm:$0xff]  ;;  %v13341_v4 = vcombine.low %v638_v58, %v642_v63 }
 0x3dc   : > { %v13214_v55 = vcombine.high %v510_v56, %v514_v28  ;;  %v886_v13 = vld [vmem:[%s15477_s22 + $0xdd0] sm:$0xff]  ;;  %v13213_v16 = vcombine.low %v510_v56, %v514_v28 }
 0x3dd   : > { %11131 = vmatpush2.bf16.msra.mxu0 %v13253_v10  ;;  %v13342_v10 = vcombine.high %v638_v58, %v642_v63  ;;  %v874_v51 = vld [vmem:[%s15477_s22 + $0xd70] sm:$0xff] }
 0x3de   : > { %11172 = vmatpush2.bf16.msra.mxu1 %v13381_v11  ;;  %11132 = vmatprep.subr.bf16.mxu0 %v13246_v39  ;;  %v758_v11 = vld [vmem:[%s15477_s22 + $0x9d0] sm:$0xff] }
 0x3df   : > { %11173 = vmatprep.subr.bf16.mxu1 %v13374_v24  ;;  %v762_v39 = vld [vmem:[%s15477_s22 + $0x9f0] sm:$0xff] }
 0x3e0   : > { %v890_v24 = vld [vmem:[%s15477_s22 + $0xdf0] sm:$0xff]  ;;  %v13462_v18 = vcombine.high %v758_v11, %v762_v39  ;;  %v13461_v5 = vcombine.low %v758_v11, %v762_v39 }
 0x3e1   : > { %11133 = vmatpush2.bf16.msra.mxu0 %v13245_v27  ;;  %v13590_v26 = vcombine.high %v886_v13, %v890_v24  ;;  %v750_v27 = vld [vmem:[%s15477_s22 + $0x990] sm:$0xff]  ;;  %v13589_v22 = vcombine.low %v886_v13, %v890_v24 }
 0x3e2   : > { %11174 = vmatpush2.bf16.msra.mxu1 %v13373_v31  ;;  %11134 = vmatprep.subr.bf16.mxu0 %v13238_v42  ;;  %v754_v31 = vld [vmem:[%s15477_s22 + $0x9b0] sm:$0xff] }
 0x3e3   : > { %11175 = vmatprep.subr.bf16.mxu1 %v13366_v62  ;;  %v878_v42 = vld [vmem:[%s15477_s22 + $0xd90] sm:$0xff]  ;;  %v13454_v38 = vcombine.high %v750_v27, %v754_v31  ;;  %v13453_v25 = vcombine.low %v750_v27, %v754_v31 }
 0x3e4   : > { %v882_v62 = vld [vmem:[%s15477_s22 + $0xdb0] sm:$0xff] }
 0x3e5   : > { %11135 = vmatpush2.bf16.msra.mxu0 %v13237_v23  ;;  %v13582_v40 = vcombine.high %v878_v42, %v882_v62  ;;  %v742_v23 = vld [vmem:[%s15477_s22 + $0x950] sm:$0xff] }
 0x3e6   : > { %11176 = vmatpush2.bf16.msra.mxu1 %v13365_v14  ;;  %11136 = vmatprep.subr.bf16.mxu0 %v13230_v43  ;;  %v746_v14 = vld [vmem:[%s15477_s22 + $0x970] sm:$0xff] }
 0x3e7   : > { %11177 = vmatprep.subr.bf16.mxu1 %v13358_v44  ;;  %v870_v44 = vld [vmem:[%s15477_s22 + $0xd50] sm:$0xff] }
 0x3e8   : > { %v734_v56 = vld [vmem:[%s15477_s22 + $0x910] sm:$0xff] }
 0x3e9   : > { %11137 = vmatpush2.bf16.msra.mxu0 %v13229_v47  ;;  %v13581_v47 = vcombine.low %v878_v42, %v882_v62  ;;  %v862_v58 = vld [vmem:[%s15477_s22 + $0xd10] sm:$0xff] }
 0x3ea   : > { %11178 = vmatpush2.bf16.msra.mxu1 %v13357_v48  ;;  %11138 = vmatprep.subr.bf16.mxu0 %v13222_v53  ;;  %v13446_v48 = vcombine.high %v742_v23, %v746_v14  ;;  %v866_v63 = vld [vmem:[%s15477_s22 + $0xd30] sm:$0xff] }
 0x3eb   : > { %11179 = vmatprep.subr.bf16.mxu1 %v13350_v54  ;;  %v13574_v54 = vcombine.high %v870_v44, %v874_v51  ;;  %v726_v11 = vld [vmem:[%s15477_s22 + $0x8d0] sm:$0xff] }
 0x3ec   : > { %v730_v39 = vld [vmem:[%s15477_s22 + $0x8f0] sm:$0xff] }
 0x3ed   : > { %11139 = vmatpush2.bf16.msra.mxu0 %v13221_v9  ;;  %v13445_v9 = vcombine.low %v742_v23, %v746_v14  ;;  %v854_v13 = vld [vmem:[%s15477_s22 + $0xcd0] sm:$0xff] }
 0x3ee   : > { %11180 = vmatpush2.bf16.msra.mxu1 %v13349_v2  ;;  %11140 = vmatprep.subr.bf16.mxu0 %v13214_v55  ;;  %v13573_v2 = vcombine.low %v870_v44, %v874_v51  ;;  %v858_v24 = vld [vmem:[%s15477_s22 + $0xcf0] sm:$0xff] }
 0x3ef   : > { %11181 = vmatprep.subr.bf16.mxu1 %v13342_v10  ;;  %v13566_v10 = vcombine.high %v862_v58, %v866_v63  ;;  %v718_v27 = vld [vmem:[%s15477_s22 + $0x890] sm:$0xff] }
 0x3f0   : > { %v722_v31 = vld [vmem:[%s15477_s22 + $0x8b0] sm:$0xff] }
 0x3f1   : > { %11141 = vmatpush2.bf16.msra.mxu0 %v13213_v16  ;;  %v846_v42 = vld [vmem:[%s15477_s22 + $0xc90] sm:$0xff]  ;;  %v13421_v51 = vcombine.low %v718_v27, %v722_v31 }
 0x3f2   : > { %11182 = vmatpush2.bf16.msra.mxu1 %v13341_v4  ;;  %11192 = vmatprep.subr.bf16.mxu0 %v13462_v18  ;;  %v13565_v4 = vcombine.low %v862_v58, %v866_v63  ;;  %v13430_v18 = vcombine.high %v726_v11, %v730_v39  ;;  %v850_v62 = vld [vmem:[%s15477_s22 + $0xcb0] sm:$0xff] }
 0x3f3   : > { %11233 = vmatprep.subr.bf16.mxu1 %v13590_v26  ;;  %v13558_v26 = vcombine.high %v854_v13, %v858_v24  ;;  %v710_v23 = vld [vmem:[%s15477_s22 + $0x850] sm:$0xff] }
 0x3f4   : > { %v10898_v43 = vpop.f32.mrf.mxu0  ;;  %11143 = vmatmul.mubr.bf16.vlgmr.msra.gmra.mxu0 %v15583_v17  ;;  %v714_v14 = vld [vmem:[%s15477_s22 + $0x870] sm:$0xff] }
 0x3f5   : > { %v16592_v34 = vadd.f32 %v10898_v43, %v16553_v30  ;;  %11184 = vmatmul.mubr.bf16.vlgmr.msra.gmra.mxu1 %v15588_v21  ;;  %11193 = vmatpush1.bf16.msra.mxu0 %v13461_v5  ;;  %v738_v30 = vld [vmem:[%s15477_s22 + $0x930] sm:$0xff]  ;;  %v13429_v5 = vcombine.low %v726_v11, %v730_v39 }
 0x3f6   : > { %11234 = vmatpush1.bf16.msra.mxu1 %v13589_v22  ;;  %v10900_v46 = vpop.f32.mrf.mxu0  ;;  %11194 = vmatprep.subr.bf16.mxu0 %v13454_v38  ;;  %v13438_v55 = vcombine.high %v734_v56, %v738_v30  ;;  %v13437_v16 = vcombine.low %v734_v56, %v738_v30  ;;  %v13557_v22 = vcombine.low %v854_v13, %v858_v24  ;;  %v838_v43 = vld [vmem:[%s15477_s22 + $0xc50] sm:$0xff] }
 0x3f7   : > { %v16596_v53 = vadd.f32 %v10900_v46, %v16558_v6  ;;  %11235 = vmatprep.subr.bf16.mxu1 %v13582_v40  ;;  %11224 = vmatprep.mubr.bf16.mxu0 %v15593_v29  ;;  %v13422_v38 = vcombine.high %v718_v27, %v722_v31  ;;  %v13550_v40 = vcombine.high %v846_v42, %v850_v62  ;;  %v842_v44 = vld [vmem:[%s15477_s22 + $0xc70] sm:$0xff] }
 0x3f8   : > { %v10902_v28 = vpop.f32.mrf.mxu0  ;;  %11265 = vmatprep.mubr.bf16.mxu1 %v15598_v32  ;;  %v13414_v46 = vcombine.high %v710_v23, %v714_v14  ;;  %v830_v56 = vld [vmem:[%s15477_s22 + $0xc10] sm:$0xff]  ;;  %v13541_v58 = vcombine.low %v838_v43, %v842_v44 }
 0x3f9   : > { %11195 = vmatpush1.bf16.msra.mxu0 %v13453_v25  ;;  %v13549_v25 = vcombine.low %v846_v42, %v850_v62  ;;  %v834_v30 = vld [vmem:[%s15477_s22 + $0xc30] sm:$0xff]  ;;  %v13413_v28 = vcombine.low %v710_v23, %v714_v14 }
 0x3fa   : > { %11236 = vmatpush1.bf16.msra.mxu1 %v13581_v47  ;;  %v10903_v6 = vpop.f32.mrf.mxu0  ;;  %11196 = vmatprep.subr.bf16.mxu0 %v13446_v48  ;;  %v13542_v47 = vcombine.high %v838_v43, %v842_v44  ;;  %v702_v48 = vld [vmem:[%s15477_s22 + $0x810] sm:$0xff]  ;;  %v13533_v39 = vcombine.low %v830_v56, %v834_v30 }
 0x3fb   : > { %11237 = vmatprep.subr.bf16.mxu1 %v13574_v54  ;;  %v706_v54 = vld [vmem:[%s15477_s22 + $0x830] sm:$0xff] }
 0x3fc   : > { %v13406_v63 = vcombine.high %v702_v48, %v706_v54  ;;  %v822_v6 = vld [vmem:[%s15477_s22 + $0xbd0] sm:$0xff]  ;;  %v13405_v11 = vcombine.low %v702_v48, %v706_v54 }
 0x3fd   : > { %11197 = vmatpush1.bf16.msra.mxu0 %v13445_v9  ;;  %v13534_v9 = vcombine.high %v830_v56, %v834_v30  ;;  %v802_v48 = vld [vmem:[%s15477_s22 + $0xb30] sm:$0xff] }
 0x3fe   : > { %11238 = vmatpush1.bf16.msra.mxu1 %v13573_v2  ;;  %11198 = vmatprep.subr.bf16.mxu0 %v13438_v55  ;;  %v826_v2 = vld [vmem:[%s15477_s22 + $0xbf0] sm:$0xff] }
 0x3ff   : > { %11239 = vmatprep.subr.bf16.mxu1 %v13566_v10  ;;  %v950_v55 = vld [vmem:[%s15477_s22 + $0xfd0] sm:$0xff]  ;;  %v13526_v13 = vcombine.high %v822_v6, %v826_v2  ;;  %v13525_v27 = vcombine.low %v822_v6, %v826_v2 }
 0x400   : > { %v954_v10 = vld [vmem:[%s15477_s22 + $0xff0] sm:$0xff] }
 0x401   : > { %11199 = vmatpush1.bf16.msra.mxu0 %v13437_v16  ;;  %v13654_v24 = vcombine.high %v950_v55, %v954_v10  ;;  %v814_v16 = vld [vmem:[%s15477_s22 + $0xb90] sm:$0xff]  ;;  %v13653_v31 = vcombine.low %v950_v55, %v954_v10 }
 0x402   : > { %11240 = vmatpush1.bf16.msra.mxu1 %v13565_v4  ;;  %11200 = vmatprep.subr.bf16.mxu0 %v13430_v18  ;;  %v818_v4 = vld [vmem:[%s15477_s22 + $0xbb0] sm:$0xff] }
 0x403   : > { %11241 = vmatprep.subr.bf16.mxu1 %v13558_v26  ;;  %v942_v18 = vld [vmem:[%s15477_s22 + $0xf90] sm:$0xff]  ;;  %v13518_v42 = vcombine.high %v814_v16, %v818_v4  ;;  %v13517_v14 = vcombine.low %v814_v16, %v818_v4 }
 0x404   : > { %v946_v26 = vld [vmem:[%s15477_s22 + $0xfb0] sm:$0xff] }
 0x405   : > { %11201 = vmatpush1.bf16.msra.mxu0 %v13429_v5  ;;  %v13646_v62 = vcombine.high %v942_v18, %v946_v26  ;;  %v806_v5 = vld [vmem:[%s15477_s22 + $0xb50] sm:$0xff]  ;;  %v13645_v44 = vcombine.low %v942_v18, %v946_v26 }
 0x406   : > { %11242 = vmatpush1.bf16.msra.mxu1 %v13557_v22  ;;  %11202 = vmatprep.subr.bf16.mxu0 %v13422_v38  ;;  %v810_v22 = vld [vmem:[%s15477_s22 + $0xb70] sm:$0xff] }
 0x407   : > { %11243 = vmatprep.subr.bf16.mxu1 %v13550_v40  ;;  %v934_v38 = vld [vmem:[%s15477_s22 + $0xf50] sm:$0xff] }
 0x408   : > { %v938_v40 = vld [vmem:[%s15477_s22 + $0xf70] sm:$0xff] }
 0x409   : > { %11203 = vmatpush1.bf16.msra.mxu0 %v13421_v51  ;;  %v13510_v51 = vcombine.high %v806_v5, %v810_v22  ;;  %v926_v56 = vld [vmem:[%s15477_s22 + $0xf10] sm:$0xff] }
 0x40a   : > { %11244 = vmatpush1.bf16.msra.mxu1 %v13549_v25  ;;  %11204 = vmatprep.subr.bf16.mxu0 %v13414_v46  ;;  %v13638_v46 = vcombine.high %v934_v38, %v938_v40  ;;  %v930_v30 = vld [vmem:[%s15477_s22 + $0xf30] sm:$0xff] }
 0x40b   : > { %11245 = vmatprep.subr.bf16.mxu1 %v13542_v47  ;;  %v798_v47 = vld [vmem:[%s15477_s22 + $0xb10] sm:$0xff]  ;;  %v13630_v6 = vcombine.high %v926_v56, %v930_v30 }
 0x40c   : > { %v790_v2 = vld [vmem:[%s15477_s22 + $0xad0] sm:$0xff] }
 0x40d   : > { %11205 = vmatpush1.bf16.msra.mxu0 %v13413_v28  ;;  %v13509_v28 = vcombine.low %v806_v5, %v810_v22  ;;  %v918_v55 = vld [vmem:[%s15477_s22 + $0xed0] sm:$0xff] }
 0x40e   : > { %11246 = vmatpush1.bf16.msra.mxu1 %v13541_v58  ;;  %11206 = vmatprep.subr.bf16.mxu0 %v13406_v63  ;;  %v13637_v58 = vcombine.low %v934_v38, %v938_v40  ;;  %v13502_v63 = vcombine.high %v798_v47, %v802_v48  ;;  %v922_v10 = vld [vmem:[%s15477_s22 + $0xef0] sm:$0xff] }
 0x40f   : > { %11247 = vmatprep.subr.bf16.mxu1 %v13534_v9  ;;  %v782_v16 = vld [vmem:[%s15477_s22 + $0xa90] sm:$0xff] }
 0x410   : > { %v786_v4 = vld [vmem:[%s15477_s22 + $0xab0] sm:$0xff] }
 0x411   : > { %11207 = vmatpush1.bf16.msra.mxu0 %v13405_v11  ;;  %v13501_v11 = vcombine.low %v798_v47, %v802_v48  ;;  %v910_v18 = vld [vmem:[%s15477_s22 + $0xe90] sm:$0xff] }
 0x412   : > { %11248 = vmatpush1.bf16.msra.mxu1 %v13533_v39  ;;  %11208 = vmatprep.subr.bf16.mxu0 %v13526_v13  ;;  %v13629_v39 = vcombine.low %v926_v56, %v930_v30  ;;  %v914_v26 = vld [vmem:[%s15477_s22 + $0xeb0] sm:$0xff] }
 0x413   : > { %11249 = vmatprep.subr.bf16.mxu1 %v13654_v24  ;;  %v13622_v24 = vcombine.high %v918_v55, %v922_v10  ;;  %v774_v5 = vld [vmem:[%s15477_s22 + $0xa50] sm:$0xff] }
 0x414   : > { %v778_v22 = vld [vmem:[%s15477_s22 + $0xa70] sm:$0xff] }
 0x415   : > { %v10939_v23 = vpop.f32.mrf.mxu1  ;;  %11209 = vmatpush2.bf16.msra.mxu0 %v13525_v27  ;;  %v902_v38 = vld [vmem:[%s15477_s22 + $0xe50] sm:$0xff]  ;;  %v13477_v56 = vcombine.low %v774_v5, %v778_v22 }
 0x416   : > { %v16633_v43 = vadd.f32 %v10939_v23, %v16592_v34  ;;  %11250 = vmatpush2.bf16.msra.mxu1 %v13653_v31  ;;  %11210 = vmatprep.subr.bf16.mxu0 %v13518_v42  ;;  %v13621_v31 = vcombine.low %v918_v55, %v922_v10  ;;  %v13486_v42 = vcombine.high %v782_v16, %v786_v4  ;;  %v906_v40 = vld [vmem:[%s15477_s22 + $0xe70] sm:$0xff] }
 0x417   : > { %v10941_v25 = vpop.f32.mrf.mxu1  ;;  %11251 = vmatprep.subr.bf16.mxu1 %v13646_v62  ;;  %v13614_v62 = vcombine.high %v910_v18, %v914_v26  ;;  %v13485_v23 = vcombine.low %v782_v16, %v786_v4  ;;  %v894_v47 = vld [vmem:[%s15477_s22 + $0xe10] sm:$0xff]  ;;  %v13605_v30 = vcombine.low %v902_v38, %v906_v40 }
 0x418   : > { %v16638_v54 = vadd.f32 %v10941_v25, %v16596_v53  ;;  %v794_v53 = vld [vmem:[%s15477_s22 + $0xaf0] sm:$0xff] }
 0x419   : > { %v10943_v34 = vpop.f32.mrf.mxu1  ;;  %11211 = vmatpush2.bf16.msra.mxu0 %v13517_v14  ;;  %v13494_v13 = vcombine.high %v790_v2, %v794_v53  ;;  %v13493_v27 = vcombine.low %v790_v2, %v794_v53  ;;  %v13613_v14 = vcombine.low %v910_v18, %v914_v26  ;;  %v766_v25 = vld [vmem:[%s15477_s22 + $0xa10] sm:$0xff] }
 0x41a   : > { %11252 = vmatpush2.bf16.msra.mxu1 %v13645_v44  ;;  %11212 = vmatprep.subr.bf16.mxu0 %v13510_v51  ;;  %v13478_v44 = vcombine.high %v774_v5, %v778_v22  ;;  %v13606_v51 = vcombine.high %v902_v38, %v906_v40  ;;  %v898_v48 = vld [vmem:[%s15477_s22 + $0xe30] sm:$0xff] }
 0x41b   : > { %v10944_v9 = vpop.f32.mrf.mxu1  ;;  %11253 = vmatprep.subr.bf16.mxu1 %v13638_v46  ;;  %v770_v46 = vld [vmem:[%s15477_s22 + $0xa30] sm:$0xff]  ;;  %v13597_v53 = vcombine.low %v894_v47, %v898_v48 }
 0x41c   : > { %v13470_v34 = vcombine.high %v766_v25, %v770_v46  ;;  %v1142_v9 = vld [vmem:[%s15477_s22 + $0x15d0] sm:$0xff]  ;;  %v13469_v2 = vcombine.low %v766_v25, %v770_v46 }
 0x41d   : > { %11213 = vmatpush2.bf16.msra.mxu0 %v13509_v28  ;;  %v13598_v28 = vcombine.high %v894_v47, %v898_v48  ;;  %v1130_v5 = vld [vmem:[%s15477_s22 + $0x1570] sm:$0xff] }
 0x41e   : > { %11254 = vmatpush2.bf16.msra.mxu1 %v13637_v58  ;;  %11214 = vmatprep.subr.bf16.mxu0 %v13502_v63  ;;  %v1014_v58 = vld [vmem:[%s15477_s22 + $0x11d0] sm:$0xff] }
 0x41f   : > { %11255 = vmatprep.subr.bf16.mxu1 %v13630_v6  ;;  %v1018_v63 = vld [vmem:[%s15477_s22 + $0x11f0] sm:$0xff] }
 0x420   : > { %v1146_v6 = vld [vmem:[%s15477_s22 + $0x15f0] sm:$0xff]  ;;  %v13718_v55 = vcombine.high %v1014_v58, %v1018_v63  ;;  %v13717_v16 = vcombine.low %v1014_v58, %v1018_v63 }
 0x421   : > { %11215 = vmatpush2.bf16.msra.mxu0 %v13501_v11  ;;  %v13846_v10 = vcombine.high %v1142_v9, %v1146_v6  ;;  %v1006_v11 = vld [vmem:[%s15477_s22 + $0x1190] sm:$0xff]  ;;  %v13845_v4 = vcombine.low %v1142_v9, %v1146_v6 }
 0x422   : > { %11256 = vmatpush2.bf16.msra.mxu1 %v13629_v39  ;;  %11216 = vmatprep.subr.bf16.mxu0 %v13494_v13  ;;  %v1010_v39 = vld [vmem:[%s15477_s22 + $0x11b0] sm:$0xff] }
 0x423   : > { %11257 = vmatprep.subr.bf16.mxu1 %v13622_v24  ;;  %v1134_v13 = vld [vmem:[%s15477_s22 + $0x1590] sm:$0xff]  ;;  %v13710_v18 = vcombine.high %v1006_v11, %v1010_v39  ;;  %v13709_v22 = vcombine.low %v1006_v11, %v1010_v39 }
 0x424   : > { %v1138_v24 = vld [vmem:[%s15477_s22 + $0x15b0] sm:$0xff] }
 0x425   : > { %11217 = vmatpush2.bf16.msra.mxu0 %v13493_v27  ;;  %v13838_v26 = vcombine.high %v1134_v13, %v1138_v24  ;;  %v998_v27 = vld [vmem:[%s15477_s22 + $0x1150] sm:$0xff]  ;;  %v13837_v40 = vcombine.low %v1134_v13, %v1138_v24 }
 0x426   : > { %11258 = vmatpush2.bf16.msra.mxu1 %v13621_v31  ;;  %11218 = vmatprep.subr.bf16.mxu0 %v13486_v42  ;;  %v1002_v31 = vld [vmem:[%s15477_s22 + $0x1170] sm:$0xff] }
 0x427   : > { %11259 = vmatprep.subr.bf16.mxu1 %v13614_v62  ;;  %v1126_v62 = vld [vmem:[%s15477_s22 + $0x1550] sm:$0xff]  ;;  %v13701_v48 = vcombine.low %v998_v27, %v1002_v31 }
 0x428   : > { %v1118_v46 = vld [vmem:[%s15477_s22 + $0x1510] sm:$0xff] }
 0x429   : > { %11219 = vmatpush2.bf16.msra.mxu0 %v13485_v23  ;;  %v13702_v23 = vcombine.high %v998_v27, %v1002_v31  ;;  %v1122_v47 = vld [vmem:[%s15477_s22 + $0x1530] sm:$0xff] }
 0x42a   : > { %11260 = vmatpush2.bf16.msra.mxu1 %v13613_v14  ;;  %11220 = vmatprep.subr.bf16.mxu0 %v13478_v44  ;;  %v13830_v14 = vcombine.high %v1126_v62, %v1130_v5  ;;  %v990_v44 = vld [vmem:[%s15477_s22 + $0x1110] sm:$0xff] }
 0x42b   : > { %11261 = vmatprep.subr.bf16.mxu1 %v13606_v51  ;;  %v994_v51 = vld [vmem:[%s15477_s22 + $0x1130] sm:$0xff] }
 0x42c   : > { %v982_v58 = vld [vmem:[%s15477_s22 + $0x10d0] sm:$0xff] }
 0x42d   : > { %11221 = vmatpush2.bf16.msra.mxu0 %v13477_v56  ;;  %v986_v63 = vld [vmem:[%s15477_s22 + $0x10f0] sm:$0xff] }
 0x42e   : > { %11262 = vmatpush2.bf16.msra.mxu1 %v13605_v30  ;;  %11222 = vmatprep.subr.bf16.mxu0 %v13470_v34  ;;  %v13829_v30 = vcombine.low %v1126_v62, %v1130_v5  ;;  %v13694_v34 = vcombine.high %v990_v44, %v994_v51  ;;  %v1110_v9 = vld [vmem:[%s15477_s22 + $0x14d0] sm:$0xff] }
 0x42f   : > { %11263 = vmatprep.subr.bf16.mxu1 %v13598_v28  ;;  %v13822_v28 = vcombine.high %v1118_v46, %v1122_v47  ;;  %v1114_v6 = vld [vmem:[%s15477_s22 + $0x14f0] sm:$0xff] }
 0x430   : > { %v974_v11 = vld [vmem:[%s15477_s22 + $0x1090] sm:$0xff] }
 0x431   : > { %11223 = vmatpush2.bf16.msra.mxu0 %v13469_v2  ;;  %v13693_v2 = vcombine.low %v990_v44, %v994_v51  ;;  %v978_v39 = vld [vmem:[%s15477_s22 + $0x10b0] sm:$0xff] }
 0x432   : > { %11264 = vmatpush2.bf16.msra.mxu1 %v13597_v53  ;;  %11274 = vmatprep.subr.bf16.mxu0 %v13718_v55  ;;  %v13821_v53 = vcombine.low %v1118_v46, %v1122_v47  ;;  %v13686_v55 = vcombine.high %v982_v58, %v986_v63  ;;  %v1102_v13 = vld [vmem:[%s15477_s22 + $0x1490] sm:$0xff] }
 0x433   : > { %11315 = vmatprep.subr.bf16.mxu1 %v13846_v10  ;;  %v13814_v10 = vcombine.high %v1110_v9, %v1114_v6  ;;  %v1106_v24 = vld [vmem:[%s15477_s22 + $0x14b0] sm:$0xff] }
 0x434   : > { %v16668_v42 = vpop.f32.mrf.mxu0  ;;  %11225 = vmatmul.mubr.bf16.vlgmr.msra.gmra.mxu0 %v15663_v37  ;;  %v966_v27 = vld [vmem:[%s15477_s22 + $0x1050] sm:$0xff] }
 0x435   : > { %11266 = vmatmul.mubr.bf16.vlgmr.msra.gmra.mxu1 %v15668_v41  ;;  %11275 = vmatpush1.bf16.msra.mxu0 %v13717_v16  ;;  %v13685_v16 = vcombine.low %v982_v58, %v986_v63  ;;  %v970_v31 = vld [vmem:[%s15477_s22 + $0x1070] sm:$0xff] }
 0x436   : > { %11316 = vmatpush1.bf16.msra.mxu1 %v13845_v4  ;;  %v16674_v38 = vpop.f32.mrf.mxu0  ;;  %11276 = vmatprep.subr.bf16.mxu0 %v13710_v18  ;;  %v13813_v4 = vcombine.low %v1110_v9, %v1114_v6  ;;  %v13678_v18 = vcombine.high %v974_v11, %v978_v39  ;;  %v1094_v62 = vld [vmem:[%s15477_s22 + $0x1450] sm:$0xff]  ;;  %v13669_v47 = vcombine.low %v966_v27, %v970_v31 }
 0x437   : > { %11317 = vmatprep.subr.bf16.mxu1 %v13838_v26  ;;  %11306 = vmatprep.mubr.bf16.mxu0 %v15673_v49  ;;  %v13806_v26 = vcombine.high %v1102_v13, %v1106_v24  ;;  %v1098_v5 = vld [vmem:[%s15477_s22 + $0x1470] sm:$0xff] }
 0x438   : > { %v10984_v25 = vpop.f32.mrf.mxu0  ;;  %11347 = vmatprep.mubr.bf16.mxu1 %v15678_v52  ;;  %v958_v44 = vld [vmem:[%s15477_s22 + $0x1010] sm:$0xff] }
 0x439   : > { %11277 = vmatpush1.bf16.msra.mxu0 %v13709_v22  ;;  %v13677_v22 = vcombine.low %v974_v11, %v978_v39  ;;  %v962_v51 = vld [vmem:[%s15477_s22 + $0x1030] sm:$0xff] }
 0x43a   : > { %11318 = vmatpush1.bf16.msra.mxu1 %v13837_v40  ;;  %v10985_v56 = vpop.f32.mrf.mxu0  ;;  %11278 = vmatprep.subr.bf16.mxu0 %v13702_v23  ;;  %v13805_v40 = vcombine.low %v1102_v13, %v1106_v24  ;;  %v13670_v23 = vcombine.high %v966_v27, %v970_v31  ;;  %v1086_v25 = vld [vmem:[%s15477_s22 + $0x1410] sm:$0xff]  ;;  %v13661_v9 = vcombine.low %v958_v44, %v962_v51 }
 0x43b   : > { %11319 = vmatprep.subr.bf16.mxu1 %v13830_v14  ;;  %v13798_v14 = vcombine.high %v1094_v62, %v1098_v5  ;;  %v1090_v46 = vld [vmem:[%s15477_s22 + $0x1430] sm:$0xff]  ;;  %v13662_v56 = vcombine.high %v958_v44, %v962_v51 }
 0x43c   : > { %v1206_v58 = vld [vmem:[%s15477_s22 + $0x17d0] sm:$0xff]  ;;  %v13789_v6 = vcombine.low %v1086_v25, %v1090_v46 }
 0x43d   : > { %11279 = vmatpush1.bf16.msra.mxu0 %v13701_v48  ;;  %v13797_v48 = vcombine.low %v1094_v62, %v1098_v5  ;;  %v1210_v63 = vld [vmem:[%s15477_s22 + $0x17f0] sm:$0xff] }
 0x43e   : > { %11320 = vmatpush1.bf16.msra.mxu1 %v13829_v30  ;;  %11280 = vmatprep.subr.bf16.mxu0 %v13694_v34  ;;  %v13790_v30 = vcombine.high %v1086_v25, %v1090_v46  ;;  %v1078_v34 = vld [vmem:[%s15477_s22 + $0x13d0] sm:$0xff]  ;;  %v13909_v24 = vcombine.low %v1206_v58, %v1210_v63 }
 0x43f   : > { %11321 = vmatprep.subr.bf16.mxu1 %v13822_v28  ;;  %v1082_v28 = vld [vmem:[%s15477_s22 + $0x13f0] sm:$0xff] }
 0x440   : > { %v1198_v11 = vld [vmem:[%s15477_s22 + $0x1790] sm:$0xff]  ;;  %v13781_v13 = vcombine.low %v1078_v34, %v1082_v28 }
 0x441   : > { %11281 = vmatpush1.bf16.msra.mxu0 %v13693_v2  ;;  %v13782_v2 = vcombine.high %v1078_v34, %v1082_v28  ;;  %v1202_v39 = vld [vmem:[%s15477_s22 + $0x17b0] sm:$0xff] }
 0x442   : > { %11322 = vmatpush1.bf16.msra.mxu1 %v13821_v53  ;;  %11282 = vmatprep.subr.bf16.mxu0 %v13686_v55  ;;  %v13910_v53 = vcombine.high %v1206_v58, %v1210_v63  ;;  %v1070_v55 = vld [vmem:[%s15477_s22 + $0x1390] sm:$0xff] }
 0x443   : > { %11323 = vmatprep.subr.bf16.mxu1 %v13814_v10  ;;  %v1074_v10 = vld [vmem:[%s15477_s22 + $0x13b0] sm:$0xff] }
 0x444   : > { %v1190_v27 = vld [vmem:[%s15477_s22 + $0x1750] sm:$0xff]  ;;  %v13773_v5 = vcombine.low %v1070_v55, %v1074_v10 }
 0x445   : > { %11283 = vmatpush1.bf16.msra.mxu0 %v13685_v16  ;;  %v13774_v16 = vcombine.high %v1070_v55, %v1074_v10  ;;  %v1194_v31 = vld [vmem:[%s15477_s22 + $0x1770] sm:$0xff] }
 0x446   : > { %11324 = vmatpush1.bf16.msra.mxu1 %v13813_v4  ;;  %11284 = vmatprep.subr.bf16.mxu0 %v13678_v18  ;;  %v13902_v4 = vcombine.high %v1198_v11, %v1202_v39  ;;  %v1062_v18 = vld [vmem:[%s15477_s22 + $0x1350] sm:$0xff] }
 0x447   : > { %11325 = vmatprep.subr.bf16.mxu1 %v13806_v26  ;;  %v1066_v26 = vld [vmem:[%s15477_s22 + $0x1370] sm:$0xff] }
 0x448   : > { %v1054_v44 = vld [vmem:[%s15477_s22 + $0x1310] sm:$0xff] }
 0x449   : > { %11285 = vmatpush1.bf16.msra.mxu0 %v13677_v22  ;;  %v13901_v22 = vcombine.low %v1198_v11, %v1202_v39  ;;  %v1058_v51 = vld [vmem:[%s15477_s22 + $0x1330] sm:$0xff] }
 0x44a   : > { %11326 = vmatpush1.bf16.msra.mxu1 %v13805_v40  ;;  %11286 = vmatprep.subr.bf16.mxu0 %v13670_v23  ;;  %v13766_v40 = vcombine.high %v1062_v18, %v1066_v26  ;;  %v1182_v25 = vld [vmem:[%s15477_s22 + $0x1710] sm:$0xff] }
 0x44b   : > { %11327 = vmatprep.subr.bf16.mxu1 %v13798_v14  ;;  %v13894_v14 = vcombine.high %v1190_v27, %v1194_v31  ;;  %v1186_v46 = vld [vmem:[%s15477_s22 + $0x1730] sm:$0xff] }
 0x44c   : > { %v13886_v28 = vcombine.high %v1182_v25, %v1186_v46  ;;  %v1046_v58 = vld [vmem:[%s15477_s22 + $0x12d0] sm:$0xff] }
 0x44d   : > { %11287 = vmatpush1.bf16.msra.mxu0 %v13669_v47  ;;  %v1050_v63 = vld [vmem:[%s15477_s22 + $0x12f0] sm:$0xff] }
 0x44e   : > { %11328 = vmatpush1.bf16.msra.mxu1 %v13797_v48  ;;  %11288 = vmatprep.subr.bf16.mxu0 %v13662_v56  ;;  %v13765_v48 = vcombine.low %v1062_v18, %v1066_v26  ;;  %v13893_v56 = vcombine.low %v1190_v27, %v1194_v31  ;;  %v13750_v55 = vcombine.high %v1046_v58, %v1050_v63  ;;  %v1038_v11 = vld [vmem:[%s15477_s22 + $0x1290] sm:$0xff] }
 0x44f   : > { %11329 = vmatprep.subr.bf16.mxu1 %v13790_v30  ;;  %v13758_v30 = vcombine.high %v1054_v44, %v1058_v51  ;;  %v1042_v39 = vld [vmem:[%s15477_s22 + $0x12b0] sm:$0xff] }
 0x450   : > { %v13742_v18 = vcombine.high %v1038_v11, %v1042_v39  ;;  %v1030_v27 = vld [vmem:[%s15477_s22 + $0x1250] sm:$0xff] }
 0x451   : > { %11289 = vmatpush1.bf16.msra.mxu0 %v13661_v9  ;;  %v1174_v9 = vld [vmem:[%s15477_s22 + $0x16d0] sm:$0xff] }
 0x452   : > { %11330 = vmatpush1.bf16.msra.mxu1 %v13789_v6  ;;  %11290 = vmatprep.subr.bf16.mxu0 %v13782_v2  ;;  %v1178_v6 = vld [vmem:[%s15477_s22 + $0x16f0] sm:$0xff]  ;;  %v13757_v2 = vcombine.low %v1054_v44, %v1058_v51 }
 0x453   : > { %11331 = vmatprep.subr.bf16.mxu1 %v13910_v53  ;;  %v13885_v53 = vcombine.low %v1182_v25, %v1186_v46  ;;  %v13878_v10 = vcombine.high %v1174_v9, %v1178_v6  ;;  %v1034_v31 = vld [vmem:[%s15477_s22 + $0x1270] sm:$0xff] }
 0x454   : > { %v13734_v44 = vcombine.high %v1030_v27, %v1034_v31  ;;  %v1022_v25 = vld [vmem:[%s15477_s22 + $0x1210] sm:$0xff] }
 0x455   : > { %v16710_v62 = vpop.f32.mrf.mxu1  ;;  %11291 = vmatpush2.bf16.msra.mxu0 %v13781_v13  ;;  %v1166_v13 = vld [vmem:[%s15477_s22 + $0x1690] sm:$0xff] }
 0x456   : > { %11332 = vmatpush2.bf16.msra.mxu1 %v13909_v24  ;;  %11292 = vmatprep.subr.bf16.mxu0 %v13774_v16  ;;  %v1170_v24 = vld [vmem:[%s15477_s22 + $0x16b0] sm:$0xff]  ;;  %v13749_v16 = vcombine.low %v1046_v58, %v1050_v63 }
 0x457   : > { %v16712_v23 = vpop.f32.mrf.mxu1  ;;  %11333 = vmatprep.subr.bf16.mxu1 %v13902_v4  ;;  %v13877_v4 = vcombine.low %v1174_v9, %v1178_v6  ;;  %v13870_v26 = vcombine.high %v1166_v13, %v1170_v24  ;;  %v1026_v46 = vld [vmem:[%s15477_s22 + $0x1230] sm:$0xff] }
 0x458   : > { %v1270_v58 = vld [vmem:[%s15477_s22 + $0x19d0] sm:$0xff] }
 0x459   : > { %v11025_v47 = vpop.f32.mrf.mxu1  ;;  %11293 = vmatpush2.bf16.msra.mxu0 %v13773_v5  ;;  %v1158_v5 = vld [vmem:[%s15477_s22 + $0x1650] sm:$0xff] }
 0x45a   : > { %11334 = vmatpush2.bf16.msra.mxu1 %v13901_v22  ;;  %11294 = vmatprep.subr.bf16.mxu0 %v13766_v40  ;;  %v1162_v22 = vld [vmem:[%s15477_s22 + $0x1670] sm:$0xff]  ;;  %v13741_v40 = vcombine.low %v1038_v11, %v1042_v39 }
 0x45b   : > { %v11026_v34 = vpop.f32.mrf.mxu1  ;;  %11335 = vmatprep.subr.bf16.mxu1 %v13894_v14  ;;  %v13869_v14 = vcombine.low %v1166_v13, %v1170_v24  ;;  %v13862_v51 = vcombine.high %v1158_v5, %v1162_v22  ;;  %v1150_v47 = vld [vmem:[%s15477_s22 + $0x1610] sm:$0xff] }
 0x45c   : > { %v13726_v34 = vcombine.high %v1022_v25, %v1026_v46  ;;  %v1274_v63 = vld [vmem:[%s15477_s22 + $0x19f0] sm:$0xff] }
 0x45d   : > { %11295 = vmatpush2.bf16.msra.mxu0 %v13765_v48  ;;  %v1154_v48 = vld [vmem:[%s15477_s22 + $0x1630] sm:$0xff] }
 0x45e   : > { %11336 = vmatpush2.bf16.msra.mxu1 %v13893_v56  ;;  %11296 = vmatprep.subr.bf16.mxu0 %v13758_v30  ;;  %v13733_v56 = vcombine.low %v1030_v27, %v1034_v31  ;;  %v13861_v30 = vcombine.low %v1158_v5, %v1162_v22  ;;  %v1398_v9 = vld [vmem:[%s15477_s22 + $0x1dd0] sm:$0xff]  ;;  %v10983_v27 = vadd.f32 %v16674_v38, %v16638_v54  ;;  %v388_v38 = vld [vmem:[#allocation2 + $0x18] sm:$0xff] }
 0x45f   : > { %11337 = vmatprep.subr.bf16.mxu1 %v13886_v28  ;;  %v13854_v28 = vcombine.high %v1150_v47, %v1154_v48  ;;  %v1402_v6 = vld [vmem:[%s15477_s22 + $0x1df0] sm:$0xff] }
 0x460   : > { %v1262_v11 = vld [vmem:[%s15477_s22 + $0x1990] sm:$0xff] }
 0x461   : > { %11297 = vmatpush2.bf16.msra.mxu0 %v13757_v2  ;;  %v13725_v2 = vcombine.low %v1022_v25, %v1026_v46  ;;  %v1266_v39 = vld [vmem:[%s15477_s22 + $0x19b0] sm:$0xff] }
 0x462   : > { %11338 = vmatpush2.bf16.msra.mxu1 %v13885_v53  ;;  %11298 = vmatprep.subr.bf16.mxu0 %v13750_v55  ;;  %v13853_v53 = vcombine.low %v1150_v47, %v1154_v48  ;;  %v13974_v55 = vcombine.high %v1270_v58, %v1274_v63  ;;  %v1390_v13 = vld [vmem:[%s15477_s22 + $0x1d90] sm:$0xff]  ;;  %v13965_v54 = vcombine.low %v1262_v11, %v1266_v39 }
 0x463   : > { %11339 = vmatprep.subr.bf16.mxu1 %v13878_v10  ;;  %v14102_v10 = vcombine.high %v1398_v9, %v1402_v6  ;;  %v1394_v24 = vld [vmem:[%s15477_s22 + $0x1db0] sm:$0xff] }
 0x464   : > { %v14094_v5 = vcombine.high %v1390_v13, %v1394_v24  ;;  %v1254_v22 = vld [vmem:[%s15477_s22 + $0x1950] sm:$0xff]  ;;  %v14093_v46 = vcombine.low %v1390_v13, %v1394_v24 }
 0x465   : > { %11299 = vmatpush2.bf16.msra.mxu0 %v13749_v16  ;;  %v10981_v16 = vadd.f32 %v16668_v42, %v16633_v43  ;;  %v1382_v43 = vld [vmem:[%s15477_s22 + $0x1d50] sm:$0xff] }
 0x466   : > { %11340 = vmatpush2.bf16.msra.mxu1 %v13877_v4  ;;  %11300 = vmatprep.subr.bf16.mxu0 %v13742_v18  ;;  %v13973_v4 = vcombine.low %v1270_v58, %v1274_v63  ;;  %v14101_v18 = vcombine.low %v1398_v9, %v1402_v6  ;;  %v1386_v42 = vld [vmem:[%s15477_s22 + $0x1d70] sm:$0xff] }
 0x467   : > { %11341 = vmatprep.subr.bf16.mxu1 %v13870_v26  ;;  %v13966_v26 = vcombine.high %v1262_v11, %v1266_v39  ;;  %v11022_v31 = vadd.f32 %v16710_v62, %v10981_v16  ;;  %v389_v58 = vld [vmem:[#allocation2 + $0x10] sm:$0xff]  ;;  %v14085_v39 = vcombine.low %v1382_v43, %v1386_v42 }
 0x468   : > { %v1374_v9 = vld [vmem:[%s15477_s22 + $0x1d10] sm:$0xff] }
 0x469   : > { %11301 = vmatpush2.bf16.msra.mxu0 %v13741_v40  ;;  %v1258_v40 = vld [vmem:[%s15477_s22 + $0x1970] sm:$0xff] }
 0x46a   : > { %11342 = vmatpush2.bf16.msra.mxu1 %v13869_v14  ;;  %11302 = vmatprep.subr.bf16.mxu0 %v13734_v44  ;;  %v11024_v44 = vadd.f32 %v16712_v23, %v10983_v27  ;;  %v13958_v47 = vcombine.high %v1254_v22, %v1258_v40  ;;  %v14086_v23 = vcombine.high %v1382_v43, %v1386_v42  ;;  %v1378_v6 = vld [vmem:[%s15477_s22 + $0x1d30] sm:$0xff] }
 0x46b   : > { %11343 = vmatprep.subr.bf16.mxu1 %v13862_v51  ;;  %v1366_v27 = vld [vmem:[%s15477_s22 + $0x1cd0] sm:$0xff] }
 0x46c   : > { %v1230_v43 = vld [vmem:[%s15477_s22 + $0x1890] sm:$0xff] }
 0x46d   : > { %11303 = vmatpush2.bf16.msra.mxu0 %v13733_v56  ;;  %v1234_v42 = vld [vmem:[%s15477_s22 + $0x18b0] sm:$0xff] }
 0x46e   : > { %11344 = vmatpush2.bf16.msra.mxu1 %v13861_v30  ;;  %11304 = vmatprep.subr.bf16.mxu0 %v13726_v34  ;;  %v1246_v34 = vld [vmem:[%s15477_s22 + $0x1910] sm:$0xff] }
 0x46f   : > { %11345 = vmatprep.subr.bf16.mxu1 %v13854_v28  ;;  %v1250_v28 = vld [vmem:[%s15477_s22 + $0x1930] sm:$0xff] }
 0x470   : > { %v13950_v13 = vcombine.high %v1246_v34, %v1250_v28 }
 0x471   : > { %11305 = vmatpush2.bf16.msra.mxu0 %v13725_v2 }
 0x472   : > { %11346 = vmatpush2.bf16.msra.mxu1 %v13853_v53  ;;  %11356 = vmatprep.subr.bf16.mxu0 %v13974_v55 }
 0x473   : > { %11397 = vmatprep.subr.bf16.mxu1 %v14102_v10  ;;  %v13957_v10 = vcombine.low %v1254_v22, %v1258_v40  ;;  %v14077_v22 = vcombine.low %v1374_v9, %v1378_v6 }
 0x474   : > { %v11062_v14 = vpop.f32.mrf.mxu0  ;;  %11307 = vmatmul.mubr.bf16.vlgmr.msra.gmra.mxu0 %v15743_v3 }
 0x475   : > { %v11063_v51 = vadd.f32 %v11062_v14, %v11022_v31  ;;  %v11103_v25 = vpop.f32.mrf.mxu1  ;;  %11348 = vmatmul.mubr.bf16.vlgmr.msra.gmra.mxu1 %v15748_v7  ;;  %11357 = vmatpush1.bf16.msra.mxu0 %v13973_v4  ;;  %v14078_v4 = vcombine.high %v1374_v9, %v1378_v6  ;;  %v1370_v31 = vld [vmem:[%s15477_s22 + $0x1cf0] sm:$0xff] }
 0x476   : > { %11398 = vmatpush1.bf16.msra.mxu1 %v14101_v18  ;;  %v11064_v62 = vpop.f32.mrf.mxu0  ;;  %11358 = vmatprep.subr.bf16.mxu0 %v13966_v26  ;;  %v1238_v18 = vld [vmem:[%s15477_s22 + $0x18d0] sm:$0xff]  ;;  %v14070_v14 = vcombine.high %v1366_v27, %v1370_v31 }
 0x477   : > { %v11104_v48 = vadd.f32 %v11103_v25, %v11063_v51  ;;  %v11065_v56 = vadd.f32 %v11064_v62, %v11024_v44  ;;  %v11105_v30 = vpop.f32.mrf.mxu1  ;;  %11399 = vmatprep.subr.bf16.mxu1 %v14094_v5  ;;  %11388 = vmatprep.mubr.bf16.mxu0 %v15753_v15  ;;  %v1242_v26 = vld [vmem:[%s15477_s22 + $0x18f0] sm:$0xff]  ;;  %v13949_v5 = vcombine.low %v1246_v34, %v1250_v28 }
 0x478   : > { %v11066_v63 = vpop.f32.mrf.mxu0  ;;  %11429 = vmatprep.mubr.bf16.mxu1 %v15758_v19  ;;  %v13942_v40 = vcombine.high %v1238_v18, %v1242_v26  ;;  %v1358_v44 = vld [vmem:[%s15477_s22 + $0x1c90] sm:$0xff]  ;;  %v13941_v25 = vcombine.low %v1238_v18, %v1242_v26 }
 0x479   : > { %v12178_v2 = vadd.f32 %v11104_v48, %v388_v38  ;;  %v11106_v53 = vadd.f32 %v11105_v30, %v11065_v56  ;;  %v11107_v55 = vpop.f32.mrf.mxu1  ;;  %11359 = vmatpush1.bf16.msra.mxu0 %v13965_v54  ;;  %v1362_v51 = vld [vmem:[%s15477_s22 + $0x1cb0] sm:$0xff]  ;;  %v14069_v54 = vcombine.low %v1366_v27, %v1370_v31  ;;  %v13934_v38 = vcombine.high %v1230_v43, %v1234_v42 }
 0x47a   : > { %11400 = vmatpush1.bf16.msra.mxu1 %v14093_v46  ;;  %v11067_v11 = vpop.f32.mrf.mxu0  ;;  %11360 = vmatprep.subr.bf16.mxu0 %v13958_v47  ;;  %v14062_v62 = vcombine.high %v1358_v44, %v1362_v51  ;;  %v1222_v46 = vld [vmem:[%s15477_s22 + $0x1850] sm:$0xff]  ;;  %v13933_v30 = vcombine.low %v1230_v43, %v1234_v42 }
 0x47b   : > { %12186 = vst [vmem:[#allocation2 + $0x18] sm:$0xff] %v12178_v2  ;;  %v12179_v24 = vadd.f32 %v11106_v53, %v389_v58  ;;  %v11108_v16 = vpop.f32.mrf.mxu1  ;;  %11401 = vmatprep.subr.bf16.mxu1 %v14086_v23  ;;  %v1226_v47 = vld [vmem:[%s15477_s22 + $0x1870] sm:$0xff]  ;;  %v14061_v23 = vcombine.low %v1358_v44, %v1362_v51 }
 0x47c   : > { %v1350_v48 = vld [vmem:[%s15477_s22 + $0x1c50] sm:$0xff]  ;;  %v13926_v34 = vcombine.high %v1222_v46, %v1226_v47  ;;  %v13925_v2 = vcombine.low %v1222_v46, %v1226_v47 }
 0x47d   : > { %12187 = vst [vmem:[#allocation2 + $0x10] sm:$0xff] %v12179_v24  ;;  %11361 = vmatpush1.bf16.msra.mxu0 %v13957_v10  ;;  %v1354_v56 = vld [vmem:[%s15477_s22 + $0x1c70] sm:$0xff] }
 0x47e   : > { %11402 = vmatpush1.bf16.msra.mxu1 %v14085_v39  ;;  %11362 = vmatprep.subr.bf16.mxu0 %v13950_v13  ;;  %v14054_v28 = vcombine.high %v1350_v48, %v1354_v56  ;;  %v1214_v58 = vld [vmem:[%s15477_s22 + $0x1810] sm:$0xff]  ;;  %v14053_v53 = vcombine.low %v1350_v48, %v1354_v56 }
 0x47f   : > { %11403 = vmatprep.subr.bf16.mxu1 %v14078_v4  ;;  %v1218_v63 = vld [vmem:[%s15477_s22 + $0x1830] sm:$0xff] }
 0x480   : > { %v1342_v9 = vld [vmem:[%s15477_s22 + $0x1c10] sm:$0xff]  ;;  %v13918_v55 = vcombine.high %v1214_v58, %v1218_v63  ;;  %v13917_v16 = vcombine.low %v1214_v58, %v1218_v63 }
 0x481   : > { %11363 = vmatpush1.bf16.msra.mxu0 %v13949_v5  ;;  %v1346_v6 = vld [vmem:[%s15477_s22 + $0x1c30] sm:$0xff] }
 0x482   : > { %11404 = vmatpush1.bf16.msra.mxu1 %v14077_v22  ;;  %11364 = vmatprep.subr.bf16.mxu0 %v13942_v40  ;;  %v14046_v10 = vcombine.high %v1342_v9, %v1346_v6  ;;  %v1334_v11 = vld [vmem:[%s15477_s22 + $0x1bd0] sm:$0xff]  ;;  %v14045_v4 = vcombine.low %v1342_v9, %v1346_v6 }
 0x483   : > { %11405 = vmatprep.subr.bf16.mxu1 %v14070_v14  ;;  %v1338_v39 = vld [vmem:[%s15477_s22 + $0x1bf0] sm:$0xff] }
 0x484   : > { %v1462_v13 = vld [vmem:[%s15477_s22 + $0x1fd0] sm:$0xff]  ;;  %v14038_v18 = vcombine.high %v1334_v11, %v1338_v39  ;;  %v14037_v40 = vcombine.low %v1334_v11, %v1338_v39 }
 0x485   : > { %11365 = vmatpush1.bf16.msra.mxu0 %v13941_v25  ;;  %v1466_v24 = vld [vmem:[%s15477_s22 + $0x1ff0] sm:$0xff] }
 0x486   : > { %11406 = vmatpush1.bf16.msra.mxu1 %v14069_v54  ;;  %11366 = vmatprep.subr.bf16.mxu0 %v13934_v38  ;;  %v14166_v26 = vcombine.high %v1462_v13, %v1466_v24  ;;  %v1326_v27 = vld [vmem:[%s15477_s22 + $0x1b90] sm:$0xff]  ;;  %v14165_v14 = vcombine.low %v1462_v13, %v1466_v24 }
 0x487   : > { %11407 = vmatprep.subr.bf16.mxu1 %v14062_v62  ;;  %v1330_v31 = vld [vmem:[%s15477_s22 + $0x1bb0] sm:$0xff] }
 0x488   : > { %v1454_v5 = vld [vmem:[%s15477_s22 + $0x1f90] sm:$0xff]  ;;  %v14030_v43 = vcombine.high %v1326_v27, %v1330_v31  ;;  %v14029_v38 = vcombine.low %v1326_v27, %v1330_v31 }
 0x489   : > { %11367 = vmatpush1.bf16.msra.mxu0 %v13933_v30  ;;  %v1458_v22 = vld [vmem:[%s15477_s22 + $0x1fb0] sm:$0xff] }
 0x48a   : > { %11408 = vmatpush1.bf16.msra.mxu1 %v14061_v23  ;;  %11368 = vmatprep.subr.bf16.mxu0 %v13926_v34  ;;  %v14158_v42 = vcombine.high %v1454_v5, %v1458_v22  ;;  %v1318_v44 = vld [vmem:[%s15477_s22 + $0x1b50] sm:$0xff]  ;;  %v14157_v62 = vcombine.low %v1454_v5, %v1458_v22 }
 0x48b   : > { %11409 = vmatprep.subr.bf16.mxu1 %v14054_v28  ;;  %v1322_v51 = vld [vmem:[%s15477_s22 + $0x1b70] sm:$0xff] }
 0x48c   : > { %v1446_v25 = vld [vmem:[%s15477_s22 + $0x1f50] sm:$0xff]  ;;  %v14022_v46 = vcombine.high %v1318_v44, %v1322_v51  ;;  %v14021_v34 = vcombine.low %v1318_v44, %v1322_v51 }
 0x48d   : > { %11369 = vmatpush1.bf16.msra.mxu0 %v13925_v2  ;;  %v1450_v54 = vld [vmem:[%s15477_s22 + $0x1f70] sm:$0xff] }
 0x48e   : > { %11410 = vmatpush1.bf16.msra.mxu1 %v14053_v53  ;;  %11370 = vmatprep.subr.bf16.mxu0 %v13918_v55  ;;  %v14150_v47 = vcombine.high %v1446_v25, %v1450_v54  ;;  %v1310_v48 = vld [vmem:[%s15477_s22 + $0x1b10] sm:$0xff]  ;;  %v14149_v28 = vcombine.low %v1446_v25, %v1450_v54 }
 0x48f   : > { %11411 = vmatprep.subr.bf16.mxu1 %v14046_v10  ;;  %v1314_v56 = vld [vmem:[%s15477_s22 + $0x1b30] sm:$0xff] }
 0x490   : > { %v1438_v30 = vld [vmem:[%s15477_s22 + $0x1f10] sm:$0xff]  ;;  %v14014_v58 = vcombine.high %v1310_v48, %v1314_v56  ;;  %v14013_v55 = vcombine.low %v1310_v48, %v1314_v56 }
 0x491   : > { %11371 = vmatpush1.bf16.msra.mxu0 %v13917_v16  ;;  %v1442_v23 = vld [vmem:[%s15477_s22 + $0x1f30] sm:$0xff] }
 0x492   : > { %11412 = vmatpush1.bf16.msra.mxu1 %v14045_v4  ;;  %11372 = vmatprep.subr.bf16.mxu0 %v14038_v18  ;;  %v14142_v63 = vcombine.high %v1438_v30, %v1442_v23  ;;  %v1302_v9 = vld [vmem:[%s15477_s22 + $0x1ad0] sm:$0xff]  ;;  %v14141_v10 = vcombine.low %v1438_v30, %v1442_v23 }
 0x493   : > { %11413 = vmatprep.subr.bf16.mxu1 %v14166_v26  ;;  %v1306_v6 = vld [vmem:[%s15477_s22 + $0x1af0] sm:$0xff] }
 0x494   : > { %v1430_v2 = vld [vmem:[%s15477_s22 + $0x1ed0] sm:$0xff]  ;;  %v14006_v11 = vcombine.high %v1302_v9, %v1306_v6  ;;  %v14005_v18 = vcombine.low %v1302_v9, %v1306_v6 }
 0x495   : > { %11373 = vmatpush2.bf16.msra.mxu0 %v14037_v40  ;;  %v1434_v53 = vld [vmem:[%s15477_s22 + $0x1ef0] sm:$0xff] }
 0x496   : > { %11414 = vmatpush2.bf16.msra.mxu1 %v14165_v14  ;;  %11374 = vmatprep.subr.bf16.mxu0 %v14030_v43  ;;  %v14134_v39 = vcombine.high %v1430_v2, %v1434_v53  ;;  %v1294_v13 = vld [vmem:[%s15477_s22 + $0x1a90] sm:$0xff]  ;;  %v14133_v26 = vcombine.low %v1430_v2, %v1434_v53 }
 0x497   : > { %11415 = vmatprep.subr.bf16.mxu1 %v14158_v42  ;;  %v1298_v24 = vld [vmem:[%s15477_s22 + $0x1ab0] sm:$0xff] }
 0x498   : > { %v1422_v16 = vld [vmem:[%s15477_s22 + $0x1e90] sm:$0xff]  ;;  %v13998_v27 = vcombine.high %v1294_v13, %v1298_v24  ;;  %v13997_v43 = vcombine.low %v1294_v13, %v1298_v24 }
 0x499   : > { %11375 = vmatpush2.bf16.msra.mxu0 %v14029_v38  ;;  %v1426_v4 = vld [vmem:[%s15477_s22 + $0x1eb0] sm:$0xff] }
 0x49a   : > { %11416 = vmatpush2.bf16.msra.mxu1 %v14157_v62  ;;  %11376 = vmatprep.subr.bf16.mxu0 %v14022_v46  ;;  %v14126_v31 = vcombine.high %v1422_v16, %v1426_v4  ;;  %v1286_v5 = vld [vmem:[%s15477_s22 + $0x1a50] sm:$0xff]  ;;  %v14125_v42 = vcombine.low %v1422_v16, %v1426_v4 }
 0x49b   : > { %11417 = vmatprep.subr.bf16.mxu1 %v14150_v47  ;;  %v1290_v22 = vld [vmem:[%s15477_s22 + $0x1a70] sm:$0xff] }
 0x49c   : > { %v1414_v40 = vld [vmem:[%s15477_s22 + $0x1e50] sm:$0xff]  ;;  %v13990_v44 = vcombine.high %v1286_v5, %v1290_v22  ;;  %v13989_v46 = vcombine.low %v1286_v5, %v1290_v22 }
 0x49d   : > { %11377 = vmatpush2.bf16.msra.mxu0 %v14021_v34  ;;  %v1418_v14 = vld [vmem:[%s15477_s22 + $0x1e70] sm:$0xff] }
 0x49e   : > { %11418 = vmatpush2.bf16.msra.mxu1 %v14149_v28  ;;  %11378 = vmatprep.subr.bf16.mxu0 %v14014_v58  ;;  %v14118_v51 = vcombine.high %v1414_v40, %v1418_v14  ;;  %v1278_v25 = vld [vmem:[%s15477_s22 + $0x1a10] sm:$0xff]  ;;  %v14117_v47 = vcombine.low %v1414_v40, %v1418_v14 }
 0x49f   : > { %11419 = vmatprep.subr.bf16.mxu1 %v14142_v63  ;;  %v1282_v54 = vld [vmem:[%s15477_s22 + $0x1a30] sm:$0xff] }
 0x4a0   : > { %v1406_v38 = vld [vmem:[%s15477_s22 + $0x1e10] sm:$0xff]  ;;  %v13982_v48 = vcombine.high %v1278_v25, %v1282_v54  ;;  %v13981_v58 = vcombine.low %v1278_v25, %v1282_v54 }
 0x4a1   : > { %11379 = vmatpush2.bf16.msra.mxu0 %v14013_v55  ;;  %v1410_v62 = vld [vmem:[%s15477_s22 + $0x1e30] sm:$0xff] }
 0x4a2   : > { %11420 = vmatpush2.bf16.msra.mxu1 %v14141_v10  ;;  %11380 = vmatprep.subr.bf16.mxu0 %v14006_v11  ;;  %v14110_v56 = vcombine.high %v1406_v38, %v1410_v62  ;;  %v1526_v30 = vld [vmem:[%s15477_s22 + $0x21d0] sm:$0xff]  ;;  %v14109_v63 = vcombine.low %v1406_v38, %v1410_v62 }
 0x4a3   : > { %11421 = vmatprep.subr.bf16.mxu1 %v14134_v39  ;;  %v1530_v23 = vld [vmem:[%s15477_s22 + $0x21f0] sm:$0xff] }
 0x4a4   : > { %v1654_v34 = vld [vmem:[%s15477_s22 + $0x25d0] sm:$0xff]  ;;  %v14230_v9 = vcombine.high %v1526_v30, %v1530_v23  ;;  %v14229_v11 = vcombine.low %v1526_v30, %v1530_v23 }
 0x4a5   : > { %11381 = vmatpush2.bf16.msra.mxu0 %v14005_v18  ;;  %v1658_v28 = vld [vmem:[%s15477_s22 + $0x25f0] sm:$0xff] }
 0x4a6   : > { %11422 = vmatpush2.bf16.msra.mxu1 %v14133_v26  ;;  %11382 = vmatprep.subr.bf16.mxu0 %v13998_v27  ;;  %v14358_v6 = vcombine.high %v1654_v34, %v1658_v28  ;;  %v1518_v2 = vld [vmem:[%s15477_s22 + $0x2190] sm:$0xff]  ;;  %v14357_v39 = vcombine.low %v1654_v34, %v1658_v28 }
 0x4a7   : > { %11423 = vmatprep.subr.bf16.mxu1 %v14126_v31  ;;  %v1522_v53 = vld [vmem:[%s15477_s22 + $0x21b0] sm:$0xff] }
 0x4a8   : > { %v1646_v55 = vld [vmem:[%s15477_s22 + $0x2590] sm:$0xff]  ;;  %v14222_v13 = vcombine.high %v1518_v2, %v1522_v53  ;;  %v14221_v5 = vcombine.low %v1518_v2, %v1522_v53 }
 0x4a9   : > { %11383 = vmatpush2.bf16.msra.mxu0 %v13997_v43  ;;  %v1650_v10 = vld [vmem:[%s15477_s22 + $0x25b0] sm:$0xff] }
 0x4aa   : > { %11424 = vmatpush2.bf16.msra.mxu1 %v14125_v42  ;;  %11384 = vmatprep.subr.bf16.mxu0 %v13990_v44  ;;  %v14350_v24 = vcombine.high %v1646_v55, %v1650_v10  ;;  %v1510_v16 = vld [vmem:[%s15477_s22 + $0x2150] sm:$0xff]  ;;  %v14349_v14 = vcombine.low %v1646_v55, %v1650_v10 }
 0x4ab   : > { %11425 = vmatprep.subr.bf16.mxu1 %v14118_v51  ;;  %v1514_v4 = vld [vmem:[%s15477_s22 + $0x2170] sm:$0xff] }
 0x4ac   : > { %v1638_v26 = vld [vmem:[%s15477_s22 + $0x2550] sm:$0xff]  ;;  %v14214_v43 = vcombine.high %v1510_v16, %v1514_v4 }
 0x4ad   : > { %11385 = vmatpush2.bf16.msra.mxu0 %v13989_v46  ;;  %v1642_v27 = vld [vmem:[%s15477_s22 + $0x2570] sm:$0xff] }
 0x4ae   : > { %11426 = vmatpush2.bf16.msra.mxu1 %v14117_v47  ;;  %11386 = vmatprep.subr.bf16.mxu0 %v13982_v48  ;;  %v14342_v44 = vcombine.high %v1638_v26, %v1642_v27  ;;  %v1502_v51 = vld [vmem:[%s15477_s22 + $0x2110] sm:$0xff]  ;;  %v14213_v48 = vcombine.low %v1510_v16, %v1514_v4  ;;  %v14341_v30 = vcombine.low %v1638_v26, %v1642_v27 }
 0x4af   : > { %11427 = vmatprep.subr.bf16.mxu1 %v14110_v56  ;;  %v1506_v25 = vld [vmem:[%s15477_s22 + $0x2130] sm:$0xff] }
 0x4b0   : > { %v1630_v62 = vld [vmem:[%s15477_s22 + $0x2510] sm:$0xff]  ;;  %v14206_v23 = vcombine.high %v1502_v51, %v1506_v25  ;;  %v14205_v2 = vcombine.low %v1502_v51, %v1506_v25 }
 0x4b1   : > { %11387 = vmatpush2.bf16.msra.mxu0 %v13981_v58  ;;  %v1634_v46 = vld [vmem:[%s15477_s22 + $0x2530] sm:$0xff] }
 0x4b2   : > { %11428 = vmatpush2.bf16.msra.mxu1 %v14109_v63  ;;  %11438 = vmatprep.subr.bf16.mxu0 %v14230_v9  ;;  %v14334_v28 = vcombine.high %v1630_v62, %v1634_v46  ;;  %v1494_v58 = vld [vmem:[%s15477_s22 + $0x20d0] sm:$0xff]  ;;  %v14333_v53 = vcombine.low %v1630_v62, %v1634_v46 }
 0x4b3   : > { %11479 = vmatprep.subr.bf16.mxu1 %v14358_v6  ;;  %v1498_v63 = vld [vmem:[%s15477_s22 + $0x20f0] sm:$0xff] }
 0x4b4   : > { %v11144_v18 = vpop.f32.mrf.mxu0  ;;  %11389 = vmatmul.mubr.bf16.vlgmr.msra.gmra.mxu0 %v15823_v45  ;;  %v1622_v9 = vld [vmem:[%s15477_s22 + $0x24d0] sm:$0xff]  ;;  %v14198_v55 = vcombine.high %v1494_v58, %v1498_v63  ;;  %v14197_v16 = vcombine.low %v1494_v58, %v1498_v63 }
 0x4b5   : > { %v11185_v31 = vpop.f32.mrf.mxu1  ;;  %11430 = vmatmul.mubr.bf16.vlgmr.msra.gmra.mxu1 %v15828_v50  ;;  %11439 = vmatpush1.bf16.msra.mxu0 %v14229_v11  ;;  %v1626_v6 = vld [vmem:[%s15477_s22 + $0x24f0] sm:$0xff] }
 0x4b6   : > { %v16822_v22 = vadd.f32 %v11185_v31, %v11144_v18  ;;  %11480 = vmatpush1.bf16.msra.mxu1 %v14357_v39  ;;  %v11146_v40 = vpop.f32.mrf.mxu0  ;;  %11440 = vmatprep.subr.bf16.mxu0 %v14222_v13  ;;  %v14326_v10 = vcombine.high %v1622_v9, %v1626_v6  ;;  %v1486_v11 = vld [vmem:[%s15477_s22 + $0x2090] sm:$0xff]  ;;  %v14325_v4 = vcombine.low %v1622_v9, %v1626_v6 }
 0x4b7   : > { %v11187_v42 = vpop.f32.mrf.mxu1  ;;  %11481 = vmatprep.subr.bf16.mxu1 %v14350_v24  ;;  %11470 = vmatprep.mubr.bf16.mxu0 %v15833_v61  ;;  %v1490_v39 = vld [vmem:[%s15477_s22 + $0x20b0] sm:$0xff] }
 0x4b8   : > { %v16827_v54 = vadd.f32 %v11187_v42, %v11146_v40  ;;  %v11148_v38 = vpop.f32.mrf.mxu0  ;;  %11511 = vmatprep.mubr.bf16.mxu1 %v15838_v1  ;;  %v1614_v13 = vld [vmem:[%s15477_s22 + $0x2490] sm:$0xff]  ;;  %v14190_v18 = vcombine.high %v1486_v11, %v1490_v39 }
 0x4b9   : > { %v11189_v47 = vpop.f32.mrf.mxu1  ;;  %11441 = vmatpush1.bf16.msra.mxu0 %v14221_v5  ;;  %v1618_v24 = vld [vmem:[%s15477_s22 + $0x24b0] sm:$0xff] }
 0x4ba   : > { %11482 = vmatpush1.bf16.msra.mxu1 %v14349_v14  ;;  %v11149_v56 = vpop.f32.mrf.mxu0  ;;  %11442 = vmatprep.subr.bf16.mxu0 %v14214_v43  ;;  %v14318_v26 = vcombine.high %v1614_v13, %v1618_v24  ;;  %v1478_v27 = vld [vmem:[%s15477_s22 + $0x2050] sm:$0xff]  ;;  %v14189_v14 = vcombine.low %v1486_v11, %v1490_v39  ;;  %v14317_v43 = vcombine.low %v1614_v13, %v1618_v24 }
 0x4bb   : > { %v11190_v34 = vpop.f32.mrf.mxu1  ;;  %11483 = vmatprep.subr.bf16.mxu1 %v14342_v44  ;;  %v1482_v31 = vld [vmem:[%s15477_s22 + $0x2070] sm:$0xff] }
 0x4bc   : > { %v1606_v5 = vld [vmem:[%s15477_s22 + $0x2450] sm:$0xff]  ;;  %v14182_v42 = vcombine.high %v1478_v27, %v1482_v31  ;;  %v14181_v46 = vcombine.low %v1478_v27, %v1482_v31 }
 0x4bd   : > { %11443 = vmatpush1.bf16.msra.mxu0 %v14213_v48  ;;  %v1610_v40 = vld [vmem:[%s15477_s22 + $0x2470] sm:$0xff] }
 0x4be   : > { %11484 = vmatpush1.bf16.msra.mxu1 %v14341_v30  ;;  %11444 = vmatprep.subr.bf16.mxu0 %v14206_v23  ;;  %v14310_v44 = vcombine.high %v1606_v5, %v1610_v40  ;;  %v1470_v51 = vld [vmem:[%s15477_s22 + $0x2010] sm:$0xff]  ;;  %v14309_v47 = vcombine.low %v1606_v5, %v1610_v40 }
 0x4bf   : > { %11485 = vmatprep.subr.bf16.mxu1 %v14334_v28  ;;  %v1474_v25 = vld [vmem:[%s15477_s22 + $0x2030] sm:$0xff] }
 0x4c0   : > { %v1598_v38 = vld [vmem:[%s15477_s22 + $0x2410] sm:$0xff]  ;;  %v14174_v48 = vcombine.high %v1470_v51, %v1474_v25  ;;  %v14173_v58 = vcombine.low %v1470_v51, %v1474_v25 }
 0x4c1   : > { %11445 = vmatpush1.bf16.msra.mxu0 %v14205_v2  ;;  %v1602_v62 = vld [vmem:[%s15477_s22 + $0x2430] sm:$0xff] }
 0x4c2   : > { %11486 = vmatpush1.bf16.msra.mxu1 %v14333_v53  ;;  %11446 = vmatprep.subr.bf16.mxu0 %v14198_v55  ;;  %v14302_v56 = vcombine.high %v1598_v38, %v1602_v62  ;;  %v1590_v30 = vld [vmem:[%s15477_s22 + $0x23d0] sm:$0xff]  ;;  %v14301_v63 = vcombine.low %v1598_v38, %v1602_v62 }
 0x4c3   : > { %11487 = vmatprep.subr.bf16.mxu1 %v14326_v10  ;;  %v1594_v23 = vld [vmem:[%s15477_s22 + $0x23f0] sm:$0xff] }
 0x4c4   : > { %v1718_v34 = vld [vmem:[%s15477_s22 + $0x27d0] sm:$0xff]  ;;  %v14294_v9 = vcombine.high %v1590_v30, %v1594_v23  ;;  %v14293_v11 = vcombine.low %v1590_v30, %v1594_v23 }
 0x4c5   : > { %11447 = vmatpush1.bf16.msra.mxu0 %v14197_v16  ;;  %v1722_v28 = vld [vmem:[%s15477_s22 + $0x27f0] sm:$0xff] }
 0x4c6   : > { %11488 = vmatpush1.bf16.msra.mxu1 %v14325_v4  ;;  %11448 = vmatprep.subr.bf16.mxu0 %v14190_v18  ;;  %v14422_v6 = vcombine.high %v1718_v34, %v1722_v28  ;;  %v1582_v2 = vld [vmem:[%s15477_s22 + $0x2390] sm:$0xff]  ;;  %v14421_v39 = vcombine.low %v1718_v34, %v1722_v28 }
 0x4c7   : > { %11489 = vmatprep.subr.bf16.mxu1 %v14318_v26  ;;  %v1586_v53 = vld [vmem:[%s15477_s22 + $0x23b0] sm:$0xff] }
 0x4c8   : > { %v1710_v55 = vld [vmem:[%s15477_s22 + $0x2790] sm:$0xff]  ;;  %v14286_v13 = vcombine.high %v1582_v2, %v1586_v53  ;;  %v14285_v27 = vcombine.low %v1582_v2, %v1586_v53 }
 0x4c9   : > { %11449 = vmatpush1.bf16.msra.mxu0 %v14189_v14  ;;  %v1714_v10 = vld [vmem:[%s15477_s22 + $0x27b0] sm:$0xff] }
 0x4ca   : > { %11490 = vmatpush1.bf16.msra.mxu1 %v14317_v43  ;;  %11450 = vmatprep.subr.bf16.mxu0 %v14182_v42  ;;  %v14414_v24 = vcombine.high %v1710_v55, %v1714_v10  ;;  %v1574_v16 = vld [vmem:[%s15477_s22 + $0x2350] sm:$0xff]  ;;  %v14413_v31 = vcombine.low %v1710_v55, %v1714_v10 }
 0x4cb   : > { %11491 = vmatprep.subr.bf16.mxu1 %v14310_v44  ;;  %v1578_v4 = vld [vmem:[%s15477_s22 + $0x2370] sm:$0xff] }
 0x4cc   : > { %v1702_v18 = vld [vmem:[%s15477_s22 + $0x2750] sm:$0xff]  ;;  %v14278_v5 = vcombine.high %v1574_v16, %v1578_v4  ;;  %v14277_v51 = vcombine.low %v1574_v16, %v1578_v4 }
 0x4cd   : > { %11451 = vmatpush1.bf16.msra.mxu0 %v14181_v46  ;;  %v1706_v26 = vld [vmem:[%s15477_s22 + $0x2770] sm:$0xff] }
 0x4ce   : > { %11492 = vmatpush1.bf16.msra.mxu1 %v14309_v47  ;;  %11452 = vmatprep.subr.bf16.mxu0 %v14174_v48  ;;  %v14406_v40 = vcombine.high %v1702_v18, %v1706_v26  ;;  %v1566_v14 = vld [vmem:[%s15477_s22 + $0x2310] sm:$0xff]  ;;  %v14405_v25 = vcombine.low %v1702_v18, %v1706_v26 }
 0x4cf   : > { %11493 = vmatprep.subr.bf16.mxu1 %v14302_v56  ;;  %v1570_v43 = vld [vmem:[%s15477_s22 + $0x2330] sm:$0xff] }
 0x4d0   : > { %v1694_v42 = vld [vmem:[%s15477_s22 + $0x2710] sm:$0xff]  ;;  %v14270_v38 = vcombine.high %v1566_v14, %v1570_v43  ;;  %v14269_v30 = vcombine.low %v1566_v14, %v1570_v43 }
 0x4d1   : > { %11453 = vmatpush1.bf16.msra.mxu0 %v14173_v58  ;;  %v1698_v44 = vld [vmem:[%s15477_s22 + $0x2730] sm:$0xff] }
 0x4d2   : > { %11494 = vmatpush1.bf16.msra.mxu1 %v14301_v63  ;;  %11454 = vmatprep.subr.bf16.mxu0 %v14294_v9  ;;  %v14398_v62 = vcombine.high %v1694_v42, %v1698_v44  ;;  %v1558_v46 = vld [vmem:[%s15477_s22 + $0x22d0] sm:$0xff]  ;;  %v14397_v23 = vcombine.low %v1694_v42, %v1698_v44 }
 0x4d3   : > { %11495 = vmatprep.subr.bf16.mxu1 %v14422_v6  ;;  %v1562_v47 = vld [vmem:[%s15477_s22 + $0x22f0] sm:$0xff] }
 0x4d4   : > { %v1686_v48 = vld [vmem:[%s15477_s22 + $0x26d0] sm:$0xff]  ;;  %v14262_v34 = vcombine.high %v1558_v46, %v1562_v47  ;;  %v14261_v2 = vcombine.low %v1558_v46, %v1562_v47 }
 0x4d5   : > { %11455 = vmatpush2.bf16.msra.mxu0 %v14293_v11  ;;  %v1690_v56 = vld [vmem:[%s15477_s22 + $0x26f0] sm:$0xff] }
 0x4d6   : > { %11496 = vmatpush2.bf16.msra.mxu1 %v14421_v39  ;;  %11456 = vmatprep.subr.bf16.mxu0 %v14286_v13  ;;  %v14390_v28 = vcombine.high %v1686_v48, %v1690_v56  ;;  %v1550_v58 = vld [vmem:[%s15477_s22 + $0x2290] sm:$0xff]  ;;  %v14389_v53 = vcombine.low %v1686_v48, %v1690_v56 }
 0x4d7   : > { %11497 = vmatprep.subr.bf16.mxu1 %v14414_v24  ;;  %v1554_v63 = vld [vmem:[%s15477_s22 + $0x22b0] sm:$0xff] }
 0x4d8   : > { %v1678_v9 = vld [vmem:[%s15477_s22 + $0x2690] sm:$0xff]  ;;  %v14254_v55 = vcombine.high %v1550_v58, %v1554_v63  ;;  %v14253_v16 = vcombine.low %v1550_v58, %v1554_v63 }
 0x4d9   : > { %11457 = vmatpush2.bf16.msra.mxu0 %v14285_v27  ;;  %v1682_v6 = vld [vmem:[%s15477_s22 + $0x26b0] sm:$0xff] }
 0x4da   : > { %11498 = vmatpush2.bf16.msra.mxu1 %v14413_v31  ;;  %11458 = vmatprep.subr.bf16.mxu0 %v14278_v5  ;;  %v14382_v10 = vcombine.high %v1678_v9, %v1682_v6  ;;  %v1542_v11 = vld [vmem:[%s15477_s22 + $0x2250] sm:$0xff]  ;;  %v14381_v4 = vcombine.low %v1678_v9, %v1682_v6 }
 0x4db   : > { %11499 = vmatprep.subr.bf16.mxu1 %v14406_v40  ;;  %v1546_v39 = vld [vmem:[%s15477_s22 + $0x2270] sm:$0xff] }
 0x4dc   : > { %v1670_v13 = vld [vmem:[%s15477_s22 + $0x2650] sm:$0xff]  ;;  %v14246_v18 = vcombine.high %v1542_v11, %v1546_v39  ;;  %v14245_v14 = vcombine.low %v1542_v11, %v1546_v39 }
 0x4dd   : > { %11459 = vmatpush2.bf16.msra.mxu0 %v14277_v51  ;;  %v1674_v24 = vld [vmem:[%s15477_s22 + $0x2670] sm:$0xff] }
 0x4de   : > { %11500 = vmatpush2.bf16.msra.mxu1 %v14405_v25  ;;  %11460 = vmatprep.subr.bf16.mxu0 %v14270_v38  ;;  %v14374_v26 = vcombine.high %v1670_v13, %v1674_v24  ;;  %v1534_v27 = vld [vmem:[%s15477_s22 + $0x2210] sm:$0xff]  ;;  %v14373_v43 = vcombine.low %v1670_v13, %v1674_v24 }
 0x4df   : > { %11501 = vmatprep.subr.bf16.mxu1 %v14398_v62  ;;  %v1538_v31 = vld [vmem:[%s15477_s22 + $0x2230] sm:$0xff] }
 0x4e0   : > { %v1662_v5 = vld [vmem:[%s15477_s22 + $0x2610] sm:$0xff]  ;;  %v14238_v42 = vcombine.high %v1534_v27, %v1538_v31  ;;  %v14237_v46 = vcombine.low %v1534_v27, %v1538_v31 }
 0x4e1   : > { %11461 = vmatpush2.bf16.msra.mxu0 %v14269_v30  ;;  %v1666_v40 = vld [vmem:[%s15477_s22 + $0x2630] sm:$0xff] }
 0x4e2   : > { %11502 = vmatpush2.bf16.msra.mxu1 %v14397_v23  ;;  %11462 = vmatprep.subr.bf16.mxu0 %v14262_v34  ;;  %v14366_v44 = vcombine.high %v1662_v5, %v1666_v40  ;;  %v1782_v51 = vld [vmem:[%s15477_s22 + $0x29d0] sm:$0xff]  ;;  %v14365_v47 = vcombine.low %v1662_v5, %v1666_v40 }
 0x4e3   : > { %11503 = vmatprep.subr.bf16.mxu1 %v14390_v28  ;;  %v1786_v25 = vld [vmem:[%s15477_s22 + $0x29f0] sm:$0xff] }
 0x4e4   : > { %v1910_v38 = vld [vmem:[%s15477_s22 + $0x2dd0] sm:$0xff]  ;;  %v14486_v48 = vcombine.high %v1782_v51, %v1786_v25  ;;  %v14485_v58 = vcombine.low %v1782_v51, %v1786_v25 }
 0x4e5   : > { %11463 = vmatpush2.bf16.msra.mxu0 %v14261_v2  ;;  %v1914_v62 = vld [vmem:[%s15477_s22 + $0x2df0] sm:$0xff] }
 0x4e6   : > { %11504 = vmatpush2.bf16.msra.mxu1 %v14389_v53  ;;  %11464 = vmatprep.subr.bf16.mxu0 %v14254_v55  ;;  %v14614_v56 = vcombine.high %v1910_v38, %v1914_v62  ;;  %v1774_v30 = vld [vmem:[%s15477_s22 + $0x2990] sm:$0xff]  ;;  %v14613_v63 = vcombine.low %v1910_v38, %v1914_v62 }
 0x4e7   : > { %11505 = vmatprep.subr.bf16.mxu1 %v14382_v10  ;;  %v1778_v23 = vld [vmem:[%s15477_s22 + $0x29b0] sm:$0xff] }
 0x4e8   : > { %v1902_v34 = vld [vmem:[%s15477_s22 + $0x2d90] sm:$0xff]  ;;  %v14478_v9 = vcombine.high %v1774_v30, %v1778_v23  ;;  %v14477_v24 = vcombine.low %v1774_v30, %v1778_v23 }
 0x4e9   : > { %11465 = vmatpush2.bf16.msra.mxu0 %v14253_v16  ;;  %v1906_v28 = vld [vmem:[%s15477_s22 + $0x2db0] sm:$0xff] }
 0x4ea   : > { %11506 = vmatpush2.bf16.msra.mxu1 %v14381_v4  ;;  %11466 = vmatprep.subr.bf16.mxu0 %v14246_v18  ;;  %v14606_v6 = vcombine.high %v1902_v34, %v1906_v28  ;;  %v1766_v2 = vld [vmem:[%s15477_s22 + $0x2950] sm:$0xff]  ;;  %v14605_v4 = vcombine.low %v1902_v34, %v1906_v28 }
 0x4eb   : > { %11507 = vmatprep.subr.bf16.mxu1 %v14374_v26  ;;  %v1770_v53 = vld [vmem:[%s15477_s22 + $0x2970] sm:$0xff] }
 0x4ec   : > { %v1894_v10 = vld [vmem:[%s15477_s22 + $0x2d50] sm:$0xff]  ;;  %v14470_v18 = vcombine.high %v1766_v2, %v1770_v53 }
 0x4ed   : > { %11467 = vmatpush2.bf16.msra.mxu0 %v14245_v14  ;;  %v1898_v11 = vld [vmem:[%s15477_s22 + $0x2d70] sm:$0xff] }
 0x4ee   : > { %11508 = vmatpush2.bf16.msra.mxu1 %v14373_v43  ;;  %11468 = vmatprep.subr.bf16.mxu0 %v14238_v42  ;;  %v1758_v5 = vld [vmem:[%s15477_s22 + $0x2910] sm:$0xff]  ;;  %v14597_v38 = vcombine.low %v1894_v10, %v1898_v11 }
 0x4ef   : > { %11509 = vmatprep.subr.bf16.mxu1 %v14366_v44  ;;  %v1762_v40 = vld [vmem:[%s15477_s22 + $0x2930] sm:$0xff] }
 0x4f0   : > { %v1886_v43 = vld [vmem:[%s15477_s22 + $0x2d10] sm:$0xff]  ;;  %v14462_v62 = vcombine.high %v1758_v5, %v1762_v40  ;;  %v14461_v34 = vcombine.low %v1758_v5, %v1762_v40 }
 0x4f1   : > { %11469 = vmatpush2.bf16.msra.mxu0 %v14237_v46  ;;  %v1890_v42 = vld [vmem:[%s15477_s22 + $0x2d30] sm:$0xff] }
 0x4f2   : > { %11510 = vmatpush2.bf16.msra.mxu1 %v14365_v47  ;;  %11520 = vmatprep.subr.bf16.mxu0 %v14486_v48  ;;  %v14590_v47 = vcombine.high %v1886_v43, %v1890_v42  ;;  %v1750_v48 = vld [vmem:[%s15477_s22 + $0x28d0] sm:$0xff]  ;;  %v14589_v28 = vcombine.low %v1886_v43, %v1890_v42 }
 0x4f3   : > { %11561 = vmatprep.subr.bf16.mxu1 %v14614_v56  ;;  %v1754_v56 = vld [vmem:[%s15477_s22 + $0x28f0] sm:$0xff] }
 0x4f4   : > { %v11226_v55 = vpop.f32.mrf.mxu0  ;;  %11471 = vmatmul.mubr.bf16.vlgmr.msra.gmra.mxu0 %v15907_v57  ;;  %v1878_v30 = vld [vmem:[%s15477_s22 + $0x2cd0] sm:$0xff] }
 0x4f5   : > { %v11227_v39 = vadd.f32 %v11226_v55, %v16822_v22  ;;  %v11267_v13 = vpop.f32.mrf.mxu1  ;;  %11512 = vmatmul.mubr.bf16.vlgmr.msra.gmra.mxu1 %v15912_v0  ;;  %11521 = vmatpush1.bf16.msra.mxu0 %v14485_v58  ;;  %v14598_v22 = vcombine.high %v1894_v10, %v1898_v11  ;;  %v1882_v23 = vld [vmem:[%s15477_s22 + $0x2cf0] sm:$0xff]  ;;  %v14454_v58 = vcombine.high %v1750_v48, %v1754_v56 }
 0x4f6   : > { %11562 = vmatpush1.bf16.msra.mxu1 %v14613_v63  ;;  %v11228_v16 = vpop.f32.mrf.mxu0  ;;  %11522 = vmatprep.subr.bf16.mxu0 %v14478_v9  ;;  %v14582_v63 = vcombine.high %v1878_v30, %v1882_v23  ;;  %v1742_v9 = vld [vmem:[%s15477_s22 + $0x2890] sm:$0xff]  ;;  %v14453_v55 = vcombine.low %v1750_v48, %v1754_v56  ;;  %v14581_v10 = vcombine.low %v1878_v30, %v1882_v23 }
 0x4f7   : > { %v16895_v26 = vadd.f32 %v11267_v13, %v11227_v39  ;;  %v11229_v27 = vadd.f32 %v11228_v16, %v16827_v54  ;;  %v11269_v31 = vpop.f32.mrf.mxu1  ;;  %11563 = vmatprep.subr.bf16.mxu1 %v14606_v6  ;;  %11552 = vmatprep.mubr.bf16.mxu0 %v15917_v12  ;;  %v14469_v54 = vcombine.low %v1766_v2, %v1770_v53  ;;  %v1746_v6 = vld [vmem:[%s15477_s22 + $0x28b0] sm:$0xff] }
 0x4f8   : > { %v11230_v14 = vpop.f32.mrf.mxu0  ;;  %11593 = vmatprep.mubr.bf16.mxu1 %v15922_v20  ;;  %v1870_v2 = vld [vmem:[%s15477_s22 + $0x2c90] sm:$0xff]  ;;  %v14446_v11 = vcombine.high %v1742_v9, %v1746_v6 }
 0x4f9   : > { %v16904_v44 = vadd.f32 %v11269_v31, %v11229_v27  ;;  %v11271_v51 = vpop.f32.mrf.mxu1  ;;  %11523 = vmatpush1.bf16.msra.mxu0 %v14477_v24  ;;  %v1874_v53 = vld [vmem:[%s15477_s22 + $0x2cb0] sm:$0xff] }
 0x4fa   : > { %11564 = vmatpush1.bf16.msra.mxu1 %v14605_v4  ;;  %v11231_v25 = vpop.f32.mrf.mxu0  ;;  %11524 = vmatprep.subr.bf16.mxu0 %v14470_v18  ;;  %v14574_v39 = vcombine.high %v1870_v2, %v1874_v53  ;;  %v1734_v13 = vld [vmem:[%s15477_s22 + $0x2850] sm:$0xff]  ;;  %v14445_v18 = vcombine.low %v1742_v9, %v1746_v6  ;;  %v14573_v27 = vcombine.low %v1870_v2, %v1874_v53 }
 0x4fb   : > { %v11272_v46 = vpop.f32.mrf.mxu1  ;;  %11565 = vmatprep.subr.bf16.mxu1 %v14598_v22  ;;  %v1738_v24 = vld [vmem:[%s15477_s22 + $0x2870] sm:$0xff] }
 0x4fc   : > { %v1862_v16 = vld [vmem:[%s15477_s22 + $0x2c50] sm:$0xff]  ;;  %v14438_v31 = vcombine.high %v1734_v13, %v1738_v24  ;;  %v14437_v42 = vcombine.low %v1734_v13, %v1738_v24 }
 0x4fd   : > { %11525 = vmatpush1.bf16.msra.mxu0 %v14469_v54  ;;  %v1866_v4 = vld [vmem:[%s15477_s22 + $0x2c70] sm:$0xff] }
 0x4fe   : > { %11566 = vmatpush1.bf16.msra.mxu1 %v14597_v38  ;;  %11526 = vmatprep.subr.bf16.mxu0 %v14462_v62  ;;  %v14566_v22 = vcombine.high %v1862_v16, %v1866_v4  ;;  %v1726_v5 = vld [vmem:[%s15477_s22 + $0x2810] sm:$0xff]  ;;  %v14565_v51 = vcombine.low %v1862_v16, %v1866_v4 }
 0x4ff   : > { %11567 = vmatprep.subr.bf16.mxu1 %v14590_v47  ;;  %v1730_v40 = vld [vmem:[%s15477_s22 + $0x2830] sm:$0xff] }
 0x500   : > { %v1854_v14 = vld [vmem:[%s15477_s22 + $0x2c10] sm:$0xff]  ;;  %v14430_v54 = vcombine.high %v1726_v5, %v1730_v40  ;;  %v14429_v48 = vcombine.low %v1726_v5, %v1730_v40 }
 0x501   : > { %11527 = vmatpush1.bf16.msra.mxu0 %v14461_v34  ;;  %v1858_v43 = vld [vmem:[%s15477_s22 + $0x2c30] sm:$0xff] }
 0x502   : > { %11568 = vmatpush1.bf16.msra.mxu1 %v14589_v28  ;;  %11528 = vmatprep.subr.bf16.mxu0 %v14454_v58  ;;  %v14558_v25 = vcombine.high %v1854_v14, %v1858_v43  ;;  %v1846_v38 = vld [vmem:[%s15477_s22 + $0x2bd0] sm:$0xff]  ;;  %v14557_v56 = vcombine.low %v1854_v14, %v1858_v43 }
 0x503   : > { %11569 = vmatprep.subr.bf16.mxu1 %v14582_v63  ;;  %v1850_v62 = vld [vmem:[%s15477_s22 + $0x2bf0] sm:$0xff] }
 0x504   : > { %v1974_v46 = vld [vmem:[%s15477_s22 + $0x2fd0] sm:$0xff]  ;;  %v14550_v30 = vcombine.high %v1846_v38, %v1850_v62  ;;  %v14549_v9 = vcombine.low %v1846_v38, %v1850_v62 }
 0x505   : > { %11529 = vmatpush1.bf16.msra.mxu0 %v14453_v55  ;;  %v1978_v47 = vld [vmem:[%s15477_s22 + $0x2ff0] sm:$0xff] }
 0x506   : > { %11570 = vmatpush1.bf16.msra.mxu1 %v14581_v10  ;;  %11530 = vmatprep.subr.bf16.mxu0 %v14446_v11  ;;  %v14678_v23 = vcombine.high %v1974_v46, %v1978_v47  ;;  %v1838_v34 = vld [vmem:[%s15477_s22 + $0x2b90] sm:$0xff]  ;;  %v14677_v6 = vcombine.low %v1974_v46, %v1978_v47 }
 0x507   : > { %11571 = vmatprep.subr.bf16.mxu1 %v14574_v39  ;;  %v1842_v28 = vld [vmem:[%s15477_s22 + $0x2bb0] sm:$0xff] }
 0x508   : > { %v1966_v58 = vld [vmem:[%s15477_s22 + $0x2f90] sm:$0xff]  ;;  %v14542_v2 = vcombine.high %v1838_v34, %v1842_v28  ;;  %v14541_v13 = vcombine.low %v1838_v34, %v1842_v28 }
 0x509   : > { %11531 = vmatpush1.bf16.msra.mxu0 %v14445_v18  ;;  %v1970_v63 = vld [vmem:[%s15477_s22 + $0x2fb0] sm:$0xff] }
 0x50a   : > { %11572 = vmatpush1.bf16.msra.mxu1 %v14573_v27  ;;  %11532 = vmatprep.subr.bf16.mxu0 %v14438_v31  ;;  %v14670_v53 = vcombine.high %v1966_v58, %v1970_v63  ;;  %v1830_v55 = vld [vmem:[%s15477_s22 + $0x2b50] sm:$0xff]  ;;  %v14669_v24 = vcombine.low %v1966_v58, %v1970_v63 }
 0x50b   : > { %11573 = vmatprep.subr.bf16.mxu1 %v14566_v22  ;;  %v1834_v10 = vld [vmem:[%s15477_s22 + $0x2b70] sm:$0xff] }
 0x50c   : > { %v1958_v11 = vld [vmem:[%s15477_s22 + $0x2f50] sm:$0xff]  ;;  %v14534_v16 = vcombine.high %v1830_v55, %v1834_v10  ;;  %v14533_v5 = vcombine.low %v1830_v55, %v1834_v10 }
 0x50d   : > { %11533 = vmatpush1.bf16.msra.mxu0 %v14437_v42  ;;  %v1962_v39 = vld [vmem:[%s15477_s22 + $0x2f70] sm:$0xff] }
 0x50e   : > { %11574 = vmatpush1.bf16.msra.mxu1 %v14565_v51  ;;  %11534 = vmatprep.subr.bf16.mxu0 %v14430_v54  ;;  %v14662_v4 = vcombine.high %v1958_v11, %v1962_v39  ;;  %v1822_v18 = vld [vmem:[%s15477_s22 + $0x2b10] sm:$0xff]  ;;  %v14661_v40 = vcombine.low %v1958_v11, %v1962_v39 }
 0x50f   : > { %11575 = vmatprep.subr.bf16.mxu1 %v14558_v25  ;;  %v1826_v27 = vld [vmem:[%s15477_s22 + $0x2b30] sm:$0xff] }
 0x510   : > { %v1950_v31 = vld [vmem:[%s15477_s22 + $0x2f10] sm:$0xff]  ;;  %v14526_v14 = vcombine.high %v1822_v18, %v1826_v27  ;;  %v14525_v38 = vcombine.low %v1822_v18, %v1826_v27 }
 0x511   : > { %11535 = vmatpush1.bf16.msra.mxu0 %v14429_v48  ;;  %v1954_v22 = vld [vmem:[%s15477_s22 + $0x2f30] sm:$0xff] }
 0x512   : > { %11576 = vmatpush1.bf16.msra.mxu1 %v14557_v56  ;;  %11536 = vmatprep.subr.bf16.mxu0 %v14550_v30  ;;  %v14654_v43 = vcombine.high %v1950_v31, %v1954_v22  ;;  %v1814_v42 = vld [vmem:[%s15477_s22 + $0x2ad0] sm:$0xff]  ;;  %v14653_v62 = vcombine.low %v1950_v31, %v1954_v22 }
 0x513   : > { %11577 = vmatprep.subr.bf16.mxu1 %v14678_v23  ;;  %v1818_v51 = vld [vmem:[%s15477_s22 + $0x2af0] sm:$0xff] }
 0x514   : > { %v1942_v54 = vld [vmem:[%s15477_s22 + $0x2ed0] sm:$0xff]  ;;  %v14518_v46 = vcombine.high %v1814_v42, %v1818_v51  ;;  %v14517_v34 = vcombine.low %v1814_v42, %v1818_v51 }
 0x515   : > { %11537 = vmatpush2.bf16.msra.mxu0 %v14549_v9  ;;  %v1946_v25 = vld [vmem:[%s15477_s22 + $0x2ef0] sm:$0xff] }
 0x516   : > { %11578 = vmatpush2.bf16.msra.mxu1 %v14677_v6  ;;  %11538 = vmatprep.subr.bf16.mxu0 %v14542_v2  ;;  %v14646_v47 = vcombine.high %v1942_v54, %v1946_v25  ;;  %v1806_v48 = vld [vmem:[%s15477_s22 + $0x2a90] sm:$0xff]  ;;  %v14645_v28 = vcombine.low %v1942_v54, %v1946_v25 }
 0x517   : > { %11579 = vmatprep.subr.bf16.mxu1 %v14670_v53  ;;  %v1810_v56 = vld [vmem:[%s15477_s22 + $0x2ab0] sm:$0xff] }
 0x518   : > { %v1934_v30 = vld [vmem:[%s15477_s22 + $0x2e90] sm:$0xff]  ;;  %v14510_v58 = vcombine.high %v1806_v48, %v1810_v56  ;;  %v14509_v55 = vcombine.low %v1806_v48, %v1810_v56 }
 0x519   : > { %11539 = vmatpush2.bf16.msra.mxu0 %v14541_v13  ;;  %v1938_v23 = vld [vmem:[%s15477_s22 + $0x2eb0] sm:$0xff] }
 0x51a   : > { %11580 = vmatpush2.bf16.msra.mxu1 %v14669_v24  ;;  %11540 = vmatprep.subr.bf16.mxu0 %v14534_v16  ;;  %v14638_v63 = vcombine.high %v1934_v30, %v1938_v23  ;;  %v1798_v9 = vld [vmem:[%s15477_s22 + $0x2a50] sm:$0xff]  ;;  %v14637_v10 = vcombine.low %v1934_v30, %v1938_v23 }
 0x51b   : > { %11581 = vmatprep.subr.bf16.mxu1 %v14662_v4  ;;  %v1802_v6 = vld [vmem:[%s15477_s22 + $0x2a70] sm:$0xff] }
 0x51c   : > { %v1926_v2 = vld [vmem:[%s15477_s22 + $0x2e50] sm:$0xff]  ;;  %v14502_v11 = vcombine.high %v1798_v9, %v1802_v6  ;;  %v14501_v18 = vcombine.low %v1798_v9, %v1802_v6  ;;  %v491_v9 = vld [vmem:[%s15477_s22 + $0x178] sm:$0xff] }
 0x51d   : > { %11541 = vmatpush2.bf16.msra.mxu0 %v14533_v5  ;;  %v1930_v53 = vld [vmem:[%s15477_s22 + $0x2e70] sm:$0xff] }
 0x51e   : > { %11582 = vmatpush2.bf16.msra.mxu1 %v14661_v40  ;;  %11542 = vmatprep.subr.bf16.mxu0 %v14526_v14  ;;  %v14630_v39 = vcombine.high %v1926_v2, %v1930_v53  ;;  %v1790_v13 = vld [vmem:[%s15477_s22 + $0x2a10] sm:$0xff]  ;;  %v14629_v27 = vcombine.low %v1926_v2, %v1930_v53  ;;  %v503_v14 = vld [vmem:[%s15477_s22 + $0x1d8] sm:$0xff] }
 0x51f   : > { %11583 = vmatprep.subr.bf16.mxu1 %v14654_v43  ;;  %v1794_v24 = vld [vmem:[%s15477_s22 + $0x2a30] sm:$0xff]  ;;  %v507_v43 = vld [vmem:[%s15477_s22 + $0x1f8] sm:$0xff] }
 0x520   : > { %v1918_v16 = vld [vmem:[%s15477_s22 + $0x2e10] sm:$0xff]  ;;  %v14494_v31 = vcombine.high %v1790_v13, %v1794_v24  ;;  %v14493_v42 = vcombine.low %v1790_v13, %v1794_v24  ;;  %v13208_v25 = vcombine.high %v503_v14, %v507_v43  ;;  %v13207_v56 = vcombine.low %v503_v14, %v507_v43 }
 0x521   : > { %11543 = vmatpush2.bf16.msra.mxu0 %v14525_v38  ;;  %v1922_v4 = vld [vmem:[%s15477_s22 + $0x2e30] sm:$0xff] }
 0x522   : > { %11584 = vmatpush2.bf16.msra.mxu1 %v14653_v62  ;;  %11544 = vmatprep.subr.bf16.mxu0 %v14518_v46  ;;  %v14622_v22 = vcombine.high %v1918_v16, %v1922_v4  ;;  %v2038_v5 = vld [vmem:[%s15477_s22 + $0x31d0] sm:$0xff]  ;;  %v14621_v51 = vcombine.low %v1918_v16, %v1922_v4  ;;  %v495_v46 = vld [vmem:[%s15477_s22 + $0x198] sm:$0xff] }
 0x523   : > { %11585 = vmatprep.subr.bf16.mxu1 %v14646_v47  ;;  %v2042_v40 = vld [vmem:[%s15477_s22 + $0x31f0] sm:$0xff]  ;;  %v499_v47 = vld [vmem:[%s15477_s22 + $0x1b8] sm:$0xff] }
 0x524   : > { %v14742_v54 = vcombine.high %v2038_v5, %v2042_v40  ;;  %v2030_v38 = vld [vmem:[%s15477_s22 + $0x3190] sm:$0xff]  ;;  %v14741_v48 = vcombine.low %v2038_v5, %v2042_v40  ;;  %v13200_v23 = vcombine.high %v495_v46, %v499_v47 }
 0x525   : > { %11545 = vmatpush2.bf16.msra.mxu0 %v14517_v34  ;;  %v2034_v62 = vld [vmem:[%s15477_s22 + $0x31b0] sm:$0xff] }
 0x526   : > { %11586 = vmatpush2.bf16.msra.mxu1 %v14645_v28  ;;  %11546 = vmatprep.subr.bf16.mxu0 %v14510_v58  ;;  %v14734_v30 = vcombine.high %v2030_v38, %v2034_v62  ;;  %v2022_v34 = vld [vmem:[%s15477_s22 + $0x3150] sm:$0xff]  ;;  %v14733_v53 = vcombine.low %v2030_v38, %v2034_v62  ;;  %v475_v38 = vld [vmem:[%s15477_s22 + $0xf8] sm:$0xff] }
 0x527   : > { %11587 = vmatprep.subr.bf16.mxu1 %v14638_v63  ;;  %v2026_v28 = vld [vmem:[%s15477_s22 + $0x3170] sm:$0xff]  ;;  %v487_v63 = vld [vmem:[%s15477_s22 + $0x158] sm:$0xff] }
 0x528   : > { %v2014_v16 = vld [vmem:[%s15477_s22 + $0x3110] sm:$0xff]  ;;  %v13191_v14 = vcombine.low %v487_v63, %v491_v9 }
 0x529   : > { %11547 = vmatpush2.bf16.msra.mxu0 %v14509_v55  ;;  %v2018_v4 = vld [vmem:[%s15477_s22 + $0x3130] sm:$0xff] }
 0x52a   : > { %11588 = vmatpush2.bf16.msra.mxu1 %v14637_v10  ;;  %11548 = vmatprep.subr.bf16.mxu0 %v14502_v11  ;;  %v13199_v10 = vcombine.low %v495_v46, %v499_v47  ;;  %v14726_v11 = vcombine.high %v2022_v34, %v2026_v28  ;;  %v14718_v43 = vcombine.high %v2014_v16, %v2018_v4 }
 0x52b   : > { %11589 = vmatprep.subr.bf16.mxu1 %v14630_v39  ;;  %v14717_v62 = vcombine.low %v2014_v16, %v2018_v4  ;;  %v1986_v16 = vld [vmem:[%s15477_s22 + $0x3030] sm:$0xff]  ;;  %v447_v4 = vld [vmem:[%s15477_s22 + $0x18] sm:$0xff] }
 0x52d   : > { %11549 = vmatpush2.bf16.msra.mxu0 %v14501_v18 }
 0x52e   : > { %11590 = vmatpush2.bf16.msra.mxu1 %v14629_v27  ;;  %11550 = vmatprep.subr.bf16.mxu0 %v14494_v31  ;;  %v479_v27 = vld [vmem:[%s15477_s22 + $0x118] sm:$0xff] }
 0x52f   : > { %11591 = vmatprep.subr.bf16.mxu1 %v14622_v22  ;;  %v483_v31 = vld [vmem:[%s15477_s22 + $0x138] sm:$0xff] }
 0x530   : > { %v13183_v46 = vcombine.low %v479_v27, %v483_v31 }
 0x531   : > { %11551 = vmatpush2.bf16.msra.mxu0 %v14493_v42 }
 0x532   : > { %11592 = vmatpush2.bf16.msra.mxu1 %v14621_v51  ;;  %11602 = vmatprep.subr.bf16.mxu0 %v14742_v54  ;;  %v13184_v51 = vcombine.high %v479_v27, %v483_v31  ;;  %v2006_v54 = vld [vmem:[%s15477_s22 + $0x30d0] sm:$0xff] }
 0x533   : > { %11643 = vmatprep.subr.bf16.mxu1 %v13208_v25  ;;  %v471_v25 = vld [vmem:[%s15477_s22 + $0xd8] sm:$0xff] }
 0x534   : > { %v11308_v58 = vpop.f32.mrf.mxu0  ;;  %11553 = vmatmul.mubr.bf16.vlgmr.msra.gmra.mxu0 %v15993_v33 }
 0x535   : > { %v11309_v6 = vadd.f32 %v11308_v58, %v16895_v26  ;;  %v11349_v2 = vpop.f32.mrf.mxu1  ;;  %11594 = vmatmul.mubr.bf16.vlgmr.msra.gmra.mxu1 %v15997_v36  ;;  %11603 = vmatpush1.bf16.msra.mxu0 %v14741_v48  ;;  %v13192_v26 = vcombine.high %v487_v63, %v491_v9  ;;  %v13176_v48 = vcombine.high %v471_v25, %v475_v38 }
 0x536   : > { %11644 = vmatpush1.bf16.msra.mxu1 %v13207_v56  ;;  %v11310_v55 = vpop.f32.mrf.mxu0  ;;  %11604 = vmatprep.subr.bf16.mxu0 %v14734_v30  ;;  %v1998_v56 = vld [vmem:[%s15477_s22 + $0x3090] sm:$0xff]  ;;  %v13175_v58 = vcombine.low %v471_v25, %v475_v38  ;;  %v623_v38 = vld [vmem:[%s15477_s22 + $0x598] sm:$0xff] }
 0x537   : > { %v16969_v39 = vadd.f32 %v11349_v2, %v11309_v6  ;;  %v11311_v13 = vadd.f32 %v11310_v55, %v16904_v44  ;;  %v11351_v24 = vpop.f32.mrf.mxu1  ;;  %11645 = vmatprep.subr.bf16.mxu1 %v13200_v23  ;;  %11634 = vmatprep.mubr.bf16.mxu0 %v15284_v8  ;;  %v14725_v44 = vcombine.low %v2022_v34, %v2026_v28  ;;  %v2002_v30 = vld [vmem:[%s15477_s22 + $0x30b0] sm:$0xff]  ;;  %v463_v23 = vld [vmem:[%s15477_s22 + $0x98] sm:$0xff] }
 0x538   : > { %v11312_v18 = vpop.f32.mrf.mxu0  ;;  %11675 = vmatprep.mubr.bf16.mxu1 %v15535_v59  ;;  %v2010_v59 = vld [vmem:[%s15477_s22 + $0x30f0] sm:$0xff]  ;;  %v467_v34 = vld [vmem:[%s15477_s22 + $0xb8] sm:$0xff]  ;;  %v14702_v63 = vcombine.high %v1998_v56, %v2002_v30 }
 0x539   : > { %v16978_v22 = vadd.f32 %v11351_v24, %v11311_v13  ;;  %v11353_v5 = vpop.f32.mrf.mxu1  ;;  %11605 = vmatpush1.bf16.msra.mxu0 %v14733_v53  ;;  %v14710_v47 = vcombine.high %v2006_v54, %v2010_v59  ;;  %v14709_v28 = vcombine.low %v2006_v54, %v2010_v59  ;;  %v13168_v9 = vcombine.high %v463_v23, %v467_v34  ;;  %v1990_v6 = vld [vmem:[%s15477_s22 + $0x3050] sm:$0xff]  ;;  %v455_v53 = vld [vmem:[%s15477_s22 + $0x58] sm:$0xff] }
 0x53a   : > { %11646 = vmatpush1.bf16.msra.mxu1 %v13199_v10  ;;  %v11313_v40 = vpop.f32.mrf.mxu0  ;;  %11606 = vmatprep.subr.bf16.mxu0 %v14726_v11  ;;  %v1994_v2 = vld [vmem:[%s15477_s22 + $0x3070] sm:$0xff]  ;;  %v459_v55 = vld [vmem:[%s15477_s22 + $0x78] sm:$0xff]  ;;  %v14701_v10 = vcombine.low %v1998_v56, %v2002_v30  ;;  %v13167_v11 = vcombine.low %v463_v23, %v467_v34 }
 0x53b   : > { %v11354_v42 = vpop.f32.mrf.mxu1  ;;  %11647 = vmatprep.subr.bf16.mxu1 %v13192_v26  ;;  %v14694_v13 = vcombine.high %v1990_v6, %v1994_v2  ;;  %v13160_v24 = vcombine.high %v455_v53, %v459_v55  ;;  %v1982_v26 = vld [vmem:[%s15477_s22 + $0x3010] sm:$0xff]  ;;  %v451_v18 = vld [vmem:[%s15477_s22 + $0x38] sm:$0xff]  ;;  %v14693_v27 = vcombine.low %v1990_v6, %v1994_v2  ;;  %v13159_v31 = vcombine.low %v455_v53, %v459_v55 }
 0x53c   : > { %v14686_v5 = vcombine.high %v1982_v26, %v1986_v16  ;;  %v631_v40 = vld [vmem:[%s15477_s22 + $0x5d8] sm:$0xff]  ;;  %v13151_v54 = vcombine.low %v447_v4, %v451_v18 }
 0x53d   : > { %11607 = vmatpush1.bf16.msra.mxu0 %v14725_v44  ;;  %v13152_v44 = vcombine.high %v447_v4, %v451_v18  ;;  %v571_v42 = vld [vmem:[%s15477_s22 + $0x3f8] sm:$0xff] }
 0x53e   : > { %11648 = vmatpush1.bf16.msra.mxu1 %v13191_v14  ;;  %11608 = vmatprep.subr.bf16.mxu0 %v14718_v43  ;;  %v635_v14 = vld [vmem:[%s15477_s22 + $0x5f8] sm:$0xff] }
 0x53f   : > { %11649 = vmatprep.subr.bf16.mxu1 %v13184_v51  ;;  %v567_v43 = vld [vmem:[%s15477_s22 + $0x3d8] sm:$0xff]  ;;  %v14685_v51 = vcombine.low %v1982_v26, %v1986_v16  ;;  %v13336_v59 = vcombine.high %v631_v40, %v635_v14 }
 0x540   : > { %v13272_v25 = vcombine.high %v567_v43, %v571_v42  ;;  %v13271_v56 = vcombine.low %v567_v43, %v571_v42  ;;  %v615_v34 = vld [vmem:[%s15477_s22 + $0x558] sm:$0xff] }
 0x541   : > { %11609 = vmatpush1.bf16.msra.mxu0 %v14717_v62  ;;  %v627_v62 = vld [vmem:[%s15477_s22 + $0x5b8] sm:$0xff] }
 0x542   : > { %11650 = vmatpush1.bf16.msra.mxu1 %v13183_v46  ;;  %11610 = vmatprep.subr.bf16.mxu0 %v14710_v47  ;;  %v559_v46 = vld [vmem:[%s15477_s22 + $0x398] sm:$0xff]  ;;  %v13328_v30 = vcombine.high %v623_v38, %v627_v62 }
 0x543   : > { %11651 = vmatprep.subr.bf16.mxu1 %v13176_v48  ;;  %v563_v47 = vld [vmem:[%s15477_s22 + $0x3b8] sm:$0xff]  ;;  %v13335_v48 = vcombine.low %v631_v40, %v635_v14 }
 0x544   : > { %v13264_v23 = vcombine.high %v559_v46, %v563_v47  ;;  %v13263_v6 = vcombine.low %v559_v46, %v563_v47  ;;  %v607_v55 = vld [vmem:[%s15477_s22 + $0x518] sm:$0xff] }
 0x545   : > { %11611 = vmatpush1.bf16.msra.mxu0 %v14709_v28  ;;  %v619_v28 = vld [vmem:[%s15477_s22 + $0x578] sm:$0xff] }
 0x546   : > { %11652 = vmatpush1.bf16.msra.mxu1 %v13175_v58  ;;  %11612 = vmatprep.subr.bf16.mxu0 %v14702_v63  ;;  %v551_v58 = vld [vmem:[%s15477_s22 + $0x358] sm:$0xff]  ;;  %v13320_v2 = vcombine.high %v615_v34, %v619_v28 }
 0x547   : > { %11653 = vmatprep.subr.bf16.mxu1 %v13168_v9  ;;  %v555_v63 = vld [vmem:[%s15477_s22 + $0x378] sm:$0xff]  ;;  %v13327_v9 = vcombine.low %v623_v38, %v627_v62 }
 0x548   : > { %v13256_v53 = vcombine.high %v551_v58, %v555_v63  ;;  %v13255_v26 = vcombine.low %v551_v58, %v555_v63  ;;  %v599_v4 = vld [vmem:[%s15477_s22 + $0x4d8] sm:$0xff] }
 0x549   : > { %11613 = vmatpush1.bf16.msra.mxu0 %v14701_v10  ;;  %v611_v10 = vld [vmem:[%s15477_s22 + $0x538] sm:$0xff] }
 0x54a   : > { %11654 = vmatpush1.bf16.msra.mxu1 %v13167_v11  ;;  %11614 = vmatprep.subr.bf16.mxu0 %v14694_v13  ;;  %v543_v11 = vld [vmem:[%s15477_s22 + $0x318] sm:$0xff] }
 0x54b   : > { %11655 = vmatprep.subr.bf16.mxu1 %v13160_v24  ;;  %v547_v13 = vld [vmem:[%s15477_s22 + $0x338] sm:$0xff]  ;;  %v13319_v24 = vcombine.low %v615_v34, %v619_v28 }
 0x54c   : > { %v13248_v16 = vcombine.high %v543_v11, %v547_v13  ;;  %v603_v18 = vld [vmem:[%s15477_s22 + $0x4f8] sm:$0xff] }
 0x54d   : > { %11615 = vmatpush1.bf16.msra.mxu0 %v14693_v27  ;;  %v535_v27 = vld [vmem:[%s15477_s22 + $0x2d8] sm:$0xff]  ;;  %v13304_v40 = vcombine.high %v599_v4, %v603_v18 }
 0x54e   : > { %11656 = vmatpush1.bf16.msra.mxu1 %v13159_v31  ;;  %11616 = vmatprep.subr.bf16.mxu0 %v14686_v5  ;;  %v539_v31 = vld [vmem:[%s15477_s22 + $0x2f8] sm:$0xff]  ;;  %v13311_v5 = vcombine.low %v607_v55, %v611_v10 }
 0x54f   : > { %11657 = vmatprep.subr.bf16.mxu1 %v13152_v44  ;;  %v13247_v44 = vcombine.low %v543_v11, %v547_v13  ;;  %v13240_v14 = vcombine.high %v535_v27, %v539_v31  ;;  %v591_v43 = vld [vmem:[%s15477_s22 + $0x498] sm:$0xff] }
 0x550   : > { %v595_v42 = vld [vmem:[%s15477_s22 + $0x4b8] sm:$0xff] }
 0x551   : > { %11617 = vmatpush1.bf16.msra.mxu0 %v14685_v51  ;;  %v527_v51 = vld [vmem:[%s15477_s22 + $0x298] sm:$0xff]  ;;  %v13296_v38 = vcombine.high %v591_v43, %v595_v42 }
 0x552   : > { %11658 = vmatpush1.bf16.msra.mxu1 %v13151_v54  ;;  %11684 = vmatprep.subr.bf16.mxu0 %v13336_v59  ;;  %v531_v54 = vld [vmem:[%s15477_s22 + $0x2b8] sm:$0xff]  ;;  %v13303_v59 = vcombine.low %v599_v4, %v603_v18 }
 0x553   : > { %11659 = vmatprep.subr.bf16.mxu1 %v13272_v25  ;;  %v13239_v25 = vcombine.low %v535_v27, %v539_v31  ;;  %v13232_v62 = vcombine.high %v527_v51, %v531_v54  ;;  %v583_v46 = vld [vmem:[%s15477_s22 + $0x458] sm:$0xff] }
 0x554   : > { %11635 = vmatmul.mubr.bf16.vlgmr.msra.gmra.mxu0 %v16040_v35  ;;  %v587_v47 = vld [vmem:[%s15477_s22 + $0x478] sm:$0xff] }
 0x555   : > { %11685 = vmatpush1.bf16.msra.mxu0 %v13335_v48  ;;  %11716 = vmatprep.mubr.bf16.mxu0 %v15537_v60  ;;  %v13312_v60 = vcombine.high %v607_v55, %v611_v10  ;;  %v519_v48 = vld [vmem:[%s15477_s22 + $0x258] sm:$0xff]  ;;  %v13288_v34 = vcombine.high %v583_v46, %v587_v47 }
 0x556   : > { %11660 = vmatpush2.bf16.msra.mxu1 %v13271_v56  ;;  %11686 = vmatprep.subr.bf16.mxu0 %v13328_v30  ;;  %v523_v56 = vld [vmem:[%s15477_s22 + $0x278] sm:$0xff]  ;;  %v13295_v30 = vcombine.low %v591_v43, %v595_v42 }
 0x557   : > { %11661 = vmatprep.subr.bf16.mxu1 %v13264_v23  ;;  %v13231_v23 = vcombine.low %v527_v51, %v531_v54  ;;  %v13224_v28 = vcombine.high %v519_v48, %v523_v56  ;;  %v575_v58 = vld [vmem:[%s15477_s22 + $0x418] sm:$0xff] }
 0x558   : > { %v579_v63 = vld [vmem:[%s15477_s22 + $0x438] sm:$0xff] }
 0x559   : > { %11687 = vmatpush1.bf16.msra.mxu0 %v13327_v9  ;;  %v511_v9 = vld [vmem:[%s15477_s22 + $0x218] sm:$0xff]  ;;  %v13280_v55 = vcombine.high %v575_v58, %v579_v63 }
 0x55a   : > { %11662 = vmatpush2.bf16.msra.mxu1 %v13263_v6  ;;  %11688 = vmatprep.subr.bf16.mxu0 %v13320_v2  ;;  %v515_v6 = vld [vmem:[%s15477_s22 + $0x238] sm:$0xff]  ;;  %v13287_v2 = vcombine.low %v583_v46, %v587_v47 }
 0x55b   : > { %11663 = vmatprep.subr.bf16.mxu1 %v13256_v53  ;;  %v13223_v53 = vcombine.low %v519_v48, %v523_v56  ;;  %v13216_v10 = vcombine.high %v511_v9, %v515_v6  ;;  %v695_v11 = vld [vmem:[%s15477_s22 + $0x7d8] sm:$0xff] }
 0x55c   : > { %v699_v13 = vld [vmem:[%s15477_s22 + $0x7f8] sm:$0xff] }
 0x55d   : > { %11689 = vmatpush1.bf16.msra.mxu0 %v13319_v24  ;;  %v759_v24 = vld [vmem:[%s15477_s22 + $0x9d8] sm:$0xff]  ;;  %v13400_v4 = vcombine.high %v695_v11, %v699_v13 }
 0x55e   : > { %11664 = vmatpush2.bf16.msra.mxu1 %v13255_v26  ;;  %11690 = vmatprep.subr.bf16.mxu0 %v13312_v60  ;;  %v763_v26 = vld [vmem:[%s15477_s22 + $0x9f8] sm:$0xff]  ;;  %v13279_v60 = vcombine.low %v575_v58, %v579_v63 }
 0x55f   : > { %11665 = vmatprep.subr.bf16.mxu1 %v13248_v16  ;;  %v13215_v16 = vcombine.low %v511_v9, %v515_v6  ;;  %v13464_v18 = vcombine.high %v759_v24, %v763_v26  ;;  %v687_v27 = vld [vmem:[%s15477_s22 + $0x798] sm:$0xff] }
 0x560   : > { %v691_v31 = vld [vmem:[%s15477_s22 + $0x7b8] sm:$0xff] }
 0x561   : > { %11691 = vmatpush1.bf16.msra.mxu0 %v13311_v5  ;;  %v751_v5 = vld [vmem:[%s15477_s22 + $0x998] sm:$0xff]  ;;  %v13392_v43 = vcombine.high %v687_v27, %v691_v31  ;;  %v13391_v47 = vcombine.low %v687_v27, %v691_v31 }
 0x562   : > { %11666 = vmatpush2.bf16.msra.mxu1 %v13247_v44  ;;  %11692 = vmatprep.subr.bf16.mxu0 %v13304_v40  ;;  %v755_v44 = vld [vmem:[%s15477_s22 + $0x9b8] sm:$0xff]  ;;  %v13399_v40 = vcombine.low %v695_v11, %v699_v13 }
 0x563   : > { %11667 = vmatprep.subr.bf16.mxu1 %v13240_v14  ;;  %v13463_v14 = vcombine.low %v759_v24, %v763_v26  ;;  %v13456_v42 = vcombine.high %v751_v5, %v755_v44  ;;  %v679_v51 = vld [vmem:[%s15477_s22 + $0x758] sm:$0xff]  ;;  %v13455_v56 = vcombine.low %v751_v5, %v755_v44 }
 0x564   : > { %v683_v54 = vld [vmem:[%s15477_s22 + $0x778] sm:$0xff] }
 0x565   : > { %11693 = vmatpush1.bf16.msra.mxu0 %v13303_v59  ;;  %v671_v58 = vld [vmem:[%s15477_s22 + $0x718] sm:$0xff] }
 0x566   : > { %11668 = vmatpush2.bf16.msra.mxu1 %v13239_v25  ;;  %11694 = vmatprep.subr.bf16.mxu0 %v13296_v38  ;;  %v743_v25 = vld [vmem:[%s15477_s22 + $0x958] sm:$0xff] }
 0x567   : > { %11669 = vmatprep.subr.bf16.mxu1 %v13232_v62  ;;  %v747_v38 = vld [vmem:[%s15477_s22 + $0x978] sm:$0xff] }
 0x568   : > { %v675_v63 = vld [vmem:[%s15477_s22 + $0x738] sm:$0xff] }
 0x569   : > { %11695 = vmatpush1.bf16.msra.mxu0 %v13295_v30  ;;  %v13384_v30 = vcombine.high %v679_v51, %v683_v54  ;;  %v735_v9 = vld [vmem:[%s15477_s22 + $0x918] sm:$0xff]  ;;  %v13376_v11 = vcombine.high %v671_v58, %v675_v63 }
 0x56a   : > { %11670 = vmatpush2.bf16.msra.mxu1 %v13231_v23  ;;  %11696 = vmatprep.subr.bf16.mxu0 %v13288_v34  ;;  %v739_v6 = vld [vmem:[%s15477_s22 + $0x938] sm:$0xff] }
 0x56b   : > { %11671 = vmatprep.subr.bf16.mxu1 %v13224_v28  ;;  %v663_v24 = vld [vmem:[%s15477_s22 + $0x6d8] sm:$0xff] }
 0x56c   : > { %v667_v26 = vld [vmem:[%s15477_s22 + $0x6f8] sm:$0xff] }
 0x56d   : > { %11697 = vmatpush1.bf16.msra.mxu0 %v13287_v2  ;;  %v13368_v27 = vcombine.high %v663_v24, %v667_v26  ;;  %v655_v5 = vld [vmem:[%s15477_s22 + $0x698] sm:$0xff] }
 0x56e   : > { %11672 = vmatpush2.bf16.msra.mxu1 %v13223_v53  ;;  %11698 = vmatprep.subr.bf16.mxu0 %v13280_v55  ;;  %v13383_v55 = vcombine.low %v679_v51, %v683_v54  ;;  %v659_v44 = vld [vmem:[%s15477_s22 + $0x6b8] sm:$0xff] }
 0x56f   : > { %11673 = vmatprep.subr.bf16.mxu1 %v13216_v10  ;;  %v13447_v10 = vcombine.low %v743_v25, %v747_v38  ;;  %v13360_v51 = vcombine.high %v655_v5, %v659_v44 }
 0x571   : > { %11699 = vmatpush1.bf16.msra.mxu0 %v13279_v60  ;;  %v727_v60 = vld [vmem:[%s15477_s22 + $0x8d8] sm:$0xff] }
 0x572   : > { %11674 = vmatpush2.bf16.msra.mxu1 %v13215_v16  ;;  %11700 = vmatprep.subr.bf16.mxu0 %v13400_v4  ;;  %v731_v16 = vld [vmem:[%s15477_s22 + $0x8f8] sm:$0xff]  ;;  %v13375_v4 = vcombine.low %v671_v58, %v675_v63 }
 0x573   : > { %11725 = vmatprep.subr.bf16.mxu1 %v13464_v18  ;;  %v13439_v18 = vcombine.low %v735_v9, %v739_v6  ;;  %v13432_v31 = vcombine.high %v727_v60, %v731_v16 }
 0x574   : > { %v11390_v59 = vpop.f32.mrf.mxu0 }
 0x575   : > { %v11391_v62 = vadd.f32 %v11390_v59, %v16969_v39  ;;  %v11431_v46 = vpop.f32.mrf.mxu1  ;;  %11676 = vmatmul.mubr.bf16.vlgmr.msra.gmra.mxu1 %v15583_v17  ;;  %11701 = vmatpush2.bf16.msra.mxu0 %v13399_v40  ;;  %v13448_v39 = vcombine.high %v743_v25, %v747_v38  ;;  %v719_v40 = vld [vmem:[%s15477_s22 + $0x898] sm:$0xff] }
 0x576   : > { %11726 = vmatpush1.bf16.msra.mxu1 %v13463_v14  ;;  %v11392_v48 = vpop.f32.mrf.mxu0  ;;  %11702 = vmatprep.subr.bf16.mxu0 %v13392_v43  ;;  %v723_v14 = vld [vmem:[%s15477_s22 + $0x8b8] sm:$0xff]  ;;  %v13367_v43 = vcombine.low %v663_v24, %v667_v26 }
 0x577   : > { %v17044_v23 = vadd.f32 %v11431_v46, %v11391_v62  ;;  %v11393_v34 = vadd.f32 %v11392_v48, %v16978_v22  ;;  %v11433_v28 = vpop.f32.mrf.mxu1  ;;  %11727 = vmatprep.subr.bf16.mxu1 %v13456_v42  ;;  %11757 = vmatprep.mubr.bf16.mxu1 %v15593_v29  ;;  %v13440_v29 = vcombine.high %v735_v9, %v739_v6  ;;  %v647_v59 = vld [vmem:[%s15477_s22 + $0x658] sm:$0xff] }
 0x578   : > { %v11394_v17 = vpop.f32.mrf.mxu0  ;;  %v13431_v42 = vcombine.low %v727_v60, %v731_v16  ;;  %v13424_v54 = vcombine.high %v719_v40, %v723_v14  ;;  %v651_v25 = vld [vmem:[%s15477_s22 + $0x678] sm:$0xff]  ;;  %v13359_v46 = vcombine.low %v655_v5, %v659_v44 }
 0x579   : > { %v17052_v2 = vadd.f32 %v11433_v28, %v11393_v34  ;;  %v11435_v53 = vpop.f32.mrf.mxu1  ;;  %11703 = vmatpush2.bf16.msra.mxu0 %v13391_v47  ;;  %v711_v38 = vld [vmem:[%s15477_s22 + $0x858] sm:$0xff]  ;;  %v13423_v47 = vcombine.low %v719_v40, %v723_v14  ;;  %v13352_v48 = vcombine.high %v647_v59, %v651_v25  ;;  %v13351_v58 = vcombine.low %v647_v59, %v651_v25 }
 0x57a   : > { %11728 = vmatpush1.bf16.msra.mxu1 %v13455_v56  ;;  %v11395_v22 = vpop.f32.mrf.mxu0  ;;  %11704 = vmatprep.subr.bf16.mxu0 %v13384_v30  ;;  %v715_v62 = vld [vmem:[%s15477_s22 + $0x878] sm:$0xff] }
 0x57b   : > { %v11436_v13 = vpop.f32.mrf.mxu1  ;;  %11729 = vmatprep.subr.bf16.mxu1 %v13448_v39  ;;  %v13416_v56 = vcombine.high %v711_v38, %v715_v62  ;;  %v639_v30 = vld [vmem:[%s15477_s22 + $0x618] sm:$0xff]  ;;  %v13415_v63 = vcombine.low %v711_v38, %v715_v62 }
 0x57c   : > { %v643_v34 = vld [vmem:[%s15477_s22 + $0x638] sm:$0xff] }
 0x57d   : > { %11705 = vmatpush2.bf16.msra.mxu0 %v13383_v55  ;;  %v703_v28 = vld [vmem:[%s15477_s22 + $0x818] sm:$0xff]  ;;  %v13344_v17 = vcombine.high %v639_v30, %v643_v34 }
 0x57e   : > { %11730 = vmatpush1.bf16.msra.mxu1 %v13447_v10  ;;  %11706 = vmatprep.subr.bf16.mxu0 %v13376_v11  ;;  %v707_v39 = vld [vmem:[%s15477_s22 + $0x838] sm:$0xff]  ;;  %v13343_v10 = vcombine.low %v639_v30, %v643_v34 }
 0x57f   : > { %11731 = vmatprep.subr.bf16.mxu1 %v13440_v29  ;;  %v13408_v9 = vcombine.high %v703_v28, %v707_v39  ;;  %v887_v6 = vld [vmem:[%s15477_s22 + $0xdd8] sm:$0xff]  ;;  %v13407_v11 = vcombine.low %v703_v28, %v707_v39 }
 0x580   : > { %v891_v53 = vld [vmem:[%s15477_s22 + $0xdf8] sm:$0xff] }
 0x581   : > { %11707 = vmatpush2.bf16.msra.mxu0 %v13375_v4  ;;  %v823_v55 = vld [vmem:[%s15477_s22 + $0xbd8] sm:$0xff]  ;;  %v13592_v13 = vcombine.high %v887_v6, %v891_v53  ;;  %v13591_v4 = vcombine.low %v887_v6, %v891_v53 }
 0x582   : > { %11732 = vmatpush1.bf16.msra.mxu1 %v13439_v18  ;;  %11708 = vmatprep.subr.bf16.mxu0 %v13368_v27  ;;  %v827_v22 = vld [vmem:[%s15477_s22 + $0xbf8] sm:$0xff] }
 0x583   : > { %11733 = vmatprep.subr.bf16.mxu1 %v13432_v31  ;;  %v13528_v29 = vcombine.high %v823_v55, %v827_v22  ;;  %v879_v24 = vld [vmem:[%s15477_s22 + $0xd98] sm:$0xff]  ;;  %v13527_v18 = vcombine.low %v823_v55, %v827_v22 }
 0x584   : > { %v883_v26 = vld [vmem:[%s15477_s22 + $0xdb8] sm:$0xff] }
 0x585   : > { %11709 = vmatpush2.bf16.msra.mxu0 %v13367_v43  ;;  %v815_v60 = vld [vmem:[%s15477_s22 + $0xb98] sm:$0xff]  ;;  %v13584_v27 = vcombine.high %v879_v24, %v883_v26  ;;  %v13583_v43 = vcombine.low %v879_v24, %v883_v26 }
 0x586   : > { %11734 = vmatpush1.bf16.msra.mxu1 %v13431_v42  ;;  %11710 = vmatprep.subr.bf16.mxu0 %v13360_v51  ;;  %v819_v16 = vld [vmem:[%s15477_s22 + $0xbb8] sm:$0xff] }
 0x587   : > { %11735 = vmatprep.subr.bf16.mxu1 %v13424_v54  ;;  %v13520_v31 = vcombine.high %v815_v60, %v819_v16  ;;  %v871_v5 = vld [vmem:[%s15477_s22 + $0xd58] sm:$0xff]  ;;  %v13519_v42 = vcombine.low %v815_v60, %v819_v16 }
 0x588   : > { %v875_v44 = vld [vmem:[%s15477_s22 + $0xd78] sm:$0xff] }
 0x589   : > { %11711 = vmatpush2.bf16.msra.mxu0 %v13359_v46  ;;  %v807_v40 = vld [vmem:[%s15477_s22 + $0xb58] sm:$0xff]  ;;  %v13576_v51 = vcombine.high %v871_v5, %v875_v44  ;;  %v13575_v62 = vcombine.low %v871_v5, %v875_v44 }
 0x58a   : > { %11736 = vmatpush1.bf16.msra.mxu1 %v13423_v47  ;;  %11712 = vmatprep.subr.bf16.mxu0 %v13352_v48  ;;  %v811_v14 = vld [vmem:[%s15477_s22 + $0xb78] sm:$0xff] }
 0x58b   : > { %11737 = vmatprep.subr.bf16.mxu1 %v13416_v56  ;;  %v13512_v54 = vcombine.high %v807_v40, %v811_v14  ;;  %v863_v59 = vld [vmem:[%s15477_s22 + $0xd18] sm:$0xff]  ;;  %v13511_v46 = vcombine.low %v807_v40, %v811_v14 }
 0x58c   : > { %v867_v25 = vld [vmem:[%s15477_s22 + $0xd38] sm:$0xff] }
 0x58d   : > { %11713 = vmatpush2.bf16.msra.mxu0 %v13351_v58  ;;  %v799_v38 = vld [vmem:[%s15477_s22 + $0xb18] sm:$0xff]  ;;  %v13567_v28 = vcombine.low %v863_v59, %v867_v25 }
 0x58e   : > { %11738 = vmatpush1.bf16.msra.mxu1 %v13415_v63  ;;  %11714 = vmatprep.subr.bf16.mxu0 %v13344_v17  ;;  %v855_v48 = vld [vmem:[%s15477_s22 + $0xcd8] sm:$0xff] }
 0x58f   : > { %11739 = vmatprep.subr.bf16.mxu1 %v13408_v9  ;;  %v859_v56 = vld [vmem:[%s15477_s22 + $0xcf8] sm:$0xff] }
 0x590   : > { %v791_v30 = vld [vmem:[%s15477_s22 + $0xad8] sm:$0xff]  ;;  %v13560_v58 = vcombine.high %v855_v48, %v859_v56  ;;  %v13559_v55 = vcombine.low %v855_v48, %v859_v56 }
 0x591   : > { %11715 = vmatpush2.bf16.msra.mxu0 %v13343_v10  ;;  %v795_v34 = vld [vmem:[%s15477_s22 + $0xaf8] sm:$0xff] }
 0x592   : > { %11740 = vmatpush1.bf16.msra.mxu1 %v13407_v11  ;;  %11766 = vmatprep.subr.bf16.mxu0 %v13592_v13  ;;  %v13496_v63 = vcombine.high %v791_v30, %v795_v34  ;;  %v847_v17 = vld [vmem:[%s15477_s22 + $0xc98] sm:$0xff]  ;;  %v13495_v22 = vcombine.low %v791_v30, %v795_v34 }
 0x593   : > { %11741 = vmatprep.subr.bf16.mxu1 %v13528_v29  ;;  %v851_v9 = vld [vmem:[%s15477_s22 + $0xcb8] sm:$0xff] }
 0x594   : > { %11717 = vmatmul.mubr.bf16.vlgmr.msra.gmra.mxu0 %v15588_v21  ;;  %v803_v21 = vld [vmem:[%s15477_s22 + $0xb38] sm:$0xff]  ;;  %v13552_v10 = vcombine.high %v847_v17, %v851_v9  ;;  %v13551_v60 = vcombine.low %v847_v17, %v851_v9 }
 0x595   : > { %11767 = vmatpush1.bf16.msra.mxu0 %v13591_v4  ;;  %11798 = vmatprep.mubr.bf16.mxu0 %v15598_v32  ;;  %v13568_v32 = vcombine.high %v863_v59, %v867_v25  ;;  %v13504_v47 = vcombine.high %v799_v38, %v803_v21  ;;  %v13503_v39 = vcombine.low %v799_v38, %v803_v21  ;;  %v783_v6 = vld [vmem:[%s15477_s22 + $0xa98] sm:$0xff] }
 0x596   : > { %11742 = vmatpush2.bf16.msra.mxu1 %v13527_v18  ;;  %11768 = vmatprep.subr.bf16.mxu0 %v13584_v27  ;;  %v787_v53 = vld [vmem:[%s15477_s22 + $0xab8] sm:$0xff] }
 0x597   : > { %11743 = vmatprep.subr.bf16.mxu1 %v13520_v31  ;;  %v13488_v11 = vcombine.high %v783_v6, %v787_v53  ;;  %v839_v13 = vld [vmem:[%s15477_s22 + $0xc58] sm:$0xff]  ;;  %v13487_v16 = vcombine.low %v783_v6, %v787_v53 }
 0x598   : > { %v843_v29 = vld [vmem:[%s15477_s22 + $0xc78] sm:$0xff] }
 0x599   : > { %11769 = vmatpush1.bf16.msra.mxu0 %v13583_v43  ;;  %v775_v24 = vld [vmem:[%s15477_s22 + $0xa58] sm:$0xff]  ;;  %v13544_v4 = vcombine.high %v839_v13, %v843_v29  ;;  %v13543_v40 = vcombine.low %v839_v13, %v843_v29 }
 0x59a   : > { %11744 = vmatpush2.bf16.msra.mxu1 %v13519_v42  ;;  %11770 = vmatprep.subr.bf16.mxu0 %v13576_v51  ;;  %v779_v26 = vld [vmem:[%s15477_s22 + $0xa78] sm:$0xff] }
 0x59b   : > { %11745 = vmatprep.subr.bf16.mxu1 %v13512_v54  ;;  %v13480_v18 = vcombine.high %v775_v24, %v779_v26  ;;  %v831_v27 = vld [vmem:[%s15477_s22 + $0xc18] sm:$0xff]  ;;  %v13479_v14 = vcombine.low %v775_v24, %v779_v26 }
 0x59c   : > { %v835_v31 = vld [vmem:[%s15477_s22 + $0xc38] sm:$0xff] }
 0x59d   : > { %11771 = vmatpush1.bf16.msra.mxu0 %v13575_v62  ;;  %v767_v5 = vld [vmem:[%s15477_s22 + $0xa18] sm:$0xff]  ;;  %v13536_v43 = vcombine.high %v831_v27, %v835_v31  ;;  %v13535_v38 = vcombine.low %v831_v27, %v835_v31 }
 0x59e   : > { %11746 = vmatpush2.bf16.msra.mxu1 %v13511_v46  ;;  %11772 = vmatprep.subr.bf16.mxu0 %v13568_v32  ;;  %v771_v44 = vld [vmem:[%s15477_s22 + $0xa38] sm:$0xff] }
 0x59f   : > { %11747 = vmatprep.subr.bf16.mxu1 %v13504_v47  ;;  %v13472_v42 = vcombine.high %v767_v5, %v771_v44  ;;  %v951_v51 = vld [vmem:[%s15477_s22 + $0xfd8] sm:$0xff]  ;;  %v13471_v21 = vcombine.low %v767_v5, %v771_v44 }
 0x5a0   : > { %v955_v54 = vld [vmem:[%s15477_s22 + $0xff8] sm:$0xff] }
 0x5a1   : > { %11773 = vmatpush1.bf16.msra.mxu0 %v13567_v28  ;;  %v1015_v59 = vld [vmem:[%s15477_s22 + $0x11d8] sm:$0xff]  ;;  %v13656_v62 = vcombine.high %v951_v51, %v955_v54  ;;  %v13655_v30 = vcombine.low %v951_v51, %v955_v54 }
 0x5a2   : > { %11748 = vmatpush2.bf16.msra.mxu1 %v13503_v39  ;;  %11774 = vmatprep.subr.bf16.mxu0 %v13560_v58  ;;  %v1019_v25 = vld [vmem:[%s15477_s22 + $0x11f8] sm:$0xff] }
 0x5a3   : > { %11749 = vmatprep.subr.bf16.mxu1 %v13496_v63  ;;  %v13720_v46 = vcombine.high %v1015_v59, %v1019_v25  ;;  %v943_v32 = vld [vmem:[%s15477_s22 + $0xf98] sm:$0xff]  ;;  %v13719_v34 = vcombine.low %v1015_v59, %v1019_v25 }
 0x5a4   : > { %v947_v47 = vld [vmem:[%s15477_s22 + $0xfb8] sm:$0xff] }
 0x5a5   : > { %11775 = vmatpush1.bf16.msra.mxu0 %v13559_v55  ;;  %v1007_v48 = vld [vmem:[%s15477_s22 + $0x1198] sm:$0xff]  ;;  %v13648_v28 = vcombine.high %v943_v32, %v947_v47 }
 0x5a6   : > { %11750 = vmatpush2.bf16.msra.mxu1 %v13495_v22  ;;  %11776 = vmatprep.subr.bf16.mxu0 %v13552_v10  ;;  %v1011_v56 = vld [vmem:[%s15477_s22 + $0x11b8] sm:$0xff]  ;;  %v13647_v22 = vcombine.low %v943_v32, %v947_v47 }
 0x5a7   : > { %11751 = vmatprep.subr.bf16.mxu1 %v13488_v11  ;;  %v13712_v39 = vcombine.high %v1007_v48, %v1011_v56  ;;  %v935_v58 = vld [vmem:[%s15477_s22 + $0xf58] sm:$0xff]  ;;  %v13711_v11 = vcombine.low %v1007_v48, %v1011_v56 }
 0x5a8   : > { %v939_v63 = vld [vmem:[%s15477_s22 + $0xf78] sm:$0xff] }
 0x5a9   : > { %11777 = vmatpush1.bf16.msra.mxu0 %v13551_v60  ;;  %v999_v9 = vld [vmem:[%s15477_s22 + $0x1158] sm:$0xff]  ;;  %v13640_v13 = vcombine.high %v935_v58, %v939_v63  ;;  %v13639_v5 = vcombine.low %v935_v58, %v939_v63 }
 0x5aa   : > { %11752 = vmatpush2.bf16.msra.mxu1 %v13487_v16  ;;  %11778 = vmatprep.subr.bf16.mxu0 %v13544_v4  ;;  %v1003_v6 = vld [vmem:[%s15477_s22 + $0x1178] sm:$0xff] }
 0x5ab   : > { %11753 = vmatprep.subr.bf16.mxu1 %v13480_v18  ;;  %v927_v60 = vld [vmem:[%s15477_s22 + $0xf18] sm:$0xff]  ;;  %v13703_v44 = vcombine.low %v999_v9, %v1003_v6 }
 0x5ac   : > { %v931_v16 = vld [vmem:[%s15477_s22 + $0xf38] sm:$0xff] }
 0x5ad   : > { %11779 = vmatpush1.bf16.msra.mxu0 %v13543_v40  ;;  %v991_v4 = vld [vmem:[%s15477_s22 + $0x1118] sm:$0xff]  ;;  %v13632_v40 = vcombine.high %v927_v60, %v931_v16  ;;  %v13631_v59 = vcombine.low %v927_v60, %v931_v16 }
 0x5ae   : > { %11754 = vmatpush2.bf16.msra.mxu1 %v13479_v14  ;;  %11780 = vmatprep.subr.bf16.mxu0 %v13536_v43  ;;  %v995_v18 = vld [vmem:[%s15477_s22 + $0x1138] sm:$0xff] }
 0x5af   : > { %11755 = vmatprep.subr.bf16.mxu1 %v13472_v42  ;;  %v919_v43 = vld [vmem:[%s15477_s22 + $0xed8] sm:$0xff]  ;;  %v13695_v25 = vcombine.low %v991_v4, %v995_v18 }
 0x5b0   : > { %v923_v42 = vld [vmem:[%s15477_s22 + $0xef8] sm:$0xff] }
 0x5b1   : > { %11781 = vmatpush1.bf16.msra.mxu0 %v13535_v38  ;;  %v983_v51 = vld [vmem:[%s15477_s22 + $0x10d8] sm:$0xff]  ;;  %v13624_v38 = vcombine.high %v919_v43, %v923_v42  ;;  %v13623_v48 = vcombine.low %v919_v43, %v923_v42 }
 0x5b2   : > { %11756 = vmatpush2.bf16.msra.mxu1 %v13471_v21  ;;  %11782 = vmatprep.subr.bf16.mxu0 %v13656_v62  ;;  %v987_v54 = vld [vmem:[%s15477_s22 + $0x10f8] sm:$0xff] }
 0x5b3   : > { %11807 = vmatprep.subr.bf16.mxu1 %v13720_v46  ;;  %v13688_v21 = vcombine.high %v983_v51, %v987_v54  ;;  %v911_v62 = vld [vmem:[%s15477_s22 + $0xe98] sm:$0xff]  ;;  %v13687_v56 = vcombine.low %v983_v51, %v987_v54 }
 0x5b4   : > { %v11472_v17 = vpop.f32.mrf.mxu0  ;;  %v915_v46 = vld [vmem:[%s15477_s22 + $0xeb8] sm:$0xff] }
 0x5b5   : > { %v11473_v53 = vadd.f32 %v11472_v17, %v17044_v23  ;;  %v11513_v55 = vpop.f32.mrf.mxu1  ;;  %11758 = vmatmul.mubr.bf16.vlgmr.msra.gmra.mxu1 %v15663_v37  ;;  %11783 = vmatpush2.bf16.msra.mxu0 %v13655_v30  ;;  %v13704_v23 = vcombine.high %v999_v9, %v1003_v6  ;;  %v975_v32 = vld [vmem:[%s15477_s22 + $0x1098] sm:$0xff]  ;;  %v13616_v30 = vcombine.high %v911_v62, %v915_v46 }
 0x5b6   : > { %11808 = vmatpush1.bf16.msra.mxu1 %v13719_v34  ;;  %v11474_v10 = vpop.f32.mrf.mxu0  ;;  %11784 = vmatprep.subr.bf16.mxu0 %v13648_v28  ;;  %v979_v47 = vld [vmem:[%s15477_s22 + $0x10b8] sm:$0xff]  ;;  %v13615_v17 = vcombine.low %v911_v62, %v915_v46 }
 0x5b7   : > { %v17118_v29 = vadd.f32 %v11513_v55, %v11473_v53  ;;  %v11475_v24 = vadd.f32 %v11474_v10, %v17052_v2  ;;  %v11515_v26 = vpop.f32.mrf.mxu1  ;;  %11809 = vmatprep.subr.bf16.mxu1 %v13712_v39  ;;  %11839 = vmatprep.mubr.bf16.mxu1 %v15673_v49  ;;  %v13696_v49 = vcombine.high %v991_v4, %v995_v18  ;;  %v903_v28 = vld [vmem:[%s15477_s22 + $0xe58] sm:$0xff] }
 0x5b8   : > { %v11476_v37 = vpop.f32.mrf.mxu0  ;;  %v13680_v34 = vcombine.high %v975_v32, %v979_v47  ;;  %v907_v39 = vld [vmem:[%s15477_s22 + $0xe78] sm:$0xff]  ;;  %v13679_v9 = vcombine.low %v975_v32, %v979_v47 }
 0x5b9   : > { %v17126_v27 = vadd.f32 %v11515_v26, %v11475_v24  ;;  %v11517_v31 = vpop.f32.mrf.mxu1  ;;  %11785 = vmatpush2.bf16.msra.mxu0 %v13647_v22  ;;  %v967_v58 = vld [vmem:[%s15477_s22 + $0x1058] sm:$0xff]  ;;  %v13608_v6 = vcombine.high %v903_v28, %v907_v39 }
 0x5ba   : > { %11810 = vmatpush1.bf16.msra.mxu1 %v13711_v11  ;;  %v11477_v2 = vpop.f32.mrf.mxu0  ;;  %11786 = vmatprep.subr.bf16.mxu0 %v13640_v13  ;;  %v971_v63 = vld [vmem:[%s15477_s22 + $0x1078] sm:$0xff]  ;;  %v13607_v13 = vcombine.low %v903_v28, %v907_v39 }
 0x5bb   : > { %v11518_v14 = vpop.f32.mrf.mxu1  ;;  %11811 = vmatprep.subr.bf16.mxu1 %v13704_v23  ;;  %v13672_v53 = vcombine.high %v967_v58, %v971_v63  ;;  %v895_v55 = vld [vmem:[%s15477_s22 + $0xe18] sm:$0xff]  ;;  %v13671_v24 = vcombine.low %v967_v58, %v971_v63 }
 0x5bc   : > { %v899_v22 = vld [vmem:[%s15477_s22 + $0xe38] sm:$0xff] }
 0x5bd   : > { %11787 = vmatpush2.bf16.msra.mxu0 %v13639_v5  ;;  %v959_v10 = vld [vmem:[%s15477_s22 + $0x1018] sm:$0xff]  ;;  %v13600_v26 = vcombine.high %v895_v55, %v899_v22  ;;  %v13599_v18 = vcombine.low %v895_v55, %v899_v22 }
 0x5be   : > { %11812 = vmatpush1.bf16.msra.mxu1 %v13703_v44  ;;  %11788 = vmatprep.subr.bf16.mxu0 %v13632_v40  ;;  %v963_v11 = vld [vmem:[%s15477_s22 + $0x1038] sm:$0xff] }
 0x5bf   : > { %11813 = vmatprep.subr.bf16.mxu1 %v13696_v49  ;;  %v13664_v23 = vcombine.high %v959_v10, %v963_v11  ;;  %v1143_v60 = vld [vmem:[%s15477_s22 + $0x15d8] sm:$0xff]  ;;  %v13663_v31 = vcombine.low %v959_v10, %v963_v11 }
 0x5c0   : > { %v1147_v16 = vld [vmem:[%s15477_s22 + $0x15f8] sm:$0xff] }
 0x5c1   : > { %11789 = vmatpush2.bf16.msra.mxu0 %v13631_v59  ;;  %v1079_v37 = vld [vmem:[%s15477_s22 + $0x13d8] sm:$0xff]  ;;  %v13848_v5 = vcombine.high %v1143_v60, %v1147_v16  ;;  %v13847_v43 = vcombine.low %v1143_v60, %v1147_v16 }
 0x5c2   : > { %11814 = vmatpush1.bf16.msra.mxu1 %v13695_v25  ;;  %11790 = vmatprep.subr.bf16.mxu0 %v13624_v38  ;;  %v1083_v4 = vld [vmem:[%s15477_s22 + $0x13f8] sm:$0xff] }
 0x5c3   : > { %11815 = vmatprep.subr.bf16.mxu1 %v13688_v21  ;;  %v13784_v2 = vcombine.high %v1079_v37, %v1083_v4  ;;  %v1135_v44 = vld [vmem:[%s15477_s22 + $0x1598] sm:$0xff]  ;;  %v13783_v42 = vcombine.low %v1079_v37, %v1083_v4 }
 0x5c4   : > { %v1139_v40 = vld [vmem:[%s15477_s22 + $0x15b8] sm:$0xff] }
 0x5c5   : > { %11791 = vmatpush2.bf16.msra.mxu0 %v13623_v48  ;;  %v1071_v14 = vld [vmem:[%s15477_s22 + $0x1398] sm:$0xff]  ;;  %v13840_v51 = vcombine.high %v1135_v44, %v1139_v40  ;;  %v13839_v62 = vcombine.low %v1135_v44, %v1139_v40 }
 0x5c6   : > { %11816 = vmatpush1.bf16.msra.mxu1 %v13687_v56  ;;  %11792 = vmatprep.subr.bf16.mxu0 %v13616_v30  ;;  %v1075_v49 = vld [vmem:[%s15477_s22 + $0x13b8] sm:$0xff] }
 0x5c7   : > { %11817 = vmatprep.subr.bf16.mxu1 %v13680_v34  ;;  %v13776_v54 = vcombine.high %v1071_v14, %v1075_v49  ;;  %v1127_v59 = vld [vmem:[%s15477_s22 + $0x1558] sm:$0xff]  ;;  %v13775_v46 = vcombine.low %v1071_v14, %v1075_v49 }
 0x5c8   : > { %v1131_v25 = vld [vmem:[%s15477_s22 + $0x1578] sm:$0xff] }
 0x5c9   : > { %11793 = vmatpush2.bf16.msra.mxu0 %v13615_v17  ;;  %v1063_v38 = vld [vmem:[%s15477_s22 + $0x1358] sm:$0xff]  ;;  %v13832_v32 = vcombine.high %v1127_v59, %v1131_v25  ;;  %v13831_v34 = vcombine.low %v1127_v59, %v1131_v25 }
 0x5ca   : > { %11818 = vmatpush1.bf16.msra.mxu1 %v13679_v9  ;;  %11794 = vmatprep.subr.bf16.mxu0 %v13608_v6  ;;  %v1067_v21 = vld [vmem:[%s15477_s22 + $0x1378] sm:$0xff] }
 0x5cb   : > { %11819 = vmatprep.subr.bf16.mxu1 %v13672_v53  ;;  %v13768_v47 = vcombine.high %v1063_v38, %v1067_v21  ;;  %v1119_v48 = vld [vmem:[%s15477_s22 + $0x1518] sm:$0xff]  ;;  %v13767_v28 = vcombine.low %v1063_v38, %v1067_v21 }
 0x5cc   : > { %v1123_v56 = vld [vmem:[%s15477_s22 + $0x1538] sm:$0xff] }
 0x5cd   : > { %11795 = vmatpush2.bf16.msra.mxu0 %v13607_v13  ;;  %v1055_v30 = vld [vmem:[%s15477_s22 + $0x1318] sm:$0xff]  ;;  %v13823_v6 = vcombine.low %v1119_v48, %v1123_v56 }
 0x5ce   : > { %11820 = vmatpush1.bf16.msra.mxu1 %v13671_v24  ;;  %11796 = vmatprep.subr.bf16.mxu0 %v13600_v26  ;;  %v1111_v58 = vld [vmem:[%s15477_s22 + $0x14d8] sm:$0xff] }
 0x5cf   : > { %11821 = vmatprep.subr.bf16.mxu1 %v13664_v23  ;;  %v1115_v63 = vld [vmem:[%s15477_s22 + $0x14f8] sm:$0xff] }
 0x5d0   : > { %v1047_v17 = vld [vmem:[%s15477_s22 + $0x12d8] sm:$0xff]  ;;  %v13816_v55 = vcombine.high %v1111_v58, %v1115_v63  ;;  %v13815_v26 = vcombine.low %v1111_v58, %v1115_v63 }
 0x5d1   : > { %11797 = vmatpush2.bf16.msra.mxu0 %v13599_v18  ;;  %v1051_v9 = vld [vmem:[%s15477_s22 + $0x12f8] sm:$0xff] }
 0x5d2   : > { %11822 = vmatpush1.bf16.msra.mxu1 %v13663_v31  ;;  %11848 = vmatprep.subr.bf16.mxu0 %v13848_v5  ;;  %v13752_v22 = vcombine.high %v1047_v17, %v1051_v9  ;;  %v1103_v10 = vld [vmem:[%s15477_s22 + $0x1498] sm:$0xff]  ;;  %v13751_v23 = vcombine.low %v1047_v17, %v1051_v9 }
 0x5d3   : > { %11823 = vmatprep.subr.bf16.mxu1 %v13784_v2  ;;  %v1107_v11 = vld [vmem:[%s15477_s22 + $0x14b8] sm:$0xff] }
 0x5d4   : > { %11799 = vmatmul.mubr.bf16.vlgmr.msra.gmra.mxu0 %v15668_v41  ;;  %v1059_v41 = vld [vmem:[%s15477_s22 + $0x1338] sm:$0xff]  ;;  %v13808_v60 = vcombine.high %v1103_v10, %v1107_v11  ;;  %v13807_v5 = vcombine.low %v1103_v10, %v1107_v11 }
 0x5d5   : > { %11849 = vmatpush1.bf16.msra.mxu0 %v13847_v43  ;;  %11880 = vmatprep.mubr.bf16.mxu0 %v15678_v52  ;;  %v13824_v52 = vcombine.high %v1119_v48, %v1123_v56  ;;  %v13760_v39 = vcombine.high %v1055_v30, %v1059_v41  ;;  %v13759_v53 = vcombine.low %v1055_v30, %v1059_v41  ;;  %v1039_v13 = vld [vmem:[%s15477_s22 + $0x1298] sm:$0xff] }
 0x5d6   : > { %11824 = vmatpush2.bf16.msra.mxu1 %v13783_v42  ;;  %11850 = vmatprep.subr.bf16.mxu0 %v13840_v51  ;;  %v1043_v24 = vld [vmem:[%s15477_s22 + $0x12b8] sm:$0xff] }
 0x5d7   : > { %11825 = vmatprep.subr.bf16.mxu1 %v13776_v54  ;;  %v13744_v16 = vcombine.high %v1039_v13, %v1043_v24  ;;  %v1095_v37 = vld [vmem:[%s15477_s22 + $0x1458] sm:$0xff]  ;;  %v13743_v2 = vcombine.low %v1039_v13, %v1043_v24 }
 0x5d8   : > { %v1099_v4 = vld [vmem:[%s15477_s22 + $0x1478] sm:$0xff] }
 0x5d9   : > { %11851 = vmatpush1.bf16.msra.mxu0 %v13839_v62  ;;  %v1031_v18 = vld [vmem:[%s15477_s22 + $0x1258] sm:$0xff]  ;;  %v13800_v44 = vcombine.high %v1095_v37, %v1099_v4  ;;  %v13799_v51 = vcombine.low %v1095_v37, %v1099_v4 }
 0x5da   : > { %11826 = vmatpush2.bf16.msra.mxu1 %v13775_v46  ;;  %11852 = vmatprep.subr.bf16.mxu0 %v13832_v32  ;;  %v1035_v31 = vld [vmem:[%s15477_s22 + $0x1278] sm:$0xff] }
 0x5db   : > { %11827 = vmatprep.subr.bf16.mxu1 %v13768_v47  ;;  %v13736_v40 = vcombine.high %v1031_v18, %v1035_v31  ;;  %v1087_v14 = vld [vmem:[%s15477_s22 + $0x1418] sm:$0xff]  ;;  %v13735_v54 = vcombine.low %v1031_v18, %v1035_v31 }
 0x5dc   : > { %v1091_v49 = vld [vmem:[%s15477_s22 + $0x1438] sm:$0xff] }
 0x5dd   : > { %11853 = vmatpush1.bf16.msra.mxu0 %v13831_v34  ;;  %v1023_v43 = vld [vmem:[%s15477_s22 + $0x1218] sm:$0xff]  ;;  %v13792_v59 = vcombine.high %v1087_v14, %v1091_v49  ;;  %v13791_v32 = vcombine.low %v1087_v14, %v1091_v49 }
 0x5de   : > { %11828 = vmatpush2.bf16.msra.mxu1 %v13767_v28  ;;  %11854 = vmatprep.subr.bf16.mxu0 %v13824_v52  ;;  %v1027_v42 = vld [vmem:[%s15477_s22 + $0x1238] sm:$0xff] }
 0x5df   : > { %11829 = vmatprep.subr.bf16.mxu1 %v13760_v39  ;;  %v13728_v25 = vcombine.high %v1023_v43, %v1027_v42  ;;  %v1207_v38 = vld [vmem:[%s15477_s22 + $0x17d8] sm:$0xff]  ;;  %v13727_v47 = vcombine.low %v1023_v43, %v1027_v42 }
 0x5e0   : > { %v1211_v21 = vld [vmem:[%s15477_s22 + $0x17f8] sm:$0xff] }
 0x5e1   : > { %11855 = vmatpush1.bf16.msra.mxu0 %v13823_v6  ;;  %v1271_v62 = vld [vmem:[%s15477_s22 + $0x19d8] sm:$0xff]  ;;  %v13912_v48 = vcombine.high %v1207_v38, %v1211_v21  ;;  %v13911_v52 = vcombine.low %v1207_v38, %v1211_v21 }
 0x5e2   : > { %11830 = vmatpush2.bf16.msra.mxu1 %v13759_v53  ;;  %11856 = vmatprep.subr.bf16.mxu0 %v13816_v55  ;;  %v1275_v46 = vld [vmem:[%s15477_s22 + $0x19f8] sm:$0xff] }
 0x5e3   : > { %11831 = vmatprep.subr.bf16.mxu1 %v13752_v22  ;;  %v13976_v56 = vcombine.high %v1271_v62, %v1275_v46  ;;  %v1199_v30 = vld [vmem:[%s15477_s22 + $0x1798] sm:$0xff]  ;;  %v13975_v39 = vcombine.low %v1271_v62, %v1275_v46 }
 0x5e4   : > { %v1203_v41 = vld [vmem:[%s15477_s22 + $0x17b8] sm:$0xff] }
 0x5e5   : > { %11857 = vmatpush1.bf16.msra.mxu0 %v13815_v26  ;;  %v1263_v34 = vld [vmem:[%s15477_s22 + $0x1998] sm:$0xff]  ;;  %v13904_v58 = vcombine.high %v1199_v30, %v1203_v41  ;;  %v13903_v10 = vcombine.low %v1199_v30, %v1203_v41 }
 0x5e6   : > { %11832 = vmatpush2.bf16.msra.mxu1 %v13751_v23  ;;  %11858 = vmatprep.subr.bf16.mxu0 %v13808_v60  ;;  %v1267_v28 = vld [vmem:[%s15477_s22 + $0x19b8] sm:$0xff] }
 0x5e7   : > { %11833 = vmatprep.subr.bf16.mxu1 %v13744_v16  ;;  %v13968_v63 = vcombine.high %v1263_v34, %v1267_v28  ;;  %v1191_v17 = vld [vmem:[%s15477_s22 + $0x1758] sm:$0xff]  ;;  %v13967_v13 = vcombine.low %v1263_v34, %v1267_v28 }
 0x5e8   : > { %v1195_v9 = vld [vmem:[%s15477_s22 + $0x1778] sm:$0xff] }
 0x5e9   : > { %11859 = vmatpush1.bf16.msra.mxu0 %v13807_v5  ;;  %v1255_v53 = vld [vmem:[%s15477_s22 + $0x1958] sm:$0xff]  ;;  %v13896_v24 = vcombine.high %v1191_v17, %v1195_v9  ;;  %v13895_v31 = vcombine.low %v1191_v17, %v1195_v9 }
 0x5ea   : > { %11834 = vmatpush2.bf16.msra.mxu1 %v13743_v2  ;;  %11860 = vmatprep.subr.bf16.mxu0 %v13800_v44  ;;  %v1259_v55 = vld [vmem:[%s15477_s22 + $0x1978] sm:$0xff] }
 0x5eb   : > { %11835 = vmatprep.subr.bf16.mxu1 %v13736_v40  ;;  %v13960_v23 = vcombine.high %v1255_v53, %v1259_v55  ;;  %v1183_v60 = vld [vmem:[%s15477_s22 + $0x1718] sm:$0xff]  ;;  %v13959_v2 = vcombine.low %v1255_v53, %v1259_v55 }
 0x5ec   : > { %v1187_v16 = vld [vmem:[%s15477_s22 + $0x1738] sm:$0xff] }
 0x5ed   : > { %11861 = vmatpush1.bf16.msra.mxu0 %v13799_v51  ;;  %v1247_v37 = vld [vmem:[%s15477_s22 + $0x1918] sm:$0xff]  ;;  %v13888_v44 = vcombine.high %v1183_v60, %v1187_v16  ;;  %v13887_v51 = vcombine.low %v1183_v60, %v1187_v16 }
 0x5ee   : > { %11836 = vmatpush2.bf16.msra.mxu1 %v13735_v54  ;;  %11862 = vmatprep.subr.bf16.mxu0 %v13792_v59  ;;  %v1251_v4 = vld [vmem:[%s15477_s22 + $0x1938] sm:$0xff] }
 0x5ef   : > { %11837 = vmatprep.subr.bf16.mxu1 %v13728_v25  ;;  %v1175_v14 = vld [vmem:[%s15477_s22 + $0x16d8] sm:$0xff]  ;;  %v13951_v54 = vcombine.low %v1247_v37, %v1251_v4 }
 0x5f0   : > { %v1179_v49 = vld [vmem:[%s15477_s22 + $0x16f8] sm:$0xff] }
 0x5f1   : > { %11863 = vmatpush1.bf16.msra.mxu0 %v13791_v32  ;;  %v1239_v43 = vld [vmem:[%s15477_s22 + $0x18d8] sm:$0xff]  ;;  %v13880_v59 = vcombine.high %v1175_v14, %v1179_v49  ;;  %v13879_v32 = vcombine.low %v1175_v14, %v1179_v49 }
 0x5f2   : > { %11838 = vmatpush2.bf16.msra.mxu1 %v13727_v47  ;;  %11864 = vmatprep.subr.bf16.mxu0 %v13912_v48  ;;  %v1243_v42 = vld [vmem:[%s15477_s22 + $0x18f8] sm:$0xff] }
 0x5f3   : > { %11889 = vmatprep.subr.bf16.mxu1 %v13976_v56  ;;  %v13944_v25 = vcombine.high %v1239_v43, %v1243_v42  ;;  %v1167_v38 = vld [vmem:[%s15477_s22 + $0x1698] sm:$0xff]  ;;  %v13943_v47 = vcombine.low %v1239_v43, %v1243_v42 }
 0x5f4   : > { %v17188_v6 = vpop.f32.mrf.mxu0  ;;  %v1171_v21 = vld [vmem:[%s15477_s22 + $0x16b8] sm:$0xff] }
 0x5f5   : > { %v17192_v22 = vpop.f32.mrf.mxu1  ;;  %11840 = vmatmul.mubr.bf16.vlgmr.msra.gmra.mxu1 %v15743_v3  ;;  %11865 = vmatpush2.bf16.msra.mxu0 %v13911_v52  ;;  %v1231_v62 = vld [vmem:[%s15477_s22 + $0x1898] sm:$0xff]  ;;  %v13872_v48 = vcombine.high %v1167_v38, %v1171_v21  ;;  %v13871_v52 = vcombine.low %v1167_v38, %v1171_v21 }
 0x5f6   : > { %11890 = vmatpush1.bf16.msra.mxu1 %v13975_v39  ;;  %v17195_v11 = vpop.f32.mrf.mxu0  ;;  %11866 = vmatprep.subr.bf16.mxu0 %v13904_v58  ;;  %v1235_v46 = vld [vmem:[%s15477_s22 + $0x18b8] sm:$0xff] }
 0x5f7   : > { %v17197_v26 = vpop.f32.mrf.mxu1  ;;  %11891 = vmatprep.subr.bf16.mxu1 %v13968_v63  ;;  %11921 = vmatprep.mubr.bf16.mxu1 %v15753_v15  ;;  %v13952_v15 = vcombine.high %v1247_v37, %v1251_v4  ;;  %v13936_v56 = vcombine.high %v1231_v62, %v1235_v46  ;;  %v1159_v30 = vld [vmem:[%s15477_s22 + $0x1658] sm:$0xff]  ;;  %v13935_v39 = vcombine.low %v1231_v62, %v1235_v46 }
 0x5f8   : > { %v11558_v3 = vpop.f32.mrf.mxu0  ;;  %v1163_v41 = vld [vmem:[%s15477_s22 + $0x1678] sm:$0xff]  ;;  %v11557_v49 = vadd.f32 %v17195_v11, %v17126_v27 }
 0x5f9   : > { %v11599_v18 = vpop.f32.mrf.mxu1  ;;  %11867 = vmatpush2.bf16.msra.mxu0 %v13903_v10  ;;  %v1223_v34 = vld [vmem:[%s15477_s22 + $0x1858] sm:$0xff]  ;;  %v13864_v58 = vcombine.high %v1159_v30, %v1163_v41  ;;  %v13863_v10 = vcombine.low %v1159_v30, %v1163_v41 }
 0x5fa   : > { %11892 = vmatpush1.bf16.msra.mxu1 %v13967_v13  ;;  %v11559_v5 = vpop.f32.mrf.mxu0  ;;  %11868 = vmatprep.subr.bf16.mxu0 %v13896_v24  ;;  %v1227_v28 = vld [vmem:[%s15477_s22 + $0x1878] sm:$0xff]  ;;  %v11598_v27 = vadd.f32 %v17197_v26, %v11557_v49 }
 0x5fb   : > { %v11600_v40 = vpop.f32.mrf.mxu1  ;;  %11893 = vmatprep.subr.bf16.mxu1 %v13960_v23  ;;  %v13928_v63 = vcombine.high %v1223_v34, %v1227_v28  ;;  %v1151_v17 = vld [vmem:[%s15477_s22 + $0x1618] sm:$0xff]  ;;  %v13927_v13 = vcombine.low %v1223_v34, %v1227_v28  ;;  %v11555_v5 = vadd.f32 %v17188_v6, %v17118_v29 }
 0x5fc   : > { %v1155_v9 = vld [vmem:[%s15477_s22 + $0x1638] sm:$0xff] }
 0x5fd   : > { %11869 = vmatpush2.bf16.msra.mxu0 %v13895_v31  ;;  %v1215_v53 = vld [vmem:[%s15477_s22 + $0x1818] sm:$0xff]  ;;  %v13856_v24 = vcombine.high %v1151_v17, %v1155_v9  ;;  %v13855_v4 = vcombine.low %v1151_v17, %v1155_v9  ;;  %v11596_v29 = vadd.f32 %v17192_v22, %v11555_v5  ;;  %v391_v22 = vld [vmem:[#allocation2 + $0x20] sm:$0xff] }
 0x5fe   : > { %11894 = vmatpush1.bf16.msra.mxu1 %v13959_v2  ;;  %11870 = vmatprep.subr.bf16.mxu0 %v13888_v44  ;;  %v1219_v55 = vld [vmem:[%s15477_s22 + $0x1838] sm:$0xff] }
 0x5ff   : > { %11895 = vmatprep.subr.bf16.mxu1 %v13952_v15  ;;  %v13920_v23 = vcombine.high %v1215_v53, %v1219_v55  ;;  %v1399_v60 = vld [vmem:[%s15477_s22 + $0x1dd8] sm:$0xff]  ;;  %v13919_v18 = vcombine.low %v1215_v53, %v1219_v55 }
 0x600   : > { %v1403_v16 = vld [vmem:[%s15477_s22 + $0x1df8] sm:$0xff] }
 0x601   : > { %11871 = vmatpush2.bf16.msra.mxu0 %v13887_v51  ;;  %v1335_v3 = vld [vmem:[%s15477_s22 + $0x1bd8] sm:$0xff]  ;;  %v14104_v31 = vcombine.high %v1399_v60, %v1403_v16  ;;  %v14103_v43 = vcombine.low %v1399_v60, %v1403_v16 }
 0x602   : > { %11896 = vmatpush1.bf16.msra.mxu1 %v13951_v54  ;;  %11872 = vmatprep.subr.bf16.mxu0 %v13880_v59  ;;  %v1339_v37 = vld [vmem:[%s15477_s22 + $0x1bf8] sm:$0xff] }
 0x603   : > { %11897 = vmatprep.subr.bf16.mxu1 %v13944_v25  ;;  %v14040_v2 = vcombine.high %v1335_v3, %v1339_v37  ;;  %v1391_v44 = vld [vmem:[%s15477_s22 + $0x1d98] sm:$0xff]  ;;  %v14039_v42 = vcombine.low %v1335_v3, %v1339_v37  ;;  %v390_v25 = vld [vmem:[#allocation2 + $0x8] sm:$0xff] }
 0x604   : > { %v1395_v40 = vld [vmem:[%s15477_s22 + $0x1db8] sm:$0xff] }
 0x605   : > { %11873 = vmatpush2.bf16.msra.mxu0 %v13879_v32  ;;  %v1327_v15 = vld [vmem:[%s15477_s22 + $0x1b98] sm:$0xff]  ;;  %v14096_v51 = vcombine.high %v1391_v44, %v1395_v40  ;;  %v14095_v46 = vcombine.low %v1391_v44, %v1395_v40 }
 0x606   : > { %11898 = vmatpush1.bf16.msra.mxu1 %v13943_v47  ;;  %11874 = vmatprep.subr.bf16.mxu0 %v13872_v48  ;;  %v1331_v14 = vld [vmem:[%s15477_s22 + $0x1bb8] sm:$0xff] }
 0x607   : > { %11899 = vmatprep.subr.bf16.mxu1 %v13936_v56  ;;  %v14032_v6 = vcombine.high %v1327_v15, %v1331_v14  ;;  %v1383_v54 = vld [vmem:[%s15477_s22 + $0x1d58] sm:$0xff]  ;;  %v14031_v47 = vcombine.low %v1327_v15, %v1331_v14 }
 0x608   : > { %v1387_v59 = vld [vmem:[%s15477_s22 + $0x1d78] sm:$0xff] }
 0x609   : > { %11875 = vmatpush2.bf16.msra.mxu0 %v13871_v52  ;;  %v1319_v21 = vld [vmem:[%s15477_s22 + $0x1b58] sm:$0xff]  ;;  %v14088_v48 = vcombine.high %v1383_v54, %v1387_v59 }
 0x60a   : > { %11900 = vmatpush1.bf16.msra.mxu1 %v13935_v39  ;;  %11876 = vmatprep.subr.bf16.mxu0 %v13864_v58  ;;  %v1323_v62 = vld [vmem:[%s15477_s22 + $0x1b78] sm:$0xff]  ;;  %v14087_v39 = vcombine.low %v1383_v54, %v1387_v59 }
 0x60b   : > { %11901 = vmatprep.subr.bf16.mxu1 %v13928_v63  ;;  %v14024_v30 = vcombine.high %v1319_v21, %v1323_v62  ;;  %v1375_v41 = vld [vmem:[%s15477_s22 + $0x1d18] sm:$0xff]  ;;  %v14023_v63 = vcombine.low %v1319_v21, %v1323_v62 }
 0x60c   : > { %v1379_v26 = vld [vmem:[%s15477_s22 + $0x1d38] sm:$0xff] }
 0x60d   : > { %11877 = vmatpush2.bf16.msra.mxu0 %v13863_v10  ;;  %v1311_v28 = vld [vmem:[%s15477_s22 + $0x1b18] sm:$0xff]  ;;  %v14080_v17 = vcombine.high %v1375_v41, %v1379_v26 }
 0x60e   : > { %11902 = vmatpush1.bf16.msra.mxu1 %v13927_v13  ;;  %11878 = vmatprep.subr.bf16.mxu0 %v13856_v24  ;;  %v1315_v52 = vld [vmem:[%s15477_s22 + $0x1b38] sm:$0xff]  ;;  %v14079_v24 = vcombine.low %v1375_v41, %v1379_v26 }
 0x60f   : > { %11903 = vmatprep.subr.bf16.mxu1 %v13920_v23  ;;  %v14016_v9 = vcombine.high %v1311_v28, %v1315_v52  ;;  %v1367_v53 = vld [vmem:[%s15477_s22 + $0x1cd8] sm:$0xff]  ;;  %v14015_v23 = vcombine.low %v1311_v28, %v1315_v52 }
 0x610   : > { %v1371_v55 = vld [vmem:[%s15477_s22 + $0x1cf8] sm:$0xff] }
 0x611   : > { %11879 = vmatpush2.bf16.msra.mxu0 %v13855_v4  ;;  %v1303_v10 = vld [vmem:[%s15477_s22 + $0x1ad8] sm:$0xff]  ;;  %v14072_v60 = vcombine.high %v1367_v53, %v1371_v55 }
 0x612   : > { %11904 = vmatpush1.bf16.msra.mxu1 %v13919_v18  ;;  %11930 = vmatprep.subr.bf16.mxu0 %v14104_v31  ;;  %v1307_v13 = vld [vmem:[%s15477_s22 + $0x1af8] sm:$0xff]  ;;  %v14071_v31 = vcombine.low %v1367_v53, %v1371_v55 }
 0x613   : > { %11905 = vmatprep.subr.bf16.mxu1 %v14040_v2  ;;  %v14008_v16 = vcombine.high %v1303_v10, %v1307_v13  ;;  %v1359_v3 = vld [vmem:[%s15477_s22 + $0x1c98] sm:$0xff]  ;;  %v14007_v5 = vcombine.low %v1303_v10, %v1307_v13 }
 0x614   : > { %v11636_v38 = vpop.f32.mrf.mxu0  ;;  %11881 = vmatmul.mubr.bf16.vlgmr.msra.gmra.mxu0 %v15748_v7  ;;  %v1363_v37 = vld [vmem:[%s15477_s22 + $0x1cb8] sm:$0xff] }
 0x615   : > { %v11637_v11 = vadd.f32 %v11636_v38, %v11596_v29  ;;  %11931 = vmatpush1.bf16.msra.mxu0 %v14103_v43  ;;  %11962 = vmatprep.mubr.bf16.mxu0 %v15758_v19  ;;  %v1295_v4 = vld [vmem:[%s15477_s22 + $0x1a98] sm:$0xff]  ;;  %v14064_v2 = vcombine.high %v1359_v3, %v1363_v37  ;;  %v14063_v43 = vcombine.low %v1359_v3, %v1363_v37 }
 0x616   : > { %11906 = vmatpush2.bf16.msra.mxu1 %v14039_v42  ;;  %v11638_v32 = vpop.f32.mrf.mxu0  ;;  %11932 = vmatprep.subr.bf16.mxu0 %v14096_v51  ;;  %v1299_v18 = vld [vmem:[%s15477_s22 + $0x1ab8] sm:$0xff] }
 0x617   : > { %v12180_v7 = vadd.f32 %v11637_v11, %v390_v25  ;;  %v11639_v56 = vadd.f32 %v11638_v32, %v11598_v27  ;;  %11907 = vmatprep.subr.bf16.mxu1 %v14032_v6  ;;  %v14000_v44 = vcombine.high %v1295_v4, %v1299_v18  ;;  %v1351_v40 = vld [vmem:[%s15477_s22 + $0x1c58] sm:$0xff]  ;;  %v13999_v42 = vcombine.low %v1295_v4, %v1299_v18 }
 0x618   : > { %v11640_v34 = vpop.f32.mrf.mxu0  ;;  %v1355_v15 = vld [vmem:[%s15477_s22 + $0x1c78] sm:$0xff] }
 0x619   : > { %12188 = vst [vmem:[#allocation2 + $0x8] sm:$0xff] %v12180_v7  ;;  %v12181_v19 = vadd.f32 %v11639_v56, %v391_v22  ;;  %11933 = vmatpush1.bf16.msra.mxu0 %v14095_v46  ;;  %v1287_v14 = vld [vmem:[%s15477_s22 + $0x1a58] sm:$0xff]  ;;  %v14056_v51 = vcombine.high %v1351_v40, %v1355_v15  ;;  %v14055_v38 = vcombine.low %v1351_v40, %v1355_v15 }
 0x61a   : > { %11908 = vmatpush2.bf16.msra.mxu1 %v14031_v47  ;;  %v11641_v58 = vpop.f32.mrf.mxu0  ;;  %11934 = vmatprep.subr.bf16.mxu0 %v14088_v48  ;;  %v1291_v49 = vld [vmem:[%s15477_s22 + $0x1a78] sm:$0xff] }
 0x61b   : > { %12189 = vst [vmem:[#allocation2 + $0x20] sm:$0xff] %v12181_v19  ;;  %11909 = vmatprep.subr.bf16.mxu1 %v14024_v30  ;;  %v13992_v29 = vcombine.high %v1287_v14, %v1291_v49  ;;  %v1343_v6 = vld [vmem:[%s15477_s22 + $0x1c18] sm:$0xff]  ;;  %v13991_v21 = vcombine.low %v1287_v14, %v1291_v49 }
 0x61c   : > { %v1347_v54 = vld [vmem:[%s15477_s22 + $0x1c38] sm:$0xff] }
 0x61d   : > { %11935 = vmatpush1.bf16.msra.mxu0 %v14087_v39  ;;  %v1279_v59 = vld [vmem:[%s15477_s22 + $0x1a18] sm:$0xff]  ;;  %v14048_v62 = vcombine.high %v1343_v6, %v1347_v54  ;;  %v14047_v47 = vcombine.low %v1343_v6, %v1347_v54 }
 0x61e   : > { %11910 = vmatpush2.bf16.msra.mxu1 %v14023_v63  ;;  %11936 = vmatprep.subr.bf16.mxu0 %v14080_v17  ;;  %v1283_v25 = vld [vmem:[%s15477_s22 + $0x1a38] sm:$0xff] }
 0x61f   : > { %11911 = vmatprep.subr.bf16.mxu1 %v14016_v9  ;;  %v13984_v27 = vcombine.high %v1279_v59, %v1283_v25  ;;  %v1463_v11 = vld [vmem:[%s15477_s22 + $0x1fd8] sm:$0xff]  ;;  %v13983_v48 = vcombine.low %v1279_v59, %v1283_v25 }
 0x620   : > { %v1467_v46 = vld [vmem:[%s15477_s22 + $0x1ff8] sm:$0xff] }
 0x621   : > { %11937 = vmatpush1.bf16.msra.mxu0 %v14079_v24  ;;  %v1527_v22 = vld [vmem:[%s15477_s22 + $0x21d8] sm:$0xff]  ;;  %v14168_v7 = vcombine.high %v1463_v11, %v1467_v46  ;;  %v14167_v28 = vcombine.low %v1463_v11, %v1467_v46 }
 0x622   : > { %11912 = vmatpush2.bf16.msra.mxu1 %v14015_v23  ;;  %11938 = vmatprep.subr.bf16.mxu0 %v14072_v60  ;;  %v1531_v32 = vld [vmem:[%s15477_s22 + $0x21f8] sm:$0xff] }
 0x623   : > { %11913 = vmatprep.subr.bf16.mxu1 %v14008_v16  ;;  %v14232_v56 = vcombine.high %v1527_v22, %v1531_v32  ;;  %v1455_v30 = vld [vmem:[%s15477_s22 + $0x1f98] sm:$0xff]  ;;  %v14231_v52 = vcombine.low %v1527_v22, %v1531_v32 }
 0x624   : > { %v1459_v41 = vld [vmem:[%s15477_s22 + $0x1fb8] sm:$0xff] }
 0x625   : > { %11939 = vmatpush1.bf16.msra.mxu0 %v14071_v31  ;;  %v1519_v26 = vld [vmem:[%s15477_s22 + $0x2198] sm:$0xff]  ;;  %v14160_v19 = vcombine.high %v1455_v30, %v1459_v41  ;;  %v14159_v55 = vcombine.low %v1455_v30, %v1459_v41 }
 0x626   : > { %11914 = vmatpush2.bf16.msra.mxu1 %v14007_v5  ;;  %11940 = vmatprep.subr.bf16.mxu0 %v14064_v2  ;;  %v1523_v34 = vld [vmem:[%s15477_s22 + $0x21b8] sm:$0xff] }
 0x627   : > { %11915 = vmatprep.subr.bf16.mxu1 %v14000_v44  ;;  %v14224_v39 = vcombine.high %v1519_v26, %v1523_v34  ;;  %v1447_v58 = vld [vmem:[%s15477_s22 + $0x1f58] sm:$0xff]  ;;  %v14223_v10 = vcombine.low %v1519_v26, %v1523_v34 }
 0x628   : > { %v1451_v63 = vld [vmem:[%s15477_s22 + $0x1f78] sm:$0xff] }
 0x629   : > { %11941 = vmatpush1.bf16.msra.mxu0 %v14063_v43  ;;  %v1511_v17 = vld [vmem:[%s15477_s22 + $0x2158] sm:$0xff]  ;;  %v14152_v13 = vcombine.high %v1447_v58, %v1451_v63  ;;  %v14151_v4 = vcombine.low %v1447_v58, %v1451_v63 }
 0x62a   : > { %11916 = vmatpush2.bf16.msra.mxu1 %v13999_v42  ;;  %11942 = vmatprep.subr.bf16.mxu0 %v14056_v51  ;;  %v1515_v9 = vld [vmem:[%s15477_s22 + $0x2178] sm:$0xff] }
 0x62b   : > { %11917 = vmatprep.subr.bf16.mxu1 %v13992_v29  ;;  %v14216_v23 = vcombine.high %v1511_v17, %v1515_v9  ;;  %v1439_v60 = vld [vmem:[%s15477_s22 + $0x1f18] sm:$0xff]  ;;  %v14215_v18 = vcombine.low %v1511_v17, %v1515_v9 }
 0x62c   : > { %v1443_v16 = vld [vmem:[%s15477_s22 + $0x1f38] sm:$0xff] }
 0x62d   : > { %11943 = vmatpush1.bf16.msra.mxu0 %v14055_v38  ;;  %v1503_v3 = vld [vmem:[%s15477_s22 + $0x2118] sm:$0xff]  ;;  %v14144_v31 = vcombine.high %v1439_v60, %v1443_v16  ;;  %v14143_v14 = vcombine.low %v1439_v60, %v1443_v16 }
 0x62e   : > { %11918 = vmatpush2.bf16.msra.mxu1 %v13991_v21  ;;  %11944 = vmatprep.subr.bf16.mxu0 %v14048_v62  ;;  %v1431_v44 = vld [vmem:[%s15477_s22 + $0x1ed8] sm:$0xff] }
 0x62f   : > { %11919 = vmatprep.subr.bf16.mxu1 %v13984_v27  ;;  %v1435_v40 = vld [vmem:[%s15477_s22 + $0x1ef8] sm:$0xff] }
 0x630   : > { %v1499_v15 = vld [vmem:[%s15477_s22 + $0x20f8] sm:$0xff]  ;;  %v14136_v43 = vcombine.high %v1431_v44, %v1435_v40  ;;  %v14135_v59 = vcombine.low %v1431_v44, %v1435_v40 }
 0x631   : > { %11945 = vmatpush1.bf16.msra.mxu0 %v14047_v47  ;;  %v1423_v51 = vld [vmem:[%s15477_s22 + $0x1e98] sm:$0xff] }
 0x632   : > { %11920 = vmatpush2.bf16.msra.mxu1 %v13983_v48  ;;  %11946 = vmatprep.subr.bf16.mxu0 %v14168_v7  ;;  %v1427_v29 = vld [vmem:[%s15477_s22 + $0x1eb8] sm:$0xff] }
 0x633   : > { %11971 = vmatprep.subr.bf16.mxu1 %v14232_v56  ;;  %v1487_v6 = vld [vmem:[%s15477_s22 + $0x2098] sm:$0xff]  ;;  %v14128_v38 = vcombine.high %v1423_v51, %v1427_v29  ;;  %v14127_v22 = vcombine.low %v1423_v51, %v1427_v29 }
 0x634   : > { %v1491_v54 = vld [vmem:[%s15477_s22 + $0x20b8] sm:$0xff] }
 0x635   : > { %v17272_v53 = vpop.f32.mrf.mxu1  ;;  %11922 = vmatmul.mubr.bf16.vlgmr.msra.gmra.mxu1 %v15823_v45  ;;  %11947 = vmatpush2.bf16.msra.mxu0 %v14167_v28  ;;  %v1507_v45 = vld [vmem:[%s15477_s22 + $0x2138] sm:$0xff]  ;;  %v14192_v21 = vcombine.high %v1487_v6, %v1491_v54  ;;  %v14191_v32 = vcombine.low %v1487_v6, %v1491_v54 }
 0x636   : > { %11972 = vmatpush1.bf16.msra.mxu1 %v14231_v52  ;;  %11948 = vmatprep.subr.bf16.mxu0 %v14160_v19  ;;  %v14208_v2 = vcombine.high %v1503_v3, %v1507_v45  ;;  %v14207_v49 = vcombine.low %v1503_v3, %v1507_v45  ;;  %v1415_v62 = vld [vmem:[%s15477_s22 + $0x1e58] sm:$0xff] }
 0x637   : > { %v17275_v24 = vpop.f32.mrf.mxu1  ;;  %11973 = vmatprep.subr.bf16.mxu1 %v14224_v39  ;;  %12003 = vmatprep.mubr.bf16.mxu1 %v15833_v61  ;;  %v1495_v61 = vld [vmem:[%s15477_s22 + $0x20d8] sm:$0xff] }
 0x638   : > { %v14200_v42 = vcombine.high %v1495_v61, %v1499_v15  ;;  %v14199_v25 = vcombine.low %v1495_v61, %v1499_v15  ;;  %v1419_v27 = vld [vmem:[%s15477_s22 + $0x1e78] sm:$0xff] }
 0x639   : > { %v11681_v37 = vpop.f32.mrf.mxu1  ;;  %11949 = vmatpush2.bf16.msra.mxu0 %v14159_v55  ;;  %v1479_v11 = vld [vmem:[%s15477_s22 + $0x2058] sm:$0xff]  ;;  %v14120_v47 = vcombine.high %v1415_v62, %v1419_v27  ;;  %v14119_v26 = vcombine.low %v1415_v62, %v1419_v27 }
 0x63a   : > { %11974 = vmatpush1.bf16.msra.mxu1 %v14223_v10  ;;  %11950 = vmatprep.subr.bf16.mxu0 %v14152_v13  ;;  %v1483_v46 = vld [vmem:[%s15477_s22 + $0x2078] sm:$0xff] }
 0x63b   : > { %v11682_v5 = vpop.f32.mrf.mxu1  ;;  %11975 = vmatprep.subr.bf16.mxu1 %v14216_v23  ;;  %v14184_v48 = vcombine.high %v1479_v11, %v1483_v46  ;;  %v1407_v7 = vld [vmem:[%s15477_s22 + $0x1e18] sm:$0xff]  ;;  %v14183_v34 = vcombine.low %v1479_v11, %v1483_v46 }
 0x63c   : > { %v1411_v56 = vld [vmem:[%s15477_s22 + $0x1e38] sm:$0xff] }
 0x63d   : > { %11951 = vmatpush2.bf16.msra.mxu0 %v14151_v4  ;;  %v1471_v30 = vld [vmem:[%s15477_s22 + $0x2018] sm:$0xff]  ;;  %v14112_v28 = vcombine.high %v1407_v7, %v1411_v56  ;;  %v14111_v17 = vcombine.low %v1407_v7, %v1411_v56 }
 0x63e   : > { %11976 = vmatpush1.bf16.msra.mxu1 %v14215_v18  ;;  %11952 = vmatprep.subr.bf16.mxu0 %v14144_v31  ;;  %v1475_v41 = vld [vmem:[%s15477_s22 + $0x2038] sm:$0xff] }
 0x63f   : > { %11977 = vmatprep.subr.bf16.mxu1 %v14208_v2  ;;  %v14176_v52 = vcombine.high %v1471_v30, %v1475_v41  ;;  %v1655_v19 = vld [vmem:[%s15477_s22 + $0x25d8] sm:$0xff]  ;;  %v14175_v9 = vcombine.low %v1471_v30, %v1475_v41 }
 0x640   : > { %v1659_v39 = vld [vmem:[%s15477_s22 + $0x25f8] sm:$0xff] }
 0x641   : > { %11953 = vmatpush2.bf16.msra.mxu0 %v14143_v14  ;;  %v1591_v58 = vld [vmem:[%s15477_s22 + $0x23d8] sm:$0xff]  ;;  %v14360_v55 = vcombine.high %v1655_v19, %v1659_v39  ;;  %v14359_v3 = vcombine.low %v1655_v19, %v1659_v39 }
 0x642   : > { %11978 = vmatpush1.bf16.msra.mxu1 %v14207_v49  ;;  %11954 = vmatprep.subr.bf16.mxu0 %v14136_v43  ;;  %v1595_v63 = vld [vmem:[%s15477_s22 + $0x23f8] sm:$0xff] }
 0x643   : > { %11979 = vmatprep.subr.bf16.mxu1 %v14200_v42  ;;  %v14296_v10 = vcombine.high %v1591_v58, %v1595_v63  ;;  %v1647_v13 = vld [vmem:[%s15477_s22 + $0x2598] sm:$0xff]  ;;  %v14295_v45 = vcombine.low %v1591_v58, %v1595_v63 }
 0x644   : > { %v1651_v23 = vld [vmem:[%s15477_s22 + $0x25b8] sm:$0xff] }
 0x645   : > { %11955 = vmatpush2.bf16.msra.mxu0 %v14135_v59  ;;  %v1583_v60 = vld [vmem:[%s15477_s22 + $0x2398] sm:$0xff]  ;;  %v14352_v37 = vcombine.high %v1647_v13, %v1651_v23  ;;  %v14351_v61 = vcombine.low %v1647_v13, %v1651_v23 }
 0x646   : > { %11980 = vmatpush1.bf16.msra.mxu1 %v14199_v25  ;;  %11956 = vmatprep.subr.bf16.mxu0 %v14128_v38  ;;  %v1587_v16 = vld [vmem:[%s15477_s22 + $0x23b8] sm:$0xff] }
 0x647   : > { %11981 = vmatprep.subr.bf16.mxu1 %v14192_v21  ;;  %v14288_v4 = vcombine.high %v1583_v60, %v1587_v16  ;;  %v1639_v18 = vld [vmem:[%s15477_s22 + $0x2558] sm:$0xff]  ;;  %v14287_v14 = vcombine.low %v1583_v60, %v1587_v16 }
 0x648   : > { %v1643_v31 = vld [vmem:[%s15477_s22 + $0x2578] sm:$0xff] }
 0x649   : > { %11957 = vmatpush2.bf16.msra.mxu0 %v14127_v22  ;;  %v1575_v2 = vld [vmem:[%s15477_s22 + $0x2358] sm:$0xff]  ;;  %v14344_v49 = vcombine.high %v1639_v18, %v1643_v31 }
 0x64a   : > { %11982 = vmatpush1.bf16.msra.mxu1 %v14191_v32  ;;  %11958 = vmatprep.subr.bf16.mxu0 %v14120_v47  ;;  %v1579_v44 = vld [vmem:[%s15477_s22 + $0x2378] sm:$0xff] }
 0x64b   : > { %11983 = vmatprep.subr.bf16.mxu1 %v14184_v48  ;;  %v1631_v42 = vld [vmem:[%s15477_s22 + $0x2518] sm:$0xff]  ;;  %v14279_v59 = vcombine.low %v1575_v2, %v1579_v44 }
 0x64c   : > { %v1567_v29 = vld [vmem:[%s15477_s22 + $0x2318] sm:$0xff] }
 0x64d   : > { %11959 = vmatpush2.bf16.msra.mxu0 %v14119_v26  ;;  %v1571_v6 = vld [vmem:[%s15477_s22 + $0x2338] sm:$0xff] }
 0x64e   : > { %11984 = vmatpush1.bf16.msra.mxu1 %v14183_v34  ;;  %11960 = vmatprep.subr.bf16.mxu0 %v14112_v28  ;;  %v14272_v25 = vcombine.high %v1567_v29, %v1571_v6  ;;  %v1623_v38 = vld [vmem:[%s15477_s22 + $0x24d8] sm:$0xff]  ;;  %v14271_v46 = vcombine.low %v1567_v29, %v1571_v6 }
 0x64f   : > { %11985 = vmatprep.subr.bf16.mxu1 %v14176_v52  ;;  %v1627_v21 = vld [vmem:[%s15477_s22 + $0x24f8] sm:$0xff] }
 0x650   : > { %v1559_v62 = vld [vmem:[%s15477_s22 + $0x22d8] sm:$0xff]  ;;  %v14328_v22 = vcombine.high %v1623_v38, %v1627_v21  ;;  %v14327_v30 = vcombine.low %v1623_v38, %v1627_v21 }
 0x651   : > { %11961 = vmatpush2.bf16.msra.mxu0 %v14111_v17  ;;  %v1563_v27 = vld [vmem:[%s15477_s22 + $0x22f8] sm:$0xff] }
 0x652   : > { %11986 = vmatpush1.bf16.msra.mxu1 %v14175_v9  ;;  %12012 = vmatprep.subr.bf16.mxu0 %v14360_v55  ;;  %v14264_v32 = vcombine.high %v1559_v62, %v1563_v27  ;;  %v1615_v47 = vld [vmem:[%s15477_s22 + $0x2498] sm:$0xff]  ;;  %v14263_v41 = vcombine.low %v1559_v62, %v1563_v27 }
 0x653   : > { %11987 = vmatprep.subr.bf16.mxu1 %v14296_v10  ;;  %v1619_v48 = vld [vmem:[%s15477_s22 + $0x24b8] sm:$0xff] }
 0x654   : > { %v11718_v5 = vpop.f32.mrf.mxu0  ;;  %11963 = vmatmul.mubr.bf16.vlgmr.msra.gmra.mxu0 %v15828_v50  ;;  %v14280_v50 = vcombine.high %v1575_v2, %v1579_v44  ;;  %v1551_v7 = vld [vmem:[%s15477_s22 + $0x2298] sm:$0xff]  ;;  %v14320_v26 = vcombine.high %v1615_v47, %v1619_v48  ;;  %v14319_v58 = vcombine.low %v1615_v47, %v1619_v48 }
 0x655   : > { %v17312_v40 = vadd.f32 %v11718_v5, %v17272_v53  ;;  %12013 = vmatpush1.bf16.msra.mxu0 %v14359_v3  ;;  %12044 = vmatprep.mubr.bf16.mxu0 %v15838_v1  ;;  %v1635_v53 = vld [vmem:[%s15477_s22 + $0x2538] sm:$0xff]  ;;  %v14343_v1 = vcombine.low %v1639_v18, %v1643_v31 }
 0x656   : > { %11988 = vmatpush2.bf16.msra.mxu1 %v14295_v45  ;;  %v11720_v15 = vpop.f32.mrf.mxu0  ;;  %12014 = vmatprep.subr.bf16.mxu0 %v14352_v37  ;;  %v14335_v11 = vcombine.low %v1631_v42, %v1635_v53  ;;  %v1555_v56 = vld [vmem:[%s15477_s22 + $0x22b8] sm:$0xff] }
 0x657   : > { %v17316_v43 = vadd.f32 %v11720_v15, %v17275_v24  ;;  %11989 = vmatprep.subr.bf16.mxu1 %v14288_v4  ;;  %v14336_v24 = vcombine.high %v1631_v42, %v1635_v53  ;;  %v14256_v34 = vcombine.high %v1551_v7, %v1555_v56  ;;  %v1607_v28 = vld [vmem:[%s15477_s22 + $0x2458] sm:$0xff]  ;;  %v14255_v63 = vcombine.low %v1551_v7, %v1555_v56 }
 0x658   : > { %v11722_v51 = vpop.f32.mrf.mxu0  ;;  %v1611_v52 = vld [vmem:[%s15477_s22 + $0x2478] sm:$0xff] }
 0x659   : > { %12015 = vmatpush1.bf16.msra.mxu0 %v14351_v61  ;;  %v1543_v19 = vld [vmem:[%s15477_s22 + $0x2258] sm:$0xff]  ;;  %v14312_v17 = vcombine.high %v1607_v28, %v1611_v52  ;;  %v14311_v60 = vcombine.low %v1607_v28, %v1611_v52 }
 0x65a   : > { %11990 = vmatpush2.bf16.msra.mxu1 %v14287_v14  ;;  %v11723_v54 = vpop.f32.mrf.mxu0  ;;  %12016 = vmatprep.subr.bf16.mxu0 %v14344_v49  ;;  %v1547_v39 = vld [vmem:[%s15477_s22 + $0x2278] sm:$0xff] }
 0x65b   : > { %11991 = vmatprep.subr.bf16.mxu1 %v14280_v50  ;;  %v14248_v9 = vcombine.high %v1543_v19, %v1547_v39  ;;  %v1599_v55 = vld [vmem:[%s15477_s22 + $0x2418] sm:$0xff]  ;;  %v14247_v16 = vcombine.low %v1543_v19, %v1547_v39 }
 0x65c   : > { %v1603_v10 = vld [vmem:[%s15477_s22 + $0x2438] sm:$0xff] }
 0x65d   : > { %12017 = vmatpush1.bf16.msra.mxu0 %v14343_v1  ;;  %v1535_v13 = vld [vmem:[%s15477_s22 + $0x2218] sm:$0xff]  ;;  %v14304_v3 = vcombine.high %v1599_v55, %v1603_v10  ;;  %v14303_v5 = vcombine.low %v1599_v55, %v1603_v10 }
 0x65e   : > { %11992 = vmatpush2.bf16.msra.mxu1 %v14279_v59  ;;  %12018 = vmatprep.subr.bf16.mxu0 %v14336_v24  ;;  %v1539_v23 = vld [vmem:[%s15477_s22 + $0x2238] sm:$0xff] }
 0x65f   : > { %11993 = vmatprep.subr.bf16.mxu1 %v14272_v25  ;;  %v14240_v45 = vcombine.high %v1535_v13, %v1539_v23  ;;  %v1719_v37 = vld [vmem:[%s15477_s22 + $0x27d8] sm:$0xff]  ;;  %v14239_v2 = vcombine.low %v1535_v13, %v1539_v23 }
 0x660   : > { %v1723_v4 = vld [vmem:[%s15477_s22 + $0x27f8] sm:$0xff] }
 0x661   : > { %12019 = vmatpush1.bf16.msra.mxu0 %v14335_v11  ;;  %v1783_v18 = vld [vmem:[%s15477_s22 + $0x29d8] sm:$0xff]  ;;  %v14424_v44 = vcombine.high %v1719_v37, %v1723_v4  ;;  %v14423_v42 = vcombine.low %v1719_v37, %v1723_v4 }
 0x662   : > { %11994 = vmatpush2.bf16.msra.mxu1 %v14271_v46  ;;  %12020 = vmatprep.subr.bf16.mxu0 %v14328_v22  ;;  %v1787_v31 = vld [vmem:[%s15477_s22 + $0x29f8] sm:$0xff] }
 0x663   : > { %11995 = vmatprep.subr.bf16.mxu1 %v14264_v32  ;;  %v14488_v61 = vcombine.high %v1783_v18, %v1787_v31  ;;  %v1711_v15 = vld [vmem:[%s15477_s22 + $0x2798] sm:$0xff]  ;;  %v14487_v53 = vcombine.low %v1783_v18, %v1787_v31 }
 0x664   : > { %v1715_v14 = vld [vmem:[%s15477_s22 + $0x27b8] sm:$0xff] }
 0x665   : > { %12021 = vmatpush1.bf16.msra.mxu0 %v14327_v30  ;;  %v1775_v49 = vld [vmem:[%s15477_s22 + $0x2998] sm:$0xff]  ;;  %v14416_v51 = vcombine.high %v1711_v15, %v1715_v14  ;;  %v14415_v25 = vcombine.low %v1711_v15, %v1715_v14 }
 0x666   : > { %11996 = vmatpush2.bf16.msra.mxu1 %v14263_v41  ;;  %12022 = vmatprep.subr.bf16.mxu0 %v14320_v26  ;;  %v1779_v50 = vld [vmem:[%s15477_s22 + $0x29b8] sm:$0xff] }
 0x667   : > { %11997 = vmatprep.subr.bf16.mxu1 %v14256_v34  ;;  %v14480_v29 = vcombine.high %v1775_v49, %v1779_v50  ;;  %v1703_v6 = vld [vmem:[%s15477_s22 + $0x2758] sm:$0xff]  ;;  %v14479_v21 = vcombine.low %v1775_v49, %v1779_v50 }
 0x668   : > { %v1707_v1 = vld [vmem:[%s15477_s22 + $0x2778] sm:$0xff] }
 0x669   : > { %12023 = vmatpush1.bf16.msra.mxu0 %v14319_v58  ;;  %v1767_v54 = vld [vmem:[%s15477_s22 + $0x2958] sm:$0xff]  ;;  %v14408_v62 = vcombine.high %v1703_v6, %v1707_v1  ;;  %v14407_v48 = vcombine.low %v1703_v6, %v1707_v1 }
 0x66a   : > { %11998 = vmatpush2.bf16.msra.mxu1 %v14255_v63  ;;  %12024 = vmatprep.subr.bf16.mxu0 %v14312_v17  ;;  %v1771_v59 = vld [vmem:[%s15477_s22 + $0x2978] sm:$0xff] }
 0x66b   : > { %11999 = vmatprep.subr.bf16.mxu1 %v14248_v9  ;;  %v14472_v11 = vcombine.high %v1767_v54, %v1771_v59  ;;  %v1695_v46 = vld [vmem:[%s15477_s22 + $0x2718] sm:$0xff]  ;;  %v14471_v7 = vcombine.low %v1767_v54, %v1771_v59 }
 0x66c   : > { %v1699_v22 = vld [vmem:[%s15477_s22 + $0x2738] sm:$0xff] }
 0x66d   : > { %12025 = vmatpush1.bf16.msra.mxu0 %v14311_v60  ;;  %v1763_v32 = vld [vmem:[%s15477_s22 + $0x2938] sm:$0xff]  ;;  %v14400_v56 = vcombine.high %v1695_v46, %v1699_v22  ;;  %v14399_v28 = vcombine.low %v1695_v46, %v1699_v22 }
 0x66e   : > { %12000 = vmatpush2.bf16.msra.mxu1 %v14247_v16  ;;  %12026 = vmatprep.subr.bf16.mxu0 %v14304_v3  ;;  %v1687_v41 = vld [vmem:[%s15477_s22 + $0x26d8] sm:$0xff] }
 0x66f   : > { %12001 = vmatprep.subr.bf16.mxu1 %v14240_v45  ;;  %v1751_v26 = vld [vmem:[%s15477_s22 + $0x28d8] sm:$0xff] }
 0x670   : > { %v1755_v34 = vld [vmem:[%s15477_s22 + $0x28f8] sm:$0xff] }
 0x671   : > { %12027 = vmatpush1.bf16.msra.mxu0 %v14303_v5  ;;  %v14456_v39 = vcombine.high %v1751_v26, %v1755_v34  ;;  %v1679_v58 = vld [vmem:[%s15477_s22 + $0x2698] sm:$0xff]  ;;  %v14455_v10 = vcombine.low %v1751_v26, %v1755_v34 }
 0x672   : > { %12002 = vmatpush2.bf16.msra.mxu1 %v14239_v2  ;;  %12028 = vmatprep.subr.bf16.mxu0 %v14424_v44  ;;  %v1683_v63 = vld [vmem:[%s15477_s22 + $0x26b8] sm:$0xff] }
 0x673   : > { %12053 = vmatprep.subr.bf16.mxu1 %v14488_v61  ;;  %v1743_v17 = vld [vmem:[%s15477_s22 + $0x2898] sm:$0xff]  ;;  %v14384_v13 = vcombine.high %v1679_v58, %v1683_v63  ;;  %v14383_v37 = vcombine.low %v1679_v58, %v1683_v63 }
 0x674   : > { %v1747_v9 = vld [vmem:[%s15477_s22 + $0x28b8] sm:$0xff] }
 0x675   : > { %v11759_v24 = vpop.f32.mrf.mxu1  ;;  %12004 = vmatmul.mubr.bf16.vlgmr.msra.gmra.mxu1 %v15907_v57  ;;  %12029 = vmatpush2.bf16.msra.mxu0 %v14423_v42  ;;  %v14448_v23 = vcombine.high %v1743_v17, %v1747_v9  ;;  %v1671_v60 = vld [vmem:[%s15477_s22 + $0x2658] sm:$0xff]  ;;  %v14447_v4 = vcombine.low %v1743_v17, %v1747_v9 }
 0x676   : > { %v17352_v38 = vadd.f32 %v11759_v24, %v17312_v40  ;;  %12054 = vmatpush1.bf16.msra.mxu1 %v14487_v53  ;;  %12030 = vmatprep.subr.bf16.mxu0 %v14416_v51  ;;  %v1759_v40 = vld [vmem:[%s15477_s22 + $0x2918] sm:$0xff] }
 0x677   : > { %v11761_v27 = vpop.f32.mrf.mxu1  ;;  %12055 = vmatprep.subr.bf16.mxu1 %v14480_v29  ;;  %12085 = vmatprep.mubr.bf16.mxu1 %v15917_v12  ;;  %v14464_v12 = vcombine.high %v1759_v40, %v1763_v32  ;;  %v14463_v52 = vcombine.low %v1759_v40, %v1763_v32  ;;  %v1675_v16 = vld [vmem:[%s15477_s22 + $0x2678] sm:$0xff] }
 0x678   : > { %v17358_v57 = vadd.f32 %v11761_v27, %v17316_v43  ;;  %v1691_v43 = vld [vmem:[%s15477_s22 + $0x26f8] sm:$0xff]  ;;  %v14376_v18 = vcombine.high %v1671_v60, %v1675_v16  ;;  %v14375_v15 = vcombine.low %v1671_v60, %v1675_v16 }
 0x679   : > { %v11763_v47 = vpop.f32.mrf.mxu1  ;;  %12031 = vmatpush2.bf16.msra.mxu0 %v14415_v25  ;;  %v14392_v19 = vcombine.high %v1687_v41, %v1691_v43  ;;  %v14391_v55 = vcombine.low %v1687_v41, %v1691_v43  ;;  %v1735_v3 = vld [vmem:[%s15477_s22 + $0x2858] sm:$0xff] }
 0x67a   : > { %12056 = vmatpush1.bf16.msra.mxu1 %v14479_v21  ;;  %12032 = vmatprep.subr.bf16.mxu0 %v14408_v62  ;;  %v1739_v45 = vld [vmem:[%s15477_s22 + $0x2878] sm:$0xff] }
 0x67b   : > { %v11764_v30 = vpop.f32.mrf.mxu1  ;;  %12057 = vmatprep.subr.bf16.mxu1 %v14472_v11  ;;  %v14440_v31 = vcombine.high %v1735_v3, %v1739_v45  ;;  %v1663_v5 = vld [vmem:[%s15477_s22 + $0x2618] sm:$0xff]  ;;  %v14439_v14 = vcombine.low %v1735_v3, %v1739_v45 }
 0x67c   : > { %v1667_v2 = vld [vmem:[%s15477_s22 + $0x2638] sm:$0xff] }
 0x67d   : > { %12033 = vmatpush2.bf16.msra.mxu0 %v14407_v48  ;;  %v1727_v44 = vld [vmem:[%s15477_s22 + $0x2818] sm:$0xff]  ;;  %v14368_v49 = vcombine.high %v1663_v5, %v1667_v2  ;;  %v14367_v6 = vcombine.low %v1663_v5, %v1667_v2 }
 0x67e   : > { %12058 = vmatpush1.bf16.msra.mxu1 %v14471_v7  ;;  %12034 = vmatprep.subr.bf16.mxu0 %v14400_v56  ;;  %v1731_v61 = vld [vmem:[%s15477_s22 + $0x2838] sm:$0xff] }
 0x67f   : > { %12059 = vmatprep.subr.bf16.mxu1 %v14464_v12  ;;  %v14432_v50 = vcombine.high %v1727_v44, %v1731_v61  ;;  %v1911_v42 = vld [vmem:[%s15477_s22 + $0x2dd8] sm:$0xff]  ;;  %v14431_v1 = vcombine.low %v1727_v44, %v1731_v61 }
 0x680   : > { %v1915_v53 = vld [vmem:[%s15477_s22 + $0x2df8] sm:$0xff] }
 0x681   : > { %12035 = vmatpush2.bf16.msra.mxu0 %v14399_v28  ;;  %v1847_v51 = vld [vmem:[%s15477_s22 + $0x2bd8] sm:$0xff]  ;;  %v14616_v54 = vcombine.high %v1911_v42, %v1915_v53  ;;  %v14615_v27 = vcombine.low %v1911_v42, %v1915_v53 }
 0x682   : > { %12060 = vmatpush1.bf16.msra.mxu1 %v14463_v52  ;;  %12036 = vmatprep.subr.bf16.mxu0 %v14392_v19  ;;  %v1851_v29 = vld [vmem:[%s15477_s22 + $0x2bf8] sm:$0xff] }
 0x683   : > { %12061 = vmatprep.subr.bf16.mxu1 %v14456_v39  ;;  %v14552_v59 = vcombine.high %v1847_v51, %v1851_v29  ;;  %v1903_v24 = vld [vmem:[%s15477_s22 + $0x2d98] sm:$0xff]  ;;  %v14551_v11 = vcombine.low %v1847_v51, %v1851_v29 }
 0x684   : > { %v1907_v25 = vld [vmem:[%s15477_s22 + $0x2db8] sm:$0xff] }
 0x685   : > { %12037 = vmatpush2.bf16.msra.mxu0 %v14391_v55  ;;  %v1839_v21 = vld [vmem:[%s15477_s22 + $0x2b98] sm:$0xff]  ;;  %v14608_v46 = vcombine.high %v1903_v24, %v1907_v25  ;;  %v14607_v30 = vcombine.low %v1903_v24, %v1907_v25 }
 0x686   : > { %12062 = vmatpush1.bf16.msra.mxu1 %v14455_v10  ;;  %12038 = vmatprep.subr.bf16.mxu0 %v14384_v13  ;;  %v1843_v62 = vld [vmem:[%s15477_s22 + $0x2bb8] sm:$0xff] }
 0x687   : > { %12063 = vmatprep.subr.bf16.mxu1 %v14448_v23  ;;  %v14544_v22 = vcombine.high %v1839_v21, %v1843_v62  ;;  %v1895_v40 = vld [vmem:[%s15477_s22 + $0x2d58] sm:$0xff]  ;;  %v14543_v41 = vcombine.low %v1839_v21, %v1843_v62 }
 0x688   : > { %v1899_v32 = vld [vmem:[%s15477_s22 + $0x2d78] sm:$0xff] }
 0x689   : > { %12039 = vmatpush2.bf16.msra.mxu0 %v14383_v37  ;;  %v1831_v48 = vld [vmem:[%s15477_s22 + $0x2b58] sm:$0xff]  ;;  %v14600_v43 = vcombine.high %v1895_v40, %v1899_v32 }
 0x68a   : > { %12064 = vmatpush1.bf16.msra.mxu1 %v14447_v4  ;;  %12040 = vmatprep.subr.bf16.mxu0 %v14376_v18  ;;  %v1835_v7 = vld [vmem:[%s15477_s22 + $0x2b78] sm:$0xff] }
 0x68b   : > { %12065 = vmatprep.subr.bf16.mxu1 %v14440_v31  ;;  %v1887_v34 = vld [vmem:[%s15477_s22 + $0x2d18] sm:$0xff]  ;;  %v14535_v58 = vcombine.low %v1831_v48, %v1835_v7 }
 0x68c   : > { %v1823_v52 = vld [vmem:[%s15477_s22 + $0x2b18] sm:$0xff] }
 0x68d   : > { %12041 = vmatpush2.bf16.msra.mxu0 %v14375_v15  ;;  %v1827_v19 = vld [vmem:[%s15477_s22 + $0x2b38] sm:$0xff] }
 0x68e   : > { %12066 = vmatpush1.bf16.msra.mxu1 %v14439_v14  ;;  %12042 = vmatprep.subr.bf16.mxu0 %v14368_v49  ;;  %v14528_v63 = vcombine.high %v1823_v52, %v1827_v19  ;;  %v1879_v17 = vld [vmem:[%s15477_s22 + $0x2cd8] sm:$0xff]  ;;  %v14527_v23 = vcombine.low %v1823_v52, %v1827_v19 }
 0x68f   : > { %12067 = vmatprep.subr.bf16.mxu1 %v14432_v50  ;;  %v1883_v9 = vld [vmem:[%s15477_s22 + $0x2cf8] sm:$0xff] }
 0x690   : > { %v1815_v55 = vld [vmem:[%s15477_s22 + $0x2ad8] sm:$0xff]  ;;  %v14584_v60 = vcombine.high %v1879_v17, %v1883_v9  ;;  %v14583_v18 = vcombine.low %v1879_v17, %v1883_v9 }
 0x691   : > { %12043 = vmatpush2.bf16.msra.mxu0 %v14367_v6  ;;  %v1819_v10 = vld [vmem:[%s15477_s22 + $0x2af8] sm:$0xff] }
 0x692   : > { %12068 = vmatpush1.bf16.msra.mxu1 %v14431_v1  ;;  %12094 = vmatprep.subr.bf16.mxu0 %v14616_v54  ;;  %v14520_v16 = vcombine.high %v1815_v55, %v1819_v10  ;;  %v1871_v3 = vld [vmem:[%s15477_s22 + $0x2c98] sm:$0xff]  ;;  %v14519_v31 = vcombine.low %v1815_v55, %v1819_v10 }
 0x693   : > { %12069 = vmatprep.subr.bf16.mxu1 %v14552_v59  ;;  %v1875_v45 = vld [vmem:[%s15477_s22 + $0x2cb8] sm:$0xff] }
 0x694   : > { %v11800_v47 = vpop.f32.mrf.mxu0  ;;  %12045 = vmatmul.mubr.bf16.vlgmr.msra.gmra.mxu0 %v15912_v0  ;;  %v14536_v0 = vcombine.high %v1831_v48, %v1835_v7  ;;  %v1807_v37 = vld [vmem:[%s15477_s22 + $0x2a98] sm:$0xff]  ;;  %v14576_v5 = vcombine.high %v1871_v3, %v1875_v45  ;;  %v14575_v49 = vcombine.low %v1871_v3, %v1875_v45 }
 0x695   : > { %v17392_v56 = vadd.f32 %v11800_v47, %v17352_v38  ;;  %12095 = vmatpush1.bf16.msra.mxu0 %v14615_v27  ;;  %12126 = vmatprep.mubr.bf16.mxu0 %v15922_v20  ;;  %v1891_v38 = vld [vmem:[%s15477_s22 + $0x2d38] sm:$0xff]  ;;  %v14599_v20 = vcombine.low %v1895_v40, %v1899_v32 }
 0x696   : > { %12070 = vmatpush2.bf16.msra.mxu1 %v14551_v11  ;;  %v11802_v12 = vpop.f32.mrf.mxu0  ;;  %12096 = vmatprep.subr.bf16.mxu0 %v14608_v46  ;;  %v14591_v13 = vcombine.low %v1887_v34, %v1891_v38  ;;  %v1811_v4 = vld [vmem:[%s15477_s22 + $0x2ab8] sm:$0xff] }
 0x697   : > { %v17396_v26 = vadd.f32 %v11802_v12, %v17358_v57  ;;  %12071 = vmatprep.subr.bf16.mxu1 %v14544_v22  ;;  %v14592_v57 = vcombine.high %v1887_v34, %v1891_v38  ;;  %v14512_v2 = vcombine.high %v1807_v37, %v1811_v4  ;;  %v1863_v44 = vld [vmem:[%s15477_s22 + $0x2c58] sm:$0xff]  ;;  %v14511_v50 = vcombine.low %v1807_v37, %v1811_v4 }
 0x698   : > { %v11804_v28 = vpop.f32.mrf.mxu0  ;;  %v1867_v61 = vld [vmem:[%s15477_s22 + $0x2c78] sm:$0xff] }
 0x699   : > { %12097 = vmatpush1.bf16.msra.mxu0 %v14607_v30  ;;  %v1799_v15 = vld [vmem:[%s15477_s22 + $0x2a58] sm:$0xff]  ;;  %v14568_v42 = vcombine.high %v1863_v44, %v1867_v61  ;;  %v14567_v54 = vcombine.low %v1863_v44, %v1867_v61 }
 0x69a   : > { %12072 = vmatpush2.bf16.msra.mxu1 %v14543_v41  ;;  %v11805_v39 = vpop.f32.mrf.mxu0  ;;  %12098 = vmatprep.subr.bf16.mxu0 %v14600_v43  ;;  %v1803_v14 = vld [vmem:[%s15477_s22 + $0x2a78] sm:$0xff] }
 0x69b   : > { %12073 = vmatprep.subr.bf16.mxu1 %v14536_v0  ;;  %v14504_v53 = vcombine.high %v1799_v15, %v1803_v14  ;;  %v1855_v51 = vld [vmem:[%s15477_s22 + $0x2c18] sm:$0xff]  ;;  %v14503_v59 = vcombine.low %v1799_v15, %v1803_v14 }
 0x69c   : > { %v1859_v29 = vld [vmem:[%s15477_s22 + $0x2c38] sm:$0xff] }
 0x69d   : > { %12099 = vmatpush1.bf16.msra.mxu0 %v14599_v20  ;;  %v1791_v6 = vld [vmem:[%s15477_s22 + $0x2a18] sm:$0xff]  ;;  %v14560_v24 = vcombine.high %v1855_v51, %v1859_v29  ;;  %v14559_v46 = vcombine.low %v1855_v51, %v1859_v29 }
 0x69e   : > { %12074 = vmatpush2.bf16.msra.mxu1 %v14535_v58  ;;  %12100 = vmatprep.subr.bf16.mxu0 %v14592_v57  ;;  %v1795_v1 = vld [vmem:[%s15477_s22 + $0x2a38] sm:$0xff] }
 0x69f   : > { %12075 = vmatprep.subr.bf16.mxu1 %v14528_v63  ;;  %v14496_v25 = vcombine.high %v1791_v6, %v1795_v1  ;;  %v1975_v21 = vld [vmem:[%s15477_s22 + $0x2fd8] sm:$0xff]  ;;  %v14495_v22 = vcombine.low %v1791_v6, %v1795_v1 }
 0x6a0   : > { %v1979_v62 = vld [vmem:[%s15477_s22 + $0x2ff8] sm:$0xff] }
 0x6a1   : > { %12101 = vmatpush1.bf16.msra.mxu0 %v14591_v13  ;;  %v2039_v27 = vld [vmem:[%s15477_s22 + $0x31d8] sm:$0xff]  ;;  %v14680_v40 = vcombine.high %v1975_v21, %v1979_v62  ;;  %v14679_v12 = vcombine.low %v1975_v21, %v1979_v62 }
 0x6a2   : > { %12076 = vmatpush2.bf16.msra.mxu1 %v14527_v23  ;;  %12102 = vmatprep.subr.bf16.mxu0 %v14584_v60  ;;  %v2043_v11 = vld [vmem:[%s15477_s22 + $0x31f8] sm:$0xff] }
 0x6a3   : > { %12077 = vmatprep.subr.bf16.mxu1 %v14520_v16  ;;  %v14744_v32 = vcombine.high %v2039_v27, %v2043_v11  ;;  %v1967_v47 = vld [vmem:[%s15477_s22 + $0x2f98] sm:$0xff]  ;;  %v14743_v41 = vcombine.low %v2039_v27, %v2043_v11 }
 0x6a4   : > { %v1971_v48 = vld [vmem:[%s15477_s22 + $0x2fb8] sm:$0xff] }
 0x6a5   : > { %12103 = vmatpush1.bf16.msra.mxu0 %v14583_v18  ;;  %v2031_v7 = vld [vmem:[%s15477_s22 + $0x3198] sm:$0xff]  ;;  %v14672_v43 = vcombine.high %v1967_v47, %v1971_v48  ;;  %v14671_v20 = vcombine.low %v1967_v47, %v1971_v48 }
 0x6a6   : > { %12078 = vmatpush2.bf16.msra.mxu1 %v14519_v31  ;;  %12104 = vmatprep.subr.bf16.mxu0 %v14576_v5  ;;  %v2035_v30 = vld [vmem:[%s15477_s22 + $0x31b8] sm:$0xff] }
 0x6a7   : > { %12079 = vmatprep.subr.bf16.mxu1 %v14512_v2  ;;  %v14736_v0 = vcombine.high %v2031_v7, %v2035_v30  ;;  %v1959_v34 = vld [vmem:[%s15477_s22 + $0x2f58] sm:$0xff]  ;;  %v14735_v58 = vcombine.low %v2031_v7, %v2035_v30 }
 0x6a8   : > { %v1963_v38 = vld [vmem:[%s15477_s22 + $0x2f78] sm:$0xff] }
 0x6a9   : > { %12105 = vmatpush1.bf16.msra.mxu0 %v14575_v49  ;;  %v2023_v28 = vld [vmem:[%s15477_s22 + $0x3158] sm:$0xff]  ;;  %v14664_v57 = vcombine.high %v1959_v34, %v1963_v38  ;;  %v14663_v23 = vcombine.low %v1959_v34, %v1963_v38 }
 0x6aa   : > { %12080 = vmatpush2.bf16.msra.mxu1 %v14511_v50  ;;  %12106 = vmatprep.subr.bf16.mxu0 %v14568_v42  ;;  %v2027_v52 = vld [vmem:[%s15477_s22 + $0x3178] sm:$0xff] }
 0x6ab   : > { %12081 = vmatprep.subr.bf16.mxu1 %v14504_v53  ;;  %v14728_v17 = vcombine.high %v2023_v28, %v2027_v52  ;;  %v1951_v9 = vld [vmem:[%s15477_s22 + $0x2f18] sm:$0xff]  ;;  %v14727_v60 = vcombine.low %v2023_v28, %v2027_v52 }
 0x6ac   : > { %v1955_v55 = vld [vmem:[%s15477_s22 + $0x2f38] sm:$0xff] }
 0x6ad   : > { %12107 = vmatpush1.bf16.msra.mxu0 %v14567_v54  ;;  %v2019_v10 = vld [vmem:[%s15477_s22 + $0x3138] sm:$0xff]  ;;  %v14656_v16 = vcombine.high %v1951_v9, %v1955_v55  ;;  %v14655_v18 = vcombine.low %v1951_v9, %v1955_v55 }
 0x6ae   : > { %12082 = vmatpush2.bf16.msra.mxu1 %v14503_v59  ;;  %12108 = vmatprep.subr.bf16.mxu0 %v14560_v24  ;;  %v1943_v45 = vld [vmem:[%s15477_s22 + $0x2ed8] sm:$0xff] }
 0x6af   : > { %12083 = vmatprep.subr.bf16.mxu1 %v14496_v25  ;;  %v2007_v37 = vld [vmem:[%s15477_s22 + $0x30d8] sm:$0xff] }
 0x6b0   : > { %v2011_v4 = vld [vmem:[%s15477_s22 + $0x30f8] sm:$0xff] }
 0x6b1   : > { %12109 = vmatpush1.bf16.msra.mxu0 %v14559_v46  ;;  %v14712_v2 = vcombine.high %v2007_v37, %v2011_v4  ;;  %v1935_v44 = vld [vmem:[%s15477_s22 + $0x2e98] sm:$0xff]  ;;  %v14711_v50 = vcombine.low %v2007_v37, %v2011_v4 }
 0x6b2   : > { %12084 = vmatpush2.bf16.msra.mxu1 %v14495_v22  ;;  %12110 = vmatprep.subr.bf16.mxu0 %v14680_v40  ;;  %v1939_v61 = vld [vmem:[%s15477_s22 + $0x2eb8] sm:$0xff] }
 0x6b3   : > { %12135 = vmatprep.subr.bf16.mxu1 %v14744_v32  ;;  %v1999_v15 = vld [vmem:[%s15477_s22 + $0x3098] sm:$0xff]  ;;  %v14640_v42 = vcombine.high %v1935_v44, %v1939_v61  ;;  %v14639_v54 = vcombine.low %v1935_v44, %v1939_v61  ;;  %v392_v61 = vld [vmem:[#allocation2 + $0x28] sm:$0xff] }
 0x6b4   : > { %v2003_v14 = vld [vmem:[%s15477_s22 + $0x30b8] sm:$0xff] }
 0x6b5   : > { %v11841_v19 = vpop.f32.mrf.mxu1  ;;  %12086 = vmatmul.mubr.bf16.vlgmr.msra.gmra.mxu1 %v15993_v33  ;;  %12111 = vmatpush2.bf16.msra.mxu0 %v14679_v12  ;;  %v14704_v53 = vcombine.high %v1999_v15, %v2003_v14  ;;  %v1927_v51 = vld [vmem:[%s15477_s22 + $0x2e58] sm:$0xff]  ;;  %v14703_v59 = vcombine.low %v1999_v15, %v2003_v14 }
 0x6b6   : > { %v17432_v39 = vadd.f32 %v11841_v19, %v17392_v56  ;;  %12136 = vmatpush1.bf16.msra.mxu1 %v14743_v41  ;;  %12112 = vmatprep.subr.bf16.mxu0 %v14672_v43  ;;  %v2015_v56 = vld [vmem:[%s15477_s22 + $0x3118] sm:$0xff] }
 0x6b7   : > { %v11843_v63 = vpop.f32.mrf.mxu1  ;;  %12137 = vmatprep.subr.bf16.mxu1 %v14736_v0  ;;  %12167 = vmatprep.mubr.bf16.mxu1 %v15284_v8  ;;  %v14720_v8 = vcombine.high %v2015_v56, %v2019_v10  ;;  %v14719_v31 = vcombine.low %v2015_v56, %v2019_v10  ;;  %v1931_v29 = vld [vmem:[%s15477_s22 + $0x2e78] sm:$0xff] }
 0x6b8   : > { %v17438_v33 = vadd.f32 %v11843_v63, %v17396_v26  ;;  %v1947_v26 = vld [vmem:[%s15477_s22 + $0x2ef8] sm:$0xff]  ;;  %v14632_v24 = vcombine.high %v1927_v51, %v1931_v29  ;;  %v14631_v46 = vcombine.low %v1927_v51, %v1931_v29 }
 0x6b9   : > { %v11845_v13 = vpop.f32.mrf.mxu1  ;;  %12113 = vmatpush2.bf16.msra.mxu0 %v14671_v20  ;;  %v14648_v5 = vcombine.high %v1943_v45, %v1947_v26  ;;  %v14647_v49 = vcombine.low %v1943_v45, %v1947_v26  ;;  %v1991_v6 = vld [vmem:[%s15477_s22 + $0x3058] sm:$0xff] }
 0x6ba   : > { %12138 = vmatpush1.bf16.msra.mxu1 %v14735_v58  ;;  %12114 = vmatprep.subr.bf16.mxu0 %v14664_v57  ;;  %v1995_v1 = vld [vmem:[%s15477_s22 + $0x3078] sm:$0xff] }
 0x6bb   : > { %v11846_v3 = vpop.f32.mrf.mxu1  ;;  %12139 = vmatprep.subr.bf16.mxu1 %v14728_v17  ;;  %v14696_v25 = vcombine.high %v1991_v6, %v1995_v1  ;;  %v1919_v21 = vld [vmem:[%s15477_s22 + $0x2e18] sm:$0xff]  ;;  %v14695_v22 = vcombine.low %v1991_v6, %v1995_v1 }
 0x6bc   : > { %v1923_v62 = vld [vmem:[%s15477_s22 + $0x2e38] sm:$0xff] }
 0x6bd   : > { %12115 = vmatpush2.bf16.msra.mxu0 %v14663_v23  ;;  %v1983_v27 = vld [vmem:[%s15477_s22 + $0x3018] sm:$0xff]  ;;  %v14624_v40 = vcombine.high %v1919_v21, %v1923_v62  ;;  %v14623_v47 = vcombine.low %v1919_v21, %v1923_v62 }
 0x6be   : > { %12140 = vmatpush1.bf16.msra.mxu1 %v14727_v60  ;;  %12116 = vmatprep.subr.bf16.mxu0 %v14656_v16  ;;  %v1987_v11 = vld [vmem:[%s15477_s22 + $0x3038] sm:$0xff] }
 0x6bf   : > { %12141 = vmatprep.subr.bf16.mxu1 %v14720_v8  ;;  %v14688_v32 = vcombine.high %v1983_v27, %v1987_v11  ;;  %v14687_v48 = vcombine.low %v1983_v27, %v1987_v11 }
 0x6c1   : > { %12117 = vmatpush2.bf16.msra.mxu0 %v14655_v18 }
 0x6c2   : > { %12142 = vmatpush1.bf16.msra.mxu1 %v14719_v31  ;;  %12118 = vmatprep.subr.bf16.mxu0 %v14648_v5 }
 0x6c3   : > { %12143 = vmatprep.subr.bf16.mxu1 %v14712_v2 }
 0x6c5   : > { %12119 = vmatpush2.bf16.msra.mxu0 %v14647_v49 }
 0x6c6   : > { %12144 = vmatpush1.bf16.msra.mxu1 %v14711_v50  ;;  %12120 = vmatprep.subr.bf16.mxu0 %v14640_v42  ;;  %v393_v42 = vld [vmem:[#allocation2 + $0x38] sm:$0xff] }
 0x6c7   : > { %12145 = vmatprep.subr.bf16.mxu1 %v14704_v53 }
 0x6c9   : > { %12121 = vmatpush2.bf16.msra.mxu0 %v14639_v54 }
 0x6ca   : > { %12146 = vmatpush1.bf16.msra.mxu1 %v14703_v59  ;;  %12122 = vmatprep.subr.bf16.mxu0 %v14632_v24 }
 0x6cb   : > { %12147 = vmatprep.subr.bf16.mxu1 %v14696_v25 }
 0x6cd   : > { %12123 = vmatpush2.bf16.msra.mxu0 %v14631_v46 }
 0x6ce   : > { %12148 = vmatpush1.bf16.msra.mxu1 %v14695_v22  ;;  %12124 = vmatprep.subr.bf16.mxu0 %v14624_v40 }
 0x6cf   : > { %12149 = vmatprep.subr.bf16.mxu1 %v14688_v32 }
 0x6d1   : > { %12125 = vmatpush2.bf16.msra.mxu0 %v14623_v47 }
 0x6d2   : > { %12150 = vmatpush1.bf16.msra.mxu1 %v14687_v48 }
 0x6d4   : > { %v11882_v7 = vpop.f32.mrf.mxu0  ;;  %12127 = vmatmul.mubr.bf16.vlgmr.msra.gmra.mxu0 %v15997_v36 }
 0x6d5   : > { %v11883_v30 = vadd.f32 %v11882_v7, %v17432_v39  ;;  %12168 = vmatmul.mubr.bf16.vlgmr.msra.gmra.mxu1 %v16040_v35 }
 0x6d6   : > { %v11884_v12 = vpop.f32.mrf.mxu0 }
 0x6d7   : > { %v11885_v41 = vadd.f32 %v11884_v12, %v17438_v33 }
 0x6d8   : > { %v11886_v43 = vpop.f32.mrf.mxu0 }
 0x6da   : > { %v11887_v0 = vpop.f32.mrf.mxu0 }
 0x6f5   : > { %v11923_v34 = vpop.f32.mrf.mxu1 }
 0x6f6   : > { %v11924_v38 = vadd.f32 %v11923_v34, %v11883_v30 }
 0x6f7   : > { %v11925_v28 = vpop.f32.mrf.mxu1 }
 0x6f8   : > { %v11926_v52 = vadd.f32 %v11925_v28, %v11885_v41 }
 0x6f9   : > { %v11927_v19 = vpop.f32.mrf.mxu1 }
 0x6fb   : > { %v11928_v20 = vpop.f32.mrf.mxu1 }
 0x714   : > { %v11964_v58 = vpop.f32.mrf.mxu0 }
 0x715   : > { %v11965_v57 = vadd.f32 %v11964_v58, %v11924_v38 }
 0x716   : > { %v11966_v63 = vpop.f32.mrf.mxu0 }
 0x717   : > { %v11967_v17 = vadd.f32 %v11966_v63, %v11926_v52 }
 0x718   : > { %v11968_v36 = vpop.f32.mrf.mxu0 }
 0x71a   : > { %v11969_v9 = vpop.f32.mrf.mxu0 }
 0x735   : > { %v12005_v39 = vpop.f32.mrf.mxu1 }
 0x736   : > { %v12006_v55 = vadd.f32 %v12005_v39, %v11965_v57 }
 0x737   : > { %v12007_v35 = vpop.f32.mrf.mxu1 }
 0x738   : > { %v12008_v56 = vadd.f32 %v12007_v35, %v11967_v17 }
 0x739   : > { %v12009_v10 = vpop.f32.mrf.mxu1 }
 0x73b   : > { %v12010_v33 = vpop.f32.mrf.mxu1 }
 0x754   : > { %v12046_v13 = vpop.f32.mrf.mxu0 }
 0x755   : > { %v12047_v37 = vadd.f32 %v12046_v13, %v12006_v55 }
 0x756   : > { %v12048_v23 = vpop.f32.mrf.mxu0 }
 0x757   : > { %v12049_v4 = vadd.f32 %v12048_v23, %v12008_v56 }
 0x758   : > { %v12050_v60 = vpop.f32.mrf.mxu0 }
 0x75a   : > { %v12051_v16 = vpop.f32.mrf.mxu0 }
 0x775   : > { %v12087_v3 = vpop.f32.mrf.mxu1 }
 0x776   : > { %v12088_v18 = vadd.f32 %v12087_v3, %v12047_v37 }
 0x777   : > { %v12089_v8 = vpop.f32.mrf.mxu1 }
 0x778   : > { %v12090_v5 = vadd.f32 %v12089_v8, %v12049_v4 }
 0x779   : > { %v12091_v45 = vpop.f32.mrf.mxu1 }
 0x77b   : > { %v12092_v26 = vpop.f32.mrf.mxu1 }
 0x794   : > { %v12128_v31 = vpop.f32.mrf.mxu0 }
 0x795   : > { %v12129_v2 = vadd.f32 %v12128_v31, %v12088_v18  ;;  %v12169_v44 = vpop.f32.mrf.mxu1 }
 0x796   : > { %v12130_v15 = vpop.f32.mrf.mxu0 }
 0x797   : > { %v12170_v14 = vadd.f32 %v12169_v44, %v12129_v2  ;;  %v12131_v49 = vadd.f32 %v12130_v15, %v12090_v5  ;;  %v12171_v50 = vpop.f32.mrf.mxu1 }
 0x798   : > { %v12132_v53 = vpop.f32.mrf.mxu0 }
 0x799   : > { %v12182_v51 = vadd.f32 %v12170_v14, %v392_v61  ;;  %v12172_v29 = vadd.f32 %v12171_v50, %v12131_v49  ;;  %v12173_v6 = vpop.f32.mrf.mxu1  ;;  %12195 = sbr.rel (%p14745_p5) target bundleno = 2225 (0x8b1), region = 80 }
 0x79a   : > { %v12133_v1 = vpop.f32.mrf.mxu0 }
 0x79b   : > { %12190 = vst [vmem:[#allocation2 + $0x28] sm:$0xff] %v12182_v51  ;;  %v12183_v54 = vadd.f32 %v12172_v29, %v393_v42  ;;  %v12174_v59 = vpop.f32.mrf.mxu1 }
 0x79d   : > { %12191 = vst [vmem:[#allocation2 + $0x38] sm:$0xff] %v12183_v54 }
 0x79e   : > { %v15003_v24 = vld [vmem:[#allocation8 + $0x78] sm:$0xff]   ;;  %v15007_v27 = vld [vmem:[#allocation8 + $0x70] sm:$0xff]   ;;  %v15011_v40 = vld [vmem:[#allocation8 + $0x68] sm:$0xff]   ;;  %v12206_v28 = vlaneseq }
 0x79f   : > { %v15004_v25 = vld [vmem:[#allocation8 + $0xf8] sm:$0xff]   ;;  %14817 = vmatprep.subr.bf16.mxu0 %v15003_v24  ;;  %v15008_v11 = vld [vmem:[#allocation8 + $0xf0] sm:$0xff]   ;;  %v15012_v32 = vld [vmem:[#allocation8 + $0xe8] sm:$0xff]  }
 0x7a0   : > { %v15005_v21 = vld [vmem:[#allocation8 + $0x38] sm:$0xff]   ;;  %14839 = vmatprep.subr.bf16.mxu1 %v15004_v25  ;;  %v15009_v46 = vld [vmem:[#allocation8 + $0x30] sm:$0xff]   ;;  %v15013_v47 = vld [vmem:[#allocation8 + $0x28] sm:$0xff]   ;;  %v17463_v57 = vshrl.u32 %v12206_v28, 7 }
 0x7a1   : > { %v15006_v62 = vld [vmem:[#allocation8 + $0xb8] sm:$0xff]   ;;  %14818 = vmatpush3.bf16.msra.mxu0 %v15005_v21  ;;  %v15010_v22 = vld [vmem:[#allocation8 + $0xb0] sm:$0xff]   ;;  %v15014_v48 = vld [vmem:[#allocation8 + $0xa8] sm:$0xff]  }
 0x7a2   : > { %14840 = vmatpush3.bf16.msra.mxu1 %v15006_v62  ;;  %14819 = vmatprep.subr.bf16.mxu0 %v15007_v27  ;;  %v15015_v7 = vld [vmem:[#allocation8 + $0x60] sm:$0xff]   ;;  %v15019_v43 = vld [vmem:[#allocation8 + $0x58] sm:$0xff]   ;;  %v15023_v52 = vld [vmem:[#allocation8 + $0x50] sm:$0xff]   ;;  %v12212_v39 = vsub.s32 1, %v17463_v57  ;;  %v12220_v35 = vsub.s32 3, %v17463_v57  ;;  %v12208_v10 = vsub.s32 0, %v17463_v57 }
 0x7a3   : > { %14841 = vmatprep.subr.bf16.mxu1 %v15008_v11  ;;  %v15016_v30 = vld [vmem:[#allocation8 + $0xe0] sm:$0xff]   ;;  %v15020_v0 = vld [vmem:[#allocation8 + $0xd8] sm:$0xff]   ;;  %v15024_v19 = vld [vmem:[#allocation8 + $0xd0] sm:$0xff]   ;;  %v12216_v13 = vsub.s32 2, %v17463_v57 }
 0x7a4   : > { %v15017_v12 = vld [vmem:[#allocation8 + $0x20] sm:$0xff]   ;;  %v15021_v34 = vld [vmem:[#allocation8 + $0x18] sm:$0xff]   ;;  %v15025_v20 = vld [vmem:[#allocation8 + $0x10] sm:$0xff]  }
 0x7a5   : > { %14820 = vmatpush3.bf16.msra.mxu0 %v15009_v46  ;;  %v15018_v41 = vld [vmem:[#allocation8 + $0xa0] sm:$0xff]   ;;  %v15022_v38 = vld [vmem:[#allocation8 + $0x98] sm:$0xff]   ;;  %v15026_v58 = vld [vmem:[#allocation8 + $0x90] sm:$0xff]  }
 0x7a6   : > { %14842 = vmatpush3.bf16.msra.mxu1 %v15010_v22  ;;  %14821 = vmatprep.subr.bf16.mxu0 %v15011_v40  ;;  %v15027_v63 = vld [vmem:[#allocation8 + $0x48] sm:$0xff]   ;;  %v15031_v55 = vld [vmem:[#allocation8 + $0x40] sm:$0xff]   ;;  %v12197_v60 = vld [vmem:[#allocation2] sm:$0xff] }
 0x7a7   : > { %14843 = vmatprep.subr.bf16.mxu1 %v15012_v32  ;;  %v15028_v17 = vld [vmem:[#allocation8 + $0xc8] sm:$0xff]   ;;  %v15032_v56 = vld [vmem:[#allocation8 + $0xc0] sm:$0xff]   ;;  %v17469_v16 = vld [vmem:[#allocation5] sm:$0xff] }
 0x7a8   : > { %v15029_v36 = vld [vmem:[#allocation8 + $0x8] sm:$0xff]   ;;  %v15033_v33 = vld [vmem:[#allocation8] sm:$0xff]   ;;  %v17471_v3 = vld [vmem:[#allocation7] sm:$0xff]  ;;  %v12213_v8 = vrot.slane %v17469_v16, %v12212_v39  ;;  %v12221_v37 = vrot.slane %v17469_v16, %v12220_v35  ;;  %v12209_v5 = vrot.slane %v17469_v16, %v12208_v10  ;;  %v12217_v44 = vrot.slane %v17469_v16, %v12216_v13 }
 0x7a9   : > { %14822 = vmatpush3.bf16.msra.mxu0 %v15013_v47  ;;  %v15030_v9 = vld [vmem:[#allocation8 + $0x88] sm:$0xff]   ;;  %v15034_v23 = vld [vmem:[#allocation8 + $0x80] sm:$0xff]   ;;  %v12263_v45 = vrot.slane %v17471_v3, %v12212_v39  ;;  %v12271_v4 = vrot.slane %v17471_v3, %v12220_v35  ;;  %v12259_v2 = vrot.slane %v17471_v3, %v12208_v10  ;;  %v12267_v61 = vrot.slane %v17471_v3, %v12216_v13  ;;  %v15035_v15 = vld [vmem:[#allocation8 + $0x178] sm:$0xff]  }
 0x7aa   : > { %14844 = vmatpush3.bf16.msra.mxu1 %v15014_v48  ;;  %14823 = vmatprep.subr.bf16.mxu0 %v15015_v7  ;;  %v12199_v26 = vld [vmem:[#allocation2 + $0x10] sm:$0xff]  ;;  %v12198_v31 = vld [vmem:[#allocation2 + $0x18] sm:$0xff]  ;;  %v12247_v14 = vmul.f32 %v12213_v8, %v12197_v60  ;;  %v15036_v50 = vld [vmem:[#allocation8 + $0x1f8] sm:$0xff]  }
 0x7ab   : > { %14845 = vmatprep.subr.bf16.mxu1 %v15016_v30  ;;  %v12196_v18 = vld [vmem:[#allocation2 + $0x30] sm:$0xff]  ;;  %v12249_v49 = vmul.f32 %v12221_v37, %v12199_v26  ;;  %v12248_v53 = vmul.f32 %v12217_v44, %v12198_v31  ;;  %v15037_v21 = vld [vmem:[#allocation8 + $0x138] sm:$0xff]   ;;  %v15039_v47 = vld [vmem:[#allocation8 + $0x170] sm:$0xff]  }
 0x7ac   : > { %v12246_v42 = vmul.f32 %v12209_v5, %v12196_v18  ;;  %v12297_v51 = vadd.f32 %v12263_v45, %v12247_v14  ;;  %v15038_v11 = vld [vmem:[#allocation8 + $0x1b8] sm:$0xff]   ;;  %v15040_v30 = vld [vmem:[#allocation8 + $0x1f0] sm:$0xff]   ;;  %v15047_v28 = vld [vmem:[#allocation8 + $0x160] sm:$0xff]  }
 0x7ad   : > { %14824 = vmatpush3.bf16.msra.mxu0 %v15017_v12  ;;  %v12299_v29 = vadd.f32 %v12271_v4, %v12249_v49  ;;  %v12298_v1 = vadd.f32 %v12267_v61, %v12248_v53  ;;  %v15041_v12 = vld [vmem:[#allocation8 + $0x130] sm:$0xff]   ;;  %v15059_v13 = vld [vmem:[#allocation8 + $0x148] sm:$0xff]   ;;  %v15063_v18 = vld [vmem:[#allocation8 + $0x140] sm:$0xff]  }
 0x7ae   : > { %14846 = vmatpush3.bf16.msra.mxu1 %v15018_v41  ;;  %14825 = vmatprep.subr.bf16.mxu0 %v15019_v43  ;;  %v12296_v6 = vadd.f32 %v12259_v2, %v12246_v42  ;;  %vm12305_vm0 = vcmp.ge.f32.partialorder %v12297_v51, 0.0  ;;  %v12313_v54 = vmul.f32 0.1, %v12297_v51  ;;  %v15042_v41 = vld [vmem:[#allocation8 + $0x1b0] sm:$0xff]   ;;  %v15043_v43 = vld [vmem:[#allocation8 + $0x168] sm:$0xff]   ;;  %v15064_v5 = vld [vmem:[#allocation8 + $0x1c0] sm:$0xff]  }
 0x7af   : > { %14847 = vmatprep.subr.bf16.mxu1 %v15020_v0  ;;  %vm12307_vm1 = vcmp.ge.f32.partialorder %v12299_v29, 0.0  ;;  %v12315_v59 = vmul.f32 0.1, %v12299_v29  ;;  %vm12306_vm3 = vcmp.ge.f32.partialorder %v12298_v1, 0.0  ;;  %v12314_v25 = vmul.f32 0.1, %v12298_v1 }
 0x7b0   : > { %vm12304_vm2 = vcmp.ge.f32.partialorder %v12296_v6, 0.0  ;;  %v12312_v24 = vmul.f32 0.1, %v12296_v6  ;;  %v12321_v62 = vsel %vm12305_vm0, %v12297_v51, %v12313_v54  ;;  %v15044_v0 = vld [vmem:[#allocation8 + $0x1e8] sm:$0xff]   ;;  %v15056_v39 = vld [vmem:[#allocation8 + $0x1d0] sm:$0xff]   ;;  %v12200_v14 = vld [vmem:[#allocation2 + $0x8] sm:$0xff] }
 0x7b1   : > { %14826 = vmatpush3.bf16.msra.mxu0 %v15021_v34  ;;  %v12323_v27 = vsel %vm12307_vm1, %v12299_v29, %v12315_v59  ;;  %v12329_v46 = vpack.c.bf16 %v12321_v62, %v12321_v62  ;;  %v12322_v32 = vsel %vm12306_vm3, %v12298_v1, %v12314_v25  ;;  %v15045_v34 = vld [vmem:[#allocation8 + $0x128] sm:$0xff]   ;;  %v15057_v35 = vld [vmem:[#allocation8 + $0x110] sm:$0xff]   ;;  %v12202_v51 = vld [vmem:[#allocation2 + $0x28] sm:$0xff] }
 0x7b2   : > { %14848 = vmatpush3.bf16.msra.mxu1 %v15022_v38  ;;  %14827 = vmatprep.subr.bf16.mxu0 %v15023_v52  ;;  %v12331_v22 = vpack.c.bf16 %v12323_v27, %v12323_v27  ;;  %v12320_v40 = vsel %vm12304_vm2, %v12296_v6, %v12312_v24  ;;  %v12330_v7 = vpack.c.bf16 %v12322_v32, %v12322_v32  ;;  %v15046_v38 = vld [vmem:[#allocation8 + $0x1a8] sm:$0xff]   ;;  %v15048_v52 = vld [vmem:[#allocation8 + $0x1e0] sm:$0xff]   ;;  %v15058_v10 = vld [vmem:[#allocation8 + $0x190] sm:$0xff]  }
 0x7b3   : > { %14849 = vmatprep.subr.bf16.mxu1 %v15024_v19  ;;  %v12328_v48 = vpack.c.bf16 %v12320_v40, %v12320_v40  ;;  %12880 = vmatprep.mubr.bf16.mxu0 %v12329_v46  ;;  %v15049_v19 = vld [vmem:[#allocation8 + $0x120] sm:$0xff]   ;;  %v15060_v60 = vld [vmem:[#allocation8 + $0x1c8] sm:$0xff]   ;;  %v12201_v61 = vld [vmem:[#allocation2 + $0x20] sm:$0xff] }
 0x7b4   : > { %12920 = vmatprep.mubr.bf16.mxu1 %v12331_v22  ;;  %v15061_v8 = vld [vmem:[#allocation8 + $0x108] sm:$0xff]   ;;  %v15066_v29 = vld [vmem:[#allocation8 + $0x180] sm:$0xff]  }
 0x7b5   : > { %14828 = vmatpush3.bf16.msra.mxu0 %v15025_v20  ;;  %v15050_v20 = vld [vmem:[#allocation8 + $0x1a0] sm:$0xff]   ;;  %v15062_v45 = vld [vmem:[#allocation8 + $0x188] sm:$0xff]  }
 0x7b6   : > { %14850 = vmatpush3.bf16.msra.mxu1 %v15026_v58  ;;  %14829 = vmatprep.subr.bf16.mxu0 %v15027_v63  ;;  %v15051_v58 = vld [vmem:[#allocation8 + $0x158] sm:$0xff]  }
 0x7b7   : > { %14851 = vmatprep.subr.bf16.mxu1 %v15028_v17  ;;  %v15052_v63 = vld [vmem:[#allocation8 + $0x1d8] sm:$0xff]  }
 0x7b8   : > { %v15053_v17 = vld [vmem:[#allocation8 + $0x118] sm:$0xff]  }
 0x7b9   : > { %14830 = vmatpush3.bf16.msra.mxu0 %v15029_v36  ;;  %v15054_v36 = vld [vmem:[#allocation8 + $0x198] sm:$0xff]  }
 0x7ba   : > { %14852 = vmatpush3.bf16.msra.mxu1 %v15030_v9  ;;  %14831 = vmatprep.subr.bf16.mxu0 %v15031_v55  ;;  %v15055_v9 = vld [vmem:[#allocation8 + $0x150] sm:$0xff]   ;;  %v12228_v55 = vsub.s32 5, %v17463_v57 }
 0x7bb   : > { %14853 = vmatprep.subr.bf16.mxu1 %v15032_v56  ;;  %v12236_v56 = vsub.s32 7, %v17463_v57 }
 0x7bc   : > { %v12229_v26 = vrot.slane %v17469_v16, %v12228_v55 }
 0x7bd   : > { %14832 = vmatpush3.bf16.msra.mxu0 %v15033_v33  ;;  %v12224_v33 = vsub.s32 4, %v17463_v57  ;;  %v12237_v37 = vrot.slane %v17469_v16, %v12236_v56  ;;  %v12287_v2 = vrot.slane %v17471_v3, %v12236_v56  ;;  %v14810_v56 = vld [vmem:[#allocation10] ss:$0 sm:$0xff] }
 0x7be   : > { %14854 = vmatpush3.bf16.msra.mxu1 %v15034_v23  ;;  %14861 = vmatprep.subr.bf16.mxu0 %v15035_v15  ;;  %v12232_v23 = vsub.s32 6, %v17463_v57  ;;  %v12279_v57 = vrot.slane %v17471_v3, %v12228_v55  ;;  %v12203_v15 = vld [vmem:[#allocation2 + $0x38] sm:$0xff] }
 0x7bf   : > { %14883 = vmatprep.subr.bf16.mxu1 %v15036_v50  ;;  %v12225_v4 = vrot.slane %v17469_v16, %v12224_v33  ;;  %v12275_v44 = vrot.slane %v17471_v3, %v12224_v33  ;;  %v12251_v50 = vmul.f32 %v12229_v26, %v12201_v61  ;;  %v12253_v42 = vmul.f32 %v12237_v37, %v12203_v15 }
 0x7c0   : > { %12881 = vmatmul.mubr.bf16.vlgmr.msra.gmra.mxu0 %v12328_v48  ;;  %v12233_v31 = vrot.slane %v17469_v16, %v12232_v23  ;;  %v12283_v49 = vrot.slane %v17471_v3, %v12232_v23  ;;  %v15065_v16 = vld [vmem:[#allocation8 + $0x100] sm:$0xff]  }
 0x7c1   : > { %12921 = vmatmul.mubr.bf16.vlgmr.msra.gmra.mxu1 %v12330_v7  ;;  %14862 = vmatpush3.bf16.msra.mxu0 %v15037_v21  ;;  %v12250_v53 = vmul.f32 %v12225_v4, %v12200_v14  ;;  %v12301_v1 = vadd.f32 %v12279_v57, %v12251_v50  ;;  %v12303_v54 = vadd.f32 %v12287_v2, %v12253_v42  ;;  %v14811_v23 = vld [vmem:[#allocation11] ss:$0 sm:$0xff] }
 0x7c2   : > { %14884 = vmatpush3.bf16.msra.mxu1 %v15038_v11  ;;  %14863 = vmatprep.subr.bf16.mxu0 %v15039_v47  ;;  %v12252_v6 = vmul.f32 %v12233_v31, %v12202_v51 }
 0x7c3   : > { %14885 = vmatprep.subr.bf16.mxu1 %v15040_v30  ;;  %v12300_v59 = vadd.f32 %v12275_v44, %v12250_v53  ;;  %vm12309_vm4 = vcmp.ge.f32.partialorder %v12301_v1, 0.0  ;;  %v12317_v25 = vmul.f32 0.1, %v12301_v1  ;;  %vm12311_vm5 = vcmp.ge.f32.partialorder %v12303_v54, 0.0 }
 0x7c4   : > { %v12302_v24 = vadd.f32 %v12283_v49, %v12252_v6  ;;  %v12319_v21 = vmul.f32 0.1, %v12303_v54 }
 0x7c5   : > { %14864 = vmatpush3.bf16.msra.mxu0 %v15041_v12  ;;  %vm12308_vm6 = vcmp.ge.f32.partialorder %v12300_v59, 0.0  ;;  %v12316_v3 = vmul.f32 0.1, %v12300_v59  ;;  %v12325_v27 = vsel %vm12309_vm4, %v12301_v1, %v12317_v25 }
 0x7c6   : > { %14886 = vmatpush3.bf16.msra.mxu1 %v15042_v41  ;;  %14865 = vmatprep.subr.bf16.mxu0 %v15043_v43  ;;  %vm12310_vm7 = vcmp.ge.f32.partialorder %v12302_v24, 0.0  ;;  %v12318_v62 = vmul.f32 0.1, %v12302_v24  ;;  %v12327_v11 = vsel %vm12311_vm5, %v12303_v54, %v12319_v21  ;;  %v12333_v46 = vpack.c.bf16 %v12325_v27, %v12325_v27 }
 0x7c7   : > { %14887 = vmatprep.subr.bf16.mxu1 %v15044_v0  ;;  %v12335_v22 = vpack.c.bf16 %v12327_v11, %v12327_v11  ;;  %v12324_v40 = vsel %vm12308_vm6, %v12300_v59, %v12316_v3 }
 0x7c8   : > { %v12326_v32 = vsel %vm12310_vm7, %v12302_v24, %v12318_v62  ;;  %v12332_v47 = vpack.c.bf16 %v12324_v40, %v12324_v40  ;;  %12960 = vmatprep.mubr.bf16.mxu0 %v12333_v46 }
 0x7c9   : > { %14866 = vmatpush3.bf16.msra.mxu0 %v15045_v34  ;;  %v12334_v48 = vpack.c.bf16 %v12326_v32, %v12326_v32  ;;  %13000 = vmatprep.mubr.bf16.mxu1 %v12335_v22 }
 0x7ca   : > { %14888 = vmatpush3.bf16.msra.mxu1 %v15046_v38  ;;  %14867 = vmatprep.subr.bf16.mxu0 %v15047_v28 }
 0x7cb   : > { %14889 = vmatprep.subr.bf16.mxu1 %v15048_v52 }
 0x7cd   : > { %14868 = vmatpush3.bf16.msra.mxu0 %v15049_v19 }
 0x7ce   : > { %14890 = vmatpush3.bf16.msra.mxu1 %v15050_v20  ;;  %14869 = vmatprep.subr.bf16.mxu0 %v15051_v58 }
 0x7cf   : > { %14891 = vmatprep.subr.bf16.mxu1 %v15052_v63 }
 0x7d1   : > { %14870 = vmatpush3.bf16.msra.mxu0 %v15053_v17 }
 0x7d2   : > { %14892 = vmatpush3.bf16.msra.mxu1 %v15054_v36  ;;  %14871 = vmatprep.subr.bf16.mxu0 %v15055_v9 }
 0x7d3   : > { %14893 = vmatprep.subr.bf16.mxu1 %v15056_v39 }
 0x7d5   : > { %14872 = vmatpush3.bf16.msra.mxu0 %v15057_v35 }
 0x7d6   : > { %14894 = vmatpush3.bf16.msra.mxu1 %v15058_v10  ;;  %14873 = vmatprep.subr.bf16.mxu0 %v15059_v13 }
 0x7d7   : > { %14895 = vmatprep.subr.bf16.mxu1 %v15060_v60 }
 0x7d9   : > { %14874 = vmatpush3.bf16.msra.mxu0 %v15061_v8 }
 0x7da   : > { %14896 = vmatpush3.bf16.msra.mxu1 %v15062_v45  ;;  %14875 = vmatprep.subr.bf16.mxu0 %v15063_v18 }
 0x7db   : > { %14897 = vmatprep.subr.bf16.mxu1 %v15064_v5 }
 0x7dd   : > { %14876 = vmatpush3.bf16.msra.mxu0 %v15065_v16 }
 0x7de   : > { %14898 = vmatpush3.bf16.msra.mxu1 %v15066_v29 }
 0x7e0   : > { %12961 = vmatmul.mubr.bf16.vlgmr.msra.gmra.mxu0 %v12332_v47 }
 0x7e1   : > { %13001 = vmatmul.mubr.bf16.vlgmr.msra.gmra.mxu1 %v12334_v48 }
 0x880   : > { %v14833_v7 = vpop.f32.mrf.mxu0 }
 0x881   : > { %v14855_v30 = vpop.f32.mrf.mxu1 }
 0x882   : > { %v14834_v12 = vpop.f32.mrf.mxu0 }
 0x883   : > { %v14856_v41 = vpop.f32.mrf.mxu1  ;;  %v14835_v28 = vadd.f32 %v14834_v12, %v14833_v7 }
 0x884   : > { %v14836_v43 = vpop.f32.mrf.mxu0  ;;  %v14857_v52 = vadd.f32 %v14856_v41, %v14855_v30 }
 0x885   : > { %v14858_v0 = vpop.f32.mrf.mxu1 }
 0x886   : > { %v14837_v34 = vpop.f32.mrf.mxu0  ;;  %v12923_v17 = vadd.f32 %v14857_v52, %v14835_v28 }
 0x887   : > { %v14859_v38 = vpop.f32.mrf.mxu1 }
 0x8a0   : > { %v14877_v19 = vpop.f32.mrf.mxu0 }
 0x8a1   : > { %v14899_v20 = vpop.f32.mrf.mxu1 }
 0x8a2   : > { %v14878_v58 = vpop.f32.mrf.mxu0 }
 0x8a3   : > { %v14900_v63 = vpop.f32.mrf.mxu1  ;;  %v14879_v36 = vadd.f32 %v14878_v58, %v14877_v19 }
 0x8a4   : > { %v14880_v9 = vpop.f32.mrf.mxu0  ;;  %v14901_v35 = vadd.f32 %v14900_v63, %v14899_v20 }
 0x8a5   : > { %v14902_v39 = vpop.f32.mrf.mxu1  ;;  %v12963_v55 = vadd.f32 %v14879_v36, %v12923_v17 }
 0x8a6   : > { %v14881_v10 = vpop.f32.mrf.mxu0 }
 0x8a7   : > { %v14903_v33 = vpop.f32.mrf.mxu1  ;;  %v13003_v13 = vadd.f32 %v14901_v35, %v12963_v55 }
 0x8a9   : > { %v13015_v60 = vmul.f32 %v14810_v56, %v13003_v13 }
 0x8ab   : > { %v13023_v8 = vadd.f32 %v14811_v23, %v13015_v60 }
 0x8ad   : > { %vm13024_vm8 = vcmp.ge.f32.partialorder %v13023_v8, 0.0  ;;  %v13025_v45 = vmul.f32 0.1, %v13023_v8 }
 0x8af   : > { %v13026_v26 = vsel %vm13024_vm8, %v13023_v8, %v13025_v45 }
 0x8b0   : > { %13027 = vst [vmem:[%s17516_s7] sm:$0xff] %v13026_v26 }
 0x8b1 PF: > { %p20_p9 = scmp.ge.s32.totalorder %s15420_s14, 4   ;;  %s17535_s24 = smov %s15263_s25 }
 0x8b2   : > { %s17536_s25 = smov %s15267_s26  ;;  %s17537_s26 = smov %s15431_s28 }
 0x8b3   : > { %s17538_s27 = smov %s15420_s14  ;;  %22 = sbr.rel (!%p20_p9) target bundleno = 6 (0x6), region = 115 }
 0x8b8   :  { %13039 = vsyncpa [#allocation4], 1 }
 0x8b9   :  { %13041 = vsyncpa [#allocation4 + $0x1], 1 }
 0x8ba   :  { %13042 = vsyncpa [#allocation6], 1 }
 0x8bb   :  { %13043 = vsyncpa [#allocation9], 1 }
 0x8bc   :  { %13044 = vsyncpa [#allocation12], 1 }

</bundles_post_ra>
